<compile_context>
chip_gen: v7x
topology: tpu7x:2x2x1
jax: 0.10.0
libtpu: 0.0.40
codegen_flags: <defaults>
</compile_context>

<pallas_src>
import jax
import jax.numpy as jnp
from jax.experimental import pallas as pl
from jax.experimental.pallas import tpu as pltpu

H_IN, W_IN, KSZ = 28, 28, 3
H_OUT, W_OUT = H_IN - KSZ + 1, W_IN - KSZ + 1        # 26, 26
S = H_OUT * W_OUT                                    # 676 spatial positions
C_OUT = 10                                           # conv channels
HID1, HID2, N_CLS = 50, 20, 10
MAX_BATCH_TILE = 128                                 # fills MXU M; VMEM-safe on all gens


# ----------------------------------------------------------------------------
# Fused Pallas kernel: one batch tile per grid step, everything stays in VMEM.
# ----------------------------------------------------------------------------
def fused_convnet_kernel(p_ref, wc_ref, bc_ref, w1_ref, b1_ref,
                         w2_ref, b2_ref, w3_ref, b3_ref, o_ref):
    # p_ref : [9, B, 676]  VMEM  im2col patches (k = kh*3+kw leading, s = r*26+col on lanes)
    # wc_ref: [10, 9]      SMEM  conv weight scalars (OIHW flattened)
    # bc_ref: [10]         SMEM  conv bias scalars
    # w1_ref: [10, 676, 50] VMEM == w1[6760,50].reshape(10,676,50) (torch Flatten order)
    # b1/w2/b2/w3/b3       VMEM  small resident MLP params
    # o_ref : [B, 10]
    h = None
    for c in range(C_OUT):
        # 3x3 conv, channel c: 9 scalar-splat FMAs on the VPU -> lane-dense [B, 676].
        acc = wc_ref[c, 0] * p_ref[0]
        for k in range(1, KSZ * KSZ):
            acc = acc + wc_ref[c, k] * p_ref[k]
        conv_c = jnp.maximum(acc + bc_ref[c], 0.0)            # [B, 676]

        # Immediately contract this channel against its slice of Linear(6760,50)
        # on the MXU; the conv activation never leaves VMEM.
        d = jnp.dot(conv_c, w1_ref[c], preferred_element_type=jnp.float32)  # [B, 50]
        h = d if h is None else h + d

    h = jnp.maximum(h + b1_ref[...], 0.0)                     # Linear1 bias + ReLU
    h = jnp.maximum(
        jnp.dot(h, w2_ref[...], preferred_element_type=jnp.float32) + b2_ref[...],
        0.0)                                                  # Linear(50,20) + ReLU
    o_ref[...] = (jnp.dot(h, w3_ref[...], preferred_element_type=jnp.float32)
                  + b3_ref[...])                              # Linear(20,10)


# ----------------------------------------------------------------------------
# Wrapper
# ----------------------------------------------------------------------------
def _im2col_k_major(x_nchw):
    # [N, 1, 28, 28] -> [9, N, 676]; patch element k = kh*3 + kw, spatial s = r*26 + col.
    img = x_nchw[:, 0]
    n = img.shape[0]
    slabs = [img[:, kh:kh + H_OUT, kw:kw + W_OUT].reshape(n, S)
             for kh in range(KSZ) for kw in range(KSZ)]
    return jnp.stack(slabs, axis=0)


def simple_convnet_forward(x, params):
    wc, bc, w1, b1, w2, b2, w3, b3 = params
    n = x.shape[0]

    # Batch tile: biggest of {n rounded to 8, capped at 128}; pad batch to a multiple.
    b_tile = min(MAX_BATCH_TILE, max(8, ((n + 7) // 8) * 8))
    n_pad = ((n + b_tile - 1) // b_tile) * b_tile
    if n_pad != n:
        x = jnp.pad(x, ((0, n_pad - n), (0, 0), (0, 0), (0, 0)))

    patches = _im2col_k_major(x)                      # [9, n_pad, 676]
    wc2d = wc.reshape(C_OUT, KSZ * KSZ)               # [10, 9]  -> SMEM
    bc1d = bc.reshape(C_OUT)                          # [10]     -> SMEM
    w1cm = w1.reshape(C_OUT, S, HID1)                 # free view, torch Flatten order

    def resident(shape):
        nd = len(shape)
        return pl.BlockSpec(shape, lambda i, _nd=nd: (0,) * _nd)

    out = pl.pallas_call(
        fused_convnet_kernel,
        out_shape=jax.ShapeDtypeStruct((n_pad, N_CLS), jnp.float32),
        grid=(n_pad // b_tile,),
        in_specs=[
            pl.BlockSpec((KSZ * KSZ, b_tile, S), lambda i: (0, i, 0)),  # patches tile
            pl.BlockSpec(memory_space=pltpu.MemorySpace.SMEM),          # conv weights
            pl.BlockSpec(memory_space=pltpu.MemorySpace.SMEM),          # conv bias
            resident((C_OUT, S, HID1)),                                 # w1 (resident)
            resident((1, HID1)),
            resident((HID1, HID2)),
            resident((1, HID2)),
            resident((HID2, N_CLS)),
            resident((1, N_CLS)),
        ],
        out_specs=pl.BlockSpec((b_tile, N_CLS), lambda i: (i, 0)),
        compiler_params=pltpu.CompilerParams(
            dimension_semantics=("parallel",),
            vmem_limit_bytes=40 * 1024 * 1024),
    )(patches, wc2d, bc1d, w1cm, b1.reshape(1, HID1),
      w2, b2.reshape(1, HID2), w3, b3.reshape(1, N_CLS))

    return out[:n]


# ----------------------------------------------------------------------------
# Params / reference
# ----------------------------------------------------------------------------
def init_params(key):
    ks = jax.random.split(key, 8)
    wc = jax.random.normal(ks[0], (C_OUT, 1, KSZ, KSZ), jnp.float32) * 0.2
    bc = jax.random.normal(ks[1], (C_OUT,), jnp.float32) * 0.05
    w1 = jax.random.normal(ks[2], (S * C_OUT, HID1), jnp.float32) * 0.02
    b1 = jax.random.normal(ks[3], (HID1,), jnp.float32) * 0.05
    w2 = jax.random.normal(ks[4], (HID1, HID2), jnp.float32) * 0.1
    b2 = jax.random.normal(ks[5], (HID2,), jnp.float32) * 0.05
    w3 = jax.random.normal(ks[6], (HID2, N_CLS), jnp.float32) * 0.1
    b3 = jax.random.normal(ks[7], (N_CLS,), jnp.float32) * 0.05
    return (wc, bc, w1, b1, w2, b2, w3, b3)


def reference_forward(x, params):
    # Pure-JAX reference reproducing the PyTorch module exactly.
    wc, bc, w1, b1, w2, b2, w3, b3 = params
    conv = jax.lax.conv_general_dilated(
        x, wc, window_strides=(1, 1), padding="VALID",
        dimension_numbers=("NCHW", "OIHW", "NCHW"))
    conv = jnp.maximum(conv + bc.reshape(1, C_OUT, 1, 1), 0.0)
    h = conv.reshape(x.shape[0], -1)                  # torch Flatten: channel-major
    h = jnp.maximum(h @ w1 + b1, 0.0)
    h = jnp.maximum(h @ w2 + b2, 0.0)
    return h @ w3 + b3


if __name__ == "__main__":
    key = jax.random.PRNGKey(0)
    kx, kp = jax.random.split(key)
    # Conv(1,10,k=3) + Linear(26*26*10, ...) forces 28x28 single-channel input.
    x = jax.random.normal(kx, (2, 1, H_IN, W_IN), jnp.float32)
    params = init_params(kp)

    fwd = jax.jit(simple_convnet_forward)
    out = jax.block_until_ready(fwd(x, params))

    ref = reference_forward(x, params)
    assert out.shape == (2, N_CLS)
    assert jnp.allclose(out, ref, atol=2e-3, rtol=2e-3), "mismatch vs reference"
    print("KERNEL_OK")
</pallas_src>

<mosaic_0001>
module attributes {stable_mosaic.version = 11 : i64} {
  func.func @fused_convnet_kernel(%arg0: i32, %arg1: memref<9x8x676xf32, #tpu.memory_space<vmem>>, %arg2: memref<10x9xf32, #tpu.memory_space<smem>>, %arg3: memref<10xf32, #tpu.memory_space<smem>>, %arg4: memref<10x676x50xf32, #tpu.memory_space<vmem>>, %arg5: memref<1x50xf32, #tpu.memory_space<vmem>>, %arg6: memref<50x20xf32, #tpu.memory_space<vmem>>, %arg7: memref<1x20xf32, #tpu.memory_space<vmem>>, %arg8: memref<20x10xf32, #tpu.memory_space<vmem>>, %arg9: memref<1x10xf32, #tpu.memory_space<vmem>>, %arg10: memref<8x10xf32, #tpu.memory_space<vmem>>) attributes {dimension_semantics = [#tpu.dimension_semantics<parallel>], iteration_bounds = array<i64: 1>, scalar_prefetch = 0 : i64, scratch_operands = 0 : i64, tpu.core_type = #tpu.core_type<tc>, window_params = [{transform_indices = @transform_0, window_bounds = array<i64: 9, 8, 676>}, {transform_indices = @transform_1, window_bounds = array<i64: 10, 9>}, {transform_indices = @transform_2, window_bounds = array<i64: 10>}, {pipeline_mode = #tpu.pipeline_mode<synchronous>, transform_indices = @transform_3, window_bounds = array<i64: 10, 676, 50>}, {pipeline_mode = #tpu.pipeline_mode<synchronous>, transform_indices = @transform_4, window_bounds = array<i64: 1, 50>}, {pipeline_mode = #tpu.pipeline_mode<synchronous>, transform_indices = @transform_5, window_bounds = array<i64: 50, 20>}, {pipeline_mode = #tpu.pipeline_mode<synchronous>, transform_indices = @transform_6, window_bounds = array<i64: 1, 20>}, {pipeline_mode = #tpu.pipeline_mode<synchronous>, transform_indices = @transform_7, window_bounds = array<i64: 20, 10>}, {pipeline_mode = #tpu.pipeline_mode<synchronous>, transform_indices = @transform_8, window_bounds = array<i64: 1, 10>}, {transform_indices = @transform_9, window_bounds = array<i64: 8, 10>}]} {
    %c0 = arith.constant 0 : index
    %c0_0 = arith.constant 0 : index
    %0 = memref.load %arg2[%c0, %c0_0] : memref<10x9xf32, #tpu.memory_space<smem>>
    %c0_1 = arith.constant 0 : index
    %c0_2 = arith.constant 0 : index
    %c0_3 = arith.constant 0 : index
    %1 = vector.load %arg1[%c0_1, %c0_2, %c0_3] : memref<9x8x676xf32, #tpu.memory_space<vmem>>, vector<1x8x676xf32>
    %2 = vector.shape_cast %1 : vector<1x8x676xf32> to vector<8x676xf32>
    %3 = vector.broadcast %0 : f32 to vector<8x676xf32>
    %4 = arith.mulf %3, %2 : vector<8x676xf32>
    %c0_4 = arith.constant 0 : index
    %c1 = arith.constant 1 : index
    %5 = memref.load %arg2[%c0_4, %c1] : memref<10x9xf32, #tpu.memory_space<smem>>
    %c1_5 = arith.constant 1 : index
    %c0_6 = arith.constant 0 : index
    %c0_7 = arith.constant 0 : index
    %6 = vector.load %arg1[%c1_5, %c0_6, %c0_7] : memref<9x8x676xf32, #tpu.memory_space<vmem>>, vector<1x8x676xf32>
    %7 = vector.shape_cast %6 : vector<1x8x676xf32> to vector<8x676xf32>
    %8 = vector.broadcast %5 : f32 to vector<8x676xf32>
    %9 = arith.mulf %8, %7 : vector<8x676xf32>
    %10 = arith.addf %4, %9 : vector<8x676xf32>
    %c0_8 = arith.constant 0 : index
    %c2 = arith.constant 2 : index
    %11 = memref.load %arg2[%c0_8, %c2] : memref<10x9xf32, #tpu.memory_space<smem>>
    %c2_9 = arith.constant 2 : index
    %c0_10 = arith.constant 0 : index
    %c0_11 = arith.constant 0 : index
    %12 = vector.load %arg1[%c2_9, %c0_10, %c0_11] : memref<9x8x676xf32, #tpu.memory_space<vmem>>, vector<1x8x676xf32>
    %13 = vector.shape_cast %12 : vector<1x8x676xf32> to vector<8x676xf32>
    %14 = vector.broadcast %11 : f32 to vector<8x676xf32>
    %15 = arith.mulf %14, %13 : vector<8x676xf32>
    %16 = arith.addf %10, %15 : vector<8x676xf32>
    %c0_12 = arith.constant 0 : index
    %c3 = arith.constant 3 : index
    %17 = memref.load %arg2[%c0_12, %c3] : memref<10x9xf32, #tpu.memory_space<smem>>
    %c3_13 = arith.constant 3 : index
    %c0_14 = arith.constant 0 : index
    %c0_15 = arith.constant 0 : index
    %18 = vector.load %arg1[%c3_13, %c0_14, %c0_15] : memref<9x8x676xf32, #tpu.memory_space<vmem>>, vector<1x8x676xf32>
    %19 = vector.shape_cast %18 : vector<1x8x676xf32> to vector<8x676xf32>
    %20 = vector.broadcast %17 : f32 to vector<8x676xf32>
    %21 = arith.mulf %20, %19 : vector<8x676xf32>
    %22 = arith.addf %16, %21 : vector<8x676xf32>
    %c0_16 = arith.constant 0 : index
    %c4 = arith.constant 4 : index
    %23 = memref.load %arg2[%c0_16, %c4] : memref<10x9xf32, #tpu.memory_space<smem>>
    %c4_17 = arith.constant 4 : index
    %c0_18 = arith.constant 0 : index
    %c0_19 = arith.constant 0 : index
    %24 = vector.load %arg1[%c4_17, %c0_18, %c0_19] : memref<9x8x676xf32, #tpu.memory_space<vmem>>, vector<1x8x676xf32>
    %25 = vector.shape_cast %24 : vector<1x8x676xf32> to vector<8x676xf32>
    %26 = vector.broadcast %23 : f32 to vector<8x676xf32>
    %27 = arith.mulf %26, %25 : vector<8x676xf32>
    %28 = arith.addf %22, %27 : vector<8x676xf32>
    %c0_20 = arith.constant 0 : index
    %c5 = arith.constant 5 : index
    %29 = memref.load %arg2[%c0_20, %c5] : memref<10x9xf32, #tpu.memory_space<smem>>
    %c5_21 = arith.constant 5 : index
    %c0_22 = arith.constant 0 : index
    %c0_23 = arith.constant 0 : index
    %30 = vector.load %arg1[%c5_21, %c0_22, %c0_23] : memref<9x8x676xf32, #tpu.memory_space<vmem>>, vector<1x8x676xf32>
    %31 = vector.shape_cast %30 : vector<1x8x676xf32> to vector<8x676xf32>
    %32 = vector.broadcast %29 : f32 to vector<8x676xf32>
    %33 = arith.mulf %32, %31 : vector<8x676xf32>
    %34 = arith.addf %28, %33 : vector<8x676xf32>
    %c0_24 = arith.constant 0 : index
    %c6 = arith.constant 6 : index
    %35 = memref.load %arg2[%c0_24, %c6] : memref<10x9xf32, #tpu.memory_space<smem>>
    %c6_25 = arith.constant 6 : index
    %c0_26 = arith.constant 0 : index
    %c0_27 = arith.constant 0 : index
    %36 = vector.load %arg1[%c6_25, %c0_26, %c0_27] : memref<9x8x676xf32, #tpu.memory_space<vmem>>, vector<1x8x676xf32>
    %37 = vector.shape_cast %36 : vector<1x8x676xf32> to vector<8x676xf32>
    %38 = vector.broadcast %35 : f32 to vector<8x676xf32>
    %39 = arith.mulf %38, %37 : vector<8x676xf32>
    %40 = arith.addf %34, %39 : vector<8x676xf32>
    %c0_28 = arith.constant 0 : index
    %c7 = arith.constant 7 : index
    %41 = memref.load %arg2[%c0_28, %c7] : memref<10x9xf32, #tpu.memory_space<smem>>
    %c7_29 = arith.constant 7 : index
    %c0_30 = arith.constant 0 : index
    %c0_31 = arith.constant 0 : index
    %42 = vector.load %arg1[%c7_29, %c0_30, %c0_31] : memref<9x8x676xf32, #tpu.memory_space<vmem>>, vector<1x8x676xf32>
    %43 = vector.shape_cast %42 : vector<1x8x676xf32> to vector<8x676xf32>
    %44 = vector.broadcast %41 : f32 to vector<8x676xf32>
    %45 = arith.mulf %44, %43 : vector<8x676xf32>
    %46 = arith.addf %40, %45 : vector<8x676xf32>
    %c0_32 = arith.constant 0 : index
    %c8 = arith.constant 8 : index
    %47 = memref.load %arg2[%c0_32, %c8] : memref<10x9xf32, #tpu.memory_space<smem>>
    %c8_33 = arith.constant 8 : index
    %c0_34 = arith.constant 0 : index
    %c0_35 = arith.constant 0 : index
    %48 = vector.load %arg1[%c8_33, %c0_34, %c0_35] : memref<9x8x676xf32, #tpu.memory_space<vmem>>, vector<1x8x676xf32>
    %49 = vector.shape_cast %48 : vector<1x8x676xf32> to vector<8x676xf32>
    %50 = vector.broadcast %47 : f32 to vector<8x676xf32>
    %51 = arith.mulf %50, %49 : vector<8x676xf32>
    %52 = arith.addf %46, %51 : vector<8x676xf32>
    %c0_36 = arith.constant 0 : index
    %53 = memref.load %arg3[%c0_36] : memref<10xf32, #tpu.memory_space<smem>>
    %54 = vector.broadcast %53 : f32 to vector<8x676xf32>
    %55 = arith.addf %52, %54 : vector<8x676xf32>
    %cst = arith.constant 0.000000e+00 : f32
    %56 = vector.broadcast %cst : f32 to vector<8x676xf32>
    %57 = arith.maximumf %55, %56 : vector<8x676xf32>
    %c0_37 = arith.constant 0 : index
    %c0_38 = arith.constant 0 : index
    %c0_39 = arith.constant 0 : index
    %58 = vector.load %arg4[%c0_37, %c0_38, %c0_39] : memref<10x676x50xf32, #tpu.memory_space<vmem>>, vector<1x676x50xf32>
    %59 = vector.shape_cast %58 : vector<1x676x50xf32> to vector<676x50xf32>
    %cst_40 = arith.constant dense<0.000000e+00> : vector<8x50xf32>
    %60 = tpu.matmul %57, %59, %cst_40 {dimension_numbers = #tpu.dot_dimension_numbers<[1], [0], [0], [1], [0, 0, 1, 1], [], []>} : vector<8x676xf32>, vector<676x50xf32>, vector<8x50xf32> -> vector<8x50xf32>
    %c1_41 = arith.constant 1 : index
    %c0_42 = arith.constant 0 : index
    %61 = memref.load %arg2[%c1_41, %c0_42] : memref<10x9xf32, #tpu.memory_space<smem>>
    %c0_43 = arith.constant 0 : index
    %c0_44 = arith.constant 0 : index
    %c0_45 = arith.constant 0 : index
    %62 = vector.load %arg1[%c0_43, %c0_44, %c0_45] : memref<9x8x676xf32, #tpu.memory_space<vmem>>, vector<1x8x676xf32>
    %63 = vector.shape_cast %62 : vector<1x8x676xf32> to vector<8x676xf32>
    %64 = vector.broadcast %61 : f32 to vector<8x676xf32>
    %65 = arith.mulf %64, %63 : vector<8x676xf32>
    %c1_46 = arith.constant 1 : index
    %c1_47 = arith.constant 1 : index
    %66 = memref.load %arg2[%c1_46, %c1_47] : memref<10x9xf32, #tpu.memory_space<smem>>
    %c1_48 = arith.constant 1 : index
    %c0_49 = arith.constant 0 : index
    %c0_50 = arith.constant 0 : index
    %67 = vector.load %arg1[%c1_48, %c0_49, %c0_50] : memref<9x8x676xf32, #tpu.memory_space<vmem>>, vector<1x8x676xf32>
    %68 = vector.shape_cast %67 : vector<1x8x676xf32> to vector<8x676xf32>
    %69 = vector.broadcast %66 : f32 to vector<8x676xf32>
    %70 = arith.mulf %69, %68 : vector<8x676xf32>
    %71 = arith.addf %65, %70 : vector<8x676xf32>
    %c1_51 = arith.constant 1 : index
    %c2_52 = arith.constant 2 : index
    %72 = memref.load %arg2[%c1_51, %c2_52] : memref<10x9xf32, #tpu.memory_space<smem>>
    %c2_53 = arith.constant 2 : index
    %c0_54 = arith.constant 0 : index
    %c0_55 = arith.constant 0 : index
    %73 = vector.load %arg1[%c2_53, %c0_54, %c0_55] : memref<9x8x676xf32, #tpu.memory_space<vmem>>, vector<1x8x676xf32>
    %74 = vector.shape_cast %73 : vector<1x8x676xf32> to vector<8x676xf32>
    %75 = vector.broadcast %72 : f32 to vector<8x676xf32>
    %76 = arith.mulf %75, %74 : vector<8x676xf32>
    %77 = arith.addf %71, %76 : vector<8x676xf32>
    %c1_56 = arith.constant 1 : index
    %c3_57 = arith.constant 3 : index
    %78 = memref.load %arg2[%c1_56, %c3_57] : memref<10x9xf32, #tpu.memory_space<smem>>
    %c3_58 = arith.constant 3 : index
    %c0_59 = arith.constant 0 : index
    %c0_60 = arith.constant 0 : index
    %79 = vector.load %arg1[%c3_58, %c0_59, %c0_60] : memref<9x8x676xf32, #tpu.memory_space<vmem>>, vector<1x8x676xf32>
    %80 = vector.shape_cast %79 : vector<1x8x676xf32> to vector<8x676xf32>
    %81 = vector.broadcast %78 : f32 to vector<8x676xf32>
    %82 = arith.mulf %81, %80 : vector<8x676xf32>
    %83 = arith.addf %77, %82 : vector<8x676xf32>
    %c1_61 = arith.constant 1 : index
    %c4_62 = arith.constant 4 : index
    %84 = memref.load %arg2[%c1_61, %c4_62] : memref<10x9xf32, #tpu.memory_space<smem>>
    %c4_63 = arith.constant 4 : index
    %c0_64 = arith.constant 0 : index
    %c0_65 = arith.constant 0 : index
    %85 = vector.load %arg1[%c4_63, %c0_64, %c0_65] : memref<9x8x676xf32, #tpu.memory_space<vmem>>, vector<1x8x676xf32>
    %86 = vector.shape_cast %85 : vector<1x8x676xf32> to vector<8x676xf32>
    %87 = vector.broadcast %84 : f32 to vector<8x676xf32>
    %88 = arith.mulf %87, %86 : vector<8x676xf32>
    %89 = arith.addf %83, %88 : vector<8x676xf32>
    %c1_66 = arith.constant 1 : index
    %c5_67 = arith.constant 5 : index
    %90 = memref.load %arg2[%c1_66, %c5_67] : memref<10x9xf32, #tpu.memory_space<smem>>
    %c5_68 = arith.constant 5 : index
    %c0_69 = arith.constant 0 : index
    %c0_70 = arith.constant 0 : index
    %91 = vector.load %arg1[%c5_68, %c0_69, %c0_70] : memref<9x8x676xf32, #tpu.memory_space<vmem>>, vector<1x8x676xf32>
    %92 = vector.shape_cast %91 : vector<1x8x676xf32> to vector<8x676xf32>
    %93 = vector.broadcast %90 : f32 to vector<8x676xf32>
    %94 = arith.mulf %93, %92 : vector<8x676xf32>
    %95 = arith.addf %89, %94 : vector<8x676xf32>
    %c1_71 = arith.constant 1 : index
    %c6_72 = arith.constant 6 : index
    %96 = memref.load %arg2[%c1_71, %c6_72] : memref<10x9xf32, #tpu.memory_space<smem>>
    %c6_73 = arith.constant 6 : index
    %c0_74 = arith.constant 0 : index
    %c0_75 = arith.constant 0 : index
    %97 = vector.load %arg1[%c6_73, %c0_74, %c0_75] : memref<9x8x676xf32, #tpu.memory_space<vmem>>, vector<1x8x676xf32>
    %98 = vector.shape_cast %97 : vector<1x8x676xf32> to vector<8x676xf32>
    %99 = vector.broadcast %96 : f32 to vector<8x676xf32>
    %100 = arith.mulf %99, %98 : vector<8x676xf32>
    %101 = arith.addf %95, %100 : vector<8x676xf32>
    %c1_76 = arith.constant 1 : index
    %c7_77 = arith.constant 7 : index
    %102 = memref.load %arg2[%c1_76, %c7_77] : memref<10x9xf32, #tpu.memory_space<smem>>
    %c7_78 = arith.constant 7 : index
    %c0_79 = arith.constant 0 : index
    %c0_80 = arith.constant 0 : index
    %103 = vector.load %arg1[%c7_78, %c0_79, %c0_80] : memref<9x8x676xf32, #tpu.memory_space<vmem>>, vector<1x8x676xf32>
    %104 = vector.shape_cast %103 : vector<1x8x676xf32> to vector<8x676xf32>
    %105 = vector.broadcast %102 : f32 to vector<8x676xf32>
    %106 = arith.mulf %105, %104 : vector<8x676xf32>
    %107 = arith.addf %101, %106 : vector<8x676xf32>
    %c1_81 = arith.constant 1 : index
    %c8_82 = arith.constant 8 : index
    %108 = memref.load %arg2[%c1_81, %c8_82] : memref<10x9xf32, #tpu.memory_space<smem>>
    %c8_83 = arith.constant 8 : index
    %c0_84 = arith.constant 0 : index
    %c0_85 = arith.constant 0 : index
    %109 = vector.load %arg1[%c8_83, %c0_84, %c0_85] : memref<9x8x676xf32, #tpu.memory_space<vmem>>, vector<1x8x676xf32>
    %110 = vector.shape_cast %109 : vector<1x8x676xf32> to vector<8x676xf32>
    %111 = vector.broadcast %108 : f32 to vector<8x676xf32>
    %112 = arith.mulf %111, %110 : vector<8x676xf32>
    %113 = arith.addf %107, %112 : vector<8x676xf32>
    %c1_86 = arith.constant 1 : index
    %114 = memref.load %arg3[%c1_86] : memref<10xf32, #tpu.memory_space<smem>>
    %115 = vector.broadcast %114 : f32 to vector<8x676xf32>
    %116 = arith.addf %113, %115 : vector<8x676xf32>
    %cst_87 = arith.constant 0.000000e+00 : f32
    %117 = vector.broadcast %cst_87 : f32 to vector<8x676xf32>
    %118 = arith.maximumf %116, %117 : vector<8x676xf32>
    %c1_88 = arith.constant 1 : index
    %c0_89 = arith.constant 0 : index
    %c0_90 = arith.constant 0 : index
    %119 = vector.load %arg4[%c1_88, %c0_89, %c0_90] : memref<10x676x50xf32, #tpu.memory_space<vmem>>, vector<1x676x50xf32>
    %120 = vector.shape_cast %119 : vector<1x676x50xf32> to vector<676x50xf32>
    %cst_91 = arith.constant dense<0.000000e+00> : vector<8x50xf32>
    %121 = tpu.matmul %118, %120, %cst_91 {dimension_numbers = #tpu.dot_dimension_numbers<[1], [0], [0], [1], [0, 0, 1, 1], [], []>} : vector<8x676xf32>, vector<676x50xf32>, vector<8x50xf32> -> vector<8x50xf32>
    %122 = arith.addf %60, %121 : vector<8x50xf32>
    %c2_92 = arith.constant 2 : index
    %c0_93 = arith.constant 0 : index
    %123 = memref.load %arg2[%c2_92, %c0_93] : memref<10x9xf32, #tpu.memory_space<smem>>
    %c0_94 = arith.constant 0 : index
    %c0_95 = arith.constant 0 : index
    %c0_96 = arith.constant 0 : index
    %124 = vector.load %arg1[%c0_94, %c0_95, %c0_96] : memref<9x8x676xf32, #tpu.memory_space<vmem>>, vector<1x8x676xf32>
    %125 = vector.shape_cast %124 : vector<1x8x676xf32> to vector<8x676xf32>
    %126 = vector.broadcast %123 : f32 to vector<8x676xf32>
    %127 = arith.mulf %126, %125 : vector<8x676xf32>
    %c2_97 = arith.constant 2 : index
    %c1_98 = arith.constant 1 : index
    %128 = memref.load %arg2[%c2_97, %c1_98] : memref<10x9xf32, #tpu.memory_space<smem>>
    %c1_99 = arith.constant 1 : index
    %c0_100 = arith.constant 0 : index
    %c0_101 = arith.constant 0 : index
    %129 = vector.load %arg1[%c1_99, %c0_100, %c0_101] : memref<9x8x676xf32, #tpu.memory_space<vmem>>, vector<1x8x676xf32>
    %130 = vector.shape_cast %129 : vector<1x8x676xf32> to vector<8x676xf32>
    %131 = vector.broadcast %128 : f32 to vector<8x676xf32>
    %132 = arith.mulf %131, %130 : vector<8x676xf32>
    %133 = arith.addf %127, %132 : vector<8x676xf32>
    %c2_102 = arith.constant 2 : index
    %c2_103 = arith.constant 2 : index
    %134 = memref.load %arg2[%c2_102, %c2_103] : memref<10x9xf32, #tpu.memory_space<smem>>
    %c2_104 = arith.constant 2 : index
    %c0_105 = arith.constant 0 : index
    %c0_106 = arith.constant 0 : index
    %135 = vector.load %arg1[%c2_104, %c0_105, %c0_106] : memref<9x8x676xf32, #tpu.memory_space<vmem>>, vector<1x8x676xf32>
    %136 = vector.shape_cast %135 : vector<1x8x676xf32> to vector<8x676xf32>
    %137 = vector.broadcast %134 : f32 to vector<8x676xf32>
    %138 = arith.mulf %137, %136 : vector<8x676xf32>
    %139 = arith.addf %133, %138 : vector<8x676xf32>
    %c2_107 = arith.constant 2 : index
    %c3_108 = arith.constant 3 : index
    %140 = memref.load %arg2[%c2_107, %c3_108] : memref<10x9xf32, #tpu.memory_space<smem>>
    %c3_109 = arith.constant 3 : index
    %c0_110 = arith.constant 0 : index
    %c0_111 = arith.constant 0 : index
    %141 = vector.load %arg1[%c3_109, %c0_110, %c0_111] : memref<9x8x676xf32, #tpu.memory_space<vmem>>, vector<1x8x676xf32>
    %142 = vector.shape_cast %141 : vector<1x8x676xf32> to vector<8x676xf32>
    %143 = vector.broadcast %140 : f32 to vector<8x676xf32>
    %144 = arith.mulf %143, %142 : vector<8x676xf32>
    %145 = arith.addf %139, %144 : vector<8x676xf32>
    %c2_112 = arith.constant 2 : index
    %c4_113 = arith.constant 4 : index
    %146 = memref.load %arg2[%c2_112, %c4_113] : memref<10x9xf32, #tpu.memory_space<smem>>
    %c4_114 = arith.constant 4 : index
    %c0_115 = arith.constant 0 : index
    %c0_116 = arith.constant 0 : index
    %147 = vector.load %arg1[%c4_114, %c0_115, %c0_116] : memref<9x8x676xf32, #tpu.memory_space<vmem>>, vector<1x8x676xf32>
    %148 = vector.shape_cast %147 : vector<1x8x676xf32> to vector<8x676xf32>
    %149 = vector.broadcast %146 : f32 to vector<8x676xf32>
    %150 = arith.mulf %149, %148 : vector<8x676xf32>
    %151 = arith.addf %145, %150 : vector<8x676xf32>
    %c2_117 = arith.constant 2 : index
    %c5_118 = arith.constant 5 : index
    %152 = memref.load %arg2[%c2_117, %c5_118] : memref<10x9xf32, #tpu.memory_space<smem>>
    %c5_119 = arith.constant 5 : index
    %c0_120 = arith.constant 0 : index
    %c0_121 = arith.constant 0 : index
    %153 = vector.load %arg1[%c5_119, %c0_120, %c0_121] : memref<9x8x676xf32, #tpu.memory_space<vmem>>, vector<1x8x676xf32>
    %154 = vector.shape_cast %153 : vector<1x8x676xf32> to vector<8x676xf32>
    %155 = vector.broadcast %152 : f32 to vector<8x676xf32>
    %156 = arith.mulf %155, %154 : vector<8x676xf32>
    %157 = arith.addf %151, %156 : vector<8x676xf32>
    %c2_122 = arith.constant 2 : index
    %c6_123 = arith.constant 6 : index
    %158 = memref.load %arg2[%c2_122, %c6_123] : memref<10x9xf32, #tpu.memory_space<smem>>
    %c6_124 = arith.constant 6 : index
    %c0_125 = arith.constant 0 : index
    %c0_126 = arith.constant 0 : index
    %159 = vector.load %arg1[%c6_124, %c0_125, %c0_126] : memref<9x8x676xf32, #tpu.memory_space<vmem>>, vector<1x8x676xf32>
    %160 = vector.shape_cast %159 : vector<1x8x676xf32> to vector<8x676xf32>
    %161 = vector.broadcast %158 : f32 to vector<8x676xf32>
    %162 = arith.mulf %161, %160 : vector<8x676xf32>
    %163 = arith.addf %157, %162 : vector<8x676xf32>
    %c2_127 = arith.constant 2 : index
    %c7_128 = arith.constant 7 : index
    %164 = memref.load %arg2[%c2_127, %c7_128] : memref<10x9xf32, #tpu.memory_space<smem>>
    %c7_129 = arith.constant 7 : index
    %c0_130 = arith.constant 0 : index
    %c0_131 = arith.constant 0 : index
    %165 = vector.load %arg1[%c7_129, %c0_130, %c0_131] : memref<9x8x676xf32, #tpu.memory_space<vmem>>, vector<1x8x676xf32>
    %166 = vector.shape_cast %165 : vector<1x8x676xf32> to vector<8x676xf32>
    %167 = vector.broadcast %164 : f32 to vector<8x676xf32>
    %168 = arith.mulf %167, %166 : vector<8x676xf32>
    %169 = arith.addf %163, %168 : vector<8x676xf32>
    %c2_132 = arith.constant 2 : index
    %c8_133 = arith.constant 8 : index
    %170 = memref.load %arg2[%c2_132, %c8_133] : memref<10x9xf32, #tpu.memory_space<smem>>
    %c8_134 = arith.constant 8 : index
    %c0_135 = arith.constant 0 : index
    %c0_136 = arith.constant 0 : index
    %171 = vector.load %arg1[%c8_134, %c0_135, %c0_136] : memref<9x8x676xf32, #tpu.memory_space<vmem>>, vector<1x8x676xf32>
    %172 = vector.shape_cast %171 : vector<1x8x676xf32> to vector<8x676xf32>
    %173 = vector.broadcast %170 : f32 to vector<8x676xf32>
    %174 = arith.mulf %173, %172 : vector<8x676xf32>
    %175 = arith.addf %169, %174 : vector<8x676xf32>
    %c2_137 = arith.constant 2 : index
    %176 = memref.load %arg3[%c2_137] : memref<10xf32, #tpu.memory_space<smem>>
    %177 = vector.broadcast %176 : f32 to vector<8x676xf32>
    %178 = arith.addf %175, %177 : vector<8x676xf32>
    %cst_138 = arith.constant 0.000000e+00 : f32
    %179 = vector.broadcast %cst_138 : f32 to vector<8x676xf32>
    %180 = arith.maximumf %178, %179 : vector<8x676xf32>
    %c2_139 = arith.constant 2 : index
    %c0_140 = arith.constant 0 : index
    %c0_141 = arith.constant 0 : index
    %181 = vector.load %arg4[%c2_139, %c0_140, %c0_141] : memref<10x676x50xf32, #tpu.memory_space<vmem>>, vector<1x676x50xf32>
    %182 = vector.shape_cast %181 : vector<1x676x50xf32> to vector<676x50xf32>
    %cst_142 = arith.constant dense<0.000000e+00> : vector<8x50xf32>
    %183 = tpu.matmul %180, %182, %cst_142 {dimension_numbers = #tpu.dot_dimension_numbers<[1], [0], [0], [1], [0, 0, 1, 1], [], []>} : vector<8x676xf32>, vector<676x50xf32>, vector<8x50xf32> -> vector<8x50xf32>
    %184 = arith.addf %122, %183 : vector<8x50xf32>
    %c3_143 = arith.constant 3 : index
    %c0_144 = arith.constant 0 : index
    %185 = memref.load %arg2[%c3_143, %c0_144] : memref<10x9xf32, #tpu.memory_space<smem>>
    %c0_145 = arith.constant 0 : index
    %c0_146 = arith.constant 0 : index
    %c0_147 = arith.constant 0 : index
    %186 = vector.load %arg1[%c0_145, %c0_146, %c0_147] : memref<9x8x676xf32, #tpu.memory_space<vmem>>, vector<1x8x676xf32>
    %187 = vector.shape_cast %186 : vector<1x8x676xf32> to vector<8x676xf32>
    %188 = vector.broadcast %185 : f32 to vector<8x676xf32>
    %189 = arith.mulf %188, %187 : vector<8x676xf32>
    %c3_148 = arith.constant 3 : index
    %c1_149 = arith.constant 1 : index
    %190 = memref.load %arg2[%c3_148, %c1_149] : memref<10x9xf32, #tpu.memory_space<smem>>
    %c1_150 = arith.constant 1 : index
    %c0_151 = arith.constant 0 : index
    %c0_152 = arith.constant 0 : index
    %191 = vector.load %arg1[%c1_150, %c0_151, %c0_152] : memref<9x8x676xf32, #tpu.memory_space<vmem>>, vector<1x8x676xf32>
    %192 = vector.shape_cast %191 : vector<1x8x676xf32> to vector<8x676xf32>
    %193 = vector.broadcast %190 : f32 to vector<8x676xf32>
    %194 = arith.mulf %193, %192 : vector<8x676xf32>
    %195 = arith.addf %189, %194 : vector<8x676xf32>
    %c3_153 = arith.constant 3 : index
    %c2_154 = arith.constant 2 : index
    %196 = memref.load %arg2[%c3_153, %c2_154] : memref<10x9xf32, #tpu.memory_space<smem>>
    %c2_155 = arith.constant 2 : index
    %c0_156 = arith.constant 0 : index
    %c0_157 = arith.constant 0 : index
    %197 = vector.load %arg1[%c2_155, %c0_156, %c0_157] : memref<9x8x676xf32, #tpu.memory_space<vmem>>, vector<1x8x676xf32>
    %198 = vector.shape_cast %197 : vector<1x8x676xf32> to vector<8x676xf32>
    %199 = vector.broadcast %196 : f32 to vector<8x676xf32>
    %200 = arith.mulf %199, %198 : vector<8x676xf32>
    %201 = arith.addf %195, %200 : vector<8x676xf32>
    %c3_158 = arith.constant 3 : index
    %c3_159 = arith.constant 3 : index
    %202 = memref.load %arg2[%c3_158, %c3_159] : memref<10x9xf32, #tpu.memory_space<smem>>
    %c3_160 = arith.constant 3 : index
    %c0_161 = arith.constant 0 : index
    %c0_162 = arith.constant 0 : index
    %203 = vector.load %arg1[%c3_160, %c0_161, %c0_162] : memref<9x8x676xf32, #tpu.memory_space<vmem>>, vector<1x8x676xf32>
    %204 = vector.shape_cast %203 : vector<1x8x676xf32> to vector<8x676xf32>
    %205 = vector.broadcast %202 : f32 to vector<8x676xf32>
    %206 = arith.mulf %205, %204 : vector<8x676xf32>
    %207 = arith.addf %201, %206 : vector<8x676xf32>
    %c3_163 = arith.constant 3 : index
    %c4_164 = arith.constant 4 : index
    %208 = memref.load %arg2[%c3_163, %c4_164] : memref<10x9xf32, #tpu.memory_space<smem>>
    %c4_165 = arith.constant 4 : index
    %c0_166 = arith.constant 0 : index
    %c0_167 = arith.constant 0 : index
    %209 = vector.load %arg1[%c4_165, %c0_166, %c0_167] : memref<9x8x676xf32, #tpu.memory_space<vmem>>, vector<1x8x676xf32>
    %210 = vector.shape_cast %209 : vector<1x8x676xf32> to vector<8x676xf32>
    %211 = vector.broadcast %208 : f32 to vector<8x676xf32>
    %212 = arith.mulf %211, %210 : vector<8x676xf32>
    %213 = arith.addf %207, %212 : vector<8x676xf32>
    %c3_168 = arith.constant 3 : index
    %c5_169 = arith.constant 5 : index
    %214 = memref.load %arg2[%c3_168, %c5_169] : memref<10x9xf32, #tpu.memory_space<smem>>
    %c5_170 = arith.constant 5 : index
    %c0_171 = arith.constant 0 : index
    %c0_172 = arith.constant 0 : index
    %215 = vector.load %arg1[%c5_170, %c0_171, %c0_172] : memref<9x8x676xf32, #tpu.memory_space<vmem>>, vector<1x8x676xf32>
    %216 = vector.shape_cast %215 : vector<1x8x676xf32> to vector<8x676xf32>
    %217 = vector.broadcast %214 : f32 to vector<8x676xf32>
    %218 = arith.mulf %217, %216 : vector<8x676xf32>
    %219 = arith.addf %213, %218 : vector<8x676xf32>
    %c3_173 = arith.constant 3 : index
    %c6_174 = arith.constant 6 : index
    %220 = memref.load %arg2[%c3_173, %c6_174] : memref<10x9xf32, #tpu.memory_space<smem>>
    %c6_175 = arith.constant 6 : index
    %c0_176 = arith.constant 0 : index
    %c0_177 = arith.constant 0 : index
    %221 = vector.load %arg1[%c6_175, %c0_176, %c0_177] : memref<9x8x676xf32, #tpu.memory_space<vmem>>, vector<1x8x676xf32>
    %222 = vector.shape_cast %221 : vector<1x8x676xf32> to vector<8x676xf32>
    %223 = vector.broadcast %220 : f32 to vector<8x676xf32>
    %224 = arith.mulf %223, %222 : vector<8x676xf32>
    %225 = arith.addf %219, %224 : vector<8x676xf32>
    %c3_178 = arith.constant 3 : index
    %c7_179 = arith.constant 7 : index
    %226 = memref.load %arg2[%c3_178, %c7_179] : memref<10x9xf32, #tpu.memory_space<smem>>
    %c7_180 = arith.constant 7 : index
    %c0_181 = arith.constant 0 : index
    %c0_182 = arith.constant 0 : index
    %227 = vector.load %arg1[%c7_180, %c0_181, %c0_182] : memref<9x8x676xf32, #tpu.memory_space<vmem>>, vector<1x8x676xf32>
    %228 = vector.shape_cast %227 : vector<1x8x676xf32> to vector<8x676xf32>
    %229 = vector.broadcast %226 : f32 to vector<8x676xf32>
    %230 = arith.mulf %229, %228 : vector<8x676xf32>
    %231 = arith.addf %225, %230 : vector<8x676xf32>
    %c3_183 = arith.constant 3 : index
    %c8_184 = arith.constant 8 : index
    %232 = memref.load %arg2[%c3_183, %c8_184] : memref<10x9xf32, #tpu.memory_space<smem>>
    %c8_185 = arith.constant 8 : index
    %c0_186 = arith.constant 0 : index
    %c0_187 = arith.constant 0 : index
    %233 = vector.load %arg1[%c8_185, %c0_186, %c0_187] : memref<9x8x676xf32, #tpu.memory_space<vmem>>, vector<1x8x676xf32>
    %234 = vector.shape_cast %233 : vector<1x8x676xf32> to vector<8x676xf32>
    %235 = vector.broadcast %232 : f32 to vector<8x676xf32>
    %236 = arith.mulf %235, %234 : vector<8x676xf32>
    %237 = arith.addf %231, %236 : vector<8x676xf32>
    %c3_188 = arith.constant 3 : index
    %238 = memref.load %arg3[%c3_188] : memref<10xf32, #tpu.memory_space<smem>>
    %239 = vector.broadcast %238 : f32 to vector<8x676xf32>
    %240 = arith.addf %237, %239 : vector<8x676xf32>
    %cst_189 = arith.constant 0.000000e+00 : f32
    %241 = vector.broadcast %cst_189 : f32 to vector<8x676xf32>
    %242 = arith.maximumf %240, %241 : vector<8x676xf32>
    %c3_190 = arith.constant 3 : index
    %c0_191 = arith.constant 0 : index
    %c0_192 = arith.constant 0 : index
    %243 = vector.load %arg4[%c3_190, %c0_191, %c0_192] : memref<10x676x50xf32, #tpu.memory_space<vmem>>, vector<1x676x50xf32>
    %244 = vector.shape_cast %243 : vector<1x676x50xf32> to vector<676x50xf32>
    %cst_193 = arith.constant dense<0.000000e+00> : vector<8x50xf32>
    %245 = tpu.matmul %242, %244, %cst_193 {dimension_numbers = #tpu.dot_dimension_numbers<[1], [0], [0], [1], [0, 0, 1, 1], [], []>} : vector<8x676xf32>, vector<676x50xf32>, vector<8x50xf32> -> vector<8x50xf32>
    %246 = arith.addf %184, %245 : vector<8x50xf32>
    %c4_194 = arith.constant 4 : index
    %c0_195 = arith.constant 0 : index
    %247 = memref.load %arg2[%c4_194, %c0_195] : memref<10x9xf32, #tpu.memory_space<smem>>
    %c0_196 = arith.constant 0 : index
    %c0_197 = arith.constant 0 : index
    %c0_198 = arith.constant 0 : index
    %248 = vector.load %arg1[%c0_196, %c0_197, %c0_198] : memref<9x8x676xf32, #tpu.memory_space<vmem>>, vector<1x8x676xf32>
    %249 = vector.shape_cast %248 : vector<1x8x676xf32> to vector<8x676xf32>
    %250 = vector.broadcast %247 : f32 to vector<8x676xf32>
    %251 = arith.mulf %250, %249 : vector<8x676xf32>
    %c4_199 = arith.constant 4 : index
    %c1_200 = arith.constant 1 : index
    %252 = memref.load %arg2[%c4_199, %c1_200] : memref<10x9xf32, #tpu.memory_space<smem>>
    %c1_201 = arith.constant 1 : index
    %c0_202 = arith.constant 0 : index
    %c0_203 = arith.constant 0 : index
    %253 = vector.load %arg1[%c1_201, %c0_202, %c0_203] : memref<9x8x676xf32, #tpu.memory_space<vmem>>, vector<1x8x676xf32>
    %254 = vector.shape_cast %253 : vector<1x8x676xf32> to vector<8x676xf32>
    %255 = vector.broadcast %252 : f32 to vector<8x676xf32>
    %256 = arith.mulf %255, %254 : vector<8x676xf32>
    %257 = arith.addf %251, %256 : vector<8x676xf32>
    %c4_204 = arith.constant 4 : index
    %c2_205 = arith.constant 2 : index
    %258 = memref.load %arg2[%c4_204, %c2_205] : memref<10x9xf32, #tpu.memory_space<smem>>
    %c2_206 = arith.constant 2 : index
    %c0_207 = arith.constant 0 : index
    %c0_208 = arith.constant 0 : index
    %259 = vector.load %arg1[%c2_206, %c0_207, %c0_208] : memref<9x8x676xf32, #tpu.memory_space<vmem>>, vector<1x8x676xf32>
    %260 = vector.shape_cast %259 : vector<1x8x676xf32> to vector<8x676xf32>
    %261 = vector.broadcast %258 : f32 to vector<8x676xf32>
    %262 = arith.mulf %261, %260 : vector<8x676xf32>
    %263 = arith.addf %257, %262 : vector<8x676xf32>
    %c4_209 = arith.constant 4 : index
    %c3_210 = arith.constant 3 : index
    %264 = memref.load %arg2[%c4_209, %c3_210] : memref<10x9xf32, #tpu.memory_space<smem>>
    %c3_211 = arith.constant 3 : index
    %c0_212 = arith.constant 0 : index
    %c0_213 = arith.constant 0 : index
    %265 = vector.load %arg1[%c3_211, %c0_212, %c0_213] : memref<9x8x676xf32, #tpu.memory_space<vmem>>, vector<1x8x676xf32>
    %266 = vector.shape_cast %265 : vector<1x8x676xf32> to vector<8x676xf32>
    %267 = vector.broadcast %264 : f32 to vector<8x676xf32>
    %268 = arith.mulf %267, %266 : vector<8x676xf32>
    %269 = arith.addf %263, %268 : vector<8x676xf32>
    %c4_214 = arith.constant 4 : index
    %c4_215 = arith.constant 4 : index
    %270 = memref.load %arg2[%c4_214, %c4_215] : memref<10x9xf32, #tpu.memory_space<smem>>
    %c4_216 = arith.constant 4 : index
    %c0_217 = arith.constant 0 : index
    %c0_218 = arith.constant 0 : index
    %271 = vector.load %arg1[%c4_216, %c0_217, %c0_218] : memref<9x8x676xf32, #tpu.memory_space<vmem>>, vector<1x8x676xf32>
    %272 = vector.shape_cast %271 : vector<1x8x676xf32> to vector<8x676xf32>
    %273 = vector.broadcast %270 : f32 to vector<8x676xf32>
    %274 = arith.mulf %273, %272 : vector<8x676xf32>
    %275 = arith.addf %269, %274 : vector<8x676xf32>
    %c4_219 = arith.constant 4 : index
    %c5_220 = arith.constant 5 : index
    %276 = memref.load %arg2[%c4_219, %c5_220] : memref<10x9xf32, #tpu.memory_space<smem>>
    %c5_221 = arith.constant 5 : index
    %c0_222 = arith.constant 0 : index
    %c0_223 = arith.constant 0 : index
    %277 = vector.load %arg1[%c5_221, %c0_222, %c0_223] : memref<9x8x676xf32, #tpu.memory_space<vmem>>, vector<1x8x676xf32>
    %278 = vector.shape_cast %277 : vector<1x8x676xf32> to vector<8x676xf32>
    %279 = vector.broadcast %276 : f32 to vector<8x676xf32>
    %280 = arith.mulf %279, %278 : vector<8x676xf32>
    %281 = arith.addf %275, %280 : vector<8x676xf32>
    %c4_224 = arith.constant 4 : index
    %c6_225 = arith.constant 6 : index
    %282 = memref.load %arg2[%c4_224, %c6_225] : memref<10x9xf32, #tpu.memory_space<smem>>
    %c6_226 = arith.constant 6 : index
    %c0_227 = arith.constant 0 : index
    %c0_228 = arith.constant 0 : index
    %283 = vector.load %arg1[%c6_226, %c0_227, %c0_228] : memref<9x8x676xf32, #tpu.memory_space<vmem>>, vector<1x8x676xf32>
    %284 = vector.shape_cast %283 : vector<1x8x676xf32> to vector<8x676xf32>
    %285 = vector.broadcast %282 : f32 to vector<8x676xf32>
    %286 = arith.mulf %285, %284 : vector<8x676xf32>
    %287 = arith.addf %281, %286 : vector<8x676xf32>
    %c4_229 = arith.constant 4 : index
    %c7_230 = arith.constant 7 : index
    %288 = memref.load %arg2[%c4_229, %c7_230] : memref<10x9xf32, #tpu.memory_space<smem>>
    %c7_231 = arith.constant 7 : index
    %c0_232 = arith.constant 0 : index
    %c0_233 = arith.constant 0 : index
    %289 = vector.load %arg1[%c7_231, %c0_232, %c0_233] : memref<9x8x676xf32, #tpu.memory_space<vmem>>, vector<1x8x676xf32>
    %290 = vector.shape_cast %289 : vector<1x8x676xf32> to vector<8x676xf32>
    %291 = vector.broadcast %288 : f32 to vector<8x676xf32>
    %292 = arith.mulf %291, %290 : vector<8x676xf32>
    %293 = arith.addf %287, %292 : vector<8x676xf32>
    %c4_234 = arith.constant 4 : index
    %c8_235 = arith.constant 8 : index
    %294 = memref.load %arg2[%c4_234, %c8_235] : memref<10x9xf32, #tpu.memory_space<smem>>
    %c8_236 = arith.constant 8 : index
    %c0_237 = arith.constant 0 : index
    %c0_238 = arith.constant 0 : index
    %295 = vector.load %arg1[%c8_236, %c0_237, %c0_238] : memref<9x8x676xf32, #tpu.memory_space<vmem>>, vector<1x8x676xf32>
    %296 = vector.shape_cast %295 : vector<1x8x676xf32> to vector<8x676xf32>
    %297 = vector.broadcast %294 : f32 to vector<8x676xf32>
    %298 = arith.mulf %297, %296 : vector<8x676xf32>
    %299 = arith.addf %293, %298 : vector<8x676xf32>
    %c4_239 = arith.constant 4 : index
    %300 = memref.load %arg3[%c4_239] : memref<10xf32, #tpu.memory_space<smem>>
    %301 = vector.broadcast %300 : f32 to vector<8x676xf32>
    %302 = arith.addf %299, %301 : vector<8x676xf32>
    %cst_240 = arith.constant 0.000000e+00 : f32
    %303 = vector.broadcast %cst_240 : f32 to vector<8x676xf32>
    %304 = arith.maximumf %302, %303 : vector<8x676xf32>
    %c4_241 = arith.constant 4 : index
    %c0_242 = arith.constant 0 : index
    %c0_243 = arith.constant 0 : index
    %305 = vector.load %arg4[%c4_241, %c0_242, %c0_243] : memref<10x676x50xf32, #tpu.memory_space<vmem>>, vector<1x676x50xf32>
    %306 = vector.shape_cast %305 : vector<1x676x50xf32> to vector<676x50xf32>
    %cst_244 = arith.constant dense<0.000000e+00> : vector<8x50xf32>
    %307 = tpu.matmul %304, %306, %cst_244 {dimension_numbers = #tpu.dot_dimension_numbers<[1], [0], [0], [1], [0, 0, 1, 1], [], []>} : vector<8x676xf32>, vector<676x50xf32>, vector<8x50xf32> -> vector<8x50xf32>
    %308 = arith.addf %246, %307 : vector<8x50xf32>
    %c5_245 = arith.constant 5 : index
    %c0_246 = arith.constant 0 : index
    %309 = memref.load %arg2[%c5_245, %c0_246] : memref<10x9xf32, #tpu.memory_space<smem>>
    %c0_247 = arith.constant 0 : index
    %c0_248 = arith.constant 0 : index
    %c0_249 = arith.constant 0 : index
    %310 = vector.load %arg1[%c0_247, %c0_248, %c0_249] : memref<9x8x676xf32, #tpu.memory_space<vmem>>, vector<1x8x676xf32>
    %311 = vector.shape_cast %310 : vector<1x8x676xf32> to vector<8x676xf32>
    %312 = vector.broadcast %309 : f32 to vector<8x676xf32>
    %313 = arith.mulf %312, %311 : vector<8x676xf32>
    %c5_250 = arith.constant 5 : index
    %c1_251 = arith.constant 1 : index
    %314 = memref.load %arg2[%c5_250, %c1_251] : memref<10x9xf32, #tpu.memory_space<smem>>
    %c1_252 = arith.constant 1 : index
    %c0_253 = arith.constant 0 : index
    %c0_254 = arith.constant 0 : index
    %315 = vector.load %arg1[%c1_252, %c0_253, %c0_254] : memref<9x8x676xf32, #tpu.memory_space<vmem>>, vector<1x8x676xf32>
    %316 = vector.shape_cast %315 : vector<1x8x676xf32> to vector<8x676xf32>
    %317 = vector.broadcast %314 : f32 to vector<8x676xf32>
    %318 = arith.mulf %317, %316 : vector<8x676xf32>
    %319 = arith.addf %313, %318 : vector<8x676xf32>
    %c5_255 = arith.constant 5 : index
    %c2_256 = arith.constant 2 : index
    %320 = memref.load %arg2[%c5_255, %c2_256] : memref<10x9xf32, #tpu.memory_space<smem>>
    %c2_257 = arith.constant 2 : index
    %c0_258 = arith.constant 0 : index
    %c0_259 = arith.constant 0 : index
    %321 = vector.load %arg1[%c2_257, %c0_258, %c0_259] : memref<9x8x676xf32, #tpu.memory_space<vmem>>, vector<1x8x676xf32>
    %322 = vector.shape_cast %321 : vector<1x8x676xf32> to vector<8x676xf32>
    %323 = vector.broadcast %320 : f32 to vector<8x676xf32>
    %324 = arith.mulf %323, %322 : vector<8x676xf32>
    %325 = arith.addf %319, %324 : vector<8x676xf32>
    %c5_260 = arith.constant 5 : index
    %c3_261 = arith.constant 3 : index
    %326 = memref.load %arg2[%c5_260, %c3_261] : memref<10x9xf32, #tpu.memory_space<smem>>
    %c3_262 = arith.constant 3 : index
    %c0_263 = arith.constant 0 : index
    %c0_264 = arith.constant 0 : index
    %327 = vector.load %arg1[%c3_262, %c0_263, %c0_264] : memref<9x8x676xf32, #tpu.memory_space<vmem>>, vector<1x8x676xf32>
    %328 = vector.shape_cast %327 : vector<1x8x676xf32> to vector<8x676xf32>
    %329 = vector.broadcast %326 : f32 to vector<8x676xf32>
    %330 = arith.mulf %329, %328 : vector<8x676xf32>
    %331 = arith.addf %325, %330 : vector<8x676xf32>
    %c5_265 = arith.constant 5 : index
    %c4_266 = arith.constant 4 : index
    %332 = memref.load %arg2[%c5_265, %c4_266] : memref<10x9xf32, #tpu.memory_space<smem>>
    %c4_267 = arith.constant 4 : index
    %c0_268 = arith.constant 0 : index
    %c0_269 = arith.constant 0 : index
    %333 = vector.load %arg1[%c4_267, %c0_268, %c0_269] : memref<9x8x676xf32, #tpu.memory_space<vmem>>, vector<1x8x676xf32>
    %334 = vector.shape_cast %333 : vector<1x8x676xf32> to vector<8x676xf32>
    %335 = vector.broadcast %332 : f32 to vector<8x676xf32>
    %336 = arith.mulf %335, %334 : vector<8x676xf32>
    %337 = arith.addf %331, %336 : vector<8x676xf32>
    %c5_270 = arith.constant 5 : index
    %c5_271 = arith.constant 5 : index
    %338 = memref.load %arg2[%c5_270, %c5_271] : memref<10x9xf32, #tpu.memory_space<smem>>
    %c5_272 = arith.constant 5 : index
    %c0_273 = arith.constant 0 : index
    %c0_274 = arith.constant 0 : index
    %339 = vector.load %arg1[%c5_272, %c0_273, %c0_274] : memref<9x8x676xf32, #tpu.memory_space<vmem>>, vector<1x8x676xf32>
    %340 = vector.shape_cast %339 : vector<1x8x676xf32> to vector<8x676xf32>
    %341 = vector.broadcast %338 : f32 to vector<8x676xf32>
    %342 = arith.mulf %341, %340 : vector<8x676xf32>
    %343 = arith.addf %337, %342 : vector<8x676xf32>
    %c5_275 = arith.constant 5 : index
    %c6_276 = arith.constant 6 : index
    %344 = memref.load %arg2[%c5_275, %c6_276] : memref<10x9xf32, #tpu.memory_space<smem>>
    %c6_277 = arith.constant 6 : index
    %c0_278 = arith.constant 0 : index
    %c0_279 = arith.constant 0 : index
    %345 = vector.load %arg1[%c6_277, %c0_278, %c0_279] : memref<9x8x676xf32, #tpu.memory_space<vmem>>, vector<1x8x676xf32>
    %346 = vector.shape_cast %345 : vector<1x8x676xf32> to vector<8x676xf32>
    %347 = vector.broadcast %344 : f32 to vector<8x676xf32>
    %348 = arith.mulf %347, %346 : vector<8x676xf32>
    %349 = arith.addf %343, %348 : vector<8x676xf32>
    %c5_280 = arith.constant 5 : index
    %c7_281 = arith.constant 7 : index
    %350 = memref.load %arg2[%c5_280, %c7_281] : memref<10x9xf32, #tpu.memory_space<smem>>
    %c7_282 = arith.constant 7 : index
    %c0_283 = arith.constant 0 : index
    %c0_284 = arith.constant 0 : index
    %351 = vector.load %arg1[%c7_282, %c0_283, %c0_284] : memref<9x8x676xf32, #tpu.memory_space<vmem>>, vector<1x8x676xf32>
    %352 = vector.shape_cast %351 : vector<1x8x676xf32> to vector<8x676xf32>
    %353 = vector.broadcast %350 : f32 to vector<8x676xf32>
    %354 = arith.mulf %353, %352 : vector<8x676xf32>
    %355 = arith.addf %349, %354 : vector<8x676xf32>
    %c5_285 = arith.constant 5 : index
    %c8_286 = arith.constant 8 : index
    %356 = memref.load %arg2[%c5_285, %c8_286] : memref<10x9xf32, #tpu.memory_space<smem>>
    %c8_287 = arith.constant 8 : index
    %c0_288 = arith.constant 0 : index
    %c0_289 = arith.constant 0 : index
    %357 = vector.load %arg1[%c8_287, %c0_288, %c0_289] : memref<9x8x676xf32, #tpu.memory_space<vmem>>, vector<1x8x676xf32>
    %358 = vector.shape_cast %357 : vector<1x8x676xf32> to vector<8x676xf32>
    %359 = vector.broadcast %356 : f32 to vector<8x676xf32>
    %360 = arith.mulf %359, %358 : vector<8x676xf32>
    %361 = arith.addf %355, %360 : vector<8x676xf32>
    %c5_290 = arith.constant 5 : index
    %362 = memref.load %arg3[%c5_290] : memref<10xf32, #tpu.memory_space<smem>>
    %363 = vector.broadcast %362 : f32 to vector<8x676xf32>
    %364 = arith.addf %361, %363 : vector<8x676xf32>
    %cst_291 = arith.constant 0.000000e+00 : f32
    %365 = vector.broadcast %cst_291 : f32 to vector<8x676xf32>
    %366 = arith.maximumf %364, %365 : vector<8x676xf32>
    %c5_292 = arith.constant 5 : index
    %c0_293 = arith.constant 0 : index
    %c0_294 = arith.constant 0 : index
    %367 = vector.load %arg4[%c5_292, %c0_293, %c0_294] : memref<10x676x50xf32, #tpu.memory_space<vmem>>, vector<1x676x50xf32>
    %368 = vector.shape_cast %367 : vector<1x676x50xf32> to vector<676x50xf32>
    %cst_295 = arith.constant dense<0.000000e+00> : vector<8x50xf32>
    %369 = tpu.matmul %366, %368, %cst_295 {dimension_numbers = #tpu.dot_dimension_numbers<[1], [0], [0], [1], [0, 0, 1, 1], [], []>} : vector<8x676xf32>, vector<676x50xf32>, vector<8x50xf32> -> vector<8x50xf32>
    %370 = arith.addf %308, %369 : vector<8x50xf32>
    %c6_296 = arith.constant 6 : index
    %c0_297 = arith.constant 0 : index
    %371 = memref.load %arg2[%c6_296, %c0_297] : memref<10x9xf32, #tpu.memory_space<smem>>
    %c0_298 = arith.constant 0 : index
    %c0_299 = arith.constant 0 : index
    %c0_300 = arith.constant 0 : index
    %372 = vector.load %arg1[%c0_298, %c0_299, %c0_300] : memref<9x8x676xf32, #tpu.memory_space<vmem>>, vector<1x8x676xf32>
    %373 = vector.shape_cast %372 : vector<1x8x676xf32> to vector<8x676xf32>
    %374 = vector.broadcast %371 : f32 to vector<8x676xf32>
    %375 = arith.mulf %374, %373 : vector<8x676xf32>
    %c6_301 = arith.constant 6 : index
    %c1_302 = arith.constant 1 : index
    %376 = memref.load %arg2[%c6_301, %c1_302] : memref<10x9xf32, #tpu.memory_space<smem>>
    %c1_303 = arith.constant 1 : index
    %c0_304 = arith.constant 0 : index
    %c0_305 = arith.constant 0 : index
    %377 = vector.load %arg1[%c1_303, %c0_304, %c0_305] : memref<9x8x676xf32, #tpu.memory_space<vmem>>, vector<1x8x676xf32>
    %378 = vector.shape_cast %377 : vector<1x8x676xf32> to vector<8x676xf32>
    %379 = vector.broadcast %376 : f32 to vector<8x676xf32>
    %380 = arith.mulf %379, %378 : vector<8x676xf32>
    %381 = arith.addf %375, %380 : vector<8x676xf32>
    %c6_306 = arith.constant 6 : index
    %c2_307 = arith.constant 2 : index
    %382 = memref.load %arg2[%c6_306, %c2_307] : memref<10x9xf32, #tpu.memory_space<smem>>
    %c2_308 = arith.constant 2 : index
    %c0_309 = arith.constant 0 : index
    %c0_310 = arith.constant 0 : index
    %383 = vector.load %arg1[%c2_308, %c0_309, %c0_310] : memref<9x8x676xf32, #tpu.memory_space<vmem>>, vector<1x8x676xf32>
    %384 = vector.shape_cast %383 : vector<1x8x676xf32> to vector<8x676xf32>
    %385 = vector.broadcast %382 : f32 to vector<8x676xf32>
    %386 = arith.mulf %385, %384 : vector<8x676xf32>
    %387 = arith.addf %381, %386 : vector<8x676xf32>
    %c6_311 = arith.constant 6 : index
    %c3_312 = arith.constant 3 : index
    %388 = memref.load %arg2[%c6_311, %c3_312] : memref<10x9xf32, #tpu.memory_space<smem>>
    %c3_313 = arith.constant 3 : index
    %c0_314 = arith.constant 0 : index
    %c0_315 = arith.constant 0 : index
    %389 = vector.load %arg1[%c3_313, %c0_314, %c0_315] : memref<9x8x676xf32, #tpu.memory_space<vmem>>, vector<1x8x676xf32>
    %390 = vector.shape_cast %389 : vector<1x8x676xf32> to vector<8x676xf32>
    %391 = vector.broadcast %388 : f32 to vector<8x676xf32>
    %392 = arith.mulf %391, %390 : vector<8x676xf32>
    %393 = arith.addf %387, %392 : vector<8x676xf32>
    %c6_316 = arith.constant 6 : index
    %c4_317 = arith.constant 4 : index
    %394 = memref.load %arg2[%c6_316, %c4_317] : memref<10x9xf32, #tpu.memory_space<smem>>
    %c4_318 = arith.constant 4 : index
    %c0_319 = arith.constant 0 : index
    %c0_320 = arith.constant 0 : index
    %395 = vector.load %arg1[%c4_318, %c0_319, %c0_320] : memref<9x8x676xf32, #tpu.memory_space<vmem>>, vector<1x8x676xf32>
    %396 = vector.shape_cast %395 : vector<1x8x676xf32> to vector<8x676xf32>
    %397 = vector.broadcast %394 : f32 to vector<8x676xf32>
    %398 = arith.mulf %397, %396 : vector<8x676xf32>
    %399 = arith.addf %393, %398 : vector<8x676xf32>
    %c6_321 = arith.constant 6 : index
    %c5_322 = arith.constant 5 : index
    %400 = memref.load %arg2[%c6_321, %c5_322] : memref<10x9xf32, #tpu.memory_space<smem>>
    %c5_323 = arith.constant 5 : index
    %c0_324 = arith.constant 0 : index
    %c0_325 = arith.constant 0 : index
    %401 = vector.load %arg1[%c5_323, %c0_324, %c0_325] : memref<9x8x676xf32, #tpu.memory_space<vmem>>, vector<1x8x676xf32>
    %402 = vector.shape_cast %401 : vector<1x8x676xf32> to vector<8x676xf32>
    %403 = vector.broadcast %400 : f32 to vector<8x676xf32>
    %404 = arith.mulf %403, %402 : vector<8x676xf32>
    %405 = arith.addf %399, %404 : vector<8x676xf32>
    %c6_326 = arith.constant 6 : index
    %c6_327 = arith.constant 6 : index
    %406 = memref.load %arg2[%c6_326, %c6_327] : memref<10x9xf32, #tpu.memory_space<smem>>
    %c6_328 = arith.constant 6 : index
    %c0_329 = arith.constant 0 : index
    %c0_330 = arith.constant 0 : index
    %407 = vector.load %arg1[%c6_328, %c0_329, %c0_330] : memref<9x8x676xf32, #tpu.memory_space<vmem>>, vector<1x8x676xf32>
    %408 = vector.shape_cast %407 : vector<1x8x676xf32> to vector<8x676xf32>
    %409 = vector.broadcast %406 : f32 to vector<8x676xf32>
    %410 = arith.mulf %409, %408 : vector<8x676xf32>
    %411 = arith.addf %405, %410 : vector<8x676xf32>
    %c6_331 = arith.constant 6 : index
    %c7_332 = arith.constant 7 : index
    %412 = memref.load %arg2[%c6_331, %c7_332] : memref<10x9xf32, #tpu.memory_space<smem>>
    %c7_333 = arith.constant 7 : index
    %c0_334 = arith.constant 0 : index
    %c0_335 = arith.constant 0 : index
    %413 = vector.load %arg1[%c7_333, %c0_334, %c0_335] : memref<9x8x676xf32, #tpu.memory_space<vmem>>, vector<1x8x676xf32>
    %414 = vector.shape_cast %413 : vector<1x8x676xf32> to vector<8x676xf32>
    %415 = vector.broadcast %412 : f32 to vector<8x676xf32>
    %416 = arith.mulf %415, %414 : vector<8x676xf32>
    %417 = arith.addf %411, %416 : vector<8x676xf32>
    %c6_336 = arith.constant 6 : index
    %c8_337 = arith.constant 8 : index
    %418 = memref.load %arg2[%c6_336, %c8_337] : memref<10x9xf32, #tpu.memory_space<smem>>
    %c8_338 = arith.constant 8 : index
    %c0_339 = arith.constant 0 : index
    %c0_340 = arith.constant 0 : index
    %419 = vector.load %arg1[%c8_338, %c0_339, %c0_340] : memref<9x8x676xf32, #tpu.memory_space<vmem>>, vector<1x8x676xf32>
    %420 = vector.shape_cast %419 : vector<1x8x676xf32> to vector<8x676xf32>
    %421 = vector.broadcast %418 : f32 to vector<8x676xf32>
    %422 = arith.mulf %421, %420 : vector<8x676xf32>
    %423 = arith.addf %417, %422 : vector<8x676xf32>
    %c6_341 = arith.constant 6 : index
    %424 = memref.load %arg3[%c6_341] : memref<10xf32, #tpu.memory_space<smem>>
    %425 = vector.broadcast %424 : f32 to vector<8x676xf32>
    %426 = arith.addf %423, %425 : vector<8x676xf32>
    %cst_342 = arith.constant 0.000000e+00 : f32
    %427 = vector.broadcast %cst_342 : f32 to vector<8x676xf32>
    %428 = arith.maximumf %426, %427 : vector<8x676xf32>
    %c6_343 = arith.constant 6 : index
    %c0_344 = arith.constant 0 : index
    %c0_345 = arith.constant 0 : index
    %429 = vector.load %arg4[%c6_343, %c0_344, %c0_345] : memref<10x676x50xf32, #tpu.memory_space<vmem>>, vector<1x676x50xf32>
    %430 = vector.shape_cast %429 : vector<1x676x50xf32> to vector<676x50xf32>
    %cst_346 = arith.constant dense<0.000000e+00> : vector<8x50xf32>
    %431 = tpu.matmul %428, %430, %cst_346 {dimension_numbers = #tpu.dot_dimension_numbers<[1], [0], [0], [1], [0, 0, 1, 1], [], []>} : vector<8x676xf32>, vector<676x50xf32>, vector<8x50xf32> -> vector<8x50xf32>
    %432 = arith.addf %370, %431 : vector<8x50xf32>
    %c7_347 = arith.constant 7 : index
    %c0_348 = arith.constant 0 : index
    %433 = memref.load %arg2[%c7_347, %c0_348] : memref<10x9xf32, #tpu.memory_space<smem>>
    %c0_349 = arith.constant 0 : index
    %c0_350 = arith.constant 0 : index
    %c0_351 = arith.constant 0 : index
    %434 = vector.load %arg1[%c0_349, %c0_350, %c0_351] : memref<9x8x676xf32, #tpu.memory_space<vmem>>, vector<1x8x676xf32>
    %435 = vector.shape_cast %434 : vector<1x8x676xf32> to vector<8x676xf32>
    %436 = vector.broadcast %433 : f32 to vector<8x676xf32>
    %437 = arith.mulf %436, %435 : vector<8x676xf32>
    %c7_352 = arith.constant 7 : index
    %c1_353 = arith.constant 1 : index
    %438 = memref.load %arg2[%c7_352, %c1_353] : memref<10x9xf32, #tpu.memory_space<smem>>
    %c1_354 = arith.constant 1 : index
    %c0_355 = arith.constant 0 : index
    %c0_356 = arith.constant 0 : index
    %439 = vector.load %arg1[%c1_354, %c0_355, %c0_356] : memref<9x8x676xf32, #tpu.memory_space<vmem>>, vector<1x8x676xf32>
    %440 = vector.shape_cast %439 : vector<1x8x676xf32> to vector<8x676xf32>
    %441 = vector.broadcast %438 : f32 to vector<8x676xf32>
    %442 = arith.mulf %441, %440 : vector<8x676xf32>
    %443 = arith.addf %437, %442 : vector<8x676xf32>
    %c7_357 = arith.constant 7 : index
    %c2_358 = arith.constant 2 : index
    %444 = memref.load %arg2[%c7_357, %c2_358] : memref<10x9xf32, #tpu.memory_space<smem>>
    %c2_359 = arith.constant 2 : index
    %c0_360 = arith.constant 0 : index
    %c0_361 = arith.constant 0 : index
    %445 = vector.load %arg1[%c2_359, %c0_360, %c0_361] : memref<9x8x676xf32, #tpu.memory_space<vmem>>, vector<1x8x676xf32>
    %446 = vector.shape_cast %445 : vector<1x8x676xf32> to vector<8x676xf32>
    %447 = vector.broadcast %444 : f32 to vector<8x676xf32>
    %448 = arith.mulf %447, %446 : vector<8x676xf32>
    %449 = arith.addf %443, %448 : vector<8x676xf32>
    %c7_362 = arith.constant 7 : index
    %c3_363 = arith.constant 3 : index
    %450 = memref.load %arg2[%c7_362, %c3_363] : memref<10x9xf32, #tpu.memory_space<smem>>
    %c3_364 = arith.constant 3 : index
    %c0_365 = arith.constant 0 : index
    %c0_366 = arith.constant 0 : index
    %451 = vector.load %arg1[%c3_364, %c0_365, %c0_366] : memref<9x8x676xf32, #tpu.memory_space<vmem>>, vector<1x8x676xf32>
    %452 = vector.shape_cast %451 : vector<1x8x676xf32> to vector<8x676xf32>
    %453 = vector.broadcast %450 : f32 to vector<8x676xf32>
    %454 = arith.mulf %453, %452 : vector<8x676xf32>
    %455 = arith.addf %449, %454 : vector<8x676xf32>
    %c7_367 = arith.constant 7 : index
    %c4_368 = arith.constant 4 : index
    %456 = memref.load %arg2[%c7_367, %c4_368] : memref<10x9xf32, #tpu.memory_space<smem>>
    %c4_369 = arith.constant 4 : index
    %c0_370 = arith.constant 0 : index
    %c0_371 = arith.constant 0 : index
    %457 = vector.load %arg1[%c4_369, %c0_370, %c0_371] : memref<9x8x676xf32, #tpu.memory_space<vmem>>, vector<1x8x676xf32>
    %458 = vector.shape_cast %457 : vector<1x8x676xf32> to vector<8x676xf32>
    %459 = vector.broadcast %456 : f32 to vector<8x676xf32>
    %460 = arith.mulf %459, %458 : vector<8x676xf32>
    %461 = arith.addf %455, %460 : vector<8x676xf32>
    %c7_372 = arith.constant 7 : index
    %c5_373 = arith.constant 5 : index
    %462 = memref.load %arg2[%c7_372, %c5_373] : memref<10x9xf32, #tpu.memory_space<smem>>
    %c5_374 = arith.constant 5 : index
    %c0_375 = arith.constant 0 : index
    %c0_376 = arith.constant 0 : index
    %463 = vector.load %arg1[%c5_374, %c0_375, %c0_376] : memref<9x8x676xf32, #tpu.memory_space<vmem>>, vector<1x8x676xf32>
    %464 = vector.shape_cast %463 : vector<1x8x676xf32> to vector<8x676xf32>
    %465 = vector.broadcast %462 : f32 to vector<8x676xf32>
    %466 = arith.mulf %465, %464 : vector<8x676xf32>
    %467 = arith.addf %461, %466 : vector<8x676xf32>
    %c7_377 = arith.constant 7 : index
    %c6_378 = arith.constant 6 : index
    %468 = memref.load %arg2[%c7_377, %c6_378] : memref<10x9xf32, #tpu.memory_space<smem>>
    %c6_379 = arith.constant 6 : index
    %c0_380 = arith.constant 0 : index
    %c0_381 = arith.constant 0 : index
    %469 = vector.load %arg1[%c6_379, %c0_380, %c0_381] : memref<9x8x676xf32, #tpu.memory_space<vmem>>, vector<1x8x676xf32>
    %470 = vector.shape_cast %469 : vector<1x8x676xf32> to vector<8x676xf32>
    %471 = vector.broadcast %468 : f32 to vector<8x676xf32>
    %472 = arith.mulf %471, %470 : vector<8x676xf32>
    %473 = arith.addf %467, %472 : vector<8x676xf32>
    %c7_382 = arith.constant 7 : index
    %c7_383 = arith.constant 7 : index
    %474 = memref.load %arg2[%c7_382, %c7_383] : memref<10x9xf32, #tpu.memory_space<smem>>
    %c7_384 = arith.constant 7 : index
    %c0_385 = arith.constant 0 : index
    %c0_386 = arith.constant 0 : index
    %475 = vector.load %arg1[%c7_384, %c0_385, %c0_386] : memref<9x8x676xf32, #tpu.memory_space<vmem>>, vector<1x8x676xf32>
    %476 = vector.shape_cast %475 : vector<1x8x676xf32> to vector<8x676xf32>
    %477 = vector.broadcast %474 : f32 to vector<8x676xf32>
    %478 = arith.mulf %477, %476 : vector<8x676xf32>
    %479 = arith.addf %473, %478 : vector<8x676xf32>
    %c7_387 = arith.constant 7 : index
    %c8_388 = arith.constant 8 : index
    %480 = memref.load %arg2[%c7_387, %c8_388] : memref<10x9xf32, #tpu.memory_space<smem>>
    %c8_389 = arith.constant 8 : index
    %c0_390 = arith.constant 0 : index
    %c0_391 = arith.constant 0 : index
    %481 = vector.load %arg1[%c8_389, %c0_390, %c0_391] : memref<9x8x676xf32, #tpu.memory_space<vmem>>, vector<1x8x676xf32>
    %482 = vector.shape_cast %481 : vector<1x8x676xf32> to vector<8x676xf32>
    %483 = vector.broadcast %480 : f32 to vector<8x676xf32>
    %484 = arith.mulf %483, %482 : vector<8x676xf32>
    %485 = arith.addf %479, %484 : vector<8x676xf32>
    %c7_392 = arith.constant 7 : index
    %486 = memref.load %arg3[%c7_392] : memref<10xf32, #tpu.memory_space<smem>>
    %487 = vector.broadcast %486 : f32 to vector<8x676xf32>
    %488 = arith.addf %485, %487 : vector<8x676xf32>
    %cst_393 = arith.constant 0.000000e+00 : f32
    %489 = vector.broadcast %cst_393 : f32 to vector<8x676xf32>
    %490 = arith.maximumf %488, %489 : vector<8x676xf32>
    %c7_394 = arith.constant 7 : index
    %c0_395 = arith.constant 0 : index
    %c0_396 = arith.constant 0 : index
    %491 = vector.load %arg4[%c7_394, %c0_395, %c0_396] : memref<10x676x50xf32, #tpu.memory_space<vmem>>, vector<1x676x50xf32>
    %492 = vector.shape_cast %491 : vector<1x676x50xf32> to vector<676x50xf32>
    %cst_397 = arith.constant dense<0.000000e+00> : vector<8x50xf32>
    %493 = tpu.matmul %490, %492, %cst_397 {dimension_numbers = #tpu.dot_dimension_numbers<[1], [0], [0], [1], [0, 0, 1, 1], [], []>} : vector<8x676xf32>, vector<676x50xf32>, vector<8x50xf32> -> vector<8x50xf32>
    %494 = arith.addf %432, %493 : vector<8x50xf32>
    %c8_398 = arith.constant 8 : index
    %c0_399 = arith.constant 0 : index
    %495 = memref.load %arg2[%c8_398, %c0_399] : memref<10x9xf32, #tpu.memory_space<smem>>
    %c0_400 = arith.constant 0 : index
    %c0_401 = arith.constant 0 : index
    %c0_402 = arith.constant 0 : index
    %496 = vector.load %arg1[%c0_400, %c0_401, %c0_402] : memref<9x8x676xf32, #tpu.memory_space<vmem>>, vector<1x8x676xf32>
    %497 = vector.shape_cast %496 : vector<1x8x676xf32> to vector<8x676xf32>
    %498 = vector.broadcast %495 : f32 to vector<8x676xf32>
    %499 = arith.mulf %498, %497 : vector<8x676xf32>
    %c8_403 = arith.constant 8 : index
    %c1_404 = arith.constant 1 : index
    %500 = memref.load %arg2[%c8_403, %c1_404] : memref<10x9xf32, #tpu.memory_space<smem>>
    %c1_405 = arith.constant 1 : index
    %c0_406 = arith.constant 0 : index
    %c0_407 = arith.constant 0 : index
    %501 = vector.load %arg1[%c1_405, %c0_406, %c0_407] : memref<9x8x676xf32, #tpu.memory_space<vmem>>, vector<1x8x676xf32>
    %502 = vector.shape_cast %501 : vector<1x8x676xf32> to vector<8x676xf32>
    %503 = vector.broadcast %500 : f32 to vector<8x676xf32>
    %504 = arith.mulf %503, %502 : vector<8x676xf32>
    %505 = arith.addf %499, %504 : vector<8x676xf32>
    %c8_408 = arith.constant 8 : index
    %c2_409 = arith.constant 2 : index
    %506 = memref.load %arg2[%c8_408, %c2_409] : memref<10x9xf32, #tpu.memory_space<smem>>
    %c2_410 = arith.constant 2 : index
    %c0_411 = arith.constant 0 : index
    %c0_412 = arith.constant 0 : index
    %507 = vector.load %arg1[%c2_410, %c0_411, %c0_412] : memref<9x8x676xf32, #tpu.memory_space<vmem>>, vector<1x8x676xf32>
    %508 = vector.shape_cast %507 : vector<1x8x676xf32> to vector<8x676xf32>
    %509 = vector.broadcast %506 : f32 to vector<8x676xf32>
    %510 = arith.mulf %509, %508 : vector<8x676xf32>
    %511 = arith.addf %505, %510 : vector<8x676xf32>
    %c8_413 = arith.constant 8 : index
    %c3_414 = arith.constant 3 : index
    %512 = memref.load %arg2[%c8_413, %c3_414] : memref<10x9xf32, #tpu.memory_space<smem>>
    %c3_415 = arith.constant 3 : index
    %c0_416 = arith.constant 0 : index
    %c0_417 = arith.constant 0 : index
    %513 = vector.load %arg1[%c3_415, %c0_416, %c0_417] : memref<9x8x676xf32, #tpu.memory_space<vmem>>, vector<1x8x676xf32>
    %514 = vector.shape_cast %513 : vector<1x8x676xf32> to vector<8x676xf32>
    %515 = vector.broadcast %512 : f32 to vector<8x676xf32>
    %516 = arith.mulf %515, %514 : vector<8x676xf32>
    %517 = arith.addf %511, %516 : vector<8x676xf32>
    %c8_418 = arith.constant 8 : index
    %c4_419 = arith.constant 4 : index
    %518 = memref.load %arg2[%c8_418, %c4_419] : memref<10x9xf32, #tpu.memory_space<smem>>
    %c4_420 = arith.constant 4 : index
    %c0_421 = arith.constant 0 : index
    %c0_422 = arith.constant 0 : index
    %519 = vector.load %arg1[%c4_420, %c0_421, %c0_422] : memref<9x8x676xf32, #tpu.memory_space<vmem>>, vector<1x8x676xf32>
    %520 = vector.shape_cast %519 : vector<1x8x676xf32> to vector<8x676xf32>
    %521 = vector.broadcast %518 : f32 to vector<8x676xf32>
    %522 = arith.mulf %521, %520 : vector<8x676xf32>
    %523 = arith.addf %517, %522 : vector<8x676xf32>
    %c8_423 = arith.constant 8 : index
    %c5_424 = arith.constant 5 : index
    %524 = memref.load %arg2[%c8_423, %c5_424] : memref<10x9xf32, #tpu.memory_space<smem>>
    %c5_425 = arith.constant 5 : index
    %c0_426 = arith.constant 0 : index
    %c0_427 = arith.constant 0 : index
    %525 = vector.load %arg1[%c5_425, %c0_426, %c0_427] : memref<9x8x676xf32, #tpu.memory_space<vmem>>, vector<1x8x676xf32>
    %526 = vector.shape_cast %525 : vector<1x8x676xf32> to vector<8x676xf32>
    %527 = vector.broadcast %524 : f32 to vector<8x676xf32>
    %528 = arith.mulf %527, %526 : vector<8x676xf32>
    %529 = arith.addf %523, %528 : vector<8x676xf32>
    %c8_428 = arith.constant 8 : index
    %c6_429 = arith.constant 6 : index
    %530 = memref.load %arg2[%c8_428, %c6_429] : memref<10x9xf32, #tpu.memory_space<smem>>
    %c6_430 = arith.constant 6 : index
    %c0_431 = arith.constant 0 : index
    %c0_432 = arith.constant 0 : index
    %531 = vector.load %arg1[%c6_430, %c0_431, %c0_432] : memref<9x8x676xf32, #tpu.memory_space<vmem>>, vector<1x8x676xf32>
    %532 = vector.shape_cast %531 : vector<1x8x676xf32> to vector<8x676xf32>
    %533 = vector.broadcast %530 : f32 to vector<8x676xf32>
    %534 = arith.mulf %533, %532 : vector<8x676xf32>
    %535 = arith.addf %529, %534 : vector<8x676xf32>
    %c8_433 = arith.constant 8 : index
    %c7_434 = arith.constant 7 : index
    %536 = memref.load %arg2[%c8_433, %c7_434] : memref<10x9xf32, #tpu.memory_space<smem>>
    %c7_435 = arith.constant 7 : index
    %c0_436 = arith.constant 0 : index
    %c0_437 = arith.constant 0 : index
    %537 = vector.load %arg1[%c7_435, %c0_436, %c0_437] : memref<9x8x676xf32, #tpu.memory_space<vmem>>, vector<1x8x676xf32>
    %538 = vector.shape_cast %537 : vector<1x8x676xf32> to vector<8x676xf32>
    %539 = vector.broadcast %536 : f32 to vector<8x676xf32>
    %540 = arith.mulf %539, %538 : vector<8x676xf32>
    %541 = arith.addf %535, %540 : vector<8x676xf32>
    %c8_438 = arith.constant 8 : index
    %c8_439 = arith.constant 8 : index
    %542 = memref.load %arg2[%c8_438, %c8_439] : memref<10x9xf32, #tpu.memory_space<smem>>
    %c8_440 = arith.constant 8 : index
    %c0_441 = arith.constant 0 : index
    %c0_442 = arith.constant 0 : index
    %543 = vector.load %arg1[%c8_440, %c0_441, %c0_442] : memref<9x8x676xf32, #tpu.memory_space<vmem>>, vector<1x8x676xf32>
    %544 = vector.shape_cast %543 : vector<1x8x676xf32> to vector<8x676xf32>
    %545 = vector.broadcast %542 : f32 to vector<8x676xf32>
    %546 = arith.mulf %545, %544 : vector<8x676xf32>
    %547 = arith.addf %541, %546 : vector<8x676xf32>
    %c8_443 = arith.constant 8 : index
    %548 = memref.load %arg3[%c8_443] : memref<10xf32, #tpu.memory_space<smem>>
    %549 = vector.broadcast %548 : f32 to vector<8x676xf32>
    %550 = arith.addf %547, %549 : vector<8x676xf32>
    %cst_444 = arith.constant 0.000000e+00 : f32
    %551 = vector.broadcast %cst_444 : f32 to vector<8x676xf32>
    %552 = arith.maximumf %550, %551 : vector<8x676xf32>
    %c8_445 = arith.constant 8 : index
    %c0_446 = arith.constant 0 : index
    %c0_447 = arith.constant 0 : index
    %553 = vector.load %arg4[%c8_445, %c0_446, %c0_447] : memref<10x676x50xf32, #tpu.memory_space<vmem>>, vector<1x676x50xf32>
    %554 = vector.shape_cast %553 : vector<1x676x50xf32> to vector<676x50xf32>
    %cst_448 = arith.constant dense<0.000000e+00> : vector<8x50xf32>
    %555 = tpu.matmul %552, %554, %cst_448 {dimension_numbers = #tpu.dot_dimension_numbers<[1], [0], [0], [1], [0, 0, 1, 1], [], []>} : vector<8x676xf32>, vector<676x50xf32>, vector<8x50xf32> -> vector<8x50xf32>
    %556 = arith.addf %494, %555 : vector<8x50xf32>
    %c9 = arith.constant 9 : index
    %c0_449 = arith.constant 0 : index
    %557 = memref.load %arg2[%c9, %c0_449] : memref<10x9xf32, #tpu.memory_space<smem>>
    %c0_450 = arith.constant 0 : index
    %c0_451 = arith.constant 0 : index
    %c0_452 = arith.constant 0 : index
    %558 = vector.load %arg1[%c0_450, %c0_451, %c0_452] : memref<9x8x676xf32, #tpu.memory_space<vmem>>, vector<1x8x676xf32>
    %559 = vector.shape_cast %558 : vector<1x8x676xf32> to vector<8x676xf32>
    %560 = vector.broadcast %557 : f32 to vector<8x676xf32>
    %561 = arith.mulf %560, %559 : vector<8x676xf32>
    %c9_453 = arith.constant 9 : index
    %c1_454 = arith.constant 1 : index
    %562 = memref.load %arg2[%c9_453, %c1_454] : memref<10x9xf32, #tpu.memory_space<smem>>
    %c1_455 = arith.constant 1 : index
    %c0_456 = arith.constant 0 : index
    %c0_457 = arith.constant 0 : index
    %563 = vector.load %arg1[%c1_455, %c0_456, %c0_457] : memref<9x8x676xf32, #tpu.memory_space<vmem>>, vector<1x8x676xf32>
    %564 = vector.shape_cast %563 : vector<1x8x676xf32> to vector<8x676xf32>
    %565 = vector.broadcast %562 : f32 to vector<8x676xf32>
    %566 = arith.mulf %565, %564 : vector<8x676xf32>
    %567 = arith.addf %561, %566 : vector<8x676xf32>
    %c9_458 = arith.constant 9 : index
    %c2_459 = arith.constant 2 : index
    %568 = memref.load %arg2[%c9_458, %c2_459] : memref<10x9xf32, #tpu.memory_space<smem>>
    %c2_460 = arith.constant 2 : index
    %c0_461 = arith.constant 0 : index
    %c0_462 = arith.constant 0 : index
    %569 = vector.load %arg1[%c2_460, %c0_461, %c0_462] : memref<9x8x676xf32, #tpu.memory_space<vmem>>, vector<1x8x676xf32>
    %570 = vector.shape_cast %569 : vector<1x8x676xf32> to vector<8x676xf32>
    %571 = vector.broadcast %568 : f32 to vector<8x676xf32>
    %572 = arith.mulf %571, %570 : vector<8x676xf32>
    %573 = arith.addf %567, %572 : vector<8x676xf32>
    %c9_463 = arith.constant 9 : index
    %c3_464 = arith.constant 3 : index
    %574 = memref.load %arg2[%c9_463, %c3_464] : memref<10x9xf32, #tpu.memory_space<smem>>
    %c3_465 = arith.constant 3 : index
    %c0_466 = arith.constant 0 : index
    %c0_467 = arith.constant 0 : index
    %575 = vector.load %arg1[%c3_465, %c0_466, %c0_467] : memref<9x8x676xf32, #tpu.memory_space<vmem>>, vector<1x8x676xf32>
    %576 = vector.shape_cast %575 : vector<1x8x676xf32> to vector<8x676xf32>
    %577 = vector.broadcast %574 : f32 to vector<8x676xf32>
    %578 = arith.mulf %577, %576 : vector<8x676xf32>
    %579 = arith.addf %573, %578 : vector<8x676xf32>
    %c9_468 = arith.constant 9 : index
    %c4_469 = arith.constant 4 : index
    %580 = memref.load %arg2[%c9_468, %c4_469] : memref<10x9xf32, #tpu.memory_space<smem>>
    %c4_470 = arith.constant 4 : index
    %c0_471 = arith.constant 0 : index
    %c0_472 = arith.constant 0 : index
    %581 = vector.load %arg1[%c4_470, %c0_471, %c0_472] : memref<9x8x676xf32, #tpu.memory_space<vmem>>, vector<1x8x676xf32>
    %582 = vector.shape_cast %581 : vector<1x8x676xf32> to vector<8x676xf32>
    %583 = vector.broadcast %580 : f32 to vector<8x676xf32>
    %584 = arith.mulf %583, %582 : vector<8x676xf32>
    %585 = arith.addf %579, %584 : vector<8x676xf32>
    %c9_473 = arith.constant 9 : index
    %c5_474 = arith.constant 5 : index
    %586 = memref.load %arg2[%c9_473, %c5_474] : memref<10x9xf32, #tpu.memory_space<smem>>
    %c5_475 = arith.constant 5 : index
    %c0_476 = arith.constant 0 : index
    %c0_477 = arith.constant 0 : index
    %587 = vector.load %arg1[%c5_475, %c0_476, %c0_477] : memref<9x8x676xf32, #tpu.memory_space<vmem>>, vector<1x8x676xf32>
    %588 = vector.shape_cast %587 : vector<1x8x676xf32> to vector<8x676xf32>
    %589 = vector.broadcast %586 : f32 to vector<8x676xf32>
    %590 = arith.mulf %589, %588 : vector<8x676xf32>
    %591 = arith.addf %585, %590 : vector<8x676xf32>
    %c9_478 = arith.constant 9 : index
    %c6_479 = arith.constant 6 : index
    %592 = memref.load %arg2[%c9_478, %c6_479] : memref<10x9xf32, #tpu.memory_space<smem>>
    %c6_480 = arith.constant 6 : index
    %c0_481 = arith.constant 0 : index
    %c0_482 = arith.constant 0 : index
    %593 = vector.load %arg1[%c6_480, %c0_481, %c0_482] : memref<9x8x676xf32, #tpu.memory_space<vmem>>, vector<1x8x676xf32>
    %594 = vector.shape_cast %593 : vector<1x8x676xf32> to vector<8x676xf32>
    %595 = vector.broadcast %592 : f32 to vector<8x676xf32>
    %596 = arith.mulf %595, %594 : vector<8x676xf32>
    %597 = arith.addf %591, %596 : vector<8x676xf32>
    %c9_483 = arith.constant 9 : index
    %c7_484 = arith.constant 7 : index
    %598 = memref.load %arg2[%c9_483, %c7_484] : memref<10x9xf32, #tpu.memory_space<smem>>
    %c7_485 = arith.constant 7 : index
    %c0_486 = arith.constant 0 : index
    %c0_487 = arith.constant 0 : index
    %599 = vector.load %arg1[%c7_485, %c0_486, %c0_487] : memref<9x8x676xf32, #tpu.memory_space<vmem>>, vector<1x8x676xf32>
    %600 = vector.shape_cast %599 : vector<1x8x676xf32> to vector<8x676xf32>
    %601 = vector.broadcast %598 : f32 to vector<8x676xf32>
    %602 = arith.mulf %601, %600 : vector<8x676xf32>
    %603 = arith.addf %597, %602 : vector<8x676xf32>
    %c9_488 = arith.constant 9 : index
    %c8_489 = arith.constant 8 : index
    %604 = memref.load %arg2[%c9_488, %c8_489] : memref<10x9xf32, #tpu.memory_space<smem>>
    %c8_490 = arith.constant 8 : index
    %c0_491 = arith.constant 0 : index
    %c0_492 = arith.constant 0 : index
    %605 = vector.load %arg1[%c8_490, %c0_491, %c0_492] : memref<9x8x676xf32, #tpu.memory_space<vmem>>, vector<1x8x676xf32>
    %606 = vector.shape_cast %605 : vector<1x8x676xf32> to vector<8x676xf32>
    %607 = vector.broadcast %604 : f32 to vector<8x676xf32>
    %608 = arith.mulf %607, %606 : vector<8x676xf32>
    %609 = arith.addf %603, %608 : vector<8x676xf32>
    %c9_493 = arith.constant 9 : index
    %610 = memref.load %arg3[%c9_493] : memref<10xf32, #tpu.memory_space<smem>>
    %611 = vector.broadcast %610 : f32 to vector<8x676xf32>
    %612 = arith.addf %609, %611 : vector<8x676xf32>
    %cst_494 = arith.constant 0.000000e+00 : f32
    %613 = vector.broadcast %cst_494 : f32 to vector<8x676xf32>
    %614 = arith.maximumf %612, %613 : vector<8x676xf32>
    %c9_495 = arith.constant 9 : index
    %c0_496 = arith.constant 0 : index
    %c0_497 = arith.constant 0 : index
    %615 = vector.load %arg4[%c9_495, %c0_496, %c0_497] : memref<10x676x50xf32, #tpu.memory_space<vmem>>, vector<1x676x50xf32>
    %616 = vector.shape_cast %615 : vector<1x676x50xf32> to vector<676x50xf32>
    %cst_498 = arith.constant dense<0.000000e+00> : vector<8x50xf32>
    %617 = tpu.matmul %614, %616, %cst_498 {dimension_numbers = #tpu.dot_dimension_numbers<[1], [0], [0], [1], [0, 0, 1, 1], [], []>} : vector<8x676xf32>, vector<676x50xf32>, vector<8x50xf32> -> vector<8x50xf32>
    %618 = arith.addf %556, %617 : vector<8x50xf32>
    %c0_499 = arith.constant 0 : index
    %c0_500 = arith.constant 0 : index
    %619 = vector.load %arg5[%c0_499, %c0_500] : memref<1x50xf32, #tpu.memory_space<vmem>>, vector<1x50xf32>
    %620 = vector.broadcast %619 : vector<1x50xf32> to vector<8x50xf32>
    %621 = arith.addf %618, %620 : vector<8x50xf32>
    %cst_501 = arith.constant 0.000000e+00 : f32
    %622 = vector.broadcast %cst_501 : f32 to vector<8x50xf32>
    %623 = arith.maximumf %621, %622 : vector<8x50xf32>
    %c0_502 = arith.constant 0 : index
    %c0_503 = arith.constant 0 : index
    %624 = vector.load %arg6[%c0_502, %c0_503] : memref<50x20xf32, #tpu.memory_space<vmem>>, vector<50x20xf32>
    %cst_504 = arith.constant dense<0.000000e+00> : vector<8x20xf32>
    %625 = tpu.matmul %623, %624, %cst_504 {dimension_numbers = #tpu.dot_dimension_numbers<[1], [0], [0], [1], [0, 0, 1, 1], [], []>} : vector<8x50xf32>, vector<50x20xf32>, vector<8x20xf32> -> vector<8x20xf32>
    %c0_505 = arith.constant 0 : index
    %c0_506 = arith.constant 0 : index
    %626 = vector.load %arg7[%c0_505, %c0_506] : memref<1x20xf32, #tpu.memory_space<vmem>>, vector<1x20xf32>
    %627 = vector.broadcast %626 : vector<1x20xf32> to vector<8x20xf32>
    %628 = arith.addf %625, %627 : vector<8x20xf32>
    %cst_507 = arith.constant 0.000000e+00 : f32
    %629 = vector.broadcast %cst_507 : f32 to vector<8x20xf32>
    %630 = arith.maximumf %628, %629 : vector<8x20xf32>
    %c0_508 = arith.constant 0 : index
    %c0_509 = arith.constant 0 : index
    %631 = vector.load %arg8[%c0_508, %c0_509] : memref<20x10xf32, #tpu.memory_space<vmem>>, vector<20x10xf32>
    %cst_510 = arith.constant dense<0.000000e+00> : vector<8x10xf32>
    %632 = tpu.matmul %630, %631, %cst_510 {dimension_numbers = #tpu.dot_dimension_numbers<[1], [0], [0], [1], [0, 0, 1, 1], [], []>} : vector<8x20xf32>, vector<20x10xf32>, vector<8x10xf32> -> vector<8x10xf32>
    %c0_511 = arith.constant 0 : index
    %c0_512 = arith.constant 0 : index
    %633 = vector.load %arg9[%c0_511, %c0_512] : memref<1x10xf32, #tpu.memory_space<vmem>>, vector<1x10xf32>
    %634 = vector.broadcast %633 : vector<1x10xf32> to vector<8x10xf32>
    %635 = arith.addf %632, %634 : vector<8x10xf32>
    %c0_513 = arith.constant 0 : index
    %c0_514 = arith.constant 0 : index
    %636 = vector.load %arg10[%c0_513, %c0_514] : memref<8x10xf32, #tpu.memory_space<vmem>>, vector<8x10xf32>
    tpu.vector_store %arg10[%c0_513, %c0_514], %635 {strides = array<i32>} : memref<8x10xf32, #tpu.memory_space<vmem>>, vector<8x10xf32>,
    return
  }
  func.func @transform_0(%arg0: i32) -> (i32, i32, i32) {
    %c0_i32 = arith.constant 0 : i32
    %c0_i32_0 = arith.constant 0 : i32
    %c0_i32_1 = arith.constant 0 : i32
    return %c0_i32, %arg0, %c0_i32_0 : i32, i32, i32
  }
  func.func @transform_1(%arg0: i32) -> (i32, i32) {
    %c0_i32 = arith.constant 0 : i32
    %c0_i32_0 = arith.constant 0 : i32
    %c0_i32_1 = arith.constant 0 : i32
    return %c0_i32, %c0_i32_0 : i32, i32
  }
  func.func @transform_2(%arg0: i32) -> i32 {
    %c0_i32 = arith.constant 0 : i32
    %c0_i32_0 = arith.constant 0 : i32
    return %c0_i32 : i32
  }
  func.func @transform_3(%arg0: i32) -> (i32, i32, i32) {
    %c0_i32 = arith.constant 0 : i32
    %c0_i32_0 = arith.constant 0 : i32
    %c0_i32_1 = arith.constant 0 : i32
    %c0_i32_2 = arith.constant 0 : i32
    return %c0_i32, %c0_i32_0, %c0_i32_1 : i32, i32, i32
  }
  func.func @transform_4(%arg0: i32) -> (i32, i32) {
    %c0_i32 = arith.constant 0 : i32
    %c0_i32_0 = arith.constant 0 : i32
    %c0_i32_1 = arith.constant 0 : i32
    return %c0_i32, %c0_i32_0 : i32, i32
  }
  func.func @transform_5(%arg0: i32) -> (i32, i32) {
    %c0_i32 = arith.constant 0 : i32
    %c0_i32_0 = arith.constant 0 : i32
    %c0_i32_1 = arith.constant 0 : i32
    return %c0_i32, %c0_i32_0 : i32, i32
  }
  func.func @transform_6(%arg0: i32) -> (i32, i32) {
    %c0_i32 = arith.constant 0 : i32
    %c0_i32_0 = arith.constant 0 : i32
    %c0_i32_1 = arith.constant 0 : i32
    return %c0_i32, %c0_i32_0 : i32, i32
  }
  func.func @transform_7(%arg0: i32) -> (i32, i32) {
    %c0_i32 = arith.constant 0 : i32
    %c0_i32_0 = arith.constant 0 : i32
    %c0_i32_1 = arith.constant 0 : i32
    return %c0_i32, %c0_i32_0 : i32, i32
  }
  func.func @transform_8(%arg0: i32) -> (i32, i32) {
    %c0_i32 = arith.constant 0 : i32
    %c0_i32_0 = arith.constant 0 : i32
    %c0_i32_1 = arith.constant 0 : i32
    return %c0_i32, %c0_i32_0 : i32, i32
  }
  func.func @transform_9(%arg0: i32) -> (i32, i32) {
    %c0_i32 = arith.constant 0 : i32
    %c0_i32_0 = arith.constant 0 : i32
    return %arg0, %c0_i32 : i32, i32
  }
}

</mosaic_0001>

<bundles_post_ra>
// kernel: simple_convnet_forward.1
= control target key start
LH: loop header
LB: loop body
LE: loop exit
PB: predicated region body
PF: predicated region fallthrough
CT: control target
= control target key end

     0   :  { %14 = vsyncpa [#allocation3], 0  ;;  %s13990_s0 = inlined_call_operand.vmem [shape: f32[9,8,676], index: 0, kind: input, shape index: {}]   ;;  %s13991_s1 = inlined_call_operand.vmem [shape: f32[10,9], index: 1, kind: input, shape index: {}]   ;;  %s13992_s2 = inlined_call_operand.vmem [shape: f32[10], index: 2, kind: input, shape index: {}]   ;;  %s13993_s3 = inlined_call_operand.vmem [shape: f32[10,676,50], index: 3, kind: input, shape index: {}]   ;;  %s13994_s4 = inlined_call_operand.vmem [shape: f32[1,50], index: 4, kind: input, shape index: {}]   ;;  %s13995_s5 = inlined_call_operand.vmem [shape: f32[50,20], index: 5, kind: input, shape index: {}]   ;;  %s13996_s6 = inlined_call_operand.vmem [shape: f32[1,20], index: 6, kind: input, shape index: {}]   ;;  %s13997_s7 = inlined_call_operand.vmem [shape: f32[20,10], index: 7, kind: input, shape index: {}]   ;;  %s13998_s8 = inlined_call_operand.vmem [shape: f32[1,10], index: 8, kind: input, shape index: {}]   ;;  %s13999_s9 = inlined_call_operand.vmem [shape: f32[8,10], index: 9, kind: output, shape index: {}]  }
   0x1   :  { %s23_s11 = sshll.u32 %s13991_s1, 4  ;;  %s24_s11 = int_to_ptr.vmem [resolvable:$true] %s23_s11 }
   0x2   :  { %15 = vsyncpa [#allocation5], 0  ;;  %s36_s14 = sshll.u32 %s13992_s2, 4  ;;  %s7538_s15 = scalar_lea.vmem %s24_s11, 256  ;;  %s37_s14 = int_to_ptr.vmem [resolvable:$true] %s36_s14 }
   0x3   :  { %p7539_p0 = scmp.ne.s32.totalorder %s24_s11, %s7538_s15  ;;  %p7543_p1 = scmp.lt.s32.totalorder %s24_s11, %s24_s11 }
   0x4   :  { %p7544_p2 = scmp.lt.s32.totalorder %s7538_s15, %s7538_s15 }
   0x6   :  { %p7545_p3 = por %p7544_p2, %p7543_p1 }
   0x8   :  { %p7546_p4 = pnand %p7545_p3, %p7539_p0 }
   0xa   :  { %7549 = shalt.err (!%p7546_p4)
}
   0xb   :  { %s7566_s16 = smov [#allocation2]   ;;  %s7567_s17 = smov 128  }
   0xc   :  { %s7568_s18 = smov 8   ;;  %s7550_s19 = scalar_lea.vmem %s37_s14, 16 }
   0xd   :  { %29 = dma.vmem_to_smem %s24_s11, 256, %s7566_s16, [#allocation3], %s7567_s17, %s7567_s17, %s7568_s18  }
   0xe   :  { %p7551_p5 = scmp.ne.s32.totalorder %s37_s14, %s7550_s19  ;;  %p7555_p6 = scmp.lt.s32.totalorder %s37_s14, %s37_s14 }
   0xf   :  { %p7556_p7 = scmp.lt.s32.totalorder %s7550_s19, %s7550_s19 }
  0x11   :  { %p7557_p8 = por %p7556_p7, %p7555_p6 }
  0x13   :  { %p7558_p9 = pnand %p7557_p8, %p7551_p5 }
  0x15   :  { %7561 = shalt.err (!%p7558_p9)
}
  0x16   :  { %s7569_s1 = smov [#allocation4]  }
  0x17   :  { %39 = dma.vmem_to_smem %s37_s14, 16, %s7569_s1, [#allocation5]  }
  0x18   :  { %7562 = dma.done.wait [#allocation3], 256  }
  0x19   :  { %7563 = vsyncadd [#allocation3], 4294967040 }
  0x1a   :  { %7564 = dma.done.wait [#allocation5], 16  }
  0x1b   :  { %7565 = vsyncadd [#allocation5], 4294967280 }
  0x1c   :  { %58 = sfence }
  0x1d   :  { %v4769_v0 = vld [vmem:[%s13993_s3 + $0x328] sm:$0xff]  ;;  %v4770_v1 = vld [vmem:[%s13993_s3 + $0x330] sm:$0xff]  ;;  %v4771_v11 = vld [vmem:[%s13993_s3 + $0x338] sm:$0xff]  ;;  %s7692_s17 = sld [smem:[#allocation2 + $0x80]]  ;;  %s7703_s22 = sld [smem:[#allocation2 + $0x81]]  ;;  %vm560_vm0 = vcmask 293888  }
  0x1e   :  { %v4801_v2 = vld [vmem:[%s13993_s3 + $0x428] sm:$0xff]  ;;  %v6363_v3 = vpack.c.bf16 %v4770_v1, %v4769_v0  ;;  %v4802_v4 = vld [vmem:[%s13993_s3 + $0x430] sm:$0xff]  ;;  %v4772_v13 = vld [vmem:[%s13993_s3 + $0x340] sm:$0xff]  ;;  %s7714_s29 = sld [smem:[#allocation2 + $0x82]]  ;;  %s7725_s15 = sld [smem:[#allocation2 + $0x83]]  ;;  %vm564_vm1 = vcmask 1043456  }
  0x1f   :  { %v4753_v5 = vld [vmem:[%s13993_s3 + $0x2a8] sm:$0xff]  ;;  %v4754_v6 = vld [vmem:[%s13993_s3 + $0x2b0] sm:$0xff]  ;;  %v6395_v7 = vpack.c.bf16 %v4802_v4, %v4801_v2  ;;  %v4803_v14 = vld [vmem:[%s13993_s3 + $0x438] sm:$0xff]  ;;  %v6367_v16 = vpack.c.bf16 %v4772_v13, %v4771_v11  ;;  %s7736_s21 = sld [smem:[#allocation2 + $0x84]]  ;;  %s7747_s30 = sld [smem:[#allocation2 + $0x85]]  ;;  %vm4517_vm2 = vcmask 1041408  }
  0x20   :  { %v6365_v8 = vpack.c.bf16 %v4754_v6, %v4753_v5  ;;  %v4785_v9 = vld [vmem:[%s13993_s3 + $0x3a8] sm:$0xff]  ;;  %v4786_v10 = vld [vmem:[%s13993_s3 + $0x3b0] sm:$0xff]  ;;  %6364 = vmatprep.subr.bf16.mxu0 %v6363_v3  ;;  %v4804_v15 = vld [vmem:[%s13993_s3 + $0x440] sm:$0xff]  ;;  %s7749_s10 = sld [smem:[#allocation2 + $0x86]]  ;;  %s7760_s19 = sld [smem:[#allocation2 + $0x87]]  ;;  %vm7572_vm3 = vmmov 0  }
  0x21   :  { %v6397_v12 = vpack.c.bf16 %v4786_v10, %v4785_v9  ;;  %6396 = vmatprep.subr.bf16.mxu1 %v6395_v7  ;;  %v6399_v17 = vpack.c.bf16 %v4804_v15, %v4803_v14  ;;  %v4755_v18 = vld [vmem:[%s13993_s3 + $0x2b8] sm:$0xff]  ;;  %v4756_v19 = vld [vmem:[%s13993_s3 + $0x2c0] sm:$0xff]  ;;  %v4773_v23 = vld [vmem:[%s13993_s3 + $0x348] sm:$0xff]  ;;  %s7774_s26 = sld [smem:[#allocation2 + $0x88]]  ;;  %s8087_s27 = sld [smem:[#allocation2 + $0x2]]  ;;  %vm4513_vm4 = vcmask 408576  }
  0x22   :  { %6366 = vmatpush3.bf16.msra.mxu0 %v6365_v8  ;;  %v4787_v20 = vld [vmem:[%s13993_s3 + $0x3b8] sm:$0xff]  ;;  %v6369_v21 = vpack.c.bf16 %v4756_v19, %v4755_v18  ;;  %v4788_v22 = vld [vmem:[%s13993_s3 + $0x3c0] sm:$0xff]  ;;  %v4774_v24 = vld [vmem:[%s13993_s3 + $0x350] sm:$0xff]  ;;  %s7788_s16 = sld [smem:[#allocation2]]  ;;  %s8120_s1 = sld [smem:[#allocation2 + $0x3]]  ;;  %vm4602_vm5 = vcmask 162816  }
  0x23   :  { %6398 = vmatpush3.bf16.msra.mxu1 %v6397_v12  ;;  %6368 = vmatprep.subr.bf16.mxu0 %v6367_v16  ;;  %v6401_v25 = vpack.c.bf16 %v4788_v22, %v4787_v20  ;;  %v6371_v26 = vpack.c.bf16 %v4774_v24, %v4773_v23  ;;  %v4805_v27 = vld [vmem:[%s13993_s3 + $0x448] sm:$0xff]  ;;  %v4806_v28 = vld [vmem:[%s13993_s3 + $0x450] sm:$0xff]  ;;  %v4775_v35 = vld [vmem:[%s13993_s3 + $0x358] sm:$0xff]  ;;  %v7772_v60 = vstv %s7692_s17  ;;  %s8168_s11 = sld [smem:[#allocation2 + $0x6]]  ;;  %s8608_s28 = sld [smem:[#allocation2 + $0x100]]  ;;  %vm4679_vm6 = vcmask 80896  }
  0x24   :  { %6400 = vmatprep.subr.bf16.mxu1 %v6399_v17  ;;  %v4757_v29 = vld [vmem:[%s13993_s3 + $0x2c8] sm:$0xff]  ;;  %v6403_v30 = vpack.c.bf16 %v4806_v28, %v4805_v27  ;;  %v4758_v31 = vld [vmem:[%s13993_s3 + $0x2d0] sm:$0xff]  ;;  %v4776_v36 = vld [vmem:[%s13993_s3 + $0x360] sm:$0xff]  ;;  %v7786_v0 = vstv %s7703_s22  ;;  %s8146_s22 = sld [smem:[#allocation2 + $0x4]]  ;;  %s8623_s14 = sld [smem:[#allocation2 + $0x101]] }
  0x25   :  { %v4789_v32 = vld [vmem:[%s13993_s3 + $0x3c8] sm:$0xff]  ;;  %v4790_v33 = vld [vmem:[%s13993_s3 + $0x3d0] sm:$0xff]  ;;  %v6373_v34 = vpack.c.bf16 %v4758_v31, %v4757_v29  ;;  %v4807_v37 = vld [vmem:[%s13993_s3 + $0x458] sm:$0xff]  ;;  %v6375_v39 = vpack.c.bf16 %v4776_v36, %v4775_v35  ;;  %v7800_v5 = vstv %s7714_s29  ;;  %s7814_s29 = sld [smem:[#allocation4 + $0x1]]  ;;  %s8625_s17 = sld [smem:[#allocation2 + $0x102]] }
  0x26   :  { %6370 = vmatpush3.bf16.msra.mxu0 %v6369_v21  ;;  %v6405_v38 = vpack.c.bf16 %v4790_v33, %v4789_v32  ;;  %v4808_v40 = vld [vmem:[%s13993_s3 + $0x460] sm:$0xff]  ;;  %v4759_v41 = vld [vmem:[%s13993_s3 + $0x2d8] sm:$0xff]  ;;  %v4777_v46 = vld [vmem:[%s13993_s3 + $0x368] sm:$0xff]  ;;  %v7812_v11 = vstv %s7725_s15  ;;  %s8668_s13 = sld [smem:[#allocation2 + $0x104]]  ;;  %s8761_s20 = sld [smem:[#allocation2 + $0x106]] }
  0x27   :  { %6402 = vmatpush3.bf16.msra.mxu1 %v6401_v25  ;;  %6372 = vmatprep.subr.bf16.mxu0 %v6371_v26  ;;  %v4760_v42 = vld [vmem:[%s13993_s3 + $0x2e0] sm:$0xff]  ;;  %v6407_v43 = vpack.c.bf16 %v4808_v40, %v4807_v37  ;;  %v4791_v44 = vld [vmem:[%s13993_s3 + $0x3d8] sm:$0xff]  ;;  %v4778_v47 = vld [vmem:[%s13993_s3 + $0x370] sm:$0xff]  ;;  %v7830_v16 = vstv %s7736_s21  ;;  %s8153_s21 = sld [smem:[#allocation2 + $0x5]]  ;;  %s8816_s18 = sld [smem:[#allocation2 + $0x108]] }
  0x28   :  { %6404 = vmatprep.subr.bf16.mxu1 %v6403_v30  ;;  %v4792_v45 = vld [vmem:[%s13993_s3 + $0x3e0] sm:$0xff]  ;;  %v4809_v48 = vld [vmem:[%s13993_s3 + $0x468] sm:$0xff]  ;;  %v4810_v49 = vld [vmem:[%s13993_s3 + $0x470] sm:$0xff]  ;;  %v6377_v50 = vpack.c.bf16 %v4760_v42, %v4759_v41  ;;  %v6379_v52 = vpack.c.bf16 %v4778_v47, %v4777_v46  ;;  %v7848_v20 = vstv %s7747_s30  ;;  %s8183_s30 = sld [smem:[#allocation2 + $0x7]]  ;;  %s8956_s24 = sld [smem:[#allocation2 + $0x180]] }
  0x29   :  { %v6409_v51 = vpack.c.bf16 %v4792_v45, %v4791_v44  ;;  %v4761_v53 = vld [vmem:[%s13993_s3 + $0x2e8] sm:$0xff]  ;;  %v4762_v54 = vld [vmem:[%s13993_s3 + $0x2f0] sm:$0xff]  ;;  %v6411_v56 = vpack.c.bf16 %v4810_v49, %v4809_v48  ;;  %v4779_v58 = vld [vmem:[%s13993_s3 + $0x378] sm:$0xff]  ;;  %v7866_v25 = vstv %s7749_s10  ;;  %s7884_s10 = sld [smem:[#allocation2 + $0x1]]  ;;  %s9278_s25 = sld [smem:[#allocation2 + $0x186]] }
  0x2a   :  { %6374 = vmatpush3.bf16.msra.mxu0 %v6373_v34  ;;  %v4793_v55 = vld [vmem:[%s13993_s3 + $0x3e8] sm:$0xff]  ;;  %v4794_v57 = vld [vmem:[%s13993_s3 + $0x3f0] sm:$0xff]  ;;  %v4780_v59 = vld [vmem:[%s13993_s3 + $0x380] sm:$0xff]  ;;  %v6381_v1 = vpack.c.bf16 %v4762_v54, %v4761_v53  ;;  %v7882_v31 = vstv %s7760_s19  ;;  %s9431_s12 = sld [smem:[#allocation2 + $0x188]]  ;;  %s9931_s15 = sld [smem:[#allocation2 + $0x205]] }
  0x2b   :  { %6406 = vmatpush3.bf16.msra.mxu1 %v6405_v38  ;;  %6376 = vmatprep.subr.bf16.mxu0 %v6375_v39  ;;  %v4811_v61 = vld [vmem:[%s13993_s3 + $0x478] sm:$0xff]  ;;  %v4812_v62 = vld [vmem:[%s13993_s3 + $0x480] sm:$0xff]  ;;  %v6413_v6 = vpack.c.bf16 %v4794_v57, %v4793_v55  ;;  %v6383_v7 = vpack.c.bf16 %v4780_v59, %v4779_v58  ;;  %v4781_v8 = vld [vmem:[%s13993_s3 + $0x388] sm:$0xff]  ;;  %v7905_v38 = vstv %s7774_s26  ;;  %s10544_s2 = sld [smem:[#allocation2 + $0x286]]  ;;  %s10617_s26 = sld [smem:[#allocation2 + $0x288]] }
  0x2c   :  { %6408 = vmatprep.subr.bf16.mxu1 %v6407_v43  ;;  %v4763_v63 = vld [vmem:[%s13993_s3 + $0x2f8] sm:$0xff]  ;;  %v4764_v2 = vld [vmem:[%s13993_s3 + $0x300] sm:$0xff]  ;;  %v4782_v9 = vld [vmem:[%s13993_s3 + $0x390] sm:$0xff]  ;;  %v6415_v12 = vpack.c.bf16 %v4812_v62, %v4811_v61  ;;  %v7929_v45 = vstv %s7788_s16  ;;  %s9217_s16 = sld [smem:[#allocation2 + $0x185]]  ;;  %s12935_s23 = sld [smem:[#allocation2 + $0x484]] }
  0x2d   :  { %v4795_v3 = vld [vmem:[%s13993_s3 + $0x3f8] sm:$0xff]  ;;  %v4796_v4 = vld [vmem:[%s13993_s3 + $0x400] sm:$0xff]  ;;  %v4813_v10 = vld [vmem:[%s13993_s3 + $0x488] sm:$0xff]  ;;  %v6385_v21 = vpack.c.bf16 %v4764_v2, %v4763_v63  ;;  %v6387_v27 = vpack.c.bf16 %v4782_v9, %v4781_v8  ;;  %v7960_v55 = vstv %s7814_s29  ;;  %s8636_s29 = sld [smem:[#allocation2 + $0x103]]  ;;  %s13029_s19 = sld [smem:[#allocation2 + $0x487]] }
  0x2e   :  { %6378 = vmatpush3.bf16.msra.mxu0 %v6377_v50  ;;  %v4814_v13 = vld [vmem:[%s13993_s3 + $0x490] sm:$0xff]  ;;  %v7822_v14 = vld [vmem:[%s13993_s3 + $0x308] sm:$0xff]  ;;  %v7845_v19 = vld [vmem:[%s13993_s3 + $0x398] sm:$0xff]  ;;  %v6417_v26 = vpack.c.bf16 %v4796_v4, %v4795_v3 }
  0x2f   :  { %6410 = vmatpush3.bf16.msra.mxu1 %v6409_v51  ;;  %6380 = vmatprep.subr.bf16.mxu0 %v6379_v52  ;;  %v7827_v15 = vld [vmem:[%s13993_s3 + $0x310] sm:$0xff]  ;;  %v7835_v17 = vld [vmem:[%s13993_s3 + $0x408] sm:$0xff]  ;;  %v7853_v22 = vld [vmem:[%s13993_s3 + $0x3a0] sm:$0xff]  ;;  %v6419_v32 = vpack.c.bf16 %v4814_v13, %v4813_v10 }
  0x30   :  { %6412 = vmatprep.subr.bf16.mxu1 %v6411_v56  ;;  %v7840_v18 = vld [vmem:[%s13993_s3 + $0x410] sm:$0xff]  ;;  %v7858_v23 = vld [vmem:[%s13993_s3 + $0x498] sm:$0xff]  ;;  %v7863_v24 = vld [vmem:[%s13993_s3 + $0x4a0] sm:$0xff]  ;;  %v6389_v39 = vpack.c.bf16 %v7827_v15, %v7822_v14  ;;  %v6391_v46 = vpack.c.bf16 %v7853_v22, %v7845_v19 }
  0x31   :  { %v7871_v28 = vld [vmem:[%s13993_s3 + $0x318] sm:$0xff]  ;;  %v61_v29 = vld [vmem:[%s13990_s0 + $0x8] sm:$0xff]  ;;  %v7889_v33 = vld [vmem:[%s13993_s3 + $0x320] sm:$0xff]  ;;  %v6421_v40 = vpack.c.bf16 %v7840_v18, %v7835_v17  ;;  %v6423_v47 = vpack.c.bf16 %v7863_v24, %v7858_v23 }
  0x32   :  { %6382 = vmatpush3.bf16.msra.mxu0 %v6381_v1  ;;  %v7879_v30 = vld [vmem:[%s13990_s0 + $0x38] sm:$0xff]  ;;  %v7894_v34 = vld [vmem:[%s13990_s0 + $0x68] sm:$0xff]  ;;  %v343_v36 = vmul.f32 %v7772_v60, %v61_v29  ;;  %v7919_v42 = vld [vmem:[%s13993_s3 + $0x420] sm:$0xff]  ;;  %v6393_v53 = vpack.c.bf16 %v7889_v33, %v7871_v28  ;;  %v8017_v13 = vmul.f32 %v7929_v45, %v61_v29  ;;  %v8050_v28 = vstv %s7884_s10  ;;  %s10278_s10 = sld [smem:[#allocation2 + $0x281]] }
  0x33   :  { %6414 = vmatpush3.bf16.msra.mxu1 %v6413_v6  ;;  %6384 = vmatprep.subr.bf16.mxu0 %v6383_v7  ;;  %v7899_v35 = vld [vmem:[%s13990_s0 + $0x98] sm:$0xff]  ;;  %v351_v37 = vmul.f32 %v7879_v30, %v7786_v0  ;;  %v7924_v43 = vld [vmem:[%s13990_s0 + $0xc8] sm:$0xff]  ;;  %v365_v44 = vmul.f32 %v7894_v34, %v7800_v5  ;;  %v8009_v10 = vld [vmem:[%s13990_s0] sm:$0xff] }
  0x34   :  { %6416 = vmatprep.subr.bf16.mxu1 %v6415_v12  ;;  %v7914_v41 = vld [vmem:[%s13993_s3 + $0x418] sm:$0xff]  ;;  %v379_v50 = vmul.f32 %v7899_v35, %v7812_v11  ;;  %v7950_v52 = vld [vmem:[%s13990_s0 + $0x48] sm:$0xff]  ;;  %v393_v2 = vmul.f32 %v7924_v43, %v7830_v16  ;;  %14114 = vst [vmem:[#allocation9_spill] sm:$0xff] %v8009_v10  ;;  %v8014_v12 = vld [vmem:[%s13990_s0 + $0x30] sm:$0xff] }
  0x35   :  { %v7938_v48 = vld [vmem:[%s13990_s0 + $0xf8] sm:$0xff]  ;;  %v357_v49 = vadd.f32 %v351_v37, %v343_v36  ;;  %v7957_v54 = vld [vmem:[%s13990_s0 + $0x128] sm:$0xff]  ;;  %v353_v59 = vmul.f32 %v7950_v52, %v7786_v0  ;;  %v6425_v61 = vpack.c.bf16 %v7919_v42, %v7914_v41  ;;  %14115 = vst [vmem:[#allocation10_spill] sm:$0xff] %v8014_v12  ;;  %v8024_v17 = vld [vmem:[%s13990_s0 + $0x60] sm:$0xff]  ;;  %v350_v22 = vmul.f32 %v8014_v12, %v7786_v0 }
  0x36   :  { %6386 = vmatpush3.bf16.msra.mxu0 %v6385_v21  ;;  %v7945_v51 = vld [vmem:[%s13990_s0 + $0x18] sm:$0xff]  ;;  %v7970_v57 = vld [vmem:[%s13990_s0 + $0xa8] sm:$0xff]  ;;  %v407_v6 = vmul.f32 %v7938_v48, %v7848_v20  ;;  %v421_v15 = vmul.f32 %v7957_v54, %v7866_v25  ;;  %v8029_v18 = vld [vmem:[%s13990_s0 + $0x90] sm:$0xff]  ;;  %v342_v21 = vmul.f32 %v7772_v60, %v8009_v10 }
  0x37   :  { %6418 = vmatpush3.bf16.msra.mxu1 %v6417_v26  ;;  %6388 = vmatprep.subr.bf16.mxu0 %v6387_v27  ;;  %v7965_v56 = vld [vmem:[%s13990_s0 + $0x78] sm:$0xff]  ;;  %v345_v58 = vmul.f32 %v7772_v60, %v7945_v51  ;;  %v7986_v63 = vld [vmem:[%s13990_s0 + $0x188] sm:$0xff]  ;;  %v371_v1 = vadd.f32 %v365_v44, %v357_v49  ;;  %v381_v9 = vmul.f32 %v7970_v57, %v7812_v11  ;;  %v8034_v19 = vld [vmem:[%s13990_s0 + $0xc0] sm:$0xff] }
  0x38   :  { %6420 = vmatprep.subr.bf16.mxu1 %v6419_v32  ;;  %v7981_v62 = vld [vmem:[%s13990_s0 + $0x158] sm:$0xff]  ;;  %v367_v4 = vmul.f32 %v7965_v56, %v7800_v5  ;;  %v8002_v7 = vld [vmem:[%s13990_s0 + $0x108] sm:$0xff]  ;;  %v364_v27 = vmul.f32 %v8024_v17, %v7800_v5  ;;  %v8057_v33 = vld [vmem:[%s13990_s0 + $0xf0] sm:$0xff]  ;;  %v356_v36 = vadd.f32 %v350_v22, %v342_v21  ;;  %v378_v37 = vmul.f32 %v8029_v18, %v7812_v11 }
  0x39   :  { %v7993_v3 = vld [vmem:[%s13990_s0 + $0xd8] sm:$0xff]  ;;  %14113 = vst [vmem:[#allocation8_spill] sm:$0xff] %v8002_v7  ;;  %v359_v8 = vadd.f32 %v353_v59, %v345_v58  ;;  %v385_v14 = vadd.f32 %v379_v50, %v371_v1  ;;  %v435_v32 = vmul.f32 %v7981_v62, %v7882_v31  ;;  %v449_v41 = vmul.f32 %v7986_v63, %v7905_v38  ;;  %v8085_v49 = vld [vmem:[%s13990_s0 + $0xa0] sm:$0xff]  ;;  %v8092_v58 = vld [vmem:[%s13990_s0 + $0x168] sm:$0xff] }
  0x3a   :  { %6390 = vmatpush3.bf16.msra.mxu0 %v6389_v39  ;;  %v8043_v23 = vld [vmem:[%s13990_s0 + $0x138] sm:$0xff]  ;;  %v395_v26 = vmul.f32 %v7993_v3, %v7830_v16  ;;  %v8064_v39 = vld [vmem:[%s13990_s0 + $0x10] sm:$0xff]  ;;  %v409_v44 = vmul.f32 %v8002_v7, %v7848_v20  ;;  %14117 = vst [vmem:[#allocation12_spill] sm:$0xff] %v8092_v58  ;;  %v8097_v59 = vld [vmem:[%s13990_s0 + $0x120] sm:$0xff]  ;;  %v370_v1 = vadd.f32 %v364_v27, %v356_v36 }
  0x3b   :  { %6422 = vmatpush3.bf16.msra.mxu1 %v6421_v40  ;;  %6392 = vmatprep.subr.bf16.mxu0 %v6391_v46  ;;  %14116 = vst [vmem:[#allocation11_spill] sm:$0xff] %v8043_v23  ;;  %v373_v24 = vadd.f32 %v367_v4, %v359_v8  ;;  %v399_v29 = vadd.f32 %v393_v2, %v385_v14  ;;  %v8069_v40 = vld [vmem:[%s13990_s0 + $0x40] sm:$0xff]  ;;  %v8102_v2 = vld [vmem:[%s13990_s0 + $0xd0] sm:$0xff]  ;;  %v272_v22 = vld [vmem:[%s13993_s3 + $0x88] sm:$0xff] }
  0x3c   :  { %6424 = vmatprep.subr.bf16.mxu1 %v6423_v47  ;;  %v392_v46 = vmul.f32 %v8034_v19, %v7830_v16  ;;  %v8080_v47 = vld [vmem:[%s13990_s0 + $0x70] sm:$0xff]  ;;  %14118 = vst [vmem:[#allocation13_spill] sm:$0xff] %v8102_v2  ;;  %v352_v4 = vmul.f32 %v8069_v40, %v7786_v0  ;;  %v423_v8 = vmul.f32 %v8043_v23, %v7866_v25  ;;  %v271_v21 = vld [vmem:[%s13993_s3 + $0x80] sm:$0xff] }
  0x3d   :  { %v387_v42 = vadd.f32 %v381_v9, %v373_v24  ;;  %v413_v50 = vadd.f32 %v407_v6, %v399_v29  ;;  %v406_v9 = vmul.f32 %v8057_v33, %v7848_v20  ;;  %v366_v14 = vmul.f32 %v8080_v47, %v7800_v5  ;;  %v8125_v24 = vld [vmem:[%s13990_s0 + $0x198] sm:$0xff]  ;;  %v8142_v7 = vld [vmem:[%s13990_s0 + $0x100] sm:$0xff] }
  0x3e   :  { %6394 = vmatpush3.bf16.msra.mxu0 %v6393_v53  ;;  %v344_v53 = vmul.f32 %v7772_v60, %v8064_v39  ;;  %v384_v27 = vadd.f32 %v378_v37, %v370_v1  ;;  %v380_v36 = vmul.f32 %v8085_v49, %v7812_v11  ;;  %14119 = vst [vmem:[#allocation14_spill] sm:$0xff] %v8142_v7 }
  0x3f   :  { %6426 = vmatpush3.bf16.msra.mxu1 %v6425_v61  ;;  %v401_v6 = vadd.f32 %v395_v26, %v387_v42  ;;  %v427_v61 = vadd.f32 %v421_v15, %v413_v50  ;;  %v8130_v26 = vld [vmem:[%s13990_s0 + $0x150] sm:$0xff]  ;;  %v14002_v42 = vmov 0.0|0.0   ;;  %v437_v15 = vmul.f32 %v8092_v58, %v7882_v31 }
  0x40   :  { %v358_v29 = vadd.f32 %v352_v4, %v344_v53  ;;  %6427 = vmatprep.subr.bf16.mxu0 %v14002_v42  ;;  %v420_v50 = vmul.f32 %v8097_v59, %v7866_v25  ;;  %v394_v37 = vmul.f32 %v8102_v2, %v7830_v16  ;;  %v398_v53 = vadd.f32 %v392_v46, %v384_v27  ;;  %v8175_v27 = vld [vmem:[%s13990_s0 + $0x160] sm:$0xff] }
  0x41   :  { %v415_v23 = vadd.f32 %v409_v44, %v401_v6  ;;  %v441_v1 = vadd.f32 %v435_v32, %v427_v61  ;;  %v8151_v44 = vld [vmem:[%s13990_s0 + $0x180] sm:$0xff]  ;;  %v6457_v6 = vpack.c.bf16 %v272_v22, %v271_v21  ;;  %v451_v58 = vmul.f32 %v8125_v24, %v7905_v38  ;;  %v8162_v32 = vld [vmem:[%s13990_s0 + $0x130] sm:$0xff]  ;;  %14121 = vst [vmem:[#allocation16_spill] sm:$0xff] %v8175_v27 }
  0x42   :  { %v372_v4 = vadd.f32 %v366_v14, %v358_v29  ;;  %v434_v2 = vmul.f32 %v8130_v26, %v7882_v31  ;;  %14120 = vst [vmem:[#allocation15_spill] sm:$0xff] %v8162_v32  ;;  %v83_v46 = vmul.f32 %v7879_v30, %v8050_v28  ;;  %v412_v21 = vadd.f32 %v406_v9, %v398_v53 }
  0x43   :  { %v429_v42 = vadd.f32 %v423_v8, %v415_v23  ;;  %v455_v14 = vadd.f32 %v449_v41, %v441_v1  ;;  %v408_v23 = vmul.f32 %v8142_v7, %v7848_v20  ;;  %6458 = vmatprep.subr.bf16.mxu1 %v6457_v6  ;;  %v448_v61 = vmul.f32 %v8151_v44, %v7905_v38 }
  0x44   :  { %v386_v22 = vadd.f32 %v380_v36, %v372_v4  ;;  %v8178_v30 = vstv %s8087_s27  ;;  %v426_v9 = vadd.f32 %v420_v50, %v412_v21  ;;  %v422_v36 = vmul.f32 %v8162_v32, %v7866_v25  ;;  %s8196_s27 = sld [smem:[#allocation2 + $0x8]]  ;;  %v263_v32 = vld [vmem:[%s13993_s3 + $0x40] sm:$0xff] }
  0x45   :  { %v443_v8 = vadd.f32 %v437_v15, %v429_v42  ;;  %v463_v41 = vadd.f32 %v7960_v55, %v455_v14  ;;  %v8188_v15 = vld [vmem:[%s13990_s0 + $0x190] sm:$0xff]  ;;  %v89_v1 = vadd.f32 %v83_v46, %v8017_v13  ;;  %v8192_v53 = vstv %s8120_s1  ;;  %s10254_s1 = sld [smem:[#allocation2 + $0x280]] }
  0x46   :  { %v400_v29 = vadd.f32 %v394_v37, %v386_v22  ;;  %14122 = vst [vmem:[#allocation17_spill] sm:$0xff] %v8188_v15  ;;  %v440_v6 = vadd.f32 %v434_v2, %v426_v9  ;;  %v436_v37 = vmul.f32 %v8175_v27, %v7882_v31  ;;  %v104_v14 = vmul.f32 %v7894_v34, %v8178_v30  ;;  %v4817_v22 = vld [vmem:[%s13993_s3 + $0x4a8] sm:$0xff] }
  0x47   :  { %v457_v42 = vadd.f32 %v451_v58, %v443_v8  ;;  %v469_v4 = vmax.f32 %v463_v41, 0.0  ;;  %v8202_v21 = vstv %s8146_s22  ;;  %v450_v2 = vmul.f32 %v8188_v15, %v7905_v38  ;;  %s10330_s22 = sld [smem:[#allocation2 + $0x282]] }
  0x48   :  { %v414_v50 = vadd.f32 %v408_v23, %v400_v29  ;;  %v454_v13 = vadd.f32 %v448_v61, %v440_v6  ;;  %v4818_v23 = vld [vmem:[%s13993_s3 + $0x4b0] sm:$0xff]  ;;  %v8213_v8 = vstv %s8153_s21  ;;  %v110_v34 = vadd.f32 %v104_v14, %v89_v1  ;;  %v256_v6 = vld [vmem:[%s13993_s3 + $0x8] sm:$0xff]  ;;  %s9019_s21 = sld [smem:[#allocation2 + $0x183]] }
  0x49   :  { %v465_v58 = vadd.f32 %v7960_v55, %v457_v42  ;;  %632 = vmatprep.mubr.f32.mxu0 %v469_v4  ;;  %v125_v9 = vmul.f32 %v7899_v35, %v8192_v53  ;;  %v6428_v42 = vpack.c.bf16 %v4818_v23, %v4817_v22  ;;  %v255_v4 = vld [vmem:[%s13993_s3] sm:$0xff]  ;;  %v273_v35 = vld [vmem:[%s13993_s3 + $0x90] sm:$0xff]  ;;  %v8244_v23 = vstv %s8183_s30  ;;  %s8974_s30 = sld [smem:[#allocation2 + $0x181]] }
  0x4a   :  { %v428_v46 = vadd.f32 %v422_v36, %v414_v50  ;;  %v462_v61 = vadd.f32 %v7960_v55, %v454_v13  ;;  %v8219_v36 = vstv %s8168_s11  ;;  %v146_v50 = vmul.f32 %v7924_v43, %v8202_v21  ;;  %v274_v13 = vld [vmem:[%s13993_s3 + $0x98] sm:$0xff]  ;;  %v4820_v22 = vld [vmem:[%s13993_s3 + $0x4c0] sm:$0xff]  ;;  %s8246_s11 = sld [smem:[#allocation4]] }
  0x4b   :  { %v471_v41 = vmax.f32 %v465_v58, 0.0  ;;  %v131_v1 = vadd.f32 %v125_v9, %v110_v34  ;;  %v8252_v34 = vstv %s8196_s27  ;;  %v6461_v9 = vpack.c.bf16 %v274_v13, %v273_v35  ;;  %s11075_s27 = sld [smem:[#allocation2 + $0x304]] }
  0x4c   :  { %v442_v29 = vadd.f32 %v436_v37, %v428_v46  ;;  %v167_v37 = vmul.f32 %v7938_v48, %v8213_v8  ;;  %v468_v58 = vmax.f32 %v462_v61, 0.0  ;;  %v4819_v46 = vld [vmem:[%s13993_s3 + $0x4b8] sm:$0xff]  ;;  %v188_v48 = vmul.f32 %v7957_v54, %v8219_v36 }
  0x4d   :  { %702 = vmatprep.mubr.f32.mxu1 %v471_v41  ;;  %v152_v43 = vadd.f32 %v146_v50, %v131_v1  ;;  %v6459_v41 = vpack.c.bf16 %v256_v6, %v255_v4  ;;  %v6431_v61 = vpack.c.bf16 %v4820_v22, %v4819_v46  ;;  %v209_v1 = vmul.f32 %v7981_v62, %v8244_v23  ;;  %v258_v54 = vld [vmem:[%s13993_s3 + $0x18] sm:$0xff]  ;;  %v4822_v4 = vld [vmem:[%s13993_s3 + $0x4d0] sm:$0xff] }
  0x4e   :  { %v456_v14 = vadd.f32 %v450_v2, %v442_v29  ;;  %633 = vmatmul.mubr.f32.vlgmr.msra.gmra.mrb[0].mxu0 %v468_v58  ;;  %v257_v29 = vld [vmem:[%s13993_s3 + $0x10] sm:$0xff]  ;;  %v14123_v27 = vmov 0.0|0.0   ;;  %v67_v6 = vmul.f32 %v7929_v45, %v8009_v10  ;;  %v82_v62 = vmul.f32 %v8014_v12, %v8050_v28  ;;  %v276_v58 = vld [vmem:[%s13993_s3 + $0xa8] sm:$0xff]  ;;  %v8296_v22 = vld [vmem:[%s13993_s3 + $0x4d8] sm:$0xff] }
  0x4f   :  { %6429 = vmatpush1.bf16.msra.mxu0 %v6428_v42  ;;  %v173_v15 = vadd.f32 %v167_v37, %v152_v43  ;;  %v4821_v42 = vld [vmem:[%s13993_s3 + $0x4c8] sm:$0xff]  ;;  %v103_v35 = vmul.f32 %v8024_v17, %v8178_v30  ;;  %v275_v37 = vld [vmem:[%s13993_s3 + $0xa0] sm:$0xff]  ;;  %v230_v46 = vmul.f32 %v7986_v63, %v8252_v34 }
  0x50   :  { %v464_v2 = vadd.f32 %v7960_v55, %v456_v14  ;;  %6430 = vmatprep.subr.bf16.mxu0 %v14123_v27  ;;  %v8284_v14 = vld [vmem:[%s13993_s3 + $0x20] sm:$0xff]  ;;  %v8291_v17 = vld [vmem:[%s13993_s3 + $0x28] sm:$0xff]  ;;  %v88_v43 = vadd.f32 %v82_v62, %v67_v6  ;;  %v8311_v6 = vld [vmem:[%s13990_s0 + $0x58] sm:$0xff] }
  0x51   :  { %v194_v13 = vadd.f32 %v188_v48, %v173_v15  ;;  %v8303_v63 = vld [vmem:[%s13990_s0 + $0x28] sm:$0xff]  ;;  %v6463_v15 = vpack.c.bf16 %v258_v54, %v257_v29  ;;  %v6434_v48 = vpack.c.bf16 %v4822_v4, %v4821_v42  ;;  %v8323_v29 = vstv %s8246_s11  ;;  %v8330_v42 = vld [vmem:[%s13990_s0 + $0xb8] sm:$0xff]  ;;  %v8340_v62 = vld [vmem:[%s13993_s3 + $0x30] sm:$0xff]  ;;  %s9003_s11 = sld [smem:[#allocation2 + $0x182]] }
  0x52   :  { %v470_v50 = vmax.f32 %v464_v2, 0.0  ;;  %v124_v2 = vmul.f32 %v8029_v18, %v8192_v53  ;;  %v8316_v18 = vld [vmem:[%s13990_s0 + $0x88] sm:$0xff]  ;;  %v145_v54 = vmul.f32 %v8034_v19, %v8202_v21  ;;  %14125 = vst [vmem:[#allocation19_spill] sm:$0xff] %v8330_v42  ;;  %v278_v4 = vld [vmem:[%s13993_s3 + $0xb8] sm:$0xff] }
  0x53   :  { %6432 = vmatpush1.bf16.msra.mxu0 %v6431_v61  ;;  %v215_v12 = vadd.f32 %v209_v1, %v194_v13  ;;  %14124 = vst [vmem:[#allocation18_spill] sm:$0xff] %v8316_v18  ;;  %v277_v61 = vld [vmem:[%s13993_s3 + $0xb0] sm:$0xff]  ;;  %v109_v1 = vadd.f32 %v103_v35, %v88_v43  ;;  %v8345_v19 = vld [vmem:[%s13993_s3 + $0x38] sm:$0xff]  ;;  %v8357_v43 = vld [vmem:[%s13990_s0 + $0xe8] sm:$0xff] }
  0x54   :  { %703 = vmatmul.mubr.f32.vlgmr.msra.gmra.mrb[0].mxu1 %v470_v50  ;;  %v4824_v50 = vld [vmem:[%s13993_s3 + $0x4e0] sm:$0xff]  ;;  %6433 = vmatprep.subr.bf16.mxu0 %v14123_v27  ;;  %14126 = vst [vmem:[#allocation20_spill] sm:$0xff] %v8357_v43 }
  0x55   :  { %6460 = vmatpush3.bf16.msra.mxu1 %v6459_v41  ;;  %v6465_v41 = vpack.c.bf16 %v276_v58, %v275_v37  ;;  %v236_v35 = vadd.f32 %v230_v46, %v215_v12  ;;  %v347_v37 = vmul.f32 %v7772_v60, %v8303_v63  ;;  %v355_v58 = vmul.f32 %v8311_v6, %v7786_v0 }
  0x56   :  { %6462 = vmatprep.subr.bf16.mxu1 %v6461_v9  ;;  %v6467_v9 = vpack.c.bf16 %v8291_v17, %v8284_v14  ;;  %v6437_v14 = vpack.c.bf16 %v4824_v50, %v8296_v22  ;;  %v130_v13 = vadd.f32 %v124_v2, %v109_v1  ;;  %v166_v17 = vmul.f32 %v8057_v33, %v8213_v8  ;;  %v8367_v33 = vld [vmem:[%s13990_s0 + $0x20] sm:$0xff]  ;;  %v8372_v2 = vld [vmem:[%s13990_s0 + $0x50] sm:$0xff]  ;;  %v4825_v1 = vld [vmem:[%s13993_s3 + $0x4e8] sm:$0xff] }
  0x57   :  { %v369_v12 = vmul.f32 %v8316_v18, %v7800_v5  ;;  %6435 = vmatpush1.bf16.msra.mxu0 %v6434_v48  ;;  %v244_v46 = vadd.f32 %v8323_v29, %v236_v35  ;;  %v361_v10 = vadd.f32 %v355_v58, %v347_v37  ;;  %v383_v22 = vmul.f32 %v8330_v42, %v7812_v11  ;;  %v4826_v35 = vld [vmem:[%s13993_s3 + $0x4f0] sm:$0xff]  ;;  %v8391_v58 = vld [vmem:[%s13990_s0 + $0x118] sm:$0xff] }
  0x58   :  { %6436 = vmatprep.subr.bf16.mxu0 %v14123_v27  ;;  %v6469_v48 = vpack.c.bf16 %v278_v4, %v277_v61  ;;  %v6471_v50 = vpack.c.bf16 %v8345_v19, %v8340_v62  ;;  %v151_v37 = vadd.f32 %v145_v54, %v130_v13  ;;  %v280_v61 = vld [vmem:[%s13993_s3 + $0xc8] sm:$0xff]  ;;  %v187_v62 = vmul.f32 %v8097_v59, %v8219_v36  ;;  %v8406_v13 = vld [vmem:[%s13990_s0 + $0xb0] sm:$0xff] }
  0x59   :  { %6464 = vmatpush3.bf16.msra.mxu1 %v6463_v15  ;;  %v8377_v15 = vld [vmem:[%s13990_s0 + $0x80] sm:$0xff]  ;;  %v250_v4 = vmax.f32 %v244_v46, 0.0  ;;  %v375_v19 = vadd.f32 %v369_v12, %v361_v10  ;;  %v397_v54 = vmul.f32 %v8357_v43, %v7830_v16  ;;  %v264_v46 = vld [vmem:[%s13993_s3 + $0x48] sm:$0xff]  ;;  %v346_v59 = vmul.f32 %v7772_v60, %v8367_v33 }
  0x5a   :  { %6466 = vmatprep.subr.bf16.mxu1 %v6465_v41  ;;  %v279_v41 = vld [vmem:[%s13993_s3 + $0xc0] sm:$0xff]  ;;  %v172_v42 = vadd.f32 %v166_v17, %v151_v37  ;;  %v8417_v10 = vld [vmem:[%s13990_s0 + $0x148] sm:$0xff]  ;;  %v354_v12 = vmul.f32 %v8372_v2, %v7786_v0  ;;  %v368_v43 = vmul.f32 %v8377_v15, %v7800_v5  ;;  %v6440_v18 = vpack.c.bf16 %v4826_v35, %v4825_v1  ;;  %v4827_v0 = vld [vmem:[%s13993_s3 + $0x4f8] sm:$0xff] }
  0x5b   :  { %6438 = vmatpush1.bf16.msra.mxu0 %v6437_v14  ;;  %v389_v7 = vadd.f32 %v383_v22, %v375_v19  ;;  %v411_v17 = vmul.f32 %v8391_v58, %v7848_v20  ;;  %v8430_v37 = vld [vmem:[%s13990_s0 + $0xe0] sm:$0xff]  ;;  %v6473_v60 = vpack.c.bf16 %v280_v61, %v279_v41  ;;  %v382_v22 = vmul.f32 %v8406_v13, %v7812_v11  ;;  %v281_v1 = vld [vmem:[%s13993_s3 + $0xd0] sm:$0xff]  ;;  %v282_v35 = vld [vmem:[%s13993_s3 + $0xd8] sm:$0xff] }
  0x5c   :  { %6439 = vmatprep.subr.bf16.mxu0 %v14123_v27  ;;  %v4828_v5 = vld [vmem:[%s13993_s3 + $0x500] sm:$0xff]  ;;  %v360_v14 = vadd.f32 %v354_v12, %v346_v59  ;;  %848 = vmatprep.mubr.f32.mxu1 %v250_v4  ;;  %v425_v61 = vmul.f32 %v8417_v10, %v7866_v25  ;;  %v8457_v19 = vld [vmem:[%s13990_s0 + $0x110] sm:$0xff]  ;;  %v193_v11 = vadd.f32 %v187_v62, %v172_v42 }
  0x5d   :  { %6468 = vmatpush3.bf16.msra.mxu1 %v6467_v9  ;;  %v8442_v9 = vld [vmem:[%s13990_s0 + $0x178] sm:$0xff]  ;;  %v403_v41 = vadd.f32 %v397_v54, %v389_v7  ;;  %14128 = vst [vmem:[#allocation22_spill] sm:$0xff] %v8457_v19  ;;  %v396_v7 = vmul.f32 %v8430_v37, %v7830_v16  ;;  %v6443_v4 = vpack.c.bf16 %v4828_v5, %v4827_v0  ;;  %v265_v54 = vld [vmem:[%s13993_s3 + $0x50] sm:$0xff]  ;;  %v8476_v62 = vld [vmem:[%s13990_s0 + $0x140] sm:$0xff] }
  0x5e   :  { %6470 = vmatprep.subr.bf16.mxu1 %v6469_v48  ;;  %14127 = vst [vmem:[#allocation21_spill] sm:$0xff] %v8442_v9  ;;  %v6475_v48 = vpack.c.bf16 %v264_v46, %v263_v32  ;;  %v208_v32 = vmul.f32 %v8130_v26, %v8244_v23  ;;  %v8464_v46 = vld [vmem:[%s13990_s0 + $0x1a8] sm:$0xff]  ;;  %v374_v59 = vadd.f32 %v368_v43, %v360_v14 }
  0x5f   :  { %14129 = vst [vmem:[#allocation23_spill] sm:$0xff] %v8464_v46  ;;  %6441 = vmatpush1.bf16.msra.mxu0 %v6440_v18  ;;  %v417_v42 = vadd.f32 %v411_v17, %v403_v41  ;;  %v439_v26 = vmul.f32 %v8442_v9, %v7882_v31  ;;  %v6477_v16 = vpack.c.bf16 %v282_v35, %v281_v1  ;;  %v266_v18 = vld [vmem:[%s13993_s3 + $0x58] sm:$0xff]  ;;  %v4829_v43 = vld [vmem:[%s13993_s3 + $0x508] sm:$0xff]  ;;  %v8501_v1 = vld [vmem:[%s13990_s0 + $0x170] sm:$0xff] }
  0x60   :  { %6442 = vmatprep.subr.bf16.mxu0 %v14123_v27  ;;  %v388_v12 = vadd.f32 %v382_v22, %v374_v59  ;;  %v410_v17 = vmul.f32 %v8457_v19, %v7848_v20  ;;  %v284_v0 = vld [vmem:[%s13993_s3 + $0xe8] sm:$0xff]  ;;  %v453_v14 = vmul.f32 %v8464_v46, %v7905_v38  ;;  %v267_v20 = vld [vmem:[%s13993_s3 + $0x60] sm:$0xff]  ;;  %v214_v35 = vadd.f32 %v208_v32, %v193_v11  ;;  %v4831_v19 = vld [vmem:[%s13993_s3 + $0x518] sm:$0xff] }
  0x61   :  { %6472 = vmatpush3.bf16.msra.mxu1 %v6471_v50  ;;  %v4830_v50 = vld [vmem:[%s13993_s3 + $0x510] sm:$0xff]  ;;  %v431_v5 = vadd.f32 %v425_v61, %v417_v42  ;;  %v268_v22 = vld [vmem:[%s13993_s3 + $0x68] sm:$0xff]  ;;  %v229_v41 = vmul.f32 %v8151_v44, %v8252_v34  ;;  %v424_v59 = vmul.f32 %v8476_v62, %v7866_v25  ;;  %v6479_v42 = vpack.c.bf16 %v266_v18, %v265_v54  ;;  %v4832_v9 = vld [vmem:[%s13993_s3 + $0x520] sm:$0xff] }
  0x62   :  { %6474 = vmatprep.subr.bf16.mxu1 %v6473_v60  ;;  %v283_v60 = vld [vmem:[%s13993_s3 + $0xe0] sm:$0xff]  ;;  %v402_v61 = vadd.f32 %v396_v7, %v388_v12  ;;  %v6446_v46 = vpack.c.bf16 %v4830_v50, %v4829_v43  ;;  %v438_v25 = vmul.f32 %v8501_v1, %v7882_v31  ;;  %v285_v7 = vld [vmem:[%s13993_s3 + $0xf0] sm:$0xff]  ;;  %v85_v31 = vmul.f32 %v7950_v52, %v8050_v28  ;;  %v270_v50 = vld [vmem:[%s13993_s3 + $0x78] sm:$0xff] }
  0x63   :  { %6444 = vmatpush1.bf16.msra.mxu0 %v6443_v4  ;;  %v445_v11 = vadd.f32 %v439_v26, %v431_v5  ;;  %v6481_v44 = vpack.c.bf16 %v284_v0, %v283_v60  ;;  %v286_v4 = vld [vmem:[%s13993_s3 + $0xf8] sm:$0xff]  ;;  %v8531_v26 = vld [vmem:[%s13990_s0 + $0x1a0] sm:$0xff]  ;;  %v6449_v18 = vpack.c.bf16 %v4832_v9, %v4831_v19  ;;  %v269_v43 = vld [vmem:[%s13993_s3 + $0x70] sm:$0xff]  ;;  %v235_v12 = vadd.f32 %v229_v41, %v214_v35 }
  0x64   :  { %6445 = vmatprep.subr.bf16.mxu0 %v14123_v27  ;;  %v416_v32 = vadd.f32 %v410_v17, %v402_v61  ;;  %14130 = vst [vmem:[#allocation24_spill] sm:$0xff] %v8531_v26  ;;  %v106_v60 = vmul.f32 %v7965_v56, %v8178_v30  ;;  %v127_v52 = vmul.f32 %v7970_v57, %v8192_v53  ;;  %v4833_v19 = vld [vmem:[%s13993_s3 + $0x528] sm:$0xff]  ;;  %v4834_v56 = vld [vmem:[%s13993_s3 + $0x530] sm:$0xff]  ;;  %v303_v57 = vld [vmem:[%s13993_s3 + $0x180] sm:$0xff] }
  0x65   :  { %6476 = vmatpush3.bf16.msra.mxu1 %v6475_v48  ;;  %v6483_v48 = vpack.c.bf16 %v268_v22, %v267_v20  ;;  %v459_v54 = vadd.f32 %v453_v14, %v445_v11  ;;  %v6485_v9 = vpack.c.bf16 %v286_v4, %v285_v7  ;;  %v452_v5 = vmul.f32 %v8531_v26, %v7905_v38  ;;  %v304_v20 = vld [vmem:[%s13993_s3 + $0x188] sm:$0xff] }
  0x66   :  { %6478 = vmatprep.subr.bf16.mxu1 %v6477_v16  ;;  %v70_v16 = vmul.f32 %v7929_v45, %v7945_v51  ;;  %v430_v17 = vadd.f32 %v424_v59, %v416_v32  ;;  %v6487_v14 = vpack.c.bf16 %v270_v50, %v269_v43  ;;  %v148_v41 = vmul.f32 %v7993_v3, %v8202_v21  ;;  %v288_v3 = vld [vmem:[%s13993_s3 + $0x108] sm:$0xff] }
  0x67   :  { %6447 = vmatpush1.bf16.msra.mxu0 %v6446_v46  ;;  %v467_v51 = vadd.f32 %v7960_v55, %v459_v54  ;;  %v243_v61 = vadd.f32 %v8323_v29, %v235_v12  ;;  %v69_v59 = vmul.f32 %v7929_v45, %v8064_v39  ;;  %v84_v38 = vmul.f32 %v8069_v40, %v8050_v28  ;;  %v14131_v39 = vld [vmem:[#allocation8_spill] sm:$0xff]  ;;  %v305_v54 = vld [vmem:[%s13993_s3 + $0x190] sm:$0xff] }
  0x68   :  { %v91_v0 = vadd.f32 %v85_v31, %v70_v16  ;;  %6448 = vmatprep.subr.bf16.mxu0 %v14123_v27  ;;  %v444_v46 = vadd.f32 %v438_v25, %v430_v17  ;;  %v6452_v11 = vpack.c.bf16 %v4834_v56, %v4833_v19  ;;  %v169_v25 = vmul.f32 %v14131_v39, %v8213_v8  ;;  %v306_v16 = vld [vmem:[%s13993_s3 + $0x198] sm:$0xff]  ;;  %v289_v56 = vld [vmem:[%s13993_s3 + $0x110] sm:$0xff] }
  0x69   :  { %6480 = vmatpush3.bf16.msra.mxu1 %v6479_v42  ;;  %v473_v22 = vmax.f32 %v467_v51, 0.0  ;;  %v105_v42 = vmul.f32 %v8080_v47, %v8178_v30  ;;  %v6489_v40 = vpack.c.bf16 %v304_v20, %v303_v57  ;;  %v4835_v47 = vld [vmem:[%s13993_s3 + $0x538] sm:$0xff]  ;;  %v90_v4 = vadd.f32 %v84_v38, %v69_v59  ;;  %v319_v59 = vld [vmem:[%s13993_s3 + $0x200] sm:$0xff]  ;;  %v320_v38 = vld [vmem:[%s13993_s3 + $0x208] sm:$0xff] }
  0x6a   :  { %6482 = vmatprep.subr.bf16.mxu1 %v6481_v44  ;;  %v112_v35 = vadd.f32 %v106_v60, %v91_v0  ;;  %v287_v44 = vld [vmem:[%s13993_s3 + $0x100] sm:$0xff]  ;;  %v458_v7 = vadd.f32 %v452_v5, %v444_v46  ;;  %v126_v50 = vmul.f32 %v8085_v49, %v8192_v53  ;;  %v249_v12 = vmax.f32 %v243_v61, 0.0  ;;  %v290_v49 = vld [vmem:[%s13993_s3 + $0x118] sm:$0xff]  ;;  %v309_v39 = vld [vmem:[%s13993_s3 + $0x1b0] sm:$0xff] }
  0x6b   :  { %6450 = vmatpush1.bf16.msra.mxu0 %v6449_v18  ;;  %4839 = vmatprep.mubr.msk.f32.mxu0 %vm560_vm0, %v473_v22  ;;  %v14132_v18 = vld [vmem:[#allocation11_spill] sm:$0xff]  ;;  %v6491_v17 = vpack.c.bf16 %v288_v3, %v287_v44  ;;  %v111_v60 = vadd.f32 %v105_v42, %v90_v4  ;;  %v6493_v19 = vpack.c.bf16 %v306_v16, %v305_v54  ;;  %v307_v5 = vld [vmem:[%s13993_s3 + $0x1a0] sm:$0xff]  ;;  %v4837_v3 = vld [vmem:[%s13993_s3 + $0x548] sm:$0xf] }
  0x6c   :  { %v133_v32 = vadd.f32 %v127_v52, %v112_v35  ;;  %6451 = vmatprep.subr.bf16.mxu0 %v14123_v27  ;;  %v190_v43 = vmul.f32 %v14132_v18, %v8219_v36  ;;  %v14133_v52 = vld [vmem:[#allocation12_spill] sm:$0xff]  ;;  %v466_v46 = vadd.f32 %v7960_v55, %v458_v7  ;;  %v232_v20 = vmul.f32 %v8125_v24, %v8252_v34  ;;  %v14134_v35 = vld [vmem:[#allocation13_spill] sm:$0xff]  ;;  %v14135_v4 = vld [vmem:[#allocation14_spill] sm:$0xff] }
  0x6d   :  { %6484 = vmatpush3.bf16.msra.mxu1 %v6483_v48  ;;  %v4836_v48 = vld [vmem:[%s13993_s3 + $0x540] sm:$0xff]  ;;  %v132_v22 = vadd.f32 %v126_v50, %v111_v60  ;;  %v6495_v61 = vpack.c.bf16 %v290_v49, %v289_v56  ;;  %v292_v24 = vld [vmem:[%s13993_s3 + $0x128] sm:$0xff]  ;;  %v168_v54 = vmul.f32 %v14135_v4, %v8213_v8  ;;  %v14136_v16 = vld [vmem:[#allocation18_spill] sm:$0xff]  ;;  %v192_v4 = vmul.f32 %v8417_v10, %v8219_v36 }
  0x6e   :  { %6486 = vmatprep.subr.bf16.mxu1 %v6485_v9  ;;  %v154_v31 = vadd.f32 %v148_v41, %v133_v32  ;;  %v6455_v51 = vpack.c.bf16 %v4836_v48, %v4835_v47  ;;  %v211_v9 = vmul.f32 %v14133_v52, %v8244_v23  ;;  %v147_v41 = vmul.f32 %v14134_v35, %v8202_v21  ;;  %v291_v55 = vld [vmem:[%s13993_s3 + $0x120] sm:$0xff]  ;;  %v293_v56 = vld [vmem:[%s13993_s3 + $0x130] sm:$0xff]  ;;  %v294_v49 = vld [vmem:[%s13993_s3 + $0x138] sm:$0xff] }
  0x6f   :  { %6453 = vmatpush1.bf16.msra.mxu0 %v6452_v11  ;;  %v14022_v11 = vmov 0.0   ;;  %v472_v32 = vmax.f32 %v466_v46, 0.0  ;;  %v87_v47 = vmul.f32 %v8311_v6, %v8050_v28  ;;  %v6499_v18 = vpack.c.bf16 %v292_v24, %v291_v55  ;;  %v312_v35 = vld [vmem:[%s13993_s3 + $0x1c8] sm:$0xff] }
  0x70   :  { %v175_v0 = vadd.f32 %v169_v25, %v154_v31  ;;  %6454 = vmatprep.subr.bf16.mxu0 %v14123_v27  ;;  %v310_v25 = vld [vmem:[%s13993_s3 + $0x1b8] sm:$0xff]  ;;  %v153_v7 = vadd.f32 %v147_v41, %v132_v22  ;;  %v108_v31 = vmul.f32 %v14136_v16, %v8178_v30  ;;  %v311_v22 = vld [vmem:[%s13993_s3 + $0x1c0] sm:$0xff]  ;;  %v149_v10 = vmul.f32 %v8430_v37, %v8202_v21 }
  0x71   :  { %6488 = vmatpush3.bf16.msra.mxu1 %v6487_v14  ;;  %v308_v14 = vld [vmem:[%s13993_s3 + $0x1a8] sm:$0xff]  ;;  %v6501_v60 = vpack.c.bf16 %v310_v25, %v309_v39  ;;  %v128_v39 = vmul.f32 %v8406_v13, %v8192_v53  ;;  %v8717_v25 = vstv %s8625_s17  ;;  %s10426_s17 = sld [smem:[#allocation2 + $0x284]] }
  0x72   :  { %6490 = vmatprep.subr.bf16.mxu1 %v6489_v40  ;;  %v196_v57 = vadd.f32 %v190_v43, %v175_v0  ;;  %v6497_v44 = vpack.c.bf16 %v308_v14, %v307_v5  ;;  %v72_v40 = vmul.f32 %v7929_v45, %v8303_v63  ;;  %v6522_v43 = vpack.c.bf16 %v320_v38, %v319_v59  ;;  %v322_v0 = vld [vmem:[%s13993_s3 + $0x218] sm:$0xff]  ;;  %v14139_v5 = vld [vmem:[#allocation20_spill] sm:$0xff] }
  0x73   :  { %6456 = vmatpush1.bf16.msra.mxu0 %v6455_v51  ;;  %v321_v51 = vld [vmem:[%s13993_s3 + $0x210] sm:$0xff]  ;;  %v150_v14 = vmul.f32 %v14139_v5, %v8202_v21  ;;  %v174_v55 = vadd.f32 %v168_v54, %v153_v7  ;;  %v8697_v59 = vld [vmem:[%s13993_s3 + $0x140] sm:$0xff]  ;;  %v326_v21 = vld [vmem:[%s13993_s3 + $0x238] sm:$0xff] }
  0x74   :  { %849 = vmatmul.mubr.f32.vlgmr.msra.gmra.mrb[2].mxu1 %v249_v12  ;;  %v217_v42 = vadd.f32 %v211_v9, %v196_v57  ;;  %748 = vmatprep.subr.mxu0 %v14022_v11  ;;  %v93_v50 = vadd.f32 %v87_v47, %v72_v40  ;;  %v14137_v12 = vld [vmem:[#allocation19_spill] sm:$0xff]  ;;  %v71_v57 = vmul.f32 %v7929_v45, %v8367_v33  ;;  %v313_v47 = vld [vmem:[%s13993_s3 + $0x1d0] sm:$0xff] }
  0x75   :  { %6492 = vmatpush3.bf16.msra.mxu1 %v6491_v17  ;;  %v129_v17 = vmul.f32 %v14137_v12, %v8192_v53  ;;  %v14138_v9 = vld [vmem:[#allocation15_spill] sm:$0xff]  ;;  %v107_v45 = vmul.f32 %v8377_v15, %v8178_v30  ;;  %v6525_v24 = vpack.c.bf16 %v322_v0, %v321_v51  ;;  %v323_v30 = vld [vmem:[%s13993_s3 + $0x220] sm:$0xff]  ;;  %v6505_v40 = vpack.c.bf16 %v312_v35, %v311_v22  ;;  %v8735_v54 = vld [vmem:[%s13993_s3 + $0x150] sm:$0xff] }
  0x76   :  { %6494 = vmatprep.subr.bf16.mxu1 %v6493_v19  ;;  %v238_v48 = vadd.f32 %v232_v20, %v217_v42  ;;  %v189_v19 = vmul.f32 %v14138_v9, %v8219_v36  ;;  %v114_v46 = vadd.f32 %v108_v31, %v93_v50  ;;  %v8681_v20 = vstv %s8608_s28  ;;  %v8740_v31 = vld [vmem:[%s13993_s3 + $0x158] sm:$0xff]  ;;  %v14141_v0 = vld [vmem:[#allocation21_spill] sm:$0xff]  ;;  %s8763_s28 = sld [smem:[#allocation2 + $0x107]]  ;;  %v315_v22 = vld [vmem:[%s13993_s3 + $0x1e0] sm:$0xff] }
  0x77   :  { %4838 = vmatpush1.msk.msra.mxu0 %vm564_vm1, %v4837_v3  ;;  %v171_v42 = vmul.f32 %v8391_v58, %v8213_v8  ;;  %v6503_v3 = vpack.c.bf16 %v294_v49, %v293_v56  ;;  %v8730_v53 = vstv %s8636_s29  ;;  %v14142_v49 = vld [vmem:[#allocation22_spill] sm:$0xff]  ;;  %v316_v35 = vld [vmem:[%s13993_s3 + $0x1e8] sm:$0xff]  ;;  %s9627_s29 = sld [smem:[#allocation2 + $0x202]] }
  0x78   :  { %v246_v52 = vadd.f32 %v8323_v29, %v238_v48  ;;  %773 = vmatmul.mubr.f32.vlgmr.msra.gmra.mrb[2].mxu0 %v472_v32  ;;  %6521 = vmatprep.subr.bf16.mxu0 %v14123_v27  ;;  %v135_v38 = vadd.f32 %v129_v17, %v114_v46  ;;  %v324_v32 = vld [vmem:[%s13993_s3 + $0x228] sm:$0xff]  ;;  %v314_v48 = vld [vmem:[%s13993_s3 + $0x1d8] sm:$0xff]  ;;  %v170_v46 = vmul.f32 %v14142_v49, %v8213_v8 }
  0x79   :  { %6496 = vmatpush3.bf16.msra.mxu1 %v6495_v61  ;;  %v86_v61 = vmul.f32 %v8372_v2, %v8050_v28  ;;  %6523 = vmatpush1.bf16.msra.mxu0 %v6522_v43  ;;  %v296_v28 = vld [vmem:[%s13993_s3 + $0x148] sm:$0xff]  ;;  %v14140_v43 = vld [vmem:[#allocation16_spill] sm:$0xff]  ;;  %v6509_v9 = vpack.c.bf16 %v314_v48, %v313_v47  ;;  %v6513_v48 = vpack.c.bf16 %v316_v35, %v315_v22 }
  0x7a   :  { %6498 = vmatprep.subr.bf16.mxu1 %v6497_v44  ;;  %v252_v41 = vmax.f32 %v246_v52, 0.0  ;;  %v8702_v44 = vstv %s8623_s14  ;;  %6524 = vmatprep.subr.bf16.mxu0 %v14123_v27  ;;  %s8719_s14 = sld [smem:[#allocation2 + $0x105]]  ;;  %v156_v7 = vadd.f32 %v150_v14, %v135_v38  ;;  %v210_v50 = vmul.f32 %v14140_v43, %v8244_v23  ;;  %v14143_v8 = vld [vmem:[#allocation17_spill] sm:$0xff] }
  0x7b   :  { %v92_v58 = vadd.f32 %v86_v61, %v71_v57  ;;  %v6507_v17 = vpack.c.bf16 %v296_v28, %v8697_v59  ;;  %v213_v52 = vmul.f32 %v14141_v0, %v8244_v23  ;;  %v8759_v14 = vstv %s8668_s13  ;;  %v14144_v61 = vld [vmem:[#allocation23_spill] sm:$0xff]  ;;  %v8785_v59 = vld [vmem:[%s13993_s3 + $0x248] sm:$0xff]  ;;  %s10055_s13 = sld [smem:[#allocation2 + $0x208]] }
  0x7c   :  { %918 = vmatprep.mubr.f32.mxu1 %v252_v41  ;;  %v177_v51 = vadd.f32 %v171_v42, %v156_v7  ;;  %v6511_v57 = vpack.c.bf16 %v8740_v31, %v8735_v54  ;;  %v231_v41 = vmul.f32 %v14143_v8, %v8252_v34  ;;  %v8792_v28 = vld [vmem:[%s13990_s0 + $0x8] sm:$0xff]  ;;  %v299_v31 = vld [vmem:[%s13993_s3 + $0x160] sm:$0xff]  ;;  %v14146_v8 = vld [vmem:[#allocation10_spill] sm:$0xff] }
  0x7d   :  { %6500 = vmatpush3.bf16.msra.mxu1 %v6499_v18  ;;  %v195_v18 = vadd.f32 %v189_v19, %v174_v55  ;;  %v113_v12 = vadd.f32 %v107_v45, %v92_v58  ;;  %6526 = vmatpush1.bf16.msra.mxu0 %v6525_v24  ;;  %v325_v19 = vld [vmem:[%s13993_s3 + $0x230] sm:$0xff]  ;;  %v234_v45 = vmul.f32 %v14144_v61, %v8252_v34  ;;  %v8780_v24 = vld [vmem:[%s13993_s3 + $0x240] sm:$0xff]  ;;  %v8853_v35 = vld [vmem:[%s13990_s0 + $0xc8] sm:$0xff] }
  0x7e   :  { %6502 = vmatprep.subr.bf16.mxu1 %v6501_v60  ;;  %v6528_v60 = vpack.c.bf16 %v324_v32, %v323_v30  ;;  %6527 = vmatprep.subr.bf16.mxu0 %v14123_v27  ;;  %v198_v55 = vadd.f32 %v192_v4, %v177_v51  ;;  %v997_v30 = vmul.f32 %v8792_v28, %v8681_v20 }
  0x7f   :  { %v134_v56 = vadd.f32 %v128_v39, %v113_v12  ;;  %v216_v38 = vadd.f32 %v210_v50, %v195_v18  ;;  %v6531_v32 = vpack.c.bf16 %v326_v21, %v325_v19  ;;  %v8799_v39 = vld [vmem:[%s13990_s0 + $0x38] sm:$0xff]  ;;  %v212_v4 = vmul.f32 %v8501_v1, %v8244_v23  ;;  %v300_v18 = vld [vmem:[%s13993_s3 + $0x168] sm:$0xff]  ;;  %v329_v21 = vld [vmem:[%s13993_s3 + $0x250] sm:$0xff] }
  0x80   :  { %v219_v58 = vadd.f32 %v213_v52, %v198_v55  ;;  %v8814_v54 = vstv %s8719_s14  ;;  %v6534_v43 = vpack.c.bf16 %v8785_v59, %v8780_v24  ;;  %v8829_v23 = vld [vmem:[%s13990_s0 + $0x98] sm:$0xff]  ;;  %v233_v52 = vmul.f32 %v8531_v26, %v8252_v34  ;;  %s9411_s14 = sld [smem:[#allocation2 + $0x187]] }
  0x81   :  { %6504 = vmatpush3.bf16.msra.mxu1 %v6503_v3  ;;  %v155_v42 = vadd.f32 %v149_v10, %v134_v56  ;;  %v191_v3 = vmul.f32 %v8476_v62, %v8219_v36  ;;  %6529 = vmatpush1.bf16.msra.mxu0 %v6528_v60  ;;  %v8806_v36 = vld [vmem:[%s13990_s0 + $0x68] sm:$0xff]  ;;  %v1033_v10 = vmul.f32 %v8829_v23, %v8730_v53  ;;  %v318_v60 = vld [vmem:[%s13993_s3 + $0x1f8] sm:$0xff]  ;;  %v8861_v24 = vstv %s8761_s20  ;;  %s8879_s20 = sld [smem:[#allocation4 + $0x2]] }
  0x82   :  { %6506 = vmatprep.subr.bf16.mxu1 %v6505_v40  ;;  %v1005_v40 = vmul.f32 %v8799_v39, %v8702_v44  ;;  %v1019_v47 = vmul.f32 %v8806_v36, %v8717_v25  ;;  %6530 = vmatprep.subr.bf16.mxu0 %v14123_v27  ;;  %v240_v50 = vadd.f32 %v234_v45, %v219_v58  ;;  %v330_v56 = vld [vmem:[%s13993_s3 + $0x258] sm:$0xff]  ;;  %v8864_v59 = vstv %s8763_s28  ;;  %s9629_s28 = sld [smem:[#allocation2 + $0x203]] }
  0x83   :  { %v176_v7 = vadd.f32 %v170_v46, %v155_v42  ;;  %v237_v51 = vadd.f32 %v231_v41, %v216_v38  ;;  %v1047_v34 = vmul.f32 %v8853_v35, %v8759_v14  ;;  %v1004_v41 = vmul.f32 %v14146_v8, %v8702_v44  ;;  %v301_v42 = vld [vmem:[%s13993_s3 + $0x170] sm:$0xff] }
  0x84   :  { %v1011_v12 = vadd.f32 %v1005_v40, %v997_v30  ;;  %v248_v46 = vadd.f32 %v8323_v29, %v240_v50  ;;  %v6515_v55 = vpack.c.bf16 %v300_v18, %v299_v31  ;;  %v6537_v40 = vpack.c.bf16 %v330_v56, %v329_v21  ;;  %v8890_v31 = vld [vmem:[%s13990_s0 + $0x60] sm:$0xff]  ;;  %v4853_v21 = vld [vmem:[%s13993_s3 + $0x558] sm:$0xff] }
  0x85   :  { %6508 = vmatpush3.bf16.msra.mxu1 %v6507_v17  ;;  %v317_v17 = vld [vmem:[%s13993_s3 + $0x1f0] sm:$0xff]  ;;  %v197_v0 = vadd.f32 %v191_v3, %v176_v7  ;;  %6532 = vmatpush1.bf16.msra.mxu0 %v6531_v32  ;;  %v302_v3 = vld [vmem:[%s13993_s3 + $0x178] sm:$0xff]  ;;  %14148 = vst [vmem:[#allocation11_spill] sm:$0xff] %v8890_v31  ;;  %v1018_v18 = vmul.f32 %v8890_v31, %v8717_v25 }
  0x86   :  { %6510 = vmatprep.subr.bf16.mxu1 %v6509_v9  ;;  %v14145_v9 = vld [vmem:[#allocation9_spill] sm:$0xff]  ;;  %v1025_v22 = vadd.f32 %v1019_v47, %v1011_v12  ;;  %6533 = vmatprep.subr.bf16.mxu0 %v14123_v27  ;;  %v6517_v38 = vpack.c.bf16 %v318_v60, %v317_v17  ;;  %v254_v30 = vmax.f32 %v248_v46, 0.0  ;;  %v8875_v32 = vld [vmem:[%s13990_s0 + $0xf8] sm:$0xff]  ;;  %v4868_v47 = vld [vmem:[%s13993_s3 + $0x5d0] sm:$0xff]  ;;  %v245_v50 = vadd.f32 %v8323_v29, %v237_v51 }
  0x87   :  { %v996_v19 = vmul.f32 %v8681_v20, %v14145_v9  ;;  %v218_v45 = vadd.f32 %v212_v4, %v197_v0  ;;  %14147 = vst [vmem:[#allocation8_spill] sm:$0xff] %v8875_v32  ;;  %v1061_v58 = vmul.f32 %v8875_v32, %v8814_v54  ;;  %v6519_v60 = vpack.c.bf16 %v302_v3, %v301_v42  ;;  %v332_v51 = vld [vmem:[%s13993_s3 + $0x268] sm:$0xff]  ;;  %v8925_v46 = vld [vmem:[%s13990_s0 + $0x158] sm:$0xff] }
  0x88   :  { %4841 = vmatprep.mubr.msk.f32.mxu0 %vm560_vm0, %v254_v30  ;;  %14150 = vst [vmem:[#allocation13_spill] sm:$0xff] %v8925_v46  ;;  %v8945_v3 = vld [vmem:[%s13990_s0 + $0x188] sm:$0xff]  ;;  %v9144_v31 = vld [vmem:[%s13990_s0 + $0x138] sm:$0xff]  ;;  %v1001_v26 = vmul.f32 %v8681_v20, %v8303_v63  ;;  %v9293_v63 = vld [vmem:[%s13993_s3 + $0x640] sm:$0xff] }
  0x89   :  { %6512 = vmatpush3.bf16.msra.mxu1 %v6511_v57  ;;  %v1039_v57 = vadd.f32 %v1033_v10, %v1025_v22  ;;  %v239_v7 = vadd.f32 %v233_v52, %v218_v45  ;;  %v1010_v4 = vadd.f32 %v1004_v41, %v996_v19  ;;  %6535 = vmatpush1.bf16.msra.mxu0 %v6534_v43  ;;  %v8899_v10 = vld [vmem:[%s13990_s0 + $0x128] sm:$0xff]  ;;  %v331_v43 = vld [vmem:[%s13993_s3 + $0x260] sm:$0xff]  ;;  %v8914_v52 = vstv %s8816_s18  ;;  %v4852_v19 = vld [vmem:[%s13993_s3 + $0x550] sm:$0xff]  ;;  %s10368_s18 = sld [smem:[#allocation2 + $0x283]] }
  0x8a   :  { %6514 = vmatprep.subr.bf16.mxu1 %v6513_v48  ;;  %v4869_v48 = vld [vmem:[%s13993_s3 + $0x5d8] sm:$0xff]  ;;  %14149 = vst [vmem:[#allocation12_spill] sm:$0xff] %v8899_v10  ;;  %v1075_v17 = vmul.f32 %v8899_v10, %v8861_v24  ;;  %6536 = vmatprep.subr.bf16.mxu0 %v14123_v27  ;;  %v4870_v22 = vld [vmem:[%s13993_s3 + $0x5e0] sm:$0xff]  ;;  %v8938_v41 = vld [vmem:[%s13990_s0 + $0x90] sm:$0xff]  ;;  %v251_v45 = vmax.f32 %v245_v50, 0.0  ;;  %v1103_v30 = vmul.f32 %v8945_v3, %v8914_v52 }
  0x8b   :  { %v1053_v12 = vadd.f32 %v1047_v34, %v1039_v57  ;;  %v8911_v0 = vadd.f32 %v8323_v29, %v239_v7  ;;  %v6551_v9 = vpack.c.bf16 %v4869_v48, %v4868_v47  ;;  %v1089_v29 = vmul.f32 %v8925_v46, %v8864_v59  ;;  %v4871_v34 = vld [vmem:[%s13993_s3 + $0x5e8] sm:$0xff]  ;;  %14151 = vst [vmem:[#allocation14_spill] sm:$0xff] %v8938_v41  ;;  %v4854_v48 = vld [vmem:[%s13993_s3 + $0x560] sm:$0xff]  ;;  %v8970_v50 = vld [vmem:[%s13990_s0 + $0x18] sm:$0xff] }
  0x8c   :  { %v1024_v8 = vadd.f32 %v1018_v18, %v1010_v4  ;;  %14152 = vst [vmem:[#allocation18_spill] sm:$0xff] %v8945_v3  ;;  %v6553_v57 = vpack.c.bf16 %v4853_v21, %v4852_v19  ;;  %v6555_v47 = vpack.c.bf16 %v4871_v34, %v4870_v22  ;;  %v4855_v7 = vld [vmem:[%s13993_s3 + $0x568] sm:$0xff]  ;;  %v8965_v18 = vstv %s8879_s20  ;;  %14153 = vst [vmem:[#allocation19_spill] sm:$0xff] %v8970_v50  ;;  %v9244_v10 = vld [vmem:[%s13990_s0 + $0x198] sm:$0xff]  ;;  %s9874_s20 = sld [smem:[#allocation2 + $0x204]] }
  0x8d   :  { %6516 = vmatpush3.bf16.msra.mxu1 %v6515_v55  ;;  %v1067_v56 = vadd.f32 %v1061_v58, %v1053_v12  ;;  %v1032_v55 = vmul.f32 %v8938_v41, %v8730_v53  ;;  %6538 = vmatpush1.bf16.msra.mxu0 %v6537_v40  ;;  %v333_v58 = vld [vmem:[%s13993_s3 + $0x270] sm:$0xff]  ;;  %v334_v40 = vld [vmem:[%s13993_s3 + $0x278] sm:$0xff]  ;;  %v999_v12 = vmul.f32 %v8970_v50, %v8681_v20  ;;  %v8992_v19 = vld [vmem:[%s13990_s0 + $0x48] sm:$0xff] }
  0x8e   :  { %6518 = vmatprep.subr.bf16.mxu1 %v6517_v38  ;;  %v6540_v38 = vpack.c.bf16 %v332_v51, %v331_v43  ;;  %6539 = vmatprep.subr.bf16.mxu0 %v14123_v27  ;;  %v8985_v51 = vld [vmem:[%s13990_s0 + $0xc0] sm:$0xff]  ;;  %14155 = vst [vmem:[#allocation20_spill] sm:$0xff] %v8992_v19  ;;  %v1007_v21 = vmul.f32 %v8992_v19, %v8702_v44  ;;  %14164 = vst [vmem:[#allocation26_spill] sm:$0xff] %v9144_v31 }
  0x8f   :  { %v1081_v42 = vadd.f32 %v1075_v17, %v1067_v56  ;;  %v4872_v17 = vld [vmem:[%s13993_s3 + $0x5f0] sm:$0xff]  ;;  %v1038_v43 = vadd.f32 %v1032_v55, %v1024_v8  ;;  %14154 = vst [vmem:[#allocation15_spill] sm:$0xff] %v8985_v51  ;;  %v8999_v56 = vld [vmem:[%s13990_s0 + $0x78] sm:$0xff]  ;;  %v6543_v22 = vpack.c.bf16 %v334_v40, %v333_v58  ;;  %v6557_v8 = vpack.c.bf16 %v4855_v7, %v4854_v48  ;;  %v335_v55 = vld [vmem:[%s13993_s3 + $0x280] sm:$0xff] }
  0x90   :  { %14156 = vst [vmem:[#allocation16_spill] sm:$0xff] %v8999_v56  ;;  %v1013_v11 = vadd.f32 %v1007_v21, %v999_v12  ;;  %v4857_v58 = vld [vmem:[%s13993_s3 + $0x578] sm:$0xff]  ;;  %v4874_v48 = vld [vmem:[%s13993_s3 + $0x600] sm:$0xff]  ;;  %v4875_v7 = vld [vmem:[%s13993_s3 + $0x608] sm:$0xff]  ;;  %v1077_v3 = vmul.f32 %v9144_v31, %v8861_v24  ;;  %v1105_v32 = vmul.f32 %v9244_v10, %v8914_v52 }
  0x91   :  { %6520 = vmatpush3.bf16.msra.mxu1 %v6519_v60  ;;  %v1095_v4 = vadd.f32 %v1089_v29, %v1081_v42  ;;  %v4873_v60 = vld [vmem:[%s13993_s3 + $0x5f8] sm:$0xff]  ;;  %v1021_v29 = vmul.f32 %v8999_v56, %v8717_v25  ;;  %6541 = vmatpush1.bf16.msra.mxu0 %v6540_v38  ;;  %v336_v42 = vld [vmem:[%s13993_s3 + $0x288] sm:$0xff]  ;;  %v6563_v41 = vpack.c.bf16 %v4875_v7, %v4874_v48  ;;  %v9127_v48 = vld [vmem:[%s13993_s3 + $0x6d0] sm:$0xff] }
  0x92   :  { %6552 = vmatprep.subr.bf16.mxu1 %v6551_v9  ;;  %v1046_v9 = vmul.f32 %v8985_v51, %v8759_v14  ;;  %6542 = vmatprep.subr.bf16.mxu0 %v14123_v27  ;;  %v9132_v7 = vld [vmem:[%s13993_s3 + $0x6d8] sm:$0xff]  ;;  %14168 = vst [vmem:[#allocation30_spill] sm:$0xff] %v9244_v10  ;;  %v253_v10 = vmax.f32 %v8911_v0, 0.0  ;;  %v1023_v0 = vmul.f32 %v14136_v16, %v8717_v25  ;;  %v9306_v16 = vld [vmem:[%s13993_s3 + $0x648] sm:$0xff] }
  0x93   :  { %v1109_v34 = vadd.f32 %v1103_v30, %v1095_v4  ;;  %v6559_v30 = vpack.c.bf16 %v4873_v60, %v4872_v17  ;;  %v9037_v4 = vld [vmem:[%s13990_s0 + $0xf0] sm:$0xff]  ;;  %v1027_v17 = vadd.f32 %v1021_v29, %v1013_v11  ;;  %v9044_v60 = vld [vmem:[%s13990_s0 + $0xd8] sm:$0xff] }
  0x94   :  { %919 = vmatmul.mubr.f32.vlgmr.msra.gmra.mrb[4].mxu1 %v251_v45  ;;  %v9015_v45 = vld [vmem:[%s13990_s0 + $0xa8] sm:$0xff]  ;;  %14158 = vst [vmem:[#allocation22_spill] sm:$0xff] %v9037_v4  ;;  %v1060_v12 = vmul.f32 %v9037_v4, %v8814_v54  ;;  %14159 = vst [vmem:[#allocation17_spill] sm:$0xff] %v9044_v60  ;;  %v1049_v21 = vmul.f32 %v9044_v60, %v8759_v14  ;;  %v9061_v11 = vld [vmem:[%s13993_s3 + $0x290] sm:$0xff] }
  0x95   :  { %6554 = vmatpush3.bf16.msra.mxu1 %v6553_v57  ;;  %14157 = vst [vmem:[#allocation21_spill] sm:$0xff] %v9015_v45  ;;  %v1035_v38 = vmul.f32 %v9015_v45, %v8730_v53  ;;  %v4856_v57 = vld [vmem:[%s13993_s3 + $0x570] sm:$0xff]  ;;  %v1117_v40 = vadd.f32 %v8965_v18, %v1109_v34  ;;  %6544 = vmatpush1.bf16.msra.mxu0 %v6543_v22  ;;  %v9089_v60 = vld [vmem:[%s13993_s3 + $0x618] sm:$0xff] }
  0x96   :  { %6556 = vmatprep.subr.bf16.mxu1 %v6555_v47  ;;  %v1052_v47 = vadd.f32 %v1046_v9, %v1038_v43  ;;  %v6546_v34 = vpack.c.bf16 %v336_v42, %v335_v55  ;;  %v9051_v43 = vld [vmem:[%s13993_s3 + $0x580] sm:$0xff]  ;;  %v9056_v9 = vld [vmem:[%s13993_s3 + $0x588] sm:$0xff]  ;;  %v9066_v22 = vld [vmem:[%s13990_s0 + $0x10] sm:$0xff]  ;;  %v6561_v51 = vpack.c.bf16 %v4857_v58, %v4856_v57  ;;  %6545 = vmatprep.subr.bf16.mxu0 %v14123_v27  ;;  %v9099_v58 = vstv %s8956_s24  ;;  %s9192_s24 = sld [smem:[#allocation2 + $0x184]] }
  0x97   :  { %v1123_v29 = vmax.f32 %v1117_v40, 0.0  ;;  %14160 = vst [vmem:[#allocation23_spill] sm:$0xff] %v9066_v22  ;;  %v998_v55 = vmul.f32 %v9066_v22, %v8681_v20  ;;  %v9073_v42 = vld [vmem:[%s13990_s0 + $0x40] sm:$0xff]  ;;  %v338_v40 = vld [vmem:[%s13993_s3 + $0x298] sm:$0xff]  ;;  %v9084_v22 = vld [vmem:[%s13993_s3 + $0x610] sm:$0xff] }
  0x98   :  { %14161 = vst [vmem:[#allocation9_spill] sm:$0xff] %v9073_v42  ;;  %v1006_v4 = vmul.f32 %v9073_v42, %v8702_v44  ;;  %v1041_v42 = vadd.f32 %v1035_v38, %v1027_v17  ;;  %v9104_v45 = vld [vmem:[%s13993_s3 + $0x590] sm:$0xff]  ;;  %v9109_v38 = vld [vmem:[%s13993_s3 + $0x598] sm:$0xff]  ;;  %v9114_v17 = vld [vmem:[%s13993_s3 + $0x620] sm:$0xff]  ;;  %v1066_v56 = vadd.f32 %v1060_v12, %v1052_v47  ;;  %v6549_v47 = vpack.c.bf16 %v338_v40, %v9061_v11 }
  0x99   :  { %6558 = vmatpush3.bf16.msra.mxu1 %v6557_v8  ;;  %v9094_v8 = vld [vmem:[%s13990_s0 + $0x108] sm:$0xff]  ;;  %1284 = vmatprep.mubr.f32.mxu1 %v1123_v29  ;;  %v9137_v29 = vld [vmem:[%s13990_s0 + $0x120] sm:$0xff]  ;;  %v9175_v11 = vld [vmem:[%s13993_s3 + $0x650] sm:$0xff]  ;;  %v9190_v40 = vstv %s9019_s21  ;;  %v6569_v31 = vpack.c.bf16 %v9109_v38, %v9104_v45  ;;  %s9610_s21 = sld [smem:[#allocation2 + $0x200]] }
  0x9a   :  { %14162 = vst [vmem:[#allocation10_spill] sm:$0xff] %v9094_v8  ;;  %v1063_v57 = vmul.f32 %v9094_v8, %v8814_v54  ;;  %6560 = vmatprep.subr.bf16.mxu1 %v6559_v30  ;;  %v9117_v8 = vstv %s8974_s30  ;;  %v9122_v30 = vld [vmem:[%s13993_s3 + $0x628] sm:$0xff]  ;;  %14163 = vst [vmem:[#allocation25_spill] sm:$0xff] %v9137_v29  ;;  %v1074_v19 = vmul.f32 %v9137_v29, %v8861_v24  ;;  %6547 = vmatpush1.bf16.msra.mxu0 %v6546_v34  ;;  %v9152_v12 = vld [vmem:[%s13993_s3 + $0x5a0] sm:$0xff]  ;;  %s9501_s30 = sld [smem:[#allocation4 + $0x3]] }
  0x9b   :  { %v1055_v50 = vadd.f32 %v1049_v21, %v1041_v42  ;;  %v1012_v46 = vadd.f32 %v1006_v4, %v998_v55  ;;  %v9157_v21 = vld [vmem:[%s13990_s0 + $0x70] sm:$0xff]  ;;  %v9162_v29 = vstv %s9003_s11  ;;  %v6565_v34 = vpack.c.bf16 %v9056_v9, %v9051_v43  ;;  %6548 = vmatprep.subr.bf16.mxu0 %v14123_v27  ;;  %v9170_v4 = vld [vmem:[%s13993_s3 + $0x5a8] sm:$0xff]  ;;  %v9180_v55 = vld [vmem:[%s13993_s3 + $0x658] sm:$0xff] }
  0x9c   :  { %14165 = vst [vmem:[#allocation27_spill] sm:$0xff] %v9157_v21  ;;  %v1020_v42 = vmul.f32 %v9157_v21, %v8717_v25  ;;  %v9185_v43 = vld [vmem:[%s13990_s0 + $0x168] sm:$0xff]  ;;  %v6567_v21 = vpack.c.bf16 %v9089_v60, %v9084_v22  ;;  %v9215_v45 = vld [vmem:[%s13993_s3 + $0x6e0] sm:$0xff]  ;;  %v9227_v22 = vld [vmem:[%s13993_s3 + $0x5b0] sm:$0xff] }
  0x9d   :  { %6562 = vmatpush3.bf16.msra.mxu1 %v6561_v51  ;;  %v1069_v51 = vadd.f32 %v1063_v57, %v1055_v50  ;;  %14166 = vst [vmem:[#allocation28_spill] sm:$0xff] %v9185_v43  ;;  %v1091_v9 = vmul.f32 %v9185_v43, %v8864_v59  ;;  %v6571_v50 = vpack.c.bf16 %v9122_v30, %v9114_v17  ;;  %v9205_v43 = vld [vmem:[%s13993_s3 + $0x630] sm:$0xff]  ;;  %v9222_v60 = vld [vmem:[%s13993_s3 + $0x6e8] sm:$0xff]  ;;  %v9232_v38 = vld [vmem:[%s13993_s3 + $0x5b8] sm:$0xff] }
  0x9e   :  { %6564 = vmatprep.subr.bf16.mxu1 %v6563_v41  ;;  %v6583_v57 = vpack.c.bf16 %v9132_v7, %v9127_v48  ;;  %v9210_v41 = vld [vmem:[%s13993_s3 + $0x638] sm:$0xff]  ;;  %v1080_v17 = vadd.f32 %v1074_v19, %v1066_v56  ;;  %v9237_v30 = vld [vmem:[%s13990_s0 + $0x150] sm:$0xff]  ;;  %6550 = vmatpush1.bf16.msra.mxu0 %v6549_v47  ;;  %v6585_v56 = vpack.c.bf16 %v9180_v55, %v9175_v11  ;;  %v9265_v47 = vld [vmem:[%s13990_s0 + $0xa0] sm:$0xff]  ;;  %v14170_v11 = vmov 0.0  }
  0x9f   :  { %14167 = vst [vmem:[#allocation29_spill] sm:$0xff] %v9237_v30  ;;  %v1088_v48 = vmul.f32 %v9237_v30, %v8864_v59  ;;  %v1083_v7 = vadd.f32 %v1077_v3, %v1069_v51  ;;  %v9255_v30 = vld [vmem:[%s13993_s3 + $0x660] sm:$0xff]  ;;  %v9260_v3 = vld [vmem:[%s13993_s3 + $0x668] sm:$0xff]  ;;  %v1026_v51 = vadd.f32 %v1020_v42, %v1012_v46  ;;  %14169 = vst [vmem:[#allocation31_spill] sm:$0xff] %v9265_v47  ;;  %964 = vmatprep.subr.mxu0 %v14170_v11 }
  0xa0   :  { %v1034_v19 = vmul.f32 %v9265_v47, %v8730_v53  ;;  %v339_v55 = vld [vmem:[%s13993_s3 + $0x2a0] sm:$0xf]  ;;  %v6575_v46 = vpack.c.bf16 %v9210_v41, %v9205_v43  ;;  %v1009_v11 = vmul.f32 %v8311_v6, %v8702_v44  ;;  %v6589_v43 = vpack.c.bf16 %v9260_v3, %v9255_v30 }
  0xa1   :  { %6566 = vmatpush3.bf16.msra.mxu1 %v6565_v34  ;;  %v1097_v42 = vadd.f32 %v1091_v9, %v1083_v7  ;;  %v6587_v34 = vpack.c.bf16 %v9222_v60, %v9215_v45  ;;  %v9298_v9 = vld [vmem:[%s13990_s0 + $0x180] sm:$0xff]  ;;  %v4904_v45 = vld [vmem:[%s13993_s3 + $0x6f0] sm:$0xff]  ;;  %v4905_v60 = vld [vmem:[%s13993_s3 + $0x6f8] sm:$0xff] }
  0xa2   :  { %6568 = vmatprep.subr.bf16.mxu1 %v6567_v21  ;;  %v1094_v21 = vadd.f32 %v1088_v48, %v1080_v17  ;;  %v1102_v6 = vmul.f32 %v9298_v9, %v8914_v52  ;;  %4840 = vmatpush1.msk.msra.mxu0 %vm564_vm1, %v339_v55  ;;  %v1040_v17 = vadd.f32 %v1034_v19, %v1026_v51  ;;  %v9324_v7 = vld [vmem:[%s13990_s0 + $0xb8] sm:$0xff] }
  0xa3   :  { %v1111_v41 = vadd.f32 %v1105_v32, %v1097_v42  ;;  %v9317_v32 = vld [vmem:[%s13990_s0 + $0xd0] sm:$0xff]  ;;  %v1015_v48 = vadd.f32 %v1009_v11, %v1001_v26  ;;  %v1037_v3 = vmul.f32 %v9324_v7, %v8730_v53  ;;  %989 = vmatmul.mubr.f32.vlgmr.msra.gmra.mrb[4].mxu0 %v253_v10  ;;  %v1051_v51 = vmul.f32 %v14139_v5, %v8759_v14  ;;  %v9339_v11 = vld [vmem:[%s13993_s3 + $0x5c0] sm:$0xff] }
  0xa4   :  { %v1048_v30 = vmul.f32 %v9317_v32, %v8759_v14  ;;  %v1000_v55 = vmul.f32 %v8681_v20, %v8367_v33  ;;  %v9334_v26 = vstv %s9192_s24  ;;  %6584 = vmatprep.subr.bf16.mxu0 %v6583_v57  ;;  %v1008_v5 = vmul.f32 %v8372_v2, %v8702_v44  ;;  %v4888_v42 = vld [vmem:[%s13993_s3 + $0x670] sm:$0xff]  ;;  %v4889_v2 = vld [vmem:[%s13993_s3 + $0x678] sm:$0xff]  ;;  %v4907_v44 = vld [vmem:[%s13993_s3 + $0x708] sm:$0xff]  ;;  %s11546_s24 = sld [smem:[#allocation2 + $0x382]] }
  0xa5   :  { %6570 = vmatpush3.bf16.msra.mxu1 %v6569_v31  ;;  %v1119_v19 = vadd.f32 %v8965_v18, %v1111_v41  ;;  %v9344_v31 = vld [vmem:[%s13993_s3 + $0x5c8] sm:$0xff]  ;;  %v1029_v10 = vadd.f32 %v1023_v0, %v1015_v48  ;;  %v1022_v33 = vmul.f32 %v8377_v15, %v8717_v25  ;;  %v9351_v20 = vstv %s9217_s16  ;;  %6586 = vmatpush3.bf16.msra.mxu0 %v6585_v56  ;;  %v4906_v15 = vld [vmem:[%s13993_s3 + $0x700] sm:$0xff]  ;;  %v9370_v56 = vld [vmem:[%s13990_s0 + $0x118] sm:$0xff]  ;;  %s12425_s16 = sld [smem:[#allocation2 + $0x404]] }
  0xa6   :  { %6572 = vmatprep.subr.bf16.mxu1 %v6571_v50  ;;  %v6579_v50 = vpack.c.bf16 %v9306_v16, %v9293_v63  ;;  %v6591_v57 = vpack.c.bf16 %v4905_v60, %v4904_v45  ;;  %v1108_v41 = vadd.f32 %v1102_v6, %v1094_v21  ;;  %6588 = vmatprep.subr.bf16.mxu0 %v6587_v34  ;;  %v9384_v45 = vld [vmem:[%s13990_s0 + $0x100] sm:$0xff]  ;;  %v9389_v48 = vstv %s9278_s25  ;;  %s11702_s25 = sld [smem:[#allocation2 + $0x384]] }
  0xa7   :  { %v1125_v47 = vmax.f32 %v1119_v19, 0.0  ;;  %v1043_v25 = vadd.f32 %v1037_v3, %v1029_v10  ;;  %v1065_v34 = vmul.f32 %v9370_v56, %v8814_v54  ;;  %v1014_v0 = vadd.f32 %v1008_v5, %v1000_v55  ;;  %v9407_v19 = vld [vmem:[%s13990_s0 + $0x130] sm:$0xff] }
  0xa8   :  { %v1036_v63 = vmul.f32 %v8406_v13, %v8730_v53  ;;  %v14171_v21 = vpack.c.bf16 %v9170_v4, %v9152_v12  ;;  %v6581_v6 = vpack.c.bf16 %v9344_v31, %v9339_v11  ;;  %v1054_v16 = vadd.f32 %v1048_v30, %v1040_v17  ;;  %v9394_v53 = vld [vmem:[%s13990_s0 + $0x148] sm:$0xff]  ;;  %v9425_v11 = vld [vmem:[%s13990_s0 + $0x178] sm:$0xff] }
  0xa9   :  { %1354 = vmatprep.mubr.f32.mxu0 %v1125_v47  ;;  %v1062_v60 = vmul.f32 %v9384_v45, %v8814_v54  ;;  %v1057_v13 = vadd.f32 %v1051_v51, %v1043_v25  ;;  %v1079_v12 = vmul.f32 %v9394_v53, %v8861_v24  ;;  %v1028_v4 = vadd.f32 %v1022_v33, %v1014_v0 }
  0xaa   :  { %6574 = vmatpush3.bf16.msra.mxu1 %v14171_v21  ;;  %v1050_v47 = vmul.f32 %v8430_v37, %v8759_v14  ;;  %6590 = vmatpush3.bf16.msra.mxu0 %v6589_v43  ;;  %v6593_v17 = vpack.c.bf16 %v4889_v2, %v4888_v42  ;;  %v6595_v30 = vpack.c.bf16 %v4907_v44, %v4906_v15  ;;  %v4891_v37 = vld [vmem:[%s13993_s3 + $0x688] sm:$0xff]  ;;  %v4908_v14 = vld [vmem:[%s13993_s3 + $0x710] sm:$0xff]  ;;  %v4909_v43 = vld [vmem:[%s13993_s3 + $0x718] sm:$0xff] }
  0xab   :  { %6576 = vmatprep.subr.bf16.mxu1 %v6575_v46  ;;  %v1116_v3 = vadd.f32 %v8965_v18, %v1108_v41  ;;  %v4890_v46 = vld [vmem:[%s13993_s3 + $0x680] sm:$0xff]  ;;  %v1076_v51 = vmul.f32 %v9407_v19, %v8861_v24  ;;  %6592 = vmatprep.subr.bf16.mxu0 %v6591_v57  ;;  %v1071_v55 = vadd.f32 %v1065_v34, %v1057_v13  ;;  %v4892_v34 = vld [vmem:[%s13993_s3 + $0x690] sm:$0xff] }
  0xac   :  { %v1093_v31 = vmul.f32 %v9425_v11, %v8864_v59  ;;  %v1042_v10 = vadd.f32 %v1036_v63, %v1028_v4  ;;  %v1064_v5 = vmul.f32 %v14142_v49, %v8814_v54  ;;  %v14172_v33 = vpack.c.bf16 %v9232_v38, %v9227_v22  ;;  %v4916_v49 = vld [vmem:[%s13993_s3 + $0x750] sm:$0xff]  ;;  %v4917_v54 = vld [vmem:[%s13993_s3 + $0x758] sm:$0xff]  ;;  %v4910_v21 = vld [vmem:[%s13993_s3 + $0x720] sm:$0xff] }
  0xad   :  { %v1068_v57 = vadd.f32 %v1062_v60, %v1054_v16  ;;  %v1107_v42 = vmul.f32 %v14144_v61, %v8914_v52  ;;  %v1434_v41 = vmul.f32 %v8792_v28, %v9099_v58  ;;  %v1442_v2 = vmul.f32 %v8799_v39, %v9117_v8  ;;  %v4911_v16 = vld [vmem:[%s13993_s3 + $0x728] sm:$0xff]  ;;  %v9474_v60 = vld [vmem:[%s13990_s0 + $0x160] sm:$0xff] }
  0xae   :  { %6578 = vmatpush3.bf16.msra.mxu1 %v14172_v33  ;;  %v1085_v22 = vadd.f32 %v1079_v12, %v1071_v55  ;;  %v1056_v38 = vadd.f32 %v1050_v47, %v1042_v10  ;;  %v1078_v61 = vmul.f32 %v8476_v62, %v8861_v24  ;;  %v1456_v28 = vmul.f32 %v8806_v36, %v9162_v29  ;;  %v4893_v62 = vld [vmem:[%s13993_s3 + $0x698] sm:$0xff]  ;;  %v4919_v12 = vld [vmem:[%s13993_s3 + $0x768] sm:$0xff]  ;;  %v4894_v4 = vld [vmem:[%s13993_s3 + $0x6a0] sm:$0xff] }
  0xaf   :  { %6580 = vmatprep.subr.bf16.mxu1 %v6579_v50  ;;  %6594 = vmatpush3.bf16.msra.mxu0 %v6593_v17  ;;  %v6597_v15 = vpack.c.bf16 %v4891_v37, %v4890_v46  ;;  %v6599_v39 = vpack.c.bf16 %v4909_v43, %v4908_v14  ;;  %v1448_v50 = vadd.f32 %v1442_v2, %v1434_v41  ;;  %v1122_v25 = vmax.f32 %v1116_v3, 0.0  ;;  %v4895_v47 = vld [vmem:[%s13993_s3 + $0x6a8] sm:$0xff]  ;;  %v14174_v14 = vld [vmem:[#allocation8_spill] sm:$0xff]  ;;  %v4913_v41 = vld [vmem:[%s13993_s3 + $0x738] sm:$0xff] }
  0xb0   :  { %v1470_v44 = vmul.f32 %v8829_v23, %v9190_v40  ;;  %6596 = vmatprep.subr.bf16.mxu0 %v6595_v30  ;;  %v1099_v24 = vadd.f32 %v1093_v31, %v1085_v22  ;;  %v1070_v0 = vadd.f32 %v1064_v5, %v1056_v38  ;;  %v1092_v36 = vmul.f32 %v8501_v1, %v8864_v59  ;;  %v4918_v23 = vld [vmem:[%s13993_s3 + $0x760] sm:$0xff]  ;;  %v4920_v22 = vld [vmem:[%s13993_s3 + $0x770] sm:$0xff]  ;;  %v4921_v38 = vld [vmem:[%s13993_s3 + $0x778] sm:$0xff] }
  0xb1   :  { %v6616_v63 = vpack.c.bf16 %v4917_v54, %v4916_v49  ;;  %v1090_v1 = vmul.f32 %v9474_v60, %v8864_v59  ;;  %v1484_v13 = vmul.f32 %v8853_v35, %v9334_v26  ;;  %v1082_v59 = vadd.f32 %v1076_v51, %v1068_v57  ;;  %v14173_v35 = vld [vmem:[#allocation24_spill] sm:$0xff] }
  0xb2   :  { %6582 = vmatpush3.bf16.msra.mxu1 %v6581_v6  ;;  %v1462_v6 = vadd.f32 %v1456_v28, %v1448_v50  ;;  %v1113_v17 = vadd.f32 %v1107_v42, %v1099_v24  ;;  %v1084_v30 = vadd.f32 %v1078_v61, %v1070_v0  ;;  %v1106_v3 = vmul.f32 %v14173_v35, %v8914_v52  ;;  %v4912_v42 = vld [vmem:[%s13993_s3 + $0x730] sm:$0xff]  ;;  %v14175_v49 = vld [vmem:[#allocation12_spill] sm:$0xff] }
  0xb3   :  { %6615 = vmatprep.subr.bf16.mxu1 %v14123_v27  ;;  %6598 = vmatpush3.bf16.msra.mxu0 %v6597_v15  ;;  %v6601_v46 = vpack.c.bf16 %v4893_v62, %v4892_v34  ;;  %v1498_v43 = vmul.f32 %v14174_v14, %v9351_v20  ;;  %v9495_v55 = vstv %s9411_s14  ;;  %v6603_v31 = vpack.c.bf16 %v4911_v16, %v4910_v21  ;;  %v9521_v28 = vld [vmem:[%s13990_s0 + $0x190] sm:$0xff]  ;;  %v9530_v62 = vld [vmem:[%s13990_s0] sm:$0xff]  ;;  %s9972_s14 = sld [smem:[#allocation2 + $0x206]] }
  0xb4   :  { %v1476_v37 = vadd.f32 %v1470_v44, %v1462_v6  ;;  %6600 = vmatprep.subr.bf16.mxu0 %v6599_v39  ;;  %v1121_v10 = vadd.f32 %v8965_v18, %v1113_v17  ;;  %v1098_v5 = vadd.f32 %v1092_v36, %v1084_v30  ;;  %v9499_v51 = vstv %s9431_s12  ;;  %v9537_v0 = vld [vmem:[%s13990_s0 + $0x30] sm:$0xff]  ;;  %v4915_v6 = vld [vmem:[%s13993_s3 + $0x748] sm:$0xff]  ;;  %s9621_s12 = sld [smem:[#allocation2 + $0x201]] }
  0xb5   :  { %1285 = vmatmul.mubr.f32.vlgmr.msra.gmra.mrb[6].mxu1 %v1122_v25  ;;  %v6619_v33 = vpack.c.bf16 %v4919_v12, %v4918_v23  ;;  %v6605_v57 = vpack.c.bf16 %v4895_v47, %v4894_v4  ;;  %v1512_v54 = vmul.f32 %v14175_v49, %v9389_v48  ;;  %v1096_v61 = vadd.f32 %v1090_v1, %v1082_v59  ;;  %v14176_v25 = vld [vmem:[#allocation13_spill] sm:$0xff]  ;;  %v4897_v23 = vld [vmem:[%s13993_s3 + $0x6b8] sm:$0xff]  ;;  %v4914_v1 = vld [vmem:[%s13993_s3 + $0x740] sm:$0xff] }
  0xb6   :  { %6617 = vmatpush1.bf16.msra.mxu1 %v6616_v63  ;;  %v1490_v2 = vadd.f32 %v1484_v13, %v1476_v37  ;;  %v1104_v15 = vmul.f32 %v9521_v28, %v8914_v52  ;;  %v1127_v39 = vmax.f32 %v1121_v10, 0.0  ;;  %v1112_v50 = vadd.f32 %v1106_v3, %v1098_v5  ;;  %v4896_v63 = vld [vmem:[%s13993_s3 + $0x6b0] sm:$0xff]  ;;  %v4922_v47 = vld [vmem:[%s13993_s3 + $0x780] sm:$0xff]  ;;  %v4923_v59 = vld [vmem:[%s13993_s3 + $0x788] sm:$0xff] }
  0xb7   :  { %6618 = vmatprep.subr.bf16.mxu1 %v14123_v27  ;;  %6602 = vmatpush3.bf16.msra.mxu0 %v6601_v46  ;;  %v1526_v34 = vmul.f32 %v14176_v25, %v9495_v55  ;;  %v1433_v24 = vmul.f32 %v9530_v62, %v9099_v58  ;;  %v1441_v52 = vmul.f32 %v9537_v0, %v9117_v8  ;;  %v14177_v12 = vld [vmem:[#allocation18_spill] sm:$0xff]  ;;  %v14178_v46 = vld [vmem:[#allocation11_spill] sm:$0xff]  ;;  %v9575_v10 = vstv %s9501_s30  ;;  %v4966_v49 = vld [vmem:[%s13993_s3 + $0x880] sm:$0xff] }
  0xb8   :  { %v1504_v44 = vadd.f32 %v1498_v43, %v1490_v2  ;;  %6604 = vmatprep.subr.bf16.mxu0 %v6603_v31  ;;  %v6607_v36 = vpack.c.bf16 %v4913_v41, %v4912_v42  ;;  %4938 = vmatprep.mubr.msk.f32.mxu1 %vm560_vm0, %v1127_v39  ;;  %v9549_v21 = vadd.f32 %v8965_v18, %v1112_v50  ;;  %v4898_v43 = vld [vmem:[%s13993_s3 + $0x6c0] sm:$0xff]  ;;  %v4899_v31 = vld [vmem:[%s13993_s3 + $0x6c8] sm:$0xff]  ;;  %v14179_v5 = vld [vmem:[#allocation19_spill] sm:$0xff] }
  0xb9   :  { %v6622_v16 = vpack.c.bf16 %v4921_v38, %v4920_v22  ;;  %v1540_v4 = vmul.f32 %v14177_v12, %v9499_v51  ;;  %v1110_v17 = vadd.f32 %v1104_v15, %v1096_v61  ;;  %v6609_v30 = vpack.c.bf16 %v4897_v23, %v4896_v63  ;;  %v4965_v2 = vld [vmem:[%s13993_s3 + $0x878] sm:$0xff]  ;;  %v14181_v22 = vld [vmem:[#allocation16_spill] sm:$0xff]  ;;  %v4924_v61 = vld [vmem:[%s13993_s3 + $0x790] sm:$0xff] }
  0xba   :  { %6620 = vmatpush1.bf16.msra.mxu1 %v6619_v33  ;;  %v1518_v13 = vadd.f32 %v1512_v54, %v1504_v44  ;;  %v1447_v3 = vadd.f32 %v1441_v52, %v1433_v24  ;;  %v1455_v37 = vmul.f32 %v14178_v46, %v9162_v29  ;;  %v6611_v14 = vpack.c.bf16 %v4915_v6, %v4914_v1  ;;  %v4925_v15 = vld [vmem:[%s13993_s3 + $0x798] sm:$0xff]  ;;  %v14182_v44 = vld [vmem:[#allocation21_spill] sm:$0xff] }
  0xbb   :  { %6621 = vmatprep.subr.bf16.mxu1 %v14123_v27  ;;  %6606 = vmatpush3.bf16.msra.mxu0 %v6605_v57  ;;  %v1436_v33 = vmul.f32 %v14179_v5, %v9099_v58  ;;  %v14180_v57 = vld [vmem:[#allocation20_spill] sm:$0xff]  ;;  %v6625_v41 = vpack.c.bf16 %v4923_v59, %v4922_v47  ;;  %v1458_v38 = vmul.f32 %v14181_v22, %v9162_v29  ;;  %v14184_v6 = vld [vmem:[#allocation17_spill] sm:$0xff]  ;;  %v4968_v59 = vld [vmem:[%s13993_s3 + $0x890] sm:$0xff] }
  0xbc   :  { %v1532_v35 = vadd.f32 %v1526_v34, %v1518_v13  ;;  %6608 = vmatprep.subr.bf16.mxu0 %v6607_v36  ;;  %v1444_v42 = vmul.f32 %v14180_v57, %v9117_v8  ;;  %v1118_v39 = vadd.f32 %v8965_v18, %v1110_v17  ;;  %v1472_v25 = vmul.f32 %v14182_v44, %v9190_v40  ;;  %v14183_v36 = vld [vmem:[#allocation14_spill] sm:$0xff]  ;;  %v4950_v18 = vld [vmem:[%s13993_s3 + $0x800] sm:$0xff]  ;;  %v4967_v47 = vld [vmem:[%s13993_s3 + $0x888] sm:$0xff] }
  0xbd   :  { %v6613_v34 = vpack.c.bf16 %v4899_v31, %v4898_v43  ;;  %v1461_v52 = vadd.f32 %v1455_v37, %v1447_v3  ;;  %v1469_v63 = vmul.f32 %v14183_v36, %v9190_v40  ;;  %v6645_v23 = vpack.c.bf16 %v4966_v49, %v4965_v2  ;;  %v4951_v5 = vld [vmem:[%s13993_s3 + $0x808] sm:$0xff]  ;;  %v4969_v49 = vld [vmem:[%s13993_s3 + $0x898] sm:$0xff]  ;;  %v4928_v22 = vld [vmem:[%s13993_s3 + $0x7b0] sm:$0xff] }
  0xbe   :  { %6623 = vmatpush1.bf16.msra.mxu1 %v6622_v16  ;;  %v1546_v54 = vadd.f32 %v1540_v4, %v1532_v35  ;;  %v1450_v50 = vadd.f32 %v1444_v42, %v1436_v33  ;;  %v4949_v16 = vld [vmem:[%s13993_s3 + $0x7f8] sm:$0xff]  ;;  %v1486_v13 = vmul.f32 %v14184_v6, %v9334_v26  ;;  %v6628_v12 = vpack.c.bf16 %v4925_v15, %v4924_v61  ;;  %v4926_v4 = vld [vmem:[%s13993_s3 + $0x7a0] sm:$0xff]  ;;  %v4952_v33 = vld [vmem:[%s13993_s3 + $0x810] sm:$0xff] }
  0xbf   :  { %6624 = vmatprep.subr.bf16.mxu1 %v14123_v27  ;;  %6610 = vmatpush3.bf16.msra.mxu0 %v6609_v30  ;;  %v1124_v17 = vmax.f32 %v1118_v39, 0.0  ;;  %v4927_v30 = vld [vmem:[%s13993_s3 + $0x7a8] sm:$0xff]  ;;  %v6647_v3 = vpack.c.bf16 %v4950_v18, %v4949_v16  ;;  %v1475_v37 = vadd.f32 %v1469_v63, %v1461_v52  ;;  %v6649_v31 = vpack.c.bf16 %v4968_v59, %v4967_v47  ;;  %v14186_v42 = vld [vmem:[#allocation10_spill] sm:$0xff]  ;;  %v4953_v15 = vld [vmem:[%s13993_s3 + $0x818] sm:$0xff] }
  0xc0   :  { %v1554_v24 = vadd.f32 %v9575_v10, %v1546_v54  ;;  %6612 = vmatprep.subr.bf16.mxu0 %v6611_v14  ;;  %v1464_v1 = vadd.f32 %v1458_v38, %v1450_v50  ;;  %v14185_v14 = vld [vmem:[#allocation15_spill] sm:$0xff]  ;;  %v6631_v2 = vpack.c.bf16 %v4927_v30, %v4926_v4  ;;  %v4970_v54 = vld [vmem:[%s13993_s3 + $0x8a0] sm:$0xff]  ;;  %v6651_v61 = vpack.c.bf16 %v4952_v33, %v4951_v5  ;;  %v14187_v50 = vld [vmem:[#allocation22_spill] sm:$0xff] }
  0xc1   :  { %v1483_v43 = vmul.f32 %v14185_v14, %v9334_v26  ;;  %v4929_v38 = vld [vmem:[%s13993_s3 + $0x7b8] sm:$0xff]  ;;  %v1497_v44 = vmul.f32 %v14187_v50, %v9351_v20  ;;  %v4972_v52 = vld [vmem:[%s13993_s3 + $0x8b0] sm:$0xff]  ;;  %v4930_v18 = vld [vmem:[%s13993_s3 + $0x7c0] sm:$0xff] }
  0xc2   :  { %6626 = vmatpush1.bf16.msra.mxu1 %v6625_v41  ;;  %v1478_v35 = vadd.f32 %v1472_v25, %v1464_v1  ;;  %v1560_v46 = vmax.f32 %v1554_v24, 0.0  ;;  %v1500_v41 = vmul.f32 %v14186_v42, %v9351_v20  ;;  %v6653_v25 = vpack.c.bf16 %v4970_v54, %v4969_v49  ;;  %v4971_v24 = vld [vmem:[%s13993_s3 + $0x8a8] sm:$0xff]  ;;  %v14188_v63 = vld [vmem:[#allocation26_spill] sm:$0xff]  ;;  %v9698_v59 = vld [vmem:[%s13990_s0 + $0x58] sm:$0xff] }
  0xc3   :  { %6627 = vmatprep.subr.bf16.mxu1 %v14123_v27  ;;  %6614 = vmatpush3.bf16.msra.mxu0 %v6613_v34  ;;  %v1489_v39 = vadd.f32 %v1483_v43, %v1475_v37  ;;  %v4954_v34 = vld [vmem:[%s13993_s3 + $0x820] sm:$0xff]  ;;  %v6634_v16 = vpack.c.bf16 %v4929_v38, %v4928_v22  ;;  %v9676_v1 = vld [vmem:[%s13990_s0 + $0x28] sm:$0xff]  ;;  %v6657_v14 = vpack.c.bf16 %v4972_v52, %v4971_v24  ;;  %v4956_v43 = vld [vmem:[%s13993_s3 + $0x830] sm:$0xff] }
  0xc4   :  { %6646 = vmatprep.subr.bf16.mxu0 %v6645_v23  ;;  %v1492_v57 = vadd.f32 %v1486_v13, %v1478_v35  ;;  %v1514_v23 = vmul.f32 %v14188_v63, %v9389_v48  ;;  %v1438_v6 = vmul.f32 %v9676_v1, %v9099_v58  ;;  %v9681_v13 = vstv %s9610_s21  ;;  %v4931_v4 = vld [vmem:[%s13993_s3 + $0x7c8] sm:$0xff]  ;;  %v4974_v5 = vld [vmem:[%s13993_s3 + $0x8c0] sm:$0xff]  ;;  %v9743_v50 = vld [vmem:[%s13990_s0 + $0x50] sm:$0xff]  ;;  %s10008_s21 = sld [smem:[#allocation2 + $0x207]] }
  0xc5   :  { %v9693_v47 = vld [vmem:[%s13993_s3 + $0x828] sm:$0xff]  ;;  %v6655_v37 = vpack.c.bf16 %v4954_v34, %v4953_v15  ;;  %v1503_v33 = vadd.f32 %v1497_v44, %v1489_v39  ;;  %v1474_v22 = vmul.f32 %v9324_v7, %v9190_v40  ;;  %v6637_v38 = vpack.c.bf16 %v4931_v4, %v4930_v18  ;;  %v9736_v15 = vld [vmem:[%s13990_s0 + $0x20] sm:$0xff]  ;;  %v4933_v34 = vld [vmem:[%s13993_s3 + $0x7d8] sm:$0xff] }
  0xc6   :  { %6629 = vmatpush1.bf16.msra.mxu1 %v6628_v12  ;;  %1355 = vmatmul.mubr.f32.vlgmr.msra.gmra.mrb[6].mxu0 %v1124_v17  ;;  %v1506_v36 = vadd.f32 %v1500_v41, %v1492_v57  ;;  %v9684_v12 = vstv %s9621_s12  ;;  %v1446_v17 = vmul.f32 %v9698_v59, %v9117_v8  ;;  %v9705_v30 = vld [vmem:[%s13990_s0 + $0x88] sm:$0xff]  ;;  %v1437_v39 = vmul.f32 %v9736_v15, %v9099_v58  ;;  %v9750_v44 = vld [vmem:[%s13990_s0 + $0x80] sm:$0xff]  ;;  %s10109_s12 = sld [smem:[#allocation4 + $0x4]] }
  0xc7   :  { %6630 = vmatprep.subr.bf16.mxu1 %v14123_v27  ;;  %6648 = vmatpush3.bf16.msra.mxu0 %v6647_v3  ;;  %v1460_v35 = vmul.f32 %v9705_v30, %v9162_v29  ;;  %v9710_v3 = vstv %s9627_s29  ;;  %v14189_v57 = vld [vmem:[#allocation25_spill] sm:$0xff]  ;;  %v1445_v7 = vmul.f32 %v9743_v50, %v9117_v8  ;;  %v6659_v24 = vpack.c.bf16 %v4956_v43, %v9693_v47  ;;  %s10584_s29 = sld [smem:[#allocation2 + $0x287]] }
  0xc8   :  { %1721 = vmatprep.mubr.f32.mxu0 %v1560_v46  ;;  %6650 = vmatprep.subr.bf16.mxu0 %v6649_v31  ;;  %v9713_v46 = vstv %s9629_s28  ;;  %v4973_v31 = vld [vmem:[%s13993_s3 + $0x8b8] sm:$0xff]  ;;  %v1511_v42 = vmul.f32 %v14189_v57, %v9389_v48  ;;  %v1520_v41 = vadd.f32 %v1514_v23, %v1506_v36  ;;  %v1452_v54 = vadd.f32 %v1446_v17, %v1438_v6  ;;  %v9762_v36 = vld [vmem:[%s13993_s3 + $0x7e0] sm:$0xff]  ;;  %v9767_v63 = vld [vmem:[%s13993_s3 + $0x7e8] sm:$0xff]  ;;  %s11125_s28 = sld [smem:[#allocation2 + $0x305]] }
  0xc9   :  { %v6661_v52 = vpack.c.bf16 %v4974_v5, %v4973_v31  ;;  %v4957_v6 = vld [vmem:[%s13993_s3 + $0x838] sm:$0xff]  ;;  %v14192_v47 = vld [vmem:[#allocation29_spill] sm:$0xff]  ;;  %v1451_v43 = vadd.f32 %v1445_v7, %v1437_v39  ;;  %v6643_v7 = vpack.c.bf16 %v9767_v63, %v9762_v36 }
  0xca   :  { %6632 = vmatpush1.bf16.msra.mxu1 %v6631_v2  ;;  %v14190_v2 = vld [vmem:[#allocation28_spill] sm:$0xff]  ;;  %v1466_v23 = vadd.f32 %v1460_v35, %v1452_v54  ;;  %v1517_v4 = vadd.f32 %v1511_v42, %v1503_v33  ;;  %v1525_v17 = vmul.f32 %v14192_v47, %v9495_v55  ;;  %v9784_v35 = vld [vmem:[%s13990_s0 + $0xb0] sm:$0xff]  ;;  %v4975_v5 = vld [vmem:[%s13993_s3 + $0x8c8] sm:$0xff] }
  0xcb   :  { %6633 = vmatprep.subr.bf16.mxu1 %v14123_v27  ;;  %6652 = vmatpush3.bf16.msra.mxu0 %v6651_v61  ;;  %v1528_v49 = vmul.f32 %v14190_v2, %v9495_v55  ;;  %v4932_v61 = vld [vmem:[%s13993_s3 + $0x7d0] sm:$0xff]  ;;  %v1473_v31 = vmul.f32 %v9784_v35, %v9190_v40  ;;  %v4959_v63 = vld [vmem:[%s13993_s3 + $0x848] sm:$0xff] }
  0xcc   :  { %6654 = vmatprep.subr.bf16.mxu0 %v6653_v25  ;;  %v1459_v25 = vmul.f32 %v9750_v44, %v9162_v29  ;;  %v4976_v33 = vld [vmem:[%s13993_s3 + $0x8d0] sm:$0xff]  ;;  %v1480_v54 = vadd.f32 %v1474_v22, %v1466_v23  ;;  %v6640_v39 = vpack.c.bf16 %v4933_v34, %v4932_v61 }
  0xcd   :  { %v1534_v57 = vadd.f32 %v1528_v49, %v1520_v41  ;;  %v14193_v42 = vld [vmem:[#allocation30_spill] sm:$0xff]  ;;  %v14194_v49 = vld [vmem:[#allocation23_spill] sm:$0xff]  ;;  %v6665_v36 = vpack.c.bf16 %v4976_v33, %v4975_v5  ;;  %v4978_v5 = vld [vmem:[%s13993_s3 + $0x8e0] sm:$0xff] }
  0xce   :  { %6635 = vmatpush1.bf16.msra.mxu1 %v6634_v16  ;;  %v9772_v16 = vld [vmem:[%s13990_s0 + $0xe8] sm:$0xff]  ;;  %v1542_v2 = vmul.f32 %v14193_v42, %v9499_v51  ;;  %v1465_v47 = vadd.f32 %v1459_v25, %v1451_v43  ;;  %v1435_v22 = vmul.f32 %v14194_v49, %v9099_v58  ;;  %v1516_v25 = vmul.f32 %v9394_v53, %v9389_v48  ;;  %v9823_v43 = vld [vmem:[%s13990_s0 + $0x110] sm:$0xff]  ;;  %v9833_v53 = vld [vmem:[%s13993_s3 + $0x978] sm:$0xff] }
  0xcf   :  { %6636 = vmatprep.subr.bf16.mxu1 %v14123_v27  ;;  %14191 = vst [vmem:[#allocation24_spill] sm:$0xff] %v9772_v16  ;;  %v1488_v18 = vmul.f32 %v9772_v16, %v9334_v26  ;;  %6656 = vmatpush3.bf16.msra.mxu0 %v6655_v37  ;;  %v4958_v37 = vld [vmem:[%s13993_s3 + $0x840] sm:$0xff]  ;;  %v4960_v58 = vld [vmem:[%s13993_s3 + $0x850] sm:$0xff]  ;;  %v14196_v33 = vld [vmem:[#allocation27_spill] sm:$0xff] }
  0xd0   :  { %6658 = vmatprep.subr.bf16.mxu0 %v6657_v14  ;;  %v1502_v14 = vmul.f32 %v9370_v56, %v9351_v20  ;;  %v9806_v16 = vld [vmem:[%s13990_s0 + $0xe0] sm:$0xff]  ;;  %v14195_v56 = vld [vmem:[#allocation9_spill] sm:$0xff]  ;;  %v6663_v34 = vpack.c.bf16 %v4958_v37, %v4957_v6  ;;  %v1479_v23 = vadd.f32 %v1473_v31, %v1465_v47  ;;  %v1539_v6 = vmul.f32 %v9298_v9, %v9499_v51  ;;  %v4977_v37 = vld [vmem:[%s13993_s3 + $0x8d8] sm:$0xff] }
  0xd1   :  { %v1487_v41 = vmul.f32 %v9806_v16, %v9334_v26  ;;  %v1494_v61 = vadd.f32 %v1488_v18, %v1480_v54  ;;  %v1531_v18 = vadd.f32 %v1525_v17, %v1517_v4  ;;  %v1548_v31 = vadd.f32 %v1542_v2, %v1534_v57  ;;  %v9855_v9 = vld [vmem:[%s13990_s0 + $0x140] sm:$0xff]  ;;  %v4981_v49 = vld [vmem:[%s13993_s3 + $0x8f8] sm:$0xff] }
  0xd2   :  { %6638 = vmatpush1.bf16.msra.mxu1 %v6637_v38  ;;  %v1443_v38 = vmul.f32 %v14195_v56, %v9117_v8  ;;  %v1501_v8 = vmul.f32 %v9823_v43, %v9351_v20  ;;  %v1457_v42 = vmul.f32 %v14196_v33, %v9162_v29  ;;  %v1530_v4 = vmul.f32 %v9425_v11, %v9495_v55  ;;  %v9863_v29 = vld [vmem:[%s13990_s0 + $0x8] sm:$0xff] }
  0xd3   :  { %6639 = vmatprep.subr.bf16.mxu1 %v14123_v27  ;;  %6660 = vmatpush3.bf16.msra.mxu0 %v6659_v24  ;;  %v9838_v24 = vld [vmem:[%s13993_s3 + $0x980] sm:$0xff]  ;;  %v1493_v17 = vadd.f32 %v1487_v41, %v1479_v23  ;;  %14197 = vst [vmem:[#allocation8_spill] sm:$0xff] %v9855_v9  ;;  %v1515_v57 = vmul.f32 %v9855_v9, %v9389_v48  ;;  %14198 = vst [vmem:[#allocation12_spill] sm:$0xff] %v9863_v29  ;;  %v4999_v23 = vld [vmem:[%s13993_s3 + $0x988] sm:$0xff] }
  0xd4   :  { %6662 = vmatprep.subr.bf16.mxu0 %v6661_v52  ;;  %v1508_v52 = vadd.f32 %v1502_v14, %v1494_v61  ;;  %v1449_v2 = vadd.f32 %v1443_v38, %v1435_v22  ;;  %v1871_v11 = vmul.f32 %v9863_v29, %v9681_v13  ;;  %v9870_v14 = vld [vmem:[%s13990_s0 + $0x38] sm:$0xff]  ;;  %v6667_v47 = vpack.c.bf16 %v4960_v58, %v4959_v63  ;;  %v4982_v22 = vld [vmem:[%s13993_s3 + $0x900] sm:$0xff]  ;;  %v9887_v38 = vld [vmem:[%s13990_s0 + $0x170] sm:$0xff] }
  0xd5   :  { %14199 = vst [vmem:[#allocation13_spill] sm:$0xff] %v9870_v14  ;;  %v6677_v41 = vpack.c.bf16 %v9838_v24, %v9833_v53  ;;  %v1507_v56 = vadd.f32 %v1501_v8, %v1493_v17  ;;  %14200 = vst [vmem:[#allocation18_spill] sm:$0xff] %v9887_v38  ;;  %v1529_v61 = vmul.f32 %v9887_v38, %v9495_v55  ;;  %v4962_v63 = vld [vmem:[%s13993_s3 + $0x860] sm:$0xff]  ;;  %v9904_v58 = vld [vmem:[%s13990_s0 + $0x1a8] sm:$0xff] }
  0xd6   :  { %6641 = vmatpush1.bf16.msra.mxu1 %v6640_v39  ;;  %v1522_v54 = vadd.f32 %v1516_v25, %v1508_v52  ;;  %v1879_v39 = vmul.f32 %v9870_v14, %v9684_v12  ;;  %v6669_v25 = vpack.c.bf16 %v4978_v5, %v4977_v37  ;;  %v1556_v8 = vadd.f32 %v9575_v10, %v1548_v31  ;;  %v9911_v53 = vld [vmem:[%s13990_s0 + $0x1a0] sm:$0xff]  ;;  %v5000_v31 = vld [vmem:[%s13993_s3 + $0x990] sm:$0xff]  ;;  %v4979_v52 = vld [vmem:[%s13993_s3 + $0x8e8] sm:$0xff] }
  0xd7   :  { %6642 = vmatprep.subr.bf16.mxu1 %v14123_v27  ;;  %6664 = vmatpush3.bf16.msra.mxu0 %v6663_v34  ;;  %v4961_v34 = vld [vmem:[%s13993_s3 + $0x858] sm:$0xff]  ;;  %14201 = vst [vmem:[#allocation11_spill] sm:$0xff] %v9904_v58  ;;  %14202 = vst [vmem:[#allocation19_spill] sm:$0xff] %v9911_v53  ;;  %v1543_v24 = vmul.f32 %v9911_v53, %v9499_v51  ;;  %v4980_v37 = vld [vmem:[%s13993_s3 + $0x8f0] sm:$0xff]  ;;  %v1521_v33 = vadd.f32 %v1515_v57, %v1507_v56  ;;  %v14204_v14 = vmov 0.0  }
  0xd8   :  { %6666 = vmatprep.subr.bf16.mxu0 %v6665_v36  ;;  %v1544_v36 = vmul.f32 %v9904_v58, %v9499_v51  ;;  %v1536_v5 = vadd.f32 %v1530_v4, %v1522_v54  ;;  %v1885_v17 = vadd.f32 %v1879_v39, %v1871_v11  ;;  %v9927_v58 = vld [vmem:[%s13990_s0 + $0x68] sm:$0xff]  ;;  %v4936_v29 = vld [vmem:[%s13993_s3 + $0x7f0] sm:$0xf]  ;;  %v1126_v4 = vmax.f32 %v9549_v21, 0.0  ;;  %v14205_v11 = vld [vmem:[#allocation31_spill] sm:$0xff] }
  0xd9   :  { %14203 = vst [vmem:[#allocation20_spill] sm:$0xff] %v9927_v58  ;;  %v1545_v57 = vadd.f32 %v1539_v6, %v1531_v18  ;;  %v1463_v54 = vadd.f32 %v1457_v42, %v1449_v2  ;;  %v1471_v39 = vmul.f32 %v14205_v11, %v9190_v40  ;;  %v6679_v56 = vpack.c.bf16 %v4982_v22, %v4981_v49  ;;  %v4984_v9 = vld [vmem:[%s13993_s3 + $0x910] sm:$0xff]  ;;  %v4963_v18 = vld [vmem:[%s13993_s3 + $0x868] sm:$0xff]  ;;  %v5001_v42 = vld [vmem:[%s13993_s3 + $0x998] sm:$0xff] }
  0xda   :  { %6644 = vmatpush1.bf16.msra.mxu1 %v6643_v7  ;;  %v1893_v7 = vmul.f32 %v9927_v58, %v9710_v3  ;;  %v6671_v53 = vpack.c.bf16 %v4962_v63, %v4961_v34  ;;  %v4983_v58 = vld [vmem:[%s13993_s3 + $0x908] sm:$0xff]  ;;  %v1535_v38 = vadd.f32 %v1529_v61, %v1521_v33  ;;  %v6673_v21 = vpack.c.bf16 %v4980_v37, %v4979_v52  ;;  %v4964_v40 = vld [vmem:[%s13993_s3 + $0x870] sm:$0xff]  ;;  %v5002_v2 = vld [vmem:[%s13993_s3 + $0x9a0] sm:$0xff] }
  0xdb   :  { %1400 = vmatprep.subr.mxu1 %v14204_v14  ;;  %6668 = vmatpush3.bf16.msra.mxu0 %v6667_v47  ;;  %v6681_v14 = vpack.c.bf16 %v5000_v31, %v4999_v23  ;;  %v1562_v6 = vmax.f32 %v1556_v8, 0.0  ;;  %v1550_v47 = vadd.f32 %v1544_v36, %v1536_v5  ;;  %v9962_v61 = vld [vmem:[%s13990_s0 + $0x98] sm:$0xff]  ;;  %v1477_v34 = vadd.f32 %v1471_v39, %v1463_v54  ;;  %v9999_v52 = vld [vmem:[%s13990_s0 + $0xc8] sm:$0xff]  ;;  %v4988_v39 = vld [vmem:[%s13993_s3 + $0x930] sm:$0xff] }
  0xdc   :  { %6670 = vmatprep.subr.bf16.mxu0 %v6669_v25  ;;  %v1549_v49 = vadd.f32 %v1543_v24, %v1535_v38  ;;  %v1899_v22 = vadd.f32 %v1893_v7, %v1885_v17  ;;  %v1907_v25 = vmul.f32 %v9962_v61, %v9713_v46  ;;  %v1485_v63 = vmul.f32 %v9317_v32, %v9334_v26  ;;  %v4985_v36 = vld [vmem:[%s13993_s3 + $0x918] sm:$0xff]  ;;  %v4986_v32 = vld [vmem:[%s13993_s3 + $0x920] sm:$0xff]  ;;  %v4987_v54 = vld [vmem:[%s13993_s3 + $0x928] sm:$0xff] }
  0xdd   :  { %v9970_v23 = vstv %s9874_s20  ;;  %v6683_v38 = vpack.c.bf16 %v4984_v9, %v4983_v58  ;;  %v6675_v8 = vpack.c.bf16 %v4964_v40, %v4963_v18  ;;  %v6685_v24 = vpack.c.bf16 %v5002_v2, %v5001_v42  ;;  %v5013_v26 = vld [vmem:[%s13993_s3 + $0x9f8] sm:$0xff]  ;;  %v5014_v9 = vld [vmem:[%s13993_s3 + $0xa00] sm:$0xff]  ;;  %v5003_v58 = vld [vmem:[%s13993_s3 + $0x9a8] sm:$0xff]  ;;  %s10488_s20 = sld [smem:[#allocation2 + $0x285]] }
  0xde   :  { %4937 = vmatpush1.msk.msra.mxu1 %vm564_vm1, %v4936_v29  ;;  %v1553_v29 = vadd.f32 %v9575_v10, %v1545_v57  ;;  %v1913_v31 = vadd.f32 %v1907_v25, %v1899_v22  ;;  %v1921_v37 = vmul.f32 %v9999_v52, %v9970_v23  ;;  %v10004_v5 = vstv %s9931_s15  ;;  %v5005_v18 = vld [vmem:[%s13993_s3 + $0x9b8] sm:$0xff]  ;;  %v5006_v40 = vld [vmem:[%s13993_s3 + $0x9c0] sm:$0xff]  ;;  %s10956_s15 = sld [smem:[#allocation2 + $0x301]] }
  0xdf   :  { %1425 = vmatmul.mubr.f32.vlgmr.msra.gmra.mrb[8].mxu1 %v1126_v4  ;;  %6678 = vmatprep.subr.bf16.mxu1 %v6677_v41  ;;  %v9978_v41 = vadd.f32 %v9575_v10, %v1549_v49  ;;  %v1491_v17 = vadd.f32 %v1485_v63, %v1477_v34  ;;  %v1499_v7 = vmul.f32 %v9384_v45, %v9351_v20  ;;  %v5015_v20 = vld [vmem:[%s13993_s3 + $0xa08] sm:$0xff]  ;;  %v5016_v45 = vld [vmem:[%s13993_s3 + $0xa10] sm:$0xff]  ;;  %v10039_v2 = vld [vmem:[%s13990_s0 + $0x18] sm:$0xff]  ;;  %v10053_v34 = vstv %s9972_s14  ;;  %s11207_s14 = sld [smem:[#allocation2 + $0x307]] }
  0xe0   :  { %6680 = vmatpush3.bf16.msra.mxu1 %v6679_v56  ;;  %6672 = vmatpush3.bf16.msra.mxu0 %v6671_v53  ;;  %v1558_v53 = vadd.f32 %v9575_v10, %v1550_v47  ;;  %v1559_v33 = vmax.f32 %v1553_v29, 0.0  ;;  %v6687_v4 = vpack.c.bf16 %v4986_v32, %v4985_v36  ;;  %v6710_v57 = vpack.c.bf16 %v5014_v9, %v5013_v26  ;;  %v10026_v56 = vld [vmem:[%s13990_s0 + $0xf8] sm:$0xff]  ;;  %v10046_v49 = vld [vmem:[%s13990_s0 + $0x48] sm:$0xff]  ;;  %v5008_v26 = vld [vmem:[%s13993_s3 + $0x9d0] sm:$0xff] }
  0xe1   :  { %6682 = vmatprep.subr.bf16.mxu1 %v6681_v14  ;;  %6674 = vmatprep.subr.bf16.mxu0 %v6673_v21  ;;  %v5004_v14 = vld [vmem:[%s13993_s3 + $0x9b0] sm:$0xff]  ;;  %v1935_v21 = vmul.f32 %v10026_v56, %v10004_v5  ;;  %v1927_v42 = vadd.f32 %v1921_v37, %v1913_v31  ;;  %v1873_v47 = vmul.f32 %v10039_v2, %v9681_v13  ;;  %v5007_v32 = vld [vmem:[%s13993_s3 + $0x9c8] sm:$0xff]  ;;  %v10087_v31 = vld [vmem:[%s13990_s0 + $0x78] sm:$0xff] }
  0xe2   :  { %1791 = vmatprep.mubr.f32.mxu1 %v1562_v6  ;;  %v6689_v11 = vpack.c.bf16 %v5004_v14, %v5003_v58  ;;  %v1564_v6 = vmax.f32 %v1558_v53, 0.0  ;;  %v1881_v22 = vmul.f32 %v10046_v49, %v9684_v12  ;;  %v1505_v25 = vadd.f32 %v1499_v7, %v1491_v17  ;;  %v10080_v58 = vld [vmem:[%s13990_s0 + $0x128] sm:$0xff] }
  0xe3   :  { %v1513_v29 = vmul.f32 %v9407_v19, %v9389_v48  ;;  %v6691_v63 = vpack.c.bf16 %v4988_v39, %v4987_v54  ;;  %v6693_v36 = vpack.c.bf16 %v5006_v40, %v5005_v18  ;;  %v4990_v48 = vld [vmem:[%s13993_s3 + $0x940] sm:$0xff]  ;;  %v5017_v19 = vld [vmem:[%s13993_s3 + $0xa18] sm:$0xff]  ;;  %v1941_v9 = vadd.f32 %v1935_v21, %v1927_v42  ;;  %v4991_v54 = vld [vmem:[%s13993_s3 + $0x948] sm:$0xff] }
  0xe4   :  { %6684 = vmatpush3.bf16.msra.mxu1 %v6683_v38  ;;  %6676 = vmatpush3.bf16.msra.mxu0 %v6675_v8  ;;  %v6713_v38 = vpack.c.bf16 %v5016_v45, %v5015_v20  ;;  %v4989_v8 = vld [vmem:[%s13993_s3 + $0x938] sm:$0xff]  ;;  %v1949_v14 = vmul.f32 %v10080_v58, %v10053_v34  ;;  %v1887_v53 = vadd.f32 %v1881_v22, %v1873_v47  ;;  %v10094_v7 = vstv %s10008_s21  ;;  %v4992_v39 = vld [vmem:[%s13993_s3 + $0x950] sm:$0xff]  ;;  %v5010_v45 = vld [vmem:[%s13993_s3 + $0x9e0] sm:$0xff]  ;;  %s10719_s21 = sld [smem:[#allocation4 + $0x5]] }
  0xe5   :  { %6686 = vmatprep.subr.bf16.mxu1 %v6685_v24  ;;  %6709 = vmatprep.subr.bf16.mxu0 %v14123_v27  ;;  %v5018_v24 = vld [vmem:[%s13993_s3 + $0xa20] sm:$0xff]  ;;  %v1895_v37 = vmul.f32 %v10087_v31, %v9710_v3  ;;  %v1527_v17 = vmul.f32 %v9474_v60, %v9495_v55  ;;  %v5019_v60 = vld [vmem:[%s13993_s3 + $0xa28] sm:$0xff]  ;;  %v5020_v55 = vld [vmem:[%s13993_s3 + $0xa30] sm:$0xff] }
  0xe6   :  { %v5009_v20 = vld [vmem:[%s13993_s3 + $0x9d8] sm:$0xff]  ;;  %v1955_v21 = vadd.f32 %v1949_v14, %v1941_v9  ;;  %v10127_v42 = vld [vmem:[%s13990_s0 + $0xa8] sm:$0xff] }
  0xe7   :  { %1722 = vmatmul.mubr.f32.vlgmr.msra.gmra.mrb[8].mxu0 %v1559_v33  ;;  %v1519_v33 = vadd.f32 %v1513_v29, %v1505_v25  ;;  %v10120_v18 = vld [vmem:[%s13990_s0 + $0x158] sm:$0xff]  ;;  %v1909_v47 = vmul.f32 %v10127_v42, %v9713_v46  ;;  %v1541_v25 = vmul.f32 %v9521_v28, %v9499_v51  ;;  %v10134_v29 = vstv %s10055_s13  ;;  %v5022_v28 = vld [vmem:[%s13993_s3 + $0xa40] sm:$0xff]  ;;  %v10161_v9 = vld [vmem:[%s13990_s0 + $0x188] sm:$0xff]  ;;  %s11485_s13 = sld [smem:[#allocation2 + $0x380]] }
  0xe8   :  { %6688 = vmatpush3.bf16.msra.mxu1 %v6687_v4  ;;  %6711 = vmatpush1.bf16.msra.mxu0 %v6710_v57  ;;  %v6695_v4 = vpack.c.bf16 %v4990_v48, %v4989_v8  ;;  %v6716_v57 = vpack.c.bf16 %v5018_v24, %v5017_v19  ;;  %v1963_v40 = vmul.f32 %v10120_v18, %v10094_v7  ;;  %v4993_v8 = vld [vmem:[%s13993_s3 + $0x958] sm:$0xff]  ;;  %v4994_v48 = vld [vmem:[%s13993_s3 + $0x960] sm:$0xff]  ;;  %v5011_v19 = vld [vmem:[%s13993_s3 + $0x9e8] sm:$0xff] }
  0xe9   :  { %6690 = vmatprep.subr.bf16.mxu1 %v6689_v11  ;;  %6712 = vmatprep.subr.bf16.mxu0 %v14123_v27  ;;  %v6697_v11 = vpack.c.bf16 %v5008_v26, %v5007_v32  ;;  %v1533_v22 = vadd.f32 %v1527_v17, %v1519_v33  ;;  %v5021_v51 = vld [vmem:[%s13993_s3 + $0xa38] sm:$0xff]  ;;  %v5012_v24 = vld [vmem:[%s13993_s3 + $0x9f0] sm:$0xff]  ;;  %v4995_v32 = vld [vmem:[%s13993_s3 + $0x968] sm:$0xff]  ;;  %v1977_v14 = vmul.f32 %v10161_v9, %v10134_v29 }
  0xea   :  { %5035 = vmatprep.mubr.msk.f32.mxu0 %vm560_vm0, %v1564_v6  ;;  %v1901_v6 = vadd.f32 %v1895_v37, %v1887_v53  ;;  %v1969_v26 = vadd.f32 %v1963_v40, %v1955_v21  ;;  %v10168_v37 = vld [vmem:[%s13990_s0 + $0xd8] sm:$0xff]  ;;  %v4996_v17 = vld [vmem:[%s13993_s3 + $0x970] sm:$0xff]  ;;  %v10194_v21 = vld [vmem:[%s13993_s3 + $0xaa0] sm:$0xff] }
  0xeb   :  { %v1923_v33 = vmul.f32 %v10168_v37, %v9970_v23  ;;  %v10205_v40 = vld [vmem:[%s13993_s3 + $0xa58] sm:$0xff] }
  0xec   :  { %6692 = vmatpush3.bf16.msra.mxu1 %v6691_v63  ;;  %6714 = vmatpush1.bf16.msra.mxu0 %v6713_v38  ;;  %v6699_v63 = vpack.c.bf16 %v4992_v39, %v4991_v54  ;;  %v6719_v38 = vpack.c.bf16 %v5020_v55, %v5019_v60  ;;  %v1915_v53 = vadd.f32 %v1909_v47, %v1901_v6  ;;  %v10210_v6 = vld [vmem:[%s13993_s3 + $0xa60] sm:$0xff]  ;;  %v10213_v47 = vstv %s10109_s12 }
  0xed   :  { %6694 = vmatprep.subr.bf16.mxu1 %v6693_v36  ;;  %6715 = vmatprep.subr.bf16.mxu0 %v14123_v27  ;;  %v6701_v36 = vpack.c.bf16 %v5010_v45, %v5009_v20  ;;  %v1547_v54 = vadd.f32 %v1541_v25, %v1533_v22  ;;  %v1878_v39 = vmul.f32 %v9537_v0, %v9684_v12  ;;  %v5062_v20 = vld [vmem:[%s13993_s3 + $0xb20] sm:$0xff]  ;;  %v5063_v45 = vld [vmem:[%s13993_s3 + $0xb28] sm:$0xff] }
  0xee   :  { %v6703_v60 = vpack.c.bf16 %v4994_v48, %v4993_v8  ;;  %v6722_v55 = vpack.c.bf16 %v5022_v28, %v5021_v51  ;;  %v10200_v0 = vld [vmem:[%s13993_s3 + $0xaa8] sm:$0xff]  ;;  %v1875_v22 = vmul.f32 %v9676_v1, %v9681_v13  ;;  %v1883_v25 = vmul.f32 %v9698_v59, %v9684_v12  ;;  %v10230_v1 = vld [vmem:[%s13990_s0 + $0x60] sm:$0xff] }
  0xef   :  { %v1929_v8 = vadd.f32 %v1923_v33, %v1915_v53  ;;  %v1555_v28 = vadd.f32 %v9575_v10, %v1547_v54  ;;  %v1892_v59 = vmul.f32 %v10230_v1, %v9710_v3  ;;  %v5064_v10 = vld [vmem:[%s13993_s3 + $0xb30] sm:$0xff]  ;;  %v10248_v53 = vld [vmem:[%s13990_s0 + $0x138] sm:$0xff] }
  0xf0   :  { %6696 = vmatpush3.bf16.msra.mxu1 %v6695_v4  ;;  %6717 = vmatpush1.bf16.msra.mxu0 %v6716_v57  ;;  %v5023_v4 = vld [vmem:[%s13993_s3 + $0xa48] sm:$0xff]  ;;  %v5024_v57 = vld [vmem:[%s13993_s3 + $0xa50] sm:$0xff]  ;;  %v1951_v33 = vmul.f32 %v10248_v53, %v10053_v34 }
  0xf1   :  { %6698 = vmatprep.subr.bf16.mxu1 %v6697_v11  ;;  %6718 = vmatprep.subr.bf16.mxu0 %v14123_v27  ;;  %v1870_v11 = vmul.f32 %v9530_v62, %v9681_v13  ;;  %v6705_v62 = vpack.c.bf16 %v5012_v24, %v5011_v19  ;;  %v6725_v51 = vpack.c.bf16 %v5024_v57, %v5023_v4 }
  0xf2   :  { %v6739_v24 = vpack.c.bf16 %v5063_v45, %v5062_v20  ;;  %v1897_v4 = vmul.f32 %v9705_v30, %v9710_v3  ;;  %v10264_v20 = vld [vmem:[%s13990_s0 + $0x90] sm:$0xff]  ;;  %v1896_v45 = vmul.f32 %v9750_v44, %v9710_v3  ;;  %v5027_v44 = vld [vmem:[%s13993_s3 + $0xa68] sm:$0xff] }
  0xf3   :  { %v1884_v19 = vadd.f32 %v1878_v39, %v1870_v11  ;;  %v1874_v11 = vmul.f32 %v9736_v15, %v9681_v13  ;;  %v1882_v39 = vmul.f32 %v9743_v50, %v9684_v12  ;;  %v1906_v30 = vmul.f32 %v10264_v20, %v9713_v46  ;;  %v5048_v15 = vld [vmem:[%s13993_s3 + $0xab0] sm:$0xff]  ;;  %v5049_v50 = vld [vmem:[%s13993_s3 + $0xab8] sm:$0xff] }
  0xf4   :  { %6700 = vmatpush3.bf16.msra.mxu1 %v6699_v63  ;;  %6720 = vmatpush1.bf16.msra.mxu0 %v6719_v38  ;;  %v6707_v63 = vpack.c.bf16 %v4996_v17, %v4995_v32  ;;  %v1983_v38 = vadd.f32 %v1977_v14, %v1969_v26  ;;  %v6741_v32 = vpack.c.bf16 %v10200_v0, %v10194_v21  ;;  %v5065_v14 = vld [vmem:[%s13993_s3 + $0xb38] sm:$0xff] }
  0xf5   :  { %6702 = vmatprep.subr.bf16.mxu1 %v6701_v36  ;;  %6721 = vmatprep.subr.bf16.mxu0 %v14123_v27  ;;  %v10222_v36 = vld [vmem:[%s13990_s0 + $0x108] sm:$0xff]  ;;  %v6728_v26 = vpack.c.bf16 %v10210_v6, %v10205_v40  ;;  %v1889_v17 = vadd.f32 %v1883_v25, %v1875_v22  ;;  %v6743_v21 = vpack.c.bf16 %v5065_v14, %v5064_v10  ;;  %v5028_v40 = vld [vmem:[%s13993_s3 + $0xa70] sm:$0xff]  ;;  %v10297_v25 = vld [vmem:[%s13990_s0 + $0xb8] sm:$0xff] }
  0xf6   :  { %v1937_v48 = vmul.f32 %v10222_v36, %v10004_v5  ;;  %v1991_v57 = vadd.f32 %v10213_v47, %v1983_v38  ;;  %v1910_v0 = vmul.f32 %v9784_v35, %v9713_v46  ;;  %v10290_v6 = vld [vmem:[%s13990_s0 + $0x168] sm:$0xff]  ;;  %v5066_v38 = vld [vmem:[%s13993_s3 + $0xb40] sm:$0xff] }
  0xf7   :  { %v1965_v35 = vmul.f32 %v10290_v6, %v10094_v7  ;;  %v1903_v22 = vadd.f32 %v1897_v4, %v1889_v17  ;;  %v10315_v14 = vld [vmem:[%s13990_s0 + $0xc0] sm:$0xff]  ;;  %v5029_v4 = vld [vmem:[%s13993_s3 + $0xa78] sm:$0xff] }
  0xf8   :  { %6704 = vmatpush3.bf16.msra.mxu1 %v6703_v60  ;;  %6723 = vmatpush1.bf16.msra.mxu0 %v6722_v55  ;;  %v1943_v54 = vadd.f32 %v1937_v48, %v1929_v8  ;;  %v1561_v60 = vmax.f32 %v1555_v28, 0.0  ;;  %v1898_v55 = vadd.f32 %v1892_v59, %v1884_v19  ;;  %v5067_v8 = vld [vmem:[%s13993_s3 + $0xb48] sm:$0xff]  ;;  %v1997_v48 = vmax.f32 %v1991_v57, 0.0  ;;  %v5030_v57 = vld [vmem:[%s13993_s3 + $0xa80] sm:$0xff] }
  0xf9   :  { %6706 = vmatprep.subr.bf16.mxu1 %v6705_v62  ;;  %6724 = vmatprep.subr.bf16.mxu0 %v14123_v27  ;;  %v1888_v62 = vadd.f32 %v1882_v39, %v1874_v11  ;;  %v1924_v19 = vmul.f32 %v9806_v16, %v9970_v23  ;;  %v6745_v59 = vpack.c.bf16 %v5049_v50, %v5048_v15  ;;  %v5051_v16 = vld [vmem:[%s13993_s3 + $0xac8] sm:$0xff]  ;;  %v5069_v39 = vld [vmem:[%s13993_s3 + $0xb58] sm:$0xff] }
  0xfa   :  { %v1912_v10 = vadd.f32 %v1906_v30, %v1898_v55  ;;  %v1920_v17 = vmul.f32 %v10315_v14, %v9970_v23  ;;  %v1938_v11 = vmul.f32 %v9823_v43, %v10004_v5  ;;  %v14206_v55 = vld [vmem:[#allocation24_spill] sm:$0xff] }
  0xfb   :  { %v1902_v28 = vadd.f32 %v1896_v45, %v1888_v62  ;;  %v1925_v30 = vmul.f32 %v14206_v55, %v9970_v23  ;;  %v10342_v45 = vstv %s10254_s1  ;;  %v14207_v62 = vld [vmem:[#allocation8_spill] sm:$0xff]  ;;  %s11000_s1 = sld [smem:[#allocation2 + $0x302]] }
  0xfc   :  { %6708 = vmatpush3.bf16.msra.mxu1 %v6707_v63  ;;  %6726 = vmatpush1.bf16.msra.mxu0 %v6725_v51  ;;  %v1911_v63 = vmul.f32 %v10297_v25, %v9713_v46  ;;  %v1957_v51 = vadd.f32 %v1951_v33, %v1943_v54  ;;  %v6731_v33 = vpack.c.bf16 %v5028_v40, %v5027_v44 }
  0xfd   :  { %6740 = vmatprep.subr.bf16.mxu1 %v6739_v24  ;;  %6727 = vmatprep.subr.bf16.mxu0 %v14123_v27  ;;  %v5050_v24 = vld [vmem:[%s13993_s3 + $0xac0] sm:$0xff]  ;;  %v1916_v54 = vadd.f32 %v1910_v0, %v1902_v28  ;;  %v1952_v0 = vmul.f32 %v14207_v62, %v10053_v34  ;;  %v6734_v40 = vpack.c.bf16 %v5030_v57, %v5029_v4  ;;  %v10390_v4 = vld [vmem:[%s13990_s0 + $0x118] sm:$0xff] }
  0xfe   :  { %v1971_v43 = vadd.f32 %v1965_v35, %v1957_v51  ;;  %v6749_v44 = vpack.c.bf16 %v5051_v16, %v5050_v24  ;;  %v10356_v35 = vld [vmem:[%s13990_s0 + $0xf0] sm:$0xff]  ;;  %v5031_v24 = vld [vmem:[%s13993_s3 + $0xa88] sm:$0xff]  ;;  %v1939_v57 = vmul.f32 %v10390_v4, %v10004_v5 }
  0xff   :  { %1792 = vmatmul.mubr.f32.vlgmr.msra.gmra.mrb[10].mxu1 %v1561_v60  ;;  %v1917_v60 = vadd.f32 %v1911_v63, %v1903_v22  ;;  %v1930_v50 = vadd.f32 %v1924_v19, %v1916_v54  ;;  %v1926_v22 = vadd.f32 %v1920_v17, %v1912_v10  ;;  %v1934_v63 = vmul.f32 %v10356_v35, %v10004_v5  ;;  %v14208_v51 = vld [vmem:[#allocation18_spill] sm:$0xff]  ;;  %v5070_v54 = vld [vmem:[%s13993_s3 + $0xb60] sm:$0xff] }
 0x100   :  { %6742 = vmatpush3.bf16.msra.mxu1 %v6741_v32  ;;  %6729 = vmatpush1.bf16.msra.mxu0 %v6728_v26  ;;  %v6747_v32 = vpack.c.bf16 %v5067_v8, %v5066_v38  ;;  %v5068_v26 = vld [vmem:[%s13993_s3 + $0xb50] sm:$0xff]  ;;  %v1966_v28 = vmul.f32 %v14208_v51, %v10094_v7  ;;  %v10366_v19 = vstv %s10278_s10  ;;  %v14213_v51 = vld [vmem:[#allocation13_spill] sm:$0xff]  ;;  %s11886_s10 = sld [smem:[#allocation2 + $0x387]] }
 0x101   :  { %6744 = vmatprep.subr.bf16.mxu1 %v6743_v21  ;;  %6730 = vmatprep.subr.bf16.mxu0 %v14123_v27  ;;  %v10347_v21 = vld [vmem:[%s13990_s0 + $0x198] sm:$0xff]  ;;  %v6751_v38 = vpack.c.bf16 %v5069_v39, %v5068_v26  ;;  %v5052_v8 = vld [vmem:[%s13993_s3 + $0xad0] sm:$0xff]  ;;  %v1931_v16 = vadd.f32 %v1925_v30, %v1917_v60  ;;  %v1940_v30 = vadd.f32 %v1934_v63, %v1926_v22  ;;  %v5054_v22 = vld [vmem:[%s13993_s3 + $0xae0] sm:$0xff] }
 0x102   :  { %2158 = vmatprep.mubr.f32.mxu1 %v1997_v48  ;;  %v1979_v15 = vmul.f32 %v10347_v21, %v10134_v29  ;;  %v1944_v48 = vadd.f32 %v1938_v11, %v1930_v50  ;;  %v5032_v10 = vld [vmem:[%s13993_s3 + $0xa90] sm:$0xff]  ;;  %v5071_v11 = vld [vmem:[%s13993_s3 + $0xb68] sm:$0xff]  ;;  %v14211_v60 = vld [vmem:[#allocation19_spill] sm:$0xff] }
 0x103   :  { %v10383_v17 = vld [vmem:[%s13990_s0 + $0x10] sm:$0xff]  ;;  %v1980_v55 = vmul.f32 %v14211_v60, %v10134_v29  ;;  %v10412_v50 = vld [vmem:[%s13990_s0 + $0x120] sm:$0xff]  ;;  %v6755_v60 = vpack.c.bf16 %v5071_v11, %v5070_v54 }
 0x104   :  { %6746 = vmatpush3.bf16.msra.mxu1 %v6745_v59  ;;  %6732 = vmatpush1.bf16.msra.mxu0 %v6731_v33  ;;  %v5053_v59 = vld [vmem:[%s13993_s3 + $0xad8] sm:$0xff]  ;;  %14209 = vst [vmem:[#allocation16_spill] sm:$0xff] %v10383_v17  ;;  %v1872_v33 = vmul.f32 %v10383_v17, %v9681_v13  ;;  %v10403_v13 = vld [vmem:[%s13990_s0 + $0x40] sm:$0xff]  ;;  %v1958_v39 = vadd.f32 %v1952_v0, %v1944_v48  ;;  %v10424_v48 = vstv %s10330_s22  ;;  %s12839_s22 = sld [smem:[#allocation2 + $0x480]] }
 0x105   :  { %6748 = vmatprep.subr.bf16.mxu1 %v6747_v32  ;;  %6733 = vmatprep.subr.bf16.mxu0 %v14123_v27  ;;  %v1985_v32 = vadd.f32 %v1979_v15, %v1971_v43  ;;  %14210 = vst [vmem:[#allocation21_spill] sm:$0xff] %v10403_v13  ;;  %v1880_v26 = vmul.f32 %v10403_v13, %v9684_v12  ;;  %v14212_v15 = vld [vmem:[#allocation12_spill] sm:$0xff] }
 0x106   :  { %v1948_v43 = vmul.f32 %v10412_v50, %v10053_v34  ;;  %v2308_v62 = vmul.f32 %v14212_v15, %v10342_v45  ;;  %v2316_v17 = vmul.f32 %v14213_v51, %v10366_v19  ;;  %v6753_v12 = vpack.c.bf16 %v5053_v59, %v5052_v8  ;;  %v5073_v8 = vld [vmem:[%s13993_s3 + $0xb78] sm:$0xff]  ;;  %v5078_v15 = vld [vmem:[%s13993_s3 + $0xba0] sm:$0xff] }
 0x107   :  { %v6737_v0 = vpack.c.bf16 %v5032_v10, %v5031_v24  ;;  %v1972_v63 = vadd.f32 %v1966_v28, %v1958_v39  ;;  %v1945_v28 = vadd.f32 %v1939_v57, %v1931_v16  ;;  %v5094_v24 = vld [vmem:[%s13993_s3 + $0xc20] sm:$0xff]  ;;  %v5095_v10 = vld [vmem:[%s13993_s3 + $0xc28] sm:$0xff]  ;;  %v10452_v54 = vadd.f32 %v10213_v47, %v1985_v32  ;;  %v10457_v57 = vld [vmem:[%s13990_s0 + $0x70] sm:$0xff] }
 0x108   :  { %6750 = vmatpush3.bf16.msra.mxu1 %v6749_v44  ;;  %6735 = vmatpush1.bf16.msra.mxu0 %v6734_v40  ;;  %v5055_v44 = vld [vmem:[%s13993_s3 + $0xae8] sm:$0xff]  ;;  %v5072_v40 = vld [vmem:[%s13993_s3 + $0xb70] sm:$0xff]  ;;  %v1886_v16 = vadd.f32 %v1880_v26, %v1872_v33  ;;  %14215 = vst [vmem:[#allocation17_spill] sm:$0xff] %v10457_v57  ;;  %v1894_v11 = vmul.f32 %v10457_v57, %v9710_v3 }
 0x109   :  { %6752 = vmatprep.subr.bf16.mxu1 %v6751_v38  ;;  %6736 = vmatprep.subr.bf16.mxu0 %v14123_v27  ;;  %v10441_v38 = vld [vmem:[%s13990_s0 + $0x148] sm:$0xff]  ;;  %v1986_v39 = vadd.f32 %v1980_v55, %v1972_v63  ;;  %v1954_v51 = vadd.f32 %v1948_v43, %v1940_v30  ;;  %v10470_v33 = vld [vmem:[%s13990_s0 + $0x150] sm:$0xff]  ;;  %v2322_v3 = vadd.f32 %v2316_v17, %v2308_v62  ;;  %v14217_v55 = vld [vmem:[#allocation20_spill] sm:$0xff]  ;;  %v14219_v17 = vmov 0.0  }
 0x10a   :  { %14214 = vst [vmem:[#allocation14_spill] sm:$0xff] %v10441_v38  ;;  %v1953_v59 = vmul.f32 %v10441_v38, %v10053_v34  ;;  %v5079_v32 = vld [vmem:[%s13993_s3 + $0xba8] sm:$0xff]  ;;  %14216 = vst [vmem:[#allocation15_spill] sm:$0xff] %v10470_v33  ;;  %v1962_v26 = vmul.f32 %v10470_v33, %v10094_v7  ;;  %v2330_v63 = vmul.f32 %v14217_v55, %v10424_v48  ;;  %v5033_v38 = vld [vmem:[%s13993_s3 + $0xa98] sm:$0xf]  ;;  %v10486_v33 = vstv %s10368_s18  ;;  %s11834_s18 = sld [smem:[#allocation2 + $0x386]] }
 0x10b   :  { %v6757_v57 = vpack.c.bf16 %v5055_v44, %v5054_v22  ;;  %v6759_v30 = vpack.c.bf16 %v5073_v8, %v5072_v40  ;;  %v5056_v43 = vld [vmem:[%s13993_s3 + $0xaf0] sm:$0xff]  ;;  %v10483_v13 = vadd.f32 %v10213_v47, %v1986_v39  ;;  %v1563_v62 = vmax.f32 %v9978_v41, 0.0  ;;  %v5097_v44 = vld [vmem:[%s13993_s3 + $0xc38] sm:$0xff]  ;;  %v10525_v55 = vld [vmem:[%s13990_s0 + $0x180] sm:$0xff] }
 0x10c   :  { %6754 = vmatpush3.bf16.msra.mxu1 %v6753_v12  ;;  %6738 = vmatpush1.bf16.msra.mxu0 %v6737_v0  ;;  %v6771_v12 = vpack.c.bf16 %v5095_v10, %v5094_v24  ;;  %v5057_v0 = vld [vmem:[%s13993_s3 + $0xaf8] sm:$0xff]  ;;  %v5096_v22 = vld [vmem:[%s13993_s3 + $0xc30] sm:$0xff]  ;;  %v1959_v40 = vadd.f32 %v1953_v59, %v1945_v28  ;;  %v6773_v8 = vpack.c.bf16 %v5079_v32, %v5078_v15  ;;  %v5074_v24 = vld [vmem:[%s13993_s3 + $0xb80] sm:$0xff]  ;;  %v1999_v39 = vmax.f32 %v10452_v54, 0.0 }
 0x10d   :  { %14218 = vst [vmem:[#allocation10_spill] sm:$0xff] %v10483_v13  ;;  %6756 = vmatprep.subr.bf16.mxu1 %v6755_v60  ;;  %1837 = vmatprep.subr.mxu0 %v14219_v17  ;;  %v10504_v60 = vld [vmem:[%s13990_s0 + $0x178] sm:$0xff]  ;;  %v5075_v10 = vld [vmem:[%s13993_s3 + $0xb88] sm:$0xff]  ;;  %v1900_v28 = vadd.f32 %v1894_v11, %v1886_v16  ;;  %v10518_v59 = vld [vmem:[%s13990_s0 + $0xa0] sm:$0xff]  ;;  %v1968_v32 = vadd.f32 %v1962_v26, %v1954_v51 }
 0x10e   :  { %v1967_v41 = vmul.f32 %v10504_v60, %v10094_v7  ;;  %14220 = vst [vmem:[#allocation22_spill] sm:$0xff] %v10518_v59  ;;  %v1908_v15 = vmul.f32 %v10518_v59, %v9713_v46  ;;  %v1976_v13 = vmul.f32 %v10525_v55, %v10134_v29  ;;  %v2336_v54 = vadd.f32 %v2330_v63, %v2322_v3  ;;  %v5058_v46 = vld [vmem:[%s13993_s3 + $0xb00] sm:$0xff]  ;;  %v5080_v51 = vld [vmem:[%s13993_s3 + $0xbb0] sm:$0xff]  ;;  %v5081_v26 = vld [vmem:[%s13993_s3 + $0xbb8] sm:$0xff] }
 0x10f   :  { %v2344_v16 = vmul.f32 %v9962_v61, %v10486_v33  ;;  %v6761_v11 = vpack.c.bf16 %v5057_v0, %v5056_v43  ;;  %v6775_v17 = vpack.c.bf16 %v5097_v44, %v5096_v22  ;;  %v10542_v3 = vstv %s10426_s17  ;;  %v5099_v63 = vld [vmem:[%s13993_s3 + $0xc48] sm:$0xff]  ;;  %v14221_v0 = vld [vmem:[#allocation11_spill] sm:$0xff]  ;;  %s11148_s17 = sld [smem:[#allocation2 + $0x306]] }
 0x110   :  { %6758 = vmatpush3.bf16.msra.mxu1 %v6757_v57  ;;  %5034 = vmatpush1.msk.msra.mxu0 %vm564_vm1, %v5033_v38  ;;  %v6763_v61 = vpack.c.bf16 %v5075_v10, %v5074_v24  ;;  %v5059_v38 = vld [vmem:[%s13993_s3 + $0xb08] sm:$0xff]  ;;  %v5098_v57 = vld [vmem:[%s13993_s3 + $0xc40] sm:$0xff]  ;;  %v1973_v43 = vadd.f32 %v1967_v41, %v1959_v40  ;;  %v1981_v22 = vmul.f32 %v14221_v0, %v10134_v29  ;;  %v10566_v24 = vld [vmem:[%s13990_s0 + $0xd0] sm:$0xff] }
 0x111   :  { %1862 = vmatmul.mubr.f32.vlgmr.msra.gmra.mrb[10].mxu0 %v1563_v62  ;;  %6760 = vmatprep.subr.bf16.mxu1 %v6759_v30  ;;  %v5076_v30 = vld [vmem:[%s13993_s3 + $0xb90] sm:$0xff]  ;;  %v5077_v62 = vld [vmem:[%s13993_s3 + $0xb98] sm:$0xff]  ;;  %v1914_v44 = vadd.f32 %v1908_v15, %v1900_v28  ;;  %v1922_v40 = vmul.f32 %v10566_v24, %v9970_v23  ;;  %v1982_v41 = vadd.f32 %v1976_v13, %v1968_v32  ;;  %v5082_v15 = vld [vmem:[%s13993_s3 + $0xbc0] sm:$0xff]  ;;  %v10582_v13 = vstv %s10488_s20  ;;  %s11034_s20 = sld [smem:[#allocation2 + $0x303]] }
 0x112   :  { %6772 = vmatprep.subr.bf16.mxu0 %v6771_v12  ;;  %2228 = vmatprep.mubr.f32.mxu0 %v1999_v39  ;;  %v6777_v12 = vpack.c.bf16 %v5081_v26, %v5080_v51  ;;  %v2350_v10 = vadd.f32 %v2344_v16, %v2336_v54  ;;  %v2358_v0 = vmul.f32 %v9999_v52, %v10542_v3  ;;  %v5060_v28 = vld [vmem:[%s13993_s3 + $0xb10] sm:$0xff]  ;;  %v5083_v23 = vld [vmem:[%s13993_s3 + $0xbc8] sm:$0xff]  ;;  %v5101_v32 = vld [vmem:[%s13993_s3 + $0xc58] sm:$0xff] }
 0x113   :  { %6774 = vmatpush3.bf16.msra.mxu0 %v6773_v8  ;;  %v6765_v39 = vpack.c.bf16 %v5059_v38, %v5058_v46  ;;  %v6779_v59 = vpack.c.bf16 %v5099_v63, %v5098_v57  ;;  %v6767_v52 = vpack.c.bf16 %v5077_v62, %v5076_v30  ;;  %v5100_v8 = vld [vmem:[%s13993_s3 + $0xc50] sm:$0xff]  ;;  %v1987_v54 = vadd.f32 %v1981_v22, %v1973_v43  ;;  %v5110_v22 = vld [vmem:[%s13993_s3 + $0xca0] sm:$0xff]  ;;  %v5103_v62 = vld [vmem:[%s13993_s3 + $0xc68] sm:$0xff] }
 0x114   :  { %6762 = vmatpush3.bf16.msra.mxu1 %v6761_v11  ;;  %6776 = vmatprep.subr.bf16.mxu0 %v6775_v17  ;;  %v5061_v17 = vld [vmem:[%s13993_s3 + $0xb18] sm:$0xff]  ;;  %v1928_v16 = vadd.f32 %v1922_v40, %v1914_v44  ;;  %v10598_v11 = vld [vmem:[%s13990_s0 + $0x100] sm:$0xff]  ;;  %v6781_v51 = vpack.c.bf16 %v5083_v23, %v5082_v15  ;;  %v1990_v26 = vadd.f32 %v10213_v47, %v1982_v41  ;;  %v5084_v43 = vld [vmem:[%s13993_s3 + $0xbd0] sm:$0xff]  ;;  %v10615_v30 = vstv %s10544_s2 }
 0x115   :  { %6764 = vmatprep.subr.bf16.mxu1 %v6763_v61  ;;  %v1936_v46 = vmul.f32 %v10598_v11, %v10004_v5  ;;  %v2364_v61 = vadd.f32 %v2358_v0, %v2350_v10  ;;  %v2372_v38 = vmul.f32 %v10026_v56, %v10582_v13  ;;  %v6769_v57 = vpack.c.bf16 %v5061_v17, %v5060_v28  ;;  %v5085_v5 = vld [vmem:[%s13993_s3 + $0xbd8] sm:$0xff]  ;;  %v5111_v56 = vld [vmem:[%s13993_s3 + $0xca8] sm:$0xff] }
 0x116   :  { %v6783_v63 = vpack.c.bf16 %v5101_v32, %v5100_v8  ;;  %v1995_v44 = vadd.f32 %v10213_v47, %v1987_v54  ;;  %v1996_v10 = vmax.f32 %v1990_v26, 0.0  ;;  %v6785_v0 = vpack.c.bf16 %v5085_v5, %v5084_v43  ;;  %v5087_v17 = vld [vmem:[%s13993_s3 + $0xbe8] sm:$0xff]  ;;  %v5113_v8 = vld [vmem:[%s13993_s3 + $0xcb8] sm:$0xff]  ;;  %v10673_v26 = vld [vmem:[%s13993_s3 + $0xcc0] sm:$0xff] }
 0x117   :  { %6778 = vmatpush3.bf16.msra.mxu0 %v6777_v12  ;;  %v1942_v40 = vadd.f32 %v1936_v46, %v1928_v16  ;;  %v10632_v12 = vld [vmem:[%s13990_s0 + $0x130] sm:$0xff]  ;;  %v2378_v28 = vadd.f32 %v2372_v38, %v2364_v61  ;;  %v2386_v15 = vmul.f32 %v10080_v58, %v10615_v30  ;;  %v6804_v23 = vpack.c.bf16 %v5111_v56, %v5110_v22  ;;  %v5105_v54 = vld [vmem:[%s13993_s3 + $0xc78] sm:$0xff]  ;;  %v10678_v61 = vld [vmem:[%s13993_s3 + $0xcc8] sm:$0xff] }
 0x118   :  { %6766 = vmatpush3.bf16.msra.mxu1 %v6765_v39  ;;  %6780 = vmatprep.subr.bf16.mxu0 %v6779_v59  ;;  %v5102_v59 = vld [vmem:[%s13993_s3 + $0xc60] sm:$0xff]  ;;  %v1950_v41 = vmul.f32 %v10632_v12, %v10053_v34  ;;  %v5112_v34 = vld [vmem:[%s13993_s3 + $0xcb0] sm:$0xff]  ;;  %v10651_v32 = vstv %s10584_s29  ;;  %v2001_v46 = vmax.f32 %v1995_v44, 0.0  ;;  %v2310_v43 = vmul.f32 %v10039_v2, %v10342_v45  ;;  %s10954_s29 = sld [smem:[#allocation2 + $0x300]] }
 0x119   :  { %6768 = vmatprep.subr.bf16.mxu1 %v6767_v52  ;;  %v5086_v39 = vld [vmem:[%s13993_s3 + $0xbe0] sm:$0xff]  ;;  %v6787_v52 = vpack.c.bf16 %v5103_v62, %v5102_v59  ;;  %v5104_v58 = vld [vmem:[%s13993_s3 + $0xc70] sm:$0xff]  ;;  %v2318_v5 = vmul.f32 %v10046_v49, %v10366_v19  ;;  %v5107_v59 = vld [vmem:[%s13993_s3 + $0xc88] sm:$0xff]  ;;  %v2400_v2 = vmul.f32 %v10120_v18, %v10651_v32  ;;  %v6807_v62 = vpack.c.bf16 %v5113_v8, %v5112_v34 }
 0x11a   :  { %v10663_v16 = vld [vmem:[%s13993_s3 + $0xbf0] sm:$0xff]  ;;  %v1956_v38 = vadd.f32 %v1950_v41, %v1942_v40  ;;  %v6789_v22 = vpack.c.bf16 %v5087_v17, %v5086_v39  ;;  %v10694_v56 = vld [vmem:[%s13993_s3 + $0xc80] sm:$0xff]  ;;  %v6791_v49 = vpack.c.bf16 %v5105_v54, %v5104_v58  ;;  %v10709_v40 = vld [vmem:[%s13993_s3 + $0xc08] sm:$0xff]  ;;  %v10717_v18 = vstv %s10617_s26  ;;  %s11336_s26 = sld [smem:[#allocation4 + $0x6]] }
 0x11b   :  { %6782 = vmatpush3.bf16.msra.mxu0 %v6781_v51  ;;  %v10668_v51 = vld [vmem:[%s13993_s3 + $0xbf8] sm:$0xff]  ;;  %v10704_v44 = vld [vmem:[%s13993_s3 + $0xc00] sm:$0xff]  ;;  %v10714_v41 = vld [vmem:[%s13993_s3 + $0xcd0] sm:$0xff]  ;;  %v2324_v34 = vadd.f32 %v2318_v5, %v2310_v43  ;;  %v2332_v8 = vmul.f32 %v10087_v31, %v10424_v48  ;;  %v6795_v58 = vpack.c.bf16 %v5107_v59, %v10694_v56 }
 0x11c   :  { %6770 = vmatpush3.bf16.msra.mxu1 %v6769_v57  ;;  %6784 = vmatprep.subr.bf16.mxu0 %v6783_v63  ;;  %v10683_v57 = vld [vmem:[%s13990_s0 + $0x160] sm:$0xff]  ;;  %v10729_v39 = vld [vmem:[%s13993_s3 + $0xcd8] sm:$0xff]  ;;  %v6797_v54 = vpack.c.bf16 %v10709_v40, %v10704_v44  ;;  %v10763_v31 = vld [vmem:[%s13993_s3 + $0xc10] sm:$0xff] }
 0x11d   :  { %6803 = vmatprep.subr.bf16.mxu1 %v14123_v27  ;;  %v1964_v63 = vmul.f32 %v10683_v57, %v10094_v7  ;;  %v2392_v7 = vadd.f32 %v2386_v15, %v2378_v28  ;;  %v10734_v28 = vld [vmem:[%s13993_s3 + $0xc90] sm:$0xff]  ;;  %v10739_v15 = vld [vmem:[%s13993_s3 + $0xc98] sm:$0xff]  ;;  %v10781_v43 = vld [vmem:[%s13993_s3 + $0xce0] sm:$0xff] }
 0x11e   :  { %v10786_v5 = vld [vmem:[%s13993_s3 + $0xce8] sm:$0xff]  ;;  %v10798_v59 = vld [vmem:[%s13990_s0 + $0x30] sm:$0xff] }
 0x11f   :  { %2159 = vmatmul.mubr.f32.vlgmr.msra.gmra.mrb[12].mxu1 %v1996_v10  ;;  %6786 = vmatpush3.bf16.msra.mxu0 %v6785_v0  ;;  %v6793_v10 = vpack.c.bf16 %v10668_v51, %v10663_v16  ;;  %v6810_v0 = vpack.c.bf16 %v10678_v61, %v10673_v26  ;;  %v2406_v16 = vadd.f32 %v2400_v2, %v2392_v7  ;;  %v10768_v61 = vld [vmem:[%s13993_s3 + $0xc18] sm:$0xff]  ;;  %v10805_v2 = vld [vmem:[%s13990_s0 + $0x50] sm:$0xff] }
 0x120   :  { %6805 = vmatpush1.bf16.msra.mxu1 %v6804_v23  ;;  %6788 = vmatprep.subr.bf16.mxu0 %v6787_v52  ;;  %v1970_v23 = vadd.f32 %v1964_v63, %v1956_v38  ;;  %v10745_v52 = vld [vmem:[%s13990_s0 + $0x190] sm:$0xff]  ;;  %v6799_v26 = vpack.c.bf16 %v10739_v15, %v10734_v28  ;;  %14224 = vst [vmem:[#allocation28_spill] sm:$0xff] %v10798_v59 }
 0x121   :  { %6806 = vmatprep.subr.bf16.mxu1 %v14123_v27  ;;  %5132 = vmatprep.mubr.msk.f32.mxu1 %vm560_vm0, %v2001_v46  ;;  %14222 = vst [vmem:[#allocation26_spill] sm:$0xff] %v10745_v52  ;;  %v1978_v17 = vmul.f32 %v10745_v52, %v10134_v29  ;;  %v2414_v46 = vmul.f32 %v10161_v9, %v10717_v18  ;;  %v5657_v51 = vpop.f32.mrb[0].mxu0  ;;  %v10773_v9 = vld [vmem:[%s13990_s0 + $0x20] sm:$0xff]  ;;  %v10823_v52 = vld [vmem:[%s13990_s0 + $0xb0] sm:$0xff] }
 0x122   :  { %v6813_v29 = vpack.c.bf16 %v10729_v39, %v10714_v41  ;;  %v2311_v38 = vmul.f32 %v10773_v9, %v10342_v45  ;;  %v5658_v63 = vpop.f32.mrb[1].mxu0  ;;  %v2315_v7 = vmul.f32 %v10798_v59, %v10366_v19  ;;  %v2338_v39 = vadd.f32 %v2332_v8, %v2324_v34  ;;  %v10841_v34 = vld [vmem:[%s13990_s0 + $0x28] sm:$0xff]  ;;  %v10848_v8 = vld [vmem:[%s13990_s0 + $0x58] sm:$0xff] }
 0x123   :  { %6790 = vmatpush3.bf16.msra.mxu0 %v6789_v22  ;;  %v10791_v22 = vld [vmem:[%s13990_s0] sm:$0xff]  ;;  %v5659_v40 = vadd.f32 %v5658_v63, %v5657_v51  ;;  %v1984_v41 = vadd.f32 %v1978_v17, %v1970_v23  ;;  %v2346_v28 = vmul.f32 %v10127_v42, %v10486_v33  ;;  %v6801_v15 = vpack.c.bf16 %v10768_v61, %v10763_v31  ;;  %v5160_v23 = vld [vmem:[%s13993_s3 + $0xdd0] sm:$0xff] }
 0x124   :  { %6808 = vmatpush1.bf16.msra.mxu1 %v6807_v62  ;;  %6792 = vmatprep.subr.bf16.mxu0 %v6791_v49  ;;  %14223 = vst [vmem:[#allocation25_spill] sm:$0xff] %v10791_v22  ;;  %v2307_v56 = vmul.f32 %v10791_v22, %v10342_v45  ;;  %v2319_v62 = vmul.f32 %v10805_v2, %v10366_v19  ;;  %v10812_v49 = vld [vmem:[%s13990_s0 + $0x80] sm:$0xff]  ;;  %v10836_v17 = vstv %s10719_s21  ;;  %14225 = vst [vmem:[#allocation29_spill] sm:$0xff] %v10841_v34  ;;  %s12001_s21 = sld [smem:[#allocation4 + $0x7]] }
 0x125   :  { %6809 = vmatprep.subr.bf16.mxu1 %v14123_v27  ;;  %v2333_v44 = vmul.f32 %v10812_v49, %v10424_v48  ;;  %v2420_v59 = vadd.f32 %v2414_v46, %v2406_v16  ;;  %v2347_v51 = vmul.f32 %v10823_v52, %v10486_v33  ;;  %v6816_v42 = vpack.c.bf16 %v10786_v5, %v10781_v43 }
 0x126   :  { %v2325_v22 = vadd.f32 %v2319_v62, %v2311_v38  ;;  %14226 = vst [vmem:[#allocation30_spill] sm:$0xff] %v10848_v8  ;;  %v2321_v46 = vadd.f32 %v2315_v7, %v2307_v56  ;;  %v2329_v31 = vmul.f32 %v10230_v1, %v10424_v48  ;;  %v10858_v38 = vld [vmem:[%s13990_s0 + $0xe0] sm:$0xff]  ;;  %v1992_v62 = vadd.f32 %v10213_v47, %v1984_v41  ;;  %v5120_v1 = vld [vmem:[%s13993_s3 + $0xcf0] sm:$0xff] }
 0x127   :  { %6794 = vmatpush3.bf16.msra.mxu0 %v6793_v10  ;;  %v5692_v63 = vpop.f32.mrb[0].mxu1  ;;  %v5159_v10 = vld [vmem:[%s13993_s3 + $0xdc8] sm:$0xff]  ;;  %v2361_v43 = vmul.f32 %v10858_v38, %v10542_v3  ;;  %v2428_v7 = vadd.f32 %v10836_v17, %v2420_v59  ;;  %v10875_v47 = vld [vmem:[%s13990_s0 + $0x110] sm:$0xff] }
 0x128   :  { %6811 = vmatpush1.bf16.msra.mxu1 %v6810_v0  ;;  %6796 = vmatprep.subr.bf16.mxu0 %v6795_v58  ;;  %v2312_v0 = vmul.f32 %v10841_v34, %v10342_v45  ;;  %v2320_v58 = vmul.f32 %v10848_v8, %v10366_v19  ;;  %v5693_v16 = vpop.f32.mrb[1].mxu1  ;;  %v2339_v61 = vadd.f32 %v2333_v44, %v2325_v22  ;;  %v5121_v22 = vld [vmem:[%s13993_s3 + $0xcf8] sm:$0xff]  ;;  %v5144_v41 = vld [vmem:[%s13993_s3 + $0xd50] sm:$0xff] }
 0x129   :  { %6812 = vmatprep.subr.bf16.mxu1 %v14123_v27  ;;  %v5694_v5 = vadd.f32 %v5693_v16, %v5692_v63  ;;  %v2352_v8 = vadd.f32 %v2346_v28, %v2338_v39  ;;  %v2360_v34 = vmul.f32 %v10168_v37, %v10542_v3  ;;  %v6833_v56 = vpack.c.bf16 %v5160_v23, %v5159_v10  ;;  %v10890_v28 = vld [vmem:[%s13990_s0 + $0x88] sm:$0xff]  ;;  %v10906_v23 = vld [vmem:[%s13990_s0 + $0x140] sm:$0xff] }
 0x12a   :  { %v2353_v44 = vadd.f32 %v2347_v51, %v2339_v61  ;;  %v2375_v37 = vmul.f32 %v10875_v47, %v10582_v13  ;;  %v2326_v39 = vadd.f32 %v2320_v58, %v2312_v0  ;;  %v2335_v51 = vadd.f32 %v2329_v31, %v2321_v46 }
 0x12b   :  { %6798 = vmatpush3.bf16.msra.mxu0 %v6797_v54  ;;  %v5143_v54 = vld [vmem:[%s13993_s3 + $0xd48] sm:$0xff]  ;;  %v10885_v59 = vadd.f32 %v5694_v5, %v5659_v40  ;;  %v5162_v40 = vld [vmem:[%s13993_s3 + $0xde0] sm:$0xff]  ;;  %v2343_v63 = vmul.f32 %v10264_v20, %v10486_v33  ;;  %v2389_v0 = vmul.f32 %v10906_v23, %v10615_v30  ;;  %v1998_v58 = vmax.f32 %v1992_v62, 0.0 }
 0x12c   :  { %6814 = vmatpush1.bf16.msra.mxu1 %v6813_v29  ;;  %6800 = vmatprep.subr.bf16.mxu0 %v6799_v26  ;;  %v2334_v29 = vmul.f32 %v10890_v28, %v10424_v48  ;;  %v5161_v26 = vld [vmem:[%s13993_s3 + $0xdd8] sm:$0xff]  ;;  %v2367_v10 = vadd.f32 %v2361_v43, %v2353_v44  ;;  %v6819_v16 = vpack.c.bf16 %v5121_v22, %v5120_v1  ;;  %v5122_v20 = vld [vmem:[%s13993_s3 + $0xd00] sm:$0xff]  ;;  %v2434_v31 = vmax.f32 %v2428_v7, 0.0  ;;  %v10918_v44 = vld [vmem:[%s13990_s0 + $0x170] sm:$0xff] }
 0x12d   :  { %6815 = vmatprep.subr.bf16.mxu1 %v14123_v27  ;;  %v2366_v61 = vadd.f32 %v2360_v34, %v2352_v8  ;;  %v2374_v5 = vmul.f32 %v10222_v36, %v10582_v13  ;;  %v6835_v46 = vpack.c.bf16 %v5144_v41, %v5143_v54  ;;  %v2403_v62 = vmul.f32 %v10918_v44, %v10651_v32  ;;  %v5123_v36 = vld [vmem:[%s13993_s3 + $0xd08] sm:$0xff]  ;;  %v5146_v8 = vld [vmem:[%s13993_s3 + $0xd60] sm:$0xff] }
 0x12e   :  { %v2381_v43 = vadd.f32 %v2375_v37, %v2367_v10  ;;  %v6837_v34 = vpack.c.bf16 %v5162_v40, %v5161_v26  ;;  %v2340_v1 = vadd.f32 %v2334_v29, %v2326_v39  ;;  %v2348_v22 = vmul.f32 %v10297_v25, %v10486_v33  ;;  %v10945_v41 = vld [vmem:[%s13990_s0 + $0x1a0] sm:$0xff]  ;;  %v5147_v10 = vld [vmem:[%s13993_s3 + $0xd68] sm:$0xff] }
 0x12f   :  { %6802 = vmatpush3.bf16.msra.mxu0 %v6801_v15  ;;  %v5145_v15 = vld [vmem:[%s13993_s3 + $0xd58] sm:$0xff]  ;;  %v2349_v7 = vadd.f32 %v2343_v63, %v2335_v51  ;;  %v2357_v37 = vmul.f32 %v10315_v14, %v10542_v3  ;;  %v2417_v25 = vmul.f32 %v10945_v41, %v10717_v18  ;;  %v2380_v39 = vadd.f32 %v2374_v5, %v2366_v61  ;;  %v5124_v14 = vld [vmem:[%s13993_s3 + $0xd10] sm:$0xff]  ;;  %v10970_v61 = vld [vmem:[%s13990_s0 + $0xe8] sm:$0xff] }
 0x130   :  { %6817 = vmatpush1.bf16.msra.mxu1 %v6816_v42  ;;  %6834 = vmatprep.subr.bf16.mxu0 %v6833_v56  ;;  %v5163_v42 = vld [vmem:[%s13993_s3 + $0xde8] sm:$0xff]  ;;  %v5164_v56 = vld [vmem:[%s13993_s3 + $0xdf0] sm:$0xff]  ;;  %v2395_v54 = vadd.f32 %v2389_v0, %v2381_v43  ;;  %v2388_v29 = vmul.f32 %v10248_v53, %v10615_v30  ;;  %v6822_v26 = vpack.c.bf16 %v5123_v36, %v5122_v20  ;;  %v5125_v53 = vld [vmem:[%s13993_s3 + $0xd18] sm:$0xff] }
 0x131   :  { %6818 = vmatprep.subr.bf16.mxu1 %v14123_v27  ;;  %v6839_v40 = vpack.c.bf16 %v5146_v8, %v5145_v15  ;;  %v6841_v63 = vpack.c.bf16 %v5164_v56, %v5163_v42  ;;  %v5148_v0 = vld [vmem:[%s13993_s3 + $0xd70] sm:$0xff]  ;;  %v5165_v5 = vld [vmem:[%s13993_s3 + $0xdf8] sm:$0xff]  ;;  %v2363_v20 = vadd.f32 %v2357_v37, %v2349_v7  ;;  %v2402_v36 = vmul.f32 %v10290_v6, %v10651_v32  ;;  %v5167_v56 = vld [vmem:[%s13993_s3 + $0xe08] sm:$0xff] }
 0x132   :  { %2229 = vmatmul.mubr.f32.vlgmr.msra.gmra.mrb[12].mxu0 %v1998_v58  ;;  %v2409_v51 = vadd.f32 %v2403_v62, %v2395_v54  ;;  %v2354_v58 = vadd.f32 %v2348_v22, %v2340_v1  ;;  %v5126_v62 = vld [vmem:[%s13993_s3 + $0xd20] sm:$0xff]  ;;  %v6825_v15 = vpack.c.bf16 %v5125_v53, %v5124_v14  ;;  %v6843_v8 = vpack.c.bf16 %v5148_v0, %v5147_v10  ;;  %v5127_v1 = vld [vmem:[%s13993_s3 + $0xd28] sm:$0xff]  ;;  %v5168_v7 = vld [vmem:[%s13993_s3 + $0xe10] sm:$0xff] }
 0x133   :  { %6836 = vmatpush3.bf16.msra.mxu0 %v6835_v46  ;;  %2595 = vmatprep.mubr.f32.mxu0 %v2434_v31  ;;  %v5166_v46 = vld [vmem:[%s13993_s3 + $0xe00] sm:$0xff]  ;;  %v2371_v31 = vmul.f32 %v10356_v35, %v10582_v13  ;;  %v5149_v35 = vld [vmem:[%s13993_s3 + $0xd78] sm:$0xff]  ;;  %v2376_v54 = vmul.f32 %v10390_v4, %v10582_v13  ;;  %v11029_v0 = vstv %s10954_s29  ;;  %s12959_s29 = sld [smem:[#allocation2 + $0x485]] }
 0x134   :  { %6820 = vmatpush1.bf16.msra.mxu1 %v6819_v16  ;;  %6838 = vmatprep.subr.bf16.mxu0 %v6837_v34  ;;  %v2362_v16 = vmul.f32 %v10970_v61, %v10542_v3  ;;  %v2423_v43 = vadd.f32 %v2417_v25, %v2409_v51  ;;  %v2394_v34 = vadd.f32 %v2388_v29, %v2380_v39  ;;  %v5150_v22 = vld [vmem:[%s13993_s3 + $0xd80] sm:$0xff]  ;;  %v5129_v4 = vld [vmem:[%s13993_s3 + $0xd38] sm:$0xff] }
 0x135   :  { %6821 = vmatprep.subr.bf16.mxu1 %v14123_v27  ;;  %v6845_v6 = vpack.c.bf16 %v5166_v46, %v5165_v5  ;;  %v2377_v25 = vadd.f32 %v2371_v31, %v2363_v20  ;;  %v2385_v39 = vmul.f32 %v10412_v50, %v10615_v30  ;;  %v6828_v29 = vpack.c.bf16 %v5127_v1, %v5126_v62  ;;  %v5151_v50 = vld [vmem:[%s13993_s3 + $0xd88] sm:$0xff]  ;;  %v14227_v53 = vld [vmem:[#allocation16_spill] sm:$0xff]  ;;  %v14229_v31 = vld [vmem:[#allocation14_spill] sm:$0xff] }
 0x136   :  { %v10998_v42 = vadd.f32 %v10836_v17, %v2423_v43  ;;  %v2368_v37 = vadd.f32 %v2362_v16, %v2354_v58  ;;  %v2408_v14 = vadd.f32 %v2402_v36, %v2394_v34  ;;  %v2416_v51 = vmul.f32 %v10347_v21, %v10717_v18  ;;  %v5152_v21 = vld [vmem:[%s13993_s3 + $0xd90] sm:$0xff]  ;;  %v5169_v16 = vld [vmem:[%s13993_s3 + $0xe18] sm:$0xff]  ;;  %v14228_v5 = vld [vmem:[#allocation21_spill] sm:$0xff] }
 0x137   :  { %6840 = vmatpush3.bf16.msra.mxu0 %v6839_v40  ;;  %v11016_v40 = vld [vmem:[%s13993_s3 + $0xd30] sm:$0xff]  ;;  %v2309_v10 = vmul.f32 %v14227_v53, %v10342_v45  ;;  %v11032_v58 = vstv %s10956_s15  ;;  %v5170_v45 = vld [vmem:[%s13993_s3 + $0xe20] sm:$0xff]  ;;  %v2317_v46 = vmul.f32 %v14228_v5, %v10366_v19  ;;  %v2390_v43 = vmul.f32 %v14229_v31, %v10615_v30  ;;  %v14230_v34 = vld [vmem:[#allocation15_spill] sm:$0xff]  ;;  %s11623_s15 = sld [smem:[#allocation2 + $0x383]] }
 0x138   :  { %6823 = vmatpush1.bf16.msra.mxu1 %v6822_v26  ;;  %6842 = vmatprep.subr.bf16.mxu0 %v6841_v63  ;;  %v6847_v26 = vpack.c.bf16 %v5150_v22, %v5149_v35  ;;  %v6849_v63 = vpack.c.bf16 %v5168_v7, %v5167_v56  ;;  %v2382_v20 = vadd.f32 %v2376_v54, %v2368_v37  ;;  %v11056_v1 = vld [vmem:[%s13990_s0 + $0x8] sm:$0xff]  ;;  %v11063_v35 = vld [vmem:[%s13990_s0 + $0x38] sm:$0xff] }
 0x139   :  { %6824 = vmatprep.subr.bf16.mxu1 %v14123_v27  ;;  %v2391_v62 = vadd.f32 %v2385_v39, %v2377_v25  ;;  %v2399_v36 = vmul.f32 %v14230_v34, %v10651_v32  ;;  %v2745_v19 = vmul.f32 %v11056_v1, %v11029_v0  ;;  %v2753_v22 = vmul.f32 %v11063_v35, %v11032_v58  ;;  %v5153_v7 = vld [vmem:[%s13993_s3 + $0xd98] sm:$0xff]  ;;  %v14231_v37 = vld [vmem:[#allocation17_spill] sm:$0xff]  ;;  %v5154_v39 = vld [vmem:[%s13993_s3 + $0xda0] sm:$0xff] }
 0x13a   :  { %v6853_v56 = vpack.c.bf16 %v5170_v45, %v5169_v16  ;;  %v2331_v54 = vmul.f32 %v14231_v37, %v10424_v48  ;;  %v11073_v25 = vstv %s11000_s1  ;;  %v2396_v48 = vadd.f32 %v2390_v43, %v2382_v20  ;;  %v5175_v53 = vld [vmem:[%s13993_s3 + $0xe48] sm:$0xff]  ;;  %v5156_v20 = vld [vmem:[%s13993_s3 + $0xdb0] sm:$0xff]  ;;  %v5193_v31 = vld [vmem:[%s13993_s3 + $0xed8] sm:$0xff] }
 0x13b   :  { %6844 = vmatpush3.bf16.msra.mxu0 %v6843_v8  ;;  %v2422_v8 = vadd.f32 %v2416_v51, %v2408_v14  ;;  %v2323_v14 = vadd.f32 %v2317_v46, %v2309_v10  ;;  %v2404_v51 = vmul.f32 %v10504_v60, %v10651_v32  ;;  %v5176_v60 = vld [vmem:[%s13993_s3 + $0xe50] sm:$0xff]  ;;  %v11107_v16 = vld [vmem:[%s13990_s0 + $0x68] sm:$0xff]  ;;  %v6855_v45 = vpack.c.bf16 %v5154_v39, %v5153_v7  ;;  %v5130_v7 = vld [vmem:[%s13993_s3 + $0xd40] sm:$0xf] }
 0x13c   :  { %6826 = vmatpush1.bf16.msra.mxu1 %v6825_v15  ;;  %6846 = vmatprep.subr.bf16.mxu0 %v6845_v6  ;;  %v6831_v15 = vpack.c.bf16 %v5129_v4, %v11016_v40  ;;  %v6851_v6 = vpack.c.bf16 %v5152_v21, %v5151_v50  ;;  %v5172_v40 = vld [vmem:[%s13993_s3 + $0xe30] sm:$0xff]  ;;  %v2413_v4 = vmul.f32 %v10525_v55, %v10717_v18  ;;  %v5155_v46 = vld [vmem:[%s13993_s3 + $0xda8] sm:$0xff]  ;;  %v11123_v34 = vstv %s11034_s20  ;;  %s12322_s20 = sld [smem:[#allocation2 + $0x400]] }
 0x13d   :  { %6827 = vmatprep.subr.bf16.mxu1 %v14123_v27  ;;  %v5192_v50 = vld [vmem:[%s13993_s3 + $0xed0] sm:$0xff]  ;;  %v2430_v10 = vadd.f32 %v10836_v17, %v2422_v8  ;;  %v2759_v21 = vadd.f32 %v2753_v22, %v2745_v19  ;;  %v2767_v55 = vmul.f32 %v11107_v16, %v11073_v25  ;;  %v5173_v8 = vld [vmem:[%s13993_s3 + $0xe38] sm:$0xff]  ;;  %v5174_v19 = vld [vmem:[%s13993_s3 + $0xe40] sm:$0xff]  ;;  %v2337_v22 = vadd.f32 %v2331_v54, %v2323_v14 }
 0x13e   :  { %v14232_v43 = vld [vmem:[#allocation22_spill] sm:$0xff]  ;;  %v5177_v14 = vld [vmem:[%s13993_s3 + $0xe58] sm:$0xff] }
 0x13f   :  { %6848 = vmatpush3.bf16.msra.mxu0 %v6847_v26  ;;  %v5171_v26 = vld [vmem:[%s13993_s3 + $0xe28] sm:$0xff]  ;;  %v14234_v37 = vld [vmem:[#allocation10_spill] sm:$0xff] }
 0x140   :  { %6829 = vmatpush1.bf16.msra.mxu1 %v6828_v29  ;;  %6850 = vmatprep.subr.bf16.mxu0 %v6849_v63  ;;  %v5191_v29 = vld [vmem:[%s13993_s3 + $0xec8] sm:$0xff]  ;;  %v2405_v63 = vadd.f32 %v2399_v36, %v2391_v62  ;;  %v6857_v5 = vpack.c.bf16 %v5172_v40, %v5171_v26  ;;  %v2345_v62 = vmul.f32 %v14232_v43, %v10486_v33  ;;  %v5194_v36 = vld [vmem:[%s13993_s3 + $0xee0] sm:$0xff]  ;;  %v2000_v39 = vmax.f32 %v14234_v37, 0.0  ;;  %v11159_v37 = vld [vmem:[%s13990_s0 + $0x98] sm:$0xff] }
 0x141   :  { %6830 = vmatprep.subr.bf16.mxu1 %v14123_v27  ;;  %v2410_v33 = vadd.f32 %v2404_v51, %v2396_v48  ;;  %v6865_v26 = vpack.c.bf16 %v5192_v50, %v5191_v29  ;;  %v6867_v40 = vpack.c.bf16 %v5176_v60, %v5175_v53  ;;  %v5178_v48 = vld [vmem:[%s13993_s3 + $0xe60] sm:$0xff]  ;;  %v2436_v51 = vmax.f32 %v2430_v10, 0.0  ;;  %v5157_v53 = vld [vmem:[%s13993_s3 + $0xdb8] sm:$0xff] }
 0x142   :  { %v2419_v54 = vadd.f32 %v2413_v4, %v2405_v63  ;;  %v2773_v43 = vadd.f32 %v2767_v55, %v2759_v21  ;;  %v2781_v29 = vmul.f32 %v11159_v37, %v11123_v34  ;;  %v6859_v63 = vpack.c.bf16 %v5156_v20, %v5155_v46  ;;  %v5158_v10 = vld [vmem:[%s13993_s3 + $0xdc0] sm:$0xff]  ;;  %v5195_v55 = vld [vmem:[%s13993_s3 + $0xee8] sm:$0xff] }
 0x143   :  { %6852 = vmatpush3.bf16.msra.mxu0 %v6851_v6  ;;  %v11139_v6 = vld [vmem:[%s13990_s0 + $0x1a8] sm:$0xff]  ;;  %v6869_v4 = vpack.c.bf16 %v5194_v36, %v5193_v31  ;;  %v6861_v50 = vpack.c.bf16 %v5174_v19, %v5173_v8  ;;  %v11167_v60 = vstv %s11075_s27  ;;  %v2351_v46 = vadd.f32 %v2345_v62, %v2337_v22  ;;  %v5180_v62 = vld [vmem:[%s13993_s3 + $0xe70] sm:$0xff]  ;;  %s11238_s27 = sld [smem:[#allocation2 + $0x308]] }
 0x144   :  { %6832 = vmatpush1.bf16.msra.mxu1 %v6831_v15  ;;  %6854 = vmatprep.subr.bf16.mxu0 %v6853_v56  ;;  %v2418_v15 = vmul.f32 %v11139_v6, %v10717_v18  ;;  %v14233_v56 = vmov 0.0   ;;  %v2359_v20 = vmul.f32 %v10566_v24, %v10542_v3  ;;  %v2427_v8 = vadd.f32 %v10836_v17, %v2419_v54  ;;  %v11191_v24 = vld [vmem:[%s13990_s0 + $0xc8] sm:$0xff]  ;;  %v5197_v54 = vld [vmem:[%s13993_s3 + $0xef8] sm:$0xff] }
 0x145   :  { %2274 = vmatprep.subr.mxu1 %v14233_v56  ;;  %v2787_v3 = vadd.f32 %v2781_v29, %v2773_v43  ;;  %v2795_v22 = vmul.f32 %v11191_v24, %v11167_v60  ;;  %v2373_v29 = vmul.f32 %v10598_v11, %v10582_v13 }
 0x146   :  { %v2424_v31 = vadd.f32 %v2418_v15, %v2410_v33  ;;  %v6863_v33 = vpack.c.bf16 %v5158_v10, %v5157_v53  ;;  %v2365_v43 = vadd.f32 %v2359_v20, %v2351_v46  ;;  %v2433_v10 = vmax.f32 %v2427_v8, 0.0  ;;  %v5200_v8 = vld [vmem:[%s13993_s3 + $0xf10] sm:$0xff] }
 0x147   :  { %6856 = vmatpush3.bf16.msra.mxu0 %v6855_v45  ;;  %v5727_v21 = vpop.f32.mrb[2].mxu1  ;;  %v5196_v45 = vld [vmem:[%s13993_s3 + $0xef0] sm:$0xff] }
 0x148   :  { %5131 = vmatpush1.msk.msra.mxu1 %vm564_vm1, %v5130_v7  ;;  %6858 = vmatprep.subr.bf16.mxu0 %v6857_v5  ;;  %v6871_v5 = vpack.c.bf16 %v5178_v48, %v5177_v14  ;;  %v5728_v36 = vpop.f32.mrb[3].mxu1  ;;  %v5179_v7 = vld [vmem:[%s13993_s3 + $0xe68] sm:$0xff]  ;;  %v6873_v15 = vpack.c.bf16 %v5196_v45, %v5195_v55  ;;  %v5198_v14 = vld [vmem:[%s13993_s3 + $0xf00] sm:$0xff]  ;;  %v11215_v48 = vld [vmem:[%s13993_s3 + $0xe78] sm:$0xff]  ;;  %v2801_v55 = vadd.f32 %v2795_v22, %v2787_v3 }
 0x149   :  { %2299 = vmatmul.mubr.f32.vlgmr.msra.gmra.mrb[14].mxu1 %v2000_v39  ;;  %6866 = vmatprep.subr.bf16.mxu1 %v6865_v26  ;;  %v5729_v19 = vadd.f32 %v5728_v36, %v5727_v21  ;;  %v5207_v39 = vld [vmem:[%s13993_s3 + $0xf48] sm:$0xff]  ;;  %v5208_v26 = vld [vmem:[%s13993_s3 + $0xf50] sm:$0xff]  ;;  %v11229_v45 = vld [vmem:[%s13990_s0 + $0xf8] sm:$0xff]  ;;  %v6877_v20 = vpack.c.bf16 %v5198_v14, %v5197_v54 }
 0x14a   :  { %6868 = vmatpush3.bf16.msra.mxu1 %v6867_v40  ;;  %2665 = vmatprep.mubr.f32.mxu1 %v2436_v51  ;;  %v11205_v40 = vstv %s11125_s28  ;;  %v5182_v51 = vld [vmem:[%s13993_s3 + $0xe80] sm:$0xff]  ;;  %v6898_v21 = vpack.c.bf16 %v5208_v26, %v5207_v39  ;;  %v11255_v22 = vld [vmem:[%s13990_s0 + $0x128] sm:$0xff]  ;;  %v11264_v39 = vld [vmem:[%s13990_s0 + $0x18] sm:$0xff]  ;;  %s11782_s28 = sld [smem:[#allocation2 + $0x385]] }
 0x14b   :  { %6860 = vmatpush3.bf16.msra.mxu0 %v6859_v63  ;;  %6870 = vmatprep.subr.bf16.mxu1 %v6869_v4  ;;  %v2432_v63 = vadd.f32 %v10836_v17, %v2424_v31  ;;  %v6875_v4 = vpack.c.bf16 %v5180_v62, %v5179_v7  ;;  %v774_v53 = vpop.f32.mrb[2].mxu0  ;;  %v2809_v46 = vmul.f32 %v11229_v45, %v11205_v40  ;;  %v5210_v36 = vld [vmem:[%s13993_s3 + $0xf60] sm:$0xff]  ;;  %v5183_v54 = vld [vmem:[%s13993_s3 + $0xe88] sm:$0xff]  ;;  %v5184_v14 = vld [vmem:[%s13993_s3 + $0xe90] sm:$0xff] }
 0x14c   :  { %6862 = vmatprep.subr.bf16.mxu0 %v6861_v50  ;;  %v11224_v50 = vstv %s11148_s17  ;;  %v775_v13 = vadd.f32 %v774_v53, %v10885_v59  ;;  %v776_v11 = vpop.f32.mrb[3].mxu0  ;;  %v6879_v31 = vpack.c.bf16 %v5182_v51, %v11215_v48  ;;  %v5199_v59 = vld [vmem:[%s13993_s3 + $0xf08] sm:$0xff]  ;;  %v2379_v7 = vadd.f32 %v2373_v29, %v2365_v43 }
 0x14d   :  { %v2387_v62 = vmul.f32 %v10632_v12, %v10615_v30  ;;  %v2438_v3 = vmax.f32 %v2432_v63, 0.0  ;;  %v2747_v26 = vmul.f32 %v11264_v39, %v11029_v0  ;;  %v11271_v30 = vld [vmem:[%s13990_s0 + $0x48] sm:$0xff]  ;;  %v2815_v48 = vadd.f32 %v2809_v46, %v2801_v55 }
 0x14e   :  { %6872 = vmatpush3.bf16.msra.mxu1 %v6871_v5  ;;  %v5209_v5 = vld [vmem:[%s13993_s3 + $0xf58] sm:$0xff]  ;;  %v2755_v12 = vmul.f32 %v11271_v30, %v11032_v58  ;;  %v2756_v51 = vmul.f32 %v10805_v2, %v11032_v58  ;;  %v2770_v43 = vmul.f32 %v10812_v49, %v11073_v25  ;;  %v6881_v29 = vpack.c.bf16 %v5200_v8, %v5199_v59  ;;  %v5211_v63 = vld [vmem:[%s13993_s3 + $0xf68] sm:$0xff]  ;;  %v5212_v2 = vld [vmem:[%s13993_s3 + $0xf70] sm:$0xff] }
 0x14f   :  { %6864 = vmatpush3.bf16.msra.mxu0 %v6863_v33  ;;  %6874 = vmatprep.subr.bf16.mxu1 %v6873_v15  ;;  %v2823_v33 = vmul.f32 %v11255_v22, %v11224_v50  ;;  %v11259_v15 = vadd.f32 %v5729_v19, %v775_v13  ;;  %v2748_v19 = vmul.f32 %v10773_v9, %v11029_v0  ;;  %v11293_v53 = vstv %s11207_s14  ;;  %v5201_v49 = vld [vmem:[%s13993_s3 + $0xf18] sm:$0xff]  ;;  %s12396_s14 = sld [smem:[#allocation2 + $0x403]] }
 0x150   :  { %6897 = vmatprep.subr.bf16.mxu0 %v14123_v27  ;;  %v6901_v9 = vpack.c.bf16 %v5210_v36, %v5209_v5  ;;  %v6883_v55 = vpack.c.bf16 %v5184_v14, %v5183_v54  ;;  %v2761_v46 = vadd.f32 %v2755_v12, %v2747_v26  ;;  %v11311_v13 = vld [vmem:[%s13990_s0 + $0x78] sm:$0xff]  ;;  %v5214_v26 = vld [vmem:[%s13993_s3 + $0xf80] sm:$0xff]  ;;  %v5204_v12 = vld [vmem:[%s13993_s3 + $0xf30] sm:$0xff] }
 0x151   :  { %v2769_v11 = vmul.f32 %v11311_v13, %v11073_v25  ;;  %v2829_v5 = vadd.f32 %v2823_v33, %v2815_v48  ;;  %v11324_v36 = vld [vmem:[%s13990_s0 + $0x158] sm:$0xff]  ;;  %v11334_v33 = vstv %s11238_s27  ;;  %v14235_v54 = vld [vmem:[#allocation26_spill] sm:$0xff]  ;;  %s12853_s27 = sld [smem:[#allocation2 + $0x482]] }
 0x152   :  { %6876 = vmatpush3.bf16.msra.mxu1 %v6875_v4  ;;  %2596 = vmatmul.mubr.f32.vlgmr.msra.gmra.mrb[14].mxu0 %v2433_v10  ;;  %v2401_v4 = vmul.f32 %v10683_v57, %v10651_v32  ;;  %v5202_v10 = vld [vmem:[%s13993_s3 + $0xf20] sm:$0xff]  ;;  %v2762_v32 = vadd.f32 %v2756_v51, %v2748_v19  ;;  %v2784_v57 = vmul.f32 %v10823_v52, %v11123_v34 }
 0x153   :  { %6899 = vmatpush1.bf16.msra.mxu0 %v6898_v21  ;;  %6878 = vmatprep.subr.bf16.mxu1 %v6877_v20  ;;  %v2393_v21 = vadd.f32 %v2387_v62, %v2379_v7  ;;  %v5185_v20 = vld [vmem:[%s13993_s3 + $0xe98] sm:$0xff]  ;;  %v5186_v52 = vld [vmem:[%s13993_s3 + $0xea0] sm:$0xff]  ;;  %v2837_v59 = vmul.f32 %v11324_v36, %v11293_v53  ;;  %v6904_v7 = vpack.c.bf16 %v5212_v2, %v5211_v63  ;;  %v11368_v2 = vld [vmem:[%s13990_s0 + $0x188] sm:$0xff] }
 0x154   :  { %6900 = vmatprep.subr.bf16.mxu0 %v14123_v27  ;;  %5229 = vmatprep.mubr.msk.f32.mxu0 %vm560_vm0, %v2438_v3  ;;  %v2776_v8 = vadd.f32 %v2770_v43, %v2762_v32  ;;  %v6885_v62 = vpack.c.bf16 %v5202_v10, %v5201_v49  ;;  %v5213_v3 = vld [vmem:[%s13993_s3 + $0xf78] sm:$0xff]  ;;  %v2415_v14 = vmul.f32 %v14235_v54, %v10717_v18 }
 0x155   :  { %v2407_v19 = vadd.f32 %v2401_v4, %v2393_v21  ;;  %v2812_v51 = vmul.f32 %v10875_v47, %v11205_v40  ;;  %v6887_v43 = vpack.c.bf16 %v5186_v52, %v5185_v20  ;;  %v2775_v63 = vadd.f32 %v2769_v11, %v2761_v46  ;;  %v11361_v4 = vld [vmem:[%s13990_s0 + $0xa8] sm:$0xff]  ;;  %v5216_v46 = vld [vmem:[%s13993_s3 + $0xf90] sm:$0xff]  ;;  %v5205_v20 = vld [vmem:[%s13993_s3 + $0xf38] sm:$0xff] }
 0x156   :  { %6880 = vmatpush3.bf16.msra.mxu1 %v6879_v31  ;;  %v2798_v31 = vmul.f32 %v10858_v38, %v11167_v60  ;;  %v5203_v38 = vld [vmem:[%s13993_s3 + $0xf28] sm:$0xff]  ;;  %v2790_v48 = vadd.f32 %v2784_v57, %v2776_v8  ;;  %v2783_v18 = vmul.f32 %v11361_v4, %v11123_v34  ;;  %v2843_v47 = vadd.f32 %v2837_v59, %v2829_v5 }
 0x157   :  { %6902 = vmatpush1.bf16.msra.mxu0 %v6901_v9  ;;  %6882 = vmatprep.subr.bf16.mxu1 %v6881_v29  ;;  %v5187_v9 = vld [vmem:[%s13993_s3 + $0xea8] sm:$0xff]  ;;  %v5188_v29 = vld [vmem:[%s13993_s3 + $0xeb0] sm:$0xff]  ;;  %v2851_v49 = vmul.f32 %v11368_v2, %v11334_v33  ;;  %v2826_v21 = vmul.f32 %v10906_v23, %v11224_v50  ;;  %v6907_v32 = vpack.c.bf16 %v5214_v26, %v5213_v3  ;;  %v5206_v23 = vld [vmem:[%s13993_s3 + $0xf40] sm:$0xff] }
 0x158   :  { %6903 = vmatprep.subr.bf16.mxu0 %v14123_v27  ;;  %v2804_v10 = vadd.f32 %v2798_v31, %v2790_v48  ;;  %v6889_v57 = vpack.c.bf16 %v5204_v12, %v5203_v38  ;;  %v6891_v11 = vpack.c.bf16 %v5188_v29, %v5187_v9  ;;  %v2421_v52 = vadd.f32 %v2415_v14, %v2407_v19  ;;  %v14236_v8 = vld [vmem:[#allocation25_spill] sm:$0xff]  ;;  %v11396_v26 = vld [vmem:[%s13990_s0 + $0xd8] sm:$0xff]  ;;  %v5218_v9 = vld [vmem:[%s13993_s3 + $0xfa0] sm:$0xff] }
 0x159   :  { %v2840_v59 = vmul.f32 %v10918_v44, %v11293_v53  ;;  %v2744_v31 = vmul.f32 %v14236_v8, %v11029_v0  ;;  %v2789_v3 = vadd.f32 %v2783_v18, %v2775_v63  ;;  %v2797_v38 = vmul.f32 %v11396_v26, %v11167_v60  ;;  %v5189_v44 = vld [vmem:[%s13993_s3 + $0xeb8] sm:$0xff]  ;;  %v14238_v63 = vld [vmem:[#allocation29_spill] sm:$0xff]  ;;  %v14239_v18 = vld [vmem:[#allocation30_spill] sm:$0xff] }
 0x15a   :  { %6884 = vmatpush3.bf16.msra.mxu1 %v6883_v55  ;;  %v5215_v55 = vld [vmem:[%s13993_s3 + $0xf88] sm:$0xff]  ;;  %v2818_v5 = vadd.f32 %v2812_v51, %v2804_v10  ;;  %v2857_v19 = vadd.f32 %v2851_v49, %v2843_v47  ;;  %v2854_v14 = vmul.f32 %v10945_v41, %v11334_v33  ;;  %v6893_v48 = vpack.c.bf16 %v5206_v23, %v5205_v20  ;;  %v5190_v51 = vld [vmem:[%s13993_s3 + $0xec0] sm:$0xff]  ;;  %v5256_v10 = vld [vmem:[%s13993_s3 + $0x1070] sm:$0xff] }
 0x15b   :  { %6905 = vmatpush1.bf16.msra.mxu0 %v6904_v7  ;;  %6886 = vmatprep.subr.bf16.mxu1 %v6885_v62  ;;  %v14237_v7 = vld [vmem:[#allocation28_spill] sm:$0xff]  ;;  %v6910_v12 = vpack.c.bf16 %v5216_v46, %v5215_v55  ;;  %v11415_v29 = vstv %s11336_s26  ;;  %v2749_v41 = vmul.f32 %v14238_v63, %v11029_v0  ;;  %v2757_v47 = vmul.f32 %v14239_v18, %v11032_v58  ;;  %s11487_s26 = sld [smem:[#allocation2 + $0x381]] }
 0x15c   :  { %6906 = vmatprep.subr.bf16.mxu0 %v14123_v27  ;;  %v2752_v62 = vmul.f32 %v14237_v7, %v11032_v58  ;;  %v2832_v54 = vadd.f32 %v2826_v21, %v2818_v5  ;;  %v2429_v49 = vadd.f32 %v10836_v17, %v2421_v52  ;;  %v5257_v21 = vld [vmem:[%s13993_s3 + $0x1078] sm:$0xff]  ;;  %v11432_v55 = vld [vmem:[%s13990_s0 + $0x60] sm:$0xff]  ;;  %v2803_v20 = vadd.f32 %v2797_v38, %v2789_v3  ;;  %v11439_v17 = vld [vmem:[%s13990_s0 + $0x108] sm:$0xff] }
 0x15d   :  { %v2766_v46 = vmul.f32 %v11432_v55, %v11073_v25  ;;  %v2811_v23 = vmul.f32 %v11439_v17, %v11205_v40  ;;  %v6895_v52 = vpack.c.bf16 %v5190_v51, %v5189_v44  ;;  %v2865_v8 = vadd.f32 %v11415_v29, %v2857_v19  ;;  %v5220_v3 = vld [vmem:[%s13993_s3 + $0xfb0] sm:$0xff]  ;;  %v5258_v19 = vld [vmem:[%s13993_s3 + $0x1080] sm:$0xff] }
 0x15e   :  { %6888 = vmatpush3.bf16.msra.mxu1 %v6887_v43  ;;  %v5217_v43 = vld [vmem:[%s13993_s3 + $0xf98] sm:$0xff]  ;;  %v6927_v7 = vpack.c.bf16 %v5257_v21, %v5256_v10  ;;  %v2763_v38 = vadd.f32 %v2757_v47, %v2749_v41  ;;  %v2771_v44 = vmul.f32 %v10890_v28, %v11073_v25  ;;  %v11471_v51 = vld [vmem:[%s13990_s0 + $0x90] sm:$0xff]  ;;  %v5242_v47 = vld [vmem:[%s13993_s3 + $0x1000] sm:$0xff] }
 0x15f   :  { %6908 = vmatpush1.bf16.msra.mxu0 %v6907_v32  ;;  %6890 = vmatprep.subr.bf16.mxu1 %v6889_v57  ;;  %v2846_v32 = vadd.f32 %v2840_v59, %v2832_v54  ;;  %v2758_v57 = vadd.f32 %v2752_v62, %v2744_v31  ;;  %v6913_v5 = vpack.c.bf16 %v5218_v9, %v5217_v43  ;;  %v5240_v59 = vld [vmem:[%s13993_s3 + $0xff0] sm:$0xff]  ;;  %v5241_v62 = vld [vmem:[%s13993_s3 + $0xff8] sm:$0xff]  ;;  %v5259_v54 = vld [vmem:[%s13993_s3 + $0x1088] sm:$0xff] }
 0x160   :  { %6909 = vmatprep.subr.bf16.mxu0 %v14123_v27  ;;  %v2780_v28 = vmul.f32 %v11471_v51, %v11123_v34  ;;  %v2817_v43 = vadd.f32 %v2811_v23, %v2803_v20  ;;  %v11478_v9 = vld [vmem:[%s13990_s0 + $0x138] sm:$0xff]  ;;  %v6929_v41 = vpack.c.bf16 %v5241_v62, %v5240_v59  ;;  %v6931_v10 = vpack.c.bf16 %v5259_v54, %v5258_v19  ;;  %v5243_v21 = vld [vmem:[%s13993_s3 + $0x1008] sm:$0xff] }
 0x161   :  { %v2860_v31 = vadd.f32 %v2854_v14, %v2846_v32  ;;  %14241 = vst [vmem:[#allocation9_spill] sm:$0xff] %v11478_v9  ;;  %v2825_v63 = vmul.f32 %v11478_v9, %v11224_v50  ;;  %v5221_v32 = vld [vmem:[%s13993_s3 + $0xfb8] sm:$0xff]  ;;  %v11525_v62 = vld [vmem:[%s13993_s3 + $0xfc8] sm:$0xff] }
 0x162   :  { %6892 = vmatpush3.bf16.msra.mxu1 %v6891_v11  ;;  %v5219_v11 = vld [vmem:[%s13993_s3 + $0xfa8] sm:$0xff]  ;;  %v11501_v20 = vld [vmem:[%s13990_s0 + $0xb8] sm:$0xff] }
 0x163   :  { %6911 = vmatpush1.bf16.msra.mxu0 %v6910_v12  ;;  %6894 = vmatprep.subr.bf16.mxu1 %v6893_v48  ;;  %v2435_v12 = vmax.f32 %v2429_v49, 0.0  ;;  %v11466_v14 = vadd.f32 %v11415_v29, %v2860_v31  ;;  %v2772_v48 = vadd.f32 %v2766_v46, %v2758_v57  ;;  %v6916_v18 = vpack.c.bf16 %v5220_v3, %v5219_v11  ;;  %v5222_v57 = vld [vmem:[%s13993_s3 + $0xfc0] sm:$0xff]  ;;  %v5261_v59 = vld [vmem:[%s13993_s3 + $0x1098] sm:$0xff]  ;;  %v11530_v11 = vld [vmem:[%s13993_s3 + $0xfd0] sm:$0xff] }
 0x164   :  { %6912 = vmatprep.subr.bf16.mxu0 %v14123_v27  ;;  %v2871_v49 = vmax.f32 %v2865_v8, 0.0  ;;  %v2777_v46 = vadd.f32 %v2771_v44, %v2763_v38  ;;  %14242 = vst [vmem:[#allocation27_spill] sm:$0xff] %v11501_v20  ;;  %v2785_v23 = vmul.f32 %v11501_v20, %v11123_v34  ;;  %v11515_v8 = vld [vmem:[%s13993_s3 + $0x1010] sm:$0xff]  ;;  %v11535_v38 = vld [vmem:[%s13990_s0 + $0xc0] sm:$0xff]  ;;  %v11542_v19 = vld [vmem:[%s13990_s0 + $0x168] sm:$0xff] }
 0x165   :  { %14240 = vst [vmem:[#allocation23_spill] sm:$0xff] %v11466_v14  ;;  %v2786_v3 = vadd.f32 %v2780_v28, %v2772_v48  ;;  %14243 = vst [vmem:[#allocation31_spill] sm:$0xff] %v11535_v38  ;;  %v2794_v44 = vmul.f32 %v11535_v38, %v11167_v60  ;;  %v2839_v54 = vmul.f32 %v11542_v19, %v11293_v53 }
 0x166   :  { %6896 = vmatpush3.bf16.msra.mxu1 %v6895_v52  ;;  %14244 = vst [vmem:[#allocation24_spill] sm:$0xff] %v11542_v19  ;;  %v6933_v48 = vpack.c.bf16 %v5243_v21, %v5242_v47  ;;  %v6919_v28 = vpack.c.bf16 %v5222_v57, %v5221_v32  ;;  %v2791_v38 = vadd.f32 %v2785_v23, %v2777_v46  ;;  %v5262_v47 = vld [vmem:[%s13993_s3 + $0x10a0] sm:$0xff]  ;;  %v11577_v21 = vld [vmem:[%s13993_s3 + $0xfd8] sm:$0xff] }
 0x167   :  { %6914 = vmatpush1.bf16.msra.mxu0 %v6913_v5  ;;  %6928 = vmatprep.subr.bf16.mxu1 %v6927_v7  ;;  %v5762_v52 = vpop.f32.mrb[4].mxu1  ;;  %v5260_v5 = vld [vmem:[%s13993_s3 + $0x1090] sm:$0xff]  ;;  %v11520_v7 = vld [vmem:[%s13993_s3 + $0x1018] sm:$0xff]  ;;  %v11582_v32 = vld [vmem:[%s13993_s3 + $0xfe0] sm:$0xff]  ;;  %v2800_v57 = vadd.f32 %v2794_v44, %v2786_v3 }
 0x168   :  { %6915 = vmatprep.subr.bf16.mxu0 %v14123_v27  ;;  %v5763_v31 = vpop.f32.mrb[5].mxu1  ;;  %v6935_v9 = vpack.c.bf16 %v5261_v59, %v5260_v5  ;;  %v11594_v23 = vld [vmem:[%s13990_s0 + $0x198] sm:$0xff]  ;;  %v11601_v5 = vld [vmem:[%s13993_s3 + $0x10b0] sm:$0xff] }
 0x169   :  { %2666 = vmatmul.mubr.f32.vlgmr.msra.gmra.mrb[16].mxu1 %v2435_v12  ;;  %v2831_v12 = vadd.f32 %v2825_v63, %v2817_v43  ;;  %v5764_v14 = vadd.f32 %v5763_v31, %v5762_v52  ;;  %v2799_v43 = vmul.f32 %v10970_v61, %v11167_v60  ;;  %v6937_v63 = vpack.c.bf16 %v11520_v7, %v11515_v8  ;;  %v11564_v61 = vld [vmem:[%s13993_s3 + $0x1020] sm:$0xff]  ;;  %v11606_v59 = vld [vmem:[%s13990_s0 + $0x10] sm:$0xff] }
 0x16a   :  { %6930 = vmatpush3.bf16.msra.mxu1 %v6929_v41  ;;  %3032 = vmatprep.mubr.f32.mxu1 %v2871_v49  ;;  %v6922_v41 = vpack.c.bf16 %v11530_v11, %v11525_v62  ;;  %14246 = vst [vmem:[#allocation18_spill] sm:$0xff] %v11594_v23  ;;  %v2853_v52 = vmul.f32 %v11594_v23, %v11334_v33  ;;  %14247 = vst [vmem:[#allocation19_spill] sm:$0xff] %v11606_v59  ;;  %v11613_v31 = vld [vmem:[%s13990_s0 + $0x40] sm:$0xff]  ;;  %v11618_v62 = vstv %s11485_s13  ;;  %v11631_v44 = vld [vmem:[%s13993_s3 + $0x1030] sm:$0xff]  ;;  %s11920_s13 = sld [smem:[#allocation2 + $0x388]] }
 0x16b   :  { %6917 = vmatpush1.bf16.msra.mxu0 %v6916_v18  ;;  %6932 = vmatprep.subr.bf16.mxu1 %v6931_v10  ;;  %v5263_v18 = vld [vmem:[%s13993_s3 + $0x10a8] sm:$0xff]  ;;  %v11567_v49 = vadd.f32 %v5764_v14, %v11259_v15  ;;  %v11587_v15 = vld [vmem:[%s13990_s0 + $0xf0] sm:$0xff]  ;;  %v2845_v46 = vadd.f32 %v2839_v54, %v2831_v12  ;;  %v2746_v8 = vmul.f32 %v11606_v59, %v11029_v0  ;;  %v11621_v11 = vstv %s11487_s26  ;;  %v5265_v0 = vld [vmem:[%s13993_s3 + $0x10b8] sm:$0xff]  ;;  %s13063_s26 = sld [smem:[#allocation2 + $0x488]] }
 0x16c   :  { %6918 = vmatprep.subr.bf16.mxu0 %v14123_v27  ;;  %v11572_v10 = vld [vmem:[%s13993_s3 + $0x1028] sm:$0xff]  ;;  %14245 = vst [vmem:[#allocation8_spill] sm:$0xff] %v11587_v15  ;;  %v2808_v14 = vmul.f32 %v11587_v15, %v11205_v40  ;;  %14248 = vst [vmem:[#allocation12_spill] sm:$0xff] %v11613_v31  ;;  %v2754_v7 = vmul.f32 %v11613_v31, %v11032_v58  ;;  %v6939_v3 = vpack.c.bf16 %v5263_v18, %v5262_v47  ;;  %v11636_v58 = vld [vmem:[%s13993_s3 + $0x1038] sm:$0xff] }
 0x16d   :  { %v2805_v12 = vadd.f32 %v2799_v43, %v2791_v38  ;;  %v11653_v38 = vld [vmem:[%s13993_s3 + $0x10c0] sm:$0xff]  ;;  %v11658_v43 = vld [vmem:[%s13993_s3 + $0x10c8] sm:$0xff]  ;;  %v11663_v47 = vld [vmem:[%s13993_s3 + $0x1170] sm:$0xff]  ;;  %v2859_v59 = vadd.f32 %v2853_v52, %v2845_v46  ;;  %v3182_v23 = vmul.f32 %v11056_v1, %v11618_v62  ;;  %v6945_v1 = vpack.c.bf16 %v11636_v58, %v11631_v44 }
 0x16e   :  { %6934 = vmatpush3.bf16.msra.mxu1 %v6933_v48  ;;  %v6941_v48 = vpack.c.bf16 %v11572_v10, %v11564_v61  ;;  %v11668_v18 = vld [vmem:[%s13990_s0 + $0x120] sm:$0xff]  ;;  %v11675_v10 = vld [vmem:[%s13993_s3 + $0x1178] sm:$0xff]  ;;  %v2814_v31 = vadd.f32 %v2808_v14, %v2800_v57  ;;  %v2760_v19 = vadd.f32 %v2754_v7, %v2746_v8  ;;  %v11695_v15 = vld [vmem:[%s13990_s0 + $0x70] sm:$0xff]  ;;  %v11700_v57 = vstv %s11546_s24  ;;  %s12495_s24 = sld [smem:[#allocation2 + $0x407]] }
 0x16f   :  { %6920 = vmatpush1.bf16.msra.mxu0 %v6919_v28  ;;  %6936 = vmatprep.subr.bf16.mxu1 %v6935_v9  ;;  %v11641_v9 = vld [vmem:[%s13990_s0 + $0x118] sm:$0xff]  ;;  %v6925_v28 = vpack.c.bf16 %v11582_v32, %v11577_v21  ;;  %14250 = vst [vmem:[#allocation20_spill] sm:$0xff] %v11668_v18  ;;  %v2822_v61 = vmul.f32 %v11668_v18, %v11224_v50  ;;  %v11680_v21 = vld [vmem:[%s13993_s3 + $0x1040] sm:$0xff]  ;;  %v11685_v32 = vld [vmem:[%s13993_s3 + $0x1048] sm:$0xff] }
 0x170   :  { %14249 = vst [vmem:[#allocation13_spill] sm:$0xff] %v11641_v9  ;;  %v2813_v54 = vmul.f32 %v11641_v9, %v11205_v40  ;;  %6921 = vmatprep.subr.bf16.mxu0 %v14123_v27  ;;  %v3190_v18 = vmul.f32 %v11063_v35, %v11621_v11  ;;  %v6943_v9 = vpack.c.bf16 %v5265_v0, %v11601_v5  ;;  %14251 = vst [vmem:[#allocation11_spill] sm:$0xff] %v11695_v15  ;;  %v11709_v35 = vld [vmem:[%s13993_s3 + $0x10f0] sm:$0xff]  ;;  %v11719_v14 = vld [vmem:[%s13990_s0 + $0x148] sm:$0xff] }
 0x171   :  { %v2768_v20 = vmul.f32 %v11695_v15, %v11073_v25  ;;  %14252 = vst [vmem:[#allocation16_spill] sm:$0xff] %v11719_v14  ;;  %v6947_v46 = vpack.c.bf16 %v11658_v43, %v11653_v38  ;;  %v6959_v52 = vpack.c.bf16 %v11675_v10, %v11663_v47  ;;  %v11733_v8 = vld [vmem:[%s13993_s3 + $0x10d0] sm:$0xff]  ;;  %v11738_v7 = vld [vmem:[%s13993_s3 + $0x10d8] sm:$0xff]  ;;  %v11755_v58 = vld [vmem:[%s13993_s3 + $0x1188] sm:$0xff]  ;;  %v2828_v38 = vadd.f32 %v2822_v61, %v2814_v31 }
 0x172   :  { %6938 = vmatpush3.bf16.msra.mxu1 %v6937_v63  ;;  %v11714_v63 = vld [vmem:[%s13993_s3 + $0x10f8] sm:$0xff]  ;;  %v2819_v25 = vadd.f32 %v2813_v54, %v2805_v12  ;;  %v11748_v0 = vld [vmem:[%s13990_s0 + $0x150] sm:$0xff]  ;;  %v2867_v43 = vadd.f32 %v11415_v29, %v2859_v59  ;;  %v3196_v47 = vadd.f32 %v3190_v18, %v3182_v23  ;;  %v3204_v10 = vmul.f32 %v11107_v16, %v11700_v57 }
 0x173   :  { %6923 = vmatpush1.bf16.msra.mxu0 %v6922_v41  ;;  %6940 = vmatprep.subr.bf16.mxu1 %v6939_v3  ;;  %v2827_v41 = vmul.f32 %v11719_v14, %v11224_v50  ;;  %v11743_v3 = vld [vmem:[%s13993_s3 + $0x1180] sm:$0xff]  ;;  %14253 = vst [vmem:[#allocation21_spill] sm:$0xff] %v11748_v0  ;;  %v2836_v44 = vmul.f32 %v11748_v0, %v11293_v53  ;;  %v11760_v12 = vld [vmem:[%s13993_s3 + $0x1050] sm:$0xff]  ;;  %v11765_v54 = vld [vmem:[%s13993_s3 + $0x1058] sm:$0xff]  ;;  %v11780_v31 = vstv %s11623_s15  ;;  %v2437_v59 = vmax.f32 %v10998_v42, 0.0  ;;  %s13150_s15 = sld [smem:[#allocation4 + $0x9]] }
 0x174   :  { %6924 = vmatprep.subr.bf16.mxu0 %v14123_v27  ;;  %v6961_v5 = vpack.c.bf16 %v11714_v63, %v11709_v35  ;;  %v2774_v15 = vadd.f32 %v2768_v20, %v2760_v19  ;;  %v11775_v14 = vld [vmem:[%s13990_s0 + $0xa0] sm:$0xff]  ;;  %v6951_v16 = vpack.c.bf16 %v11738_v7, %v11733_v8  ;;  %v11789_v20 = vld [vmem:[%s13990_s0 + $0x178] sm:$0xff]  ;;  %v11817_v35 = vld [vmem:[%s13993_s3 + $0x1108] sm:$0xff]  ;;  %v3218_v8 = vmul.f32 %v11159_v37, %v11780_v31 }
 0x175   :  { %v2782_v0 = vmul.f32 %v11775_v14, %v11123_v34  ;;  %v2833_v23 = vadd.f32 %v2827_v41, %v2819_v25  ;;  %v2841_v19 = vmul.f32 %v11789_v20, %v11293_v53  ;;  %v5227_v34 = vld [vmem:[%s13993_s3 + $0xfe8] sm:$0xf]  ;;  %v11812_v42 = vld [vmem:[%s13993_s3 + $0x1100] sm:$0xff]  ;;  %v2842_v63 = vadd.f32 %v2836_v44, %v2828_v38  ;;  %v5292_v37 = vld [vmem:[%s13993_s3 + $0x1190] sm:$0xff] }
 0x176   :  { %6942 = vmatpush3.bf16.msra.mxu1 %v6941_v48  ;;  %v990_v61 = vpop.f32.mrb[4].mxu0  ;;  %v2873_v25 = vmax.f32 %v2867_v43, 0.0  ;;  %v3210_v41 = vadd.f32 %v3204_v10, %v3196_v47  ;;  %v11827_v48 = vld [vmem:[%s13990_s0 + $0xd0] sm:$0xff]  ;;  %v11832_v44 = vstv %s11702_s25  ;;  %v5270_v38 = vld [vmem:[%s13993_s3 + $0x10e0] sm:$0xff] }
 0x177   :  { %6926 = vmatpush1.bf16.msra.mxu0 %v6925_v28  ;;  %6944 = vmatprep.subr.bf16.mxu1 %v6943_v9  ;;  %v6963_v9 = vpack.c.bf16 %v11755_v58, %v11743_v3  ;;  %v11805_v28 = vld [vmem:[%s13990_s0 + $0x180] sm:$0xff]  ;;  %v11822_v7 = vadd.f32 %v990_v61, %v11567_v49  ;;  %v992_v3 = vpop.f32.mrb[5].mxu0  ;;  %v2788_v58 = vadd.f32 %v2782_v0, %v2774_v15  ;;  %v5293_v49 = vld [vmem:[%s13993_s3 + $0x1198] sm:$0xff]  ;;  %v11863_v43 = vld [vmem:[%s13990_s0 + $0x50] sm:$0xff] }
 0x178   :  { %2711 = vmatprep.subr.mxu0 %v14233_v56  ;;  %v2850_v18 = vmul.f32 %v11805_v28, %v11334_v33  ;;  %v2796_v56 = vmul.f32 %v11827_v48, %v11167_v60  ;;  %v2847_v15 = vadd.f32 %v2841_v19, %v2833_v23  ;;  %v11848_v60 = vld [vmem:[%s13990_s0 + $0x20] sm:$0xff]  ;;  %v6965_v0 = vpack.c.bf16 %v11817_v35, %v11812_v42  ;;  %v11882_v19 = vld [vmem:[%s13993_s3 + $0x1068] sm:$0xff]  ;;  %v5276_v35 = vld [vmem:[%s13993_s3 + $0x1110] sm:$0xff] }
 0x179   :  { %v3193_v47 = vmul.f32 %v11863_v43, %v11621_v11  ;;  %v11877_v23 = vld [vmem:[%s13993_s3 + $0x1060] sm:$0xff]  ;;  %v3232_v61 = vmul.f32 %v11191_v24, %v11832_v44  ;;  %v6967_v42 = vpack.c.bf16 %v5293_v49, %v5292_v37  ;;  %v11903_v24 = vld [vmem:[%s13990_s0 + $0xb0] sm:$0xff] }
 0x17a   :  { %6946 = vmatpush3.bf16.msra.mxu1 %v6945_v1  ;;  %v2855_v1 = vmul.f32 %v11139_v6, %v11334_v33  ;;  %v5271_v6 = vld [vmem:[%s13993_s3 + $0x10e8] sm:$0xff]  ;;  %v11916_v3 = vld [vmem:[%s13990_s0 + $0x100] sm:$0xff] }
 0x17b   :  { %5228 = vmatpush1.msk.msra.mxu0 %vm564_vm1, %v5227_v34  ;;  %6948 = vmatprep.subr.bf16.mxu1 %v6947_v46  ;;  %v3185_v46 = vmul.f32 %v11848_v60, %v11618_v62  ;;  %v2856_v34 = vadd.f32 %v2850_v18, %v2842_v63  ;;  %v5277_v18 = vld [vmem:[%s13993_s3 + $0x1118] sm:$0xff]  ;;  %v11898_v63 = vstv %s11782_s28  ;;  %14256 = vst [vmem:[#allocation15_spill] sm:$0xff] %v11916_v3 }
 0x17c   :  { %2736 = vmatmul.mubr.f32.vlgmr.msra.gmra.mrb[16].mxu0 %v2437_v59  ;;  %6960 = vmatprep.subr.bf16.mxu0 %v6959_v52  ;;  %v11870_v52 = vld [vmem:[%s13990_s0 + $0x80] sm:$0xff]  ;;  %v3224_v59 = vadd.f32 %v3218_v8, %v3210_v41  ;;  %14255 = vst [vmem:[#allocation14_spill] sm:$0xff] %v11898_v63  ;;  %v5295_v41 = vld [vmem:[%s13993_s3 + $0x11a8] sm:$0xff]  ;;  %v2802_v8 = vadd.f32 %v2796_v56, %v2788_v58 }
 0x17d   :  { %v3207_v10 = vmul.f32 %v11870_v52, %v11700_v57  ;;  %6962 = vmatpush3.bf16.msra.mxu0 %v6961_v5  ;;  %3102 = vmatprep.mubr.f32.mxu0 %v2873_v25  ;;  %v14254_v5 = vpack.c.bf16 %v11685_v32, %v11680_v21  ;;  %v3199_v25 = vadd.f32 %v3193_v47, %v3185_v46  ;;  %v11927_v46 = vld [vmem:[%s13993_s3 + $0x1120] sm:$0xff]  ;;  %v5279_v56 = vld [vmem:[%s13993_s3 + $0x1128] sm:$0xff]  ;;  %v5305_v47 = vld [vmem:[%s13993_s3 + $0x11f8] sm:$0xff] }
 0x17e   :  { %6964 = vmatprep.subr.bf16.mxu0 %v6963_v9  ;;  %v3221_v21 = vmul.f32 %v11903_v24, %v11780_v31  ;;  %v6955_v32 = vpack.c.bf16 %v5271_v6, %v5270_v38  ;;  %v5294_v9 = vld [vmem:[%s13993_s3 + $0x11a0] sm:$0xff]  ;;  %v2810_v37 = vmul.f32 %v11916_v3, %v11205_v40  ;;  %v2861_v49 = vadd.f32 %v2855_v1, %v2847_v15  ;;  %v11935_v40 = vld [vmem:[%s13993_s3 + $0x11f0] sm:$0xff] }
 0x17f   :  { %6950 = vmatpush3.bf16.msra.mxu1 %v14254_v5  ;;  %v3213_v58 = vadd.f32 %v3207_v10, %v3199_v25  ;;  %v11940_v15 = vld [vmem:[%s13990_s0 + $0xe0] sm:$0xff]  ;;  %v6969_v38 = vpack.c.bf16 %v5277_v18, %v5276_v35  ;;  %v2864_v6 = vadd.f32 %v11415_v29, %v2856_v34  ;;  %v5296_v10 = vld [vmem:[%s13993_s3 + $0x11b0] sm:$0xff]  ;;  %v3246_v5 = vmul.f32 %v11229_v45, %v11898_v63 }
 0x180   :  { %6952 = vmatprep.subr.bf16.mxu1 %v6951_v16  ;;  %v6957_v16 = vpack.c.bf16 %v11882_v19, %v11877_v23  ;;  %v3235_v1 = vmul.f32 %v11940_v15, %v11832_v44  ;;  %v5297_v23 = vld [vmem:[%s13993_s3 + $0x11b8] sm:$0xff]  ;;  %v3238_v19 = vadd.f32 %v3232_v61, %v3224_v59  ;;  %v6971_v34 = vpack.c.bf16 %v5295_v41, %v5294_v9  ;;  %v11965_v25 = vld [vmem:[%s13990_s0 + $0x110] sm:$0xff] }
 0x181   :  { %6966 = vmatpush3.bf16.msra.mxu0 %v6965_v0  ;;  %v14257_v0 = vpack.c.bf16 %v11765_v54, %v11760_v12  ;;  %v11960_v35 = vstv %s11834_s18  ;;  %v3227_v18 = vadd.f32 %v3221_v21, %v3213_v58  ;;  %v3249_v59 = vmul.f32 %v11965_v25, %v11898_v63  ;;  %v11973_v12 = vld [vmem:[%s13993_s3 + $0x1130] sm:$0xff]  ;;  %v11978_v54 = vld [vmem:[%s13993_s3 + $0x1138] sm:$0xff]  ;;  %s12901_s18 = sld [smem:[#allocation2 + $0x483]] }
 0x182   :  { %6968 = vmatprep.subr.bf16.mxu0 %v6967_v42  ;;  %v6973_v45 = vpack.c.bf16 %v5279_v56, %v11927_v46  ;;  %v2816_v61 = vadd.f32 %v2810_v37, %v2802_v8  ;;  %v11983_v42 = vld [vmem:[%s13990_s0 + $0x130] sm:$0xff]  ;;  %v6992_v9 = vpack.c.bf16 %v5305_v47, %v11935_v40  ;;  %v6975_v41 = vpack.c.bf16 %v5297_v23, %v5296_v10  ;;  %v11992_v56 = vld [vmem:[%s13990_s0 + $0x140] sm:$0xff]  ;;  %v5299_v47 = vld [vmem:[%s13993_s3 + $0x11c8] sm:$0xff] }
 0x183   :  { %6954 = vmatpush3.bf16.msra.mxu1 %v14257_v0  ;;  %14258 = vst [vmem:[#allocation17_spill] sm:$0xff] %v11983_v42  ;;  %v2824_v21 = vmul.f32 %v11983_v42, %v11224_v50  ;;  %v3241_v46 = vadd.f32 %v3235_v1, %v3227_v18  ;;  %v3263_v8 = vmul.f32 %v11992_v56, %v11960_v35  ;;  %v2870_v37 = vmax.f32 %v2864_v6, 0.0  ;;  %v5306_v40 = vld [vmem:[%s13993_s3 + $0x1200] sm:$0xff]  ;;  %v5307_v1 = vld [vmem:[%s13993_s3 + $0x1208] sm:$0xff]  ;;  %v14276_v3 = vld [vmem:[#allocation18_spill] sm:$0xff] }
 0x184   :  { %6956 = vmatprep.subr.bf16.mxu1 %v6955_v32  ;;  %v2869_v32 = vadd.f32 %v11415_v29, %v2861_v49  ;;  %v3252_v58 = vadd.f32 %v3246_v5, %v3238_v19  ;;  %v3260_v50 = vmul.f32 %v11255_v22, %v11960_v35  ;;  %v11999_v0 = vstv %s11886_s10  ;;  %v12014_v22 = vld [vmem:[%s13990_s0 + $0x170] sm:$0xff]  ;;  %v5298_v6 = vld [vmem:[%s13993_s3 + $0x11c0] sm:$0xff]  ;;  %s12324_s10 = sld [smem:[#allocation2 + $0x401]] }
 0x185   :  { %6970 = vmatpush3.bf16.msra.mxu0 %v6969_v38  ;;  %v6977_v49 = vpack.c.bf16 %v11978_v54, %v11973_v12  ;;  %v3255_v38 = vadd.f32 %v3249_v59, %v3241_v46  ;;  %v2830_v10 = vadd.f32 %v2824_v21, %v2816_v61  ;;  %v12028_v23 = vld [vmem:[%s13990_s0 + $0x160] sm:$0xff]  ;;  %v3184_v59 = vmul.f32 %v11264_v39, %v11618_v62 }
 0x186   :  { %6972 = vmatprep.subr.bf16.mxu0 %v6971_v34  ;;  %14259 = vst [vmem:[#allocation22_spill] sm:$0xff] %v12028_v23  ;;  %v2838_v19 = vmul.f32 %v12028_v23, %v11293_v53  ;;  %v2875_v5 = vmax.f32 %v2869_v32, 0.0  ;;  %v12033_v34 = vstv %s11920_s13  ;;  %v3192_v12 = vmul.f32 %v11271_v30, %v11621_v11  ;;  %v12042_v61 = vld [vmem:[%s13990_s0 + $0x1a0] sm:$0xff]  ;;  %s12440_s13 = sld [smem:[#allocation2 + $0x405]] }
 0x187   :  { %6958 = vmatpush3.bf16.msra.mxu1 %v6957_v16  ;;  %v3277_v16 = vmul.f32 %v12014_v22, %v11999_v0  ;;  %v3269_v54 = vadd.f32 %v3263_v8, %v3255_v38  ;;  %v3291_v21 = vmul.f32 %v12042_v61, %v12033_v34  ;;  %v6995_v53 = vpack.c.bf16 %v5307_v1, %v5306_v40  ;;  %v5282_v8 = vld [vmem:[%s13993_s3 + $0x1140] sm:$0xff]  ;;  %v5283_v38 = vld [vmem:[%s13993_s3 + $0x1148] sm:$0xff] }
 0x188   :  { %6991 = vmatprep.subr.bf16.mxu1 %v14123_v27  ;;  %v5797_v18 = vpop.f32.mrb[6].mxu1  ;;  %v3266_v46 = vadd.f32 %v3260_v50, %v3252_v58  ;;  %v3274_v39 = vmul.f32 %v11324_v36, %v11999_v0  ;;  %v6979_v30 = vpack.c.bf16 %v5299_v47, %v5298_v6  ;;  %v5309_v36 = vld [vmem:[%s13993_s3 + $0x1218] sm:$0xff]  ;;  %v12072_v50 = vld [vmem:[%s13990_s0 + $0x190] sm:$0xff]  ;;  %v2844_v1 = vadd.f32 %v2838_v19, %v2830_v10  ;;  %v5311_v19 = vld [vmem:[%s13993_s3 + $0x1228] sm:$0xff] }
 0x189   :  { %6974 = vmatpush3.bf16.msra.mxu0 %v6973_v45  ;;  %v5798_v32 = vpop.f32.mrb[7].mxu1  ;;  %v5308_v45 = vld [vmem:[%s13993_s3 + $0x1210] sm:$0xff]  ;;  %v3283_v58 = vadd.f32 %v3277_v16, %v3269_v54  ;;  %14260 = vst [vmem:[#allocation10_spill] sm:$0xff] %v12072_v50  ;;  %v2852_v40 = vmul.f32 %v12072_v50, %v11334_v33  ;;  %v3198_v16 = vadd.f32 %v3192_v12, %v3184_v59  ;;  %v12085_v42 = vstv %s12001_s21  ;;  %v5303_v59 = vld [vmem:[%s13993_s3 + $0x11e8] sm:$0xff]  ;;  %v12109_v12 = vld [vmem:[%s13990_s0] sm:$0xff]  ;;  %s12351_s21 = sld [smem:[#allocation2 + $0x402]] }
 0x18a   :  { %3033 = vmatmul.mubr.f32.vlgmr.msra.gmra.mrb[18].mxu1 %v2870_v37  ;;  %6976 = vmatprep.subr.bf16.mxu0 %v6975_v41  ;;  %v12057_v37 = vadd.f32 %v5798_v32, %v5797_v18  ;;  %v5301_v41 = vld [vmem:[%s13993_s3 + $0x11d8] sm:$0xff]  ;;  %v3206_v6 = vmul.f32 %v11311_v13, %v11700_v57  ;;  %v6981_v18 = vpack.c.bf16 %v5283_v38, %v5282_v8  ;;  %v5284_v54 = vld [vmem:[%s13993_s3 + $0x1150] sm:$0xff] }
 0x18b   :  { %6993 = vmatpush1.bf16.msra.mxu1 %v6992_v9  ;;  %v5300_v9 = vld [vmem:[%s13993_s3 + $0x11d0] sm:$0xff]  ;;  %5326 = vmatprep.mubr.msk.f32.mxu1 %vm560_vm0, %v2875_v5  ;;  %v3297_v47 = vadd.f32 %v3291_v21, %v3283_v58  ;;  %v3280_v32 = vadd.f32 %v3274_v39, %v3266_v46  ;;  %v3288_v23 = vmul.f32 %v11368_v2, %v12033_v34  ;;  %v5285_v13 = vld [vmem:[%s13993_s3 + $0x1158] sm:$0xff]  ;;  %v5302_v5 = vld [vmem:[%s13993_s3 + $0x11e0] sm:$0xff] }
 0x18c   :  { %6994 = vmatprep.subr.bf16.mxu1 %v14123_v27  ;;  %v6998_v33 = vpack.c.bf16 %v5309_v36, %v5308_v45  ;;  %v6983_v10 = vpack.c.bf16 %v5301_v41, %v5300_v9  ;;  %14262 = vst [vmem:[#allocation25_spill] sm:$0xff] %v12109_v12  ;;  %v3181_v21 = vmul.f32 %v12109_v12, %v11618_v62  ;;  %v5286_v58 = vld [vmem:[%s13993_s3 + $0x1160] sm:$0xff]  ;;  %v5287_v41 = vld [vmem:[%s13993_s3 + $0x1168] sm:$0xff]  ;;  %v12315_v50 = vld [vmem:[%s13993_s3 + $0x12d8] sm:$0xff] }
 0x18d   :  { %6978 = vmatpush3.bf16.msra.mxu0 %v6977_v49  ;;  %v5310_v49 = vld [vmem:[%s13993_s3 + $0x1220] sm:$0xff]  ;;  %v12097_v2 = vadd.f32 %v12085_v42, %v3297_v47  ;;  %v2858_v39 = vadd.f32 %v2852_v40, %v2844_v1  ;;  %v3220_v8 = vmul.f32 %v11361_v4, %v11780_v31  ;;  %v6985_v38 = vpack.c.bf16 %v5285_v13, %v5284_v54  ;;  %v5312_v40 = vld [vmem:[%s13993_s3 + $0x1230] sm:$0xff]  ;;  %v5313_v4 = vld [vmem:[%s13993_s3 + $0x1238] sm:$0xff] }
 0x18e   :  { %6980 = vmatprep.subr.bf16.mxu0 %v6979_v30  ;;  %v3212_v30 = vadd.f32 %v3206_v6, %v3198_v16  ;;  %v7001_v45 = vpack.c.bf16 %v5311_v19, %v5310_v49  ;;  %v3294_v36 = vadd.f32 %v3288_v23, %v3280_v32  ;;  %v6987_v9 = vpack.c.bf16 %v5303_v59, %v5302_v5  ;;  %v12137_v1 = vld [vmem:[%s13990_s0 + $0x28] sm:$0xff]  ;;  %v12144_v16 = vld [vmem:[%s13990_s0 + $0x58] sm:$0xff]  ;;  %v12163_v5 = vld [vmem:[%s13993_s3 + $0x1240] sm:$0xff] }
 0x18f   :  { %6996 = vmatpush1.bf16.msra.mxu1 %v6995_v53  ;;  %14261 = vst [vmem:[#allocation26_spill] sm:$0xff] %v12097_v2  ;;  %v12116_v53 = vld [vmem:[%s13990_s0 + $0x30] sm:$0xff]  ;;  %14264 = vst [vmem:[#allocation29_spill] sm:$0xff] %v12137_v1  ;;  %v3186_v23 = vmul.f32 %v12137_v1, %v11618_v62  ;;  %v3194_v6 = vmul.f32 %v12144_v16, %v11621_v11  ;;  %v5353_v47 = vld [vmem:[%s13993_s3 + $0x1318] sm:$0xff]  ;;  %v3203_v32 = vmul.f32 %v11432_v55, %v11700_v57 }
 0x190   :  { %6997 = vmatprep.subr.bf16.mxu1 %v14123_v27  ;;  %14263 = vst [vmem:[#allocation28_spill] sm:$0xff] %v12116_v53  ;;  %v3189_v46 = vmul.f32 %v12116_v53, %v11621_v11  ;;  %14265 = vst [vmem:[#allocation30_spill] sm:$0xff] %v12144_v16  ;;  %v3234_v13 = vmul.f32 %v11396_v26, %v11832_v44  ;;  %v6989_v49 = vpack.c.bf16 %v5287_v41, %v5286_v58  ;;  %v12168_v59 = vld [vmem:[%s13993_s3 + $0x1248] sm:$0xff]  ;;  %v5337_v26 = vld [vmem:[%s13993_s3 + $0x1298] sm:$0xff] }
 0x191   :  { %6982 = vmatpush3.bf16.msra.mxu0 %v6981_v18  ;;  %v5354_v18 = vld [vmem:[%s13993_s3 + $0x1320] sm:$0xff]  ;;  %v7004_v19 = vpack.c.bf16 %v5313_v4, %v5312_v40  ;;  %v3302_v55 = vadd.f32 %v12085_v42, %v3294_v36  ;;  %v12199_v58 = vld [vmem:[%s13993_s3 + $0x1258] sm:$0xff]  ;;  %v12206_v40 = vld [vmem:[%s13993_s3 + $0x12a8] sm:$0xff] }
 0x192   :  { %6984 = vmatprep.subr.bf16.mxu0 %v6983_v10  ;;  %v3195_v54 = vadd.f32 %v3189_v46, %v3181_v21  ;;  %v3226_v10 = vadd.f32 %v3220_v8, %v3212_v30  ;;  %v5338_v21 = vld [vmem:[%s13993_s3 + $0x12a0] sm:$0xff]  ;;  %v5355_v46 = vld [vmem:[%s13993_s3 + $0x1328] sm:$0xff]  ;;  %v12211_v4 = vld [vmem:[%s13993_s3 + $0x12b0] sm:$0xff] }
 0x193   :  { %6999 = vmatpush1.bf16.msra.mxu1 %v6998_v33  ;;  %v2866_v33 = vadd.f32 %v11415_v29, %v2858_v39  ;;  %v7021_v29 = vpack.c.bf16 %v5354_v18, %v5353_v47  ;;  %v3200_v39 = vadd.f32 %v3194_v6, %v3186_v23  ;;  %v12183_v30 = vld [vmem:[%s13990_s0 + $0x88] sm:$0xff]  ;;  %v12216_v23 = vld [vmem:[%s13993_s3 + $0x1338] sm:$0xff]  ;;  %v7007_v47 = vpack.c.bf16 %v12168_v59, %v12163_v5  ;;  %v12245_v5 = vld [vmem:[%s13993_s3 + $0x12c0] sm:$0xff] }
 0x194   :  { %7000 = vmatprep.subr.bf16.mxu1 %v14123_v27  ;;  %14266 = vst [vmem:[#allocation32_spill] sm:$0xff] %v12183_v30  ;;  %v3208_v8 = vmul.f32 %v12183_v30, %v11700_v57  ;;  %v3209_v36 = vadd.f32 %v3203_v32, %v3195_v54  ;;  %v3240_v6 = vadd.f32 %v3234_v13, %v3226_v10  ;;  %v12225_v54 = vld [vmem:[%s13993_s3 + $0x1340] sm:$0xff]  ;;  %v12250_v59 = vld [vmem:[%s13993_s3 + $0x1348] sm:$0xff]  ;;  %v14268_v2 = vld [vmem:[#allocation31_spill] sm:$0xff] }
 0x195   :  { %6986 = vmatpush3.bf16.msra.mxu0 %v6985_v38  ;;  %v5356_v38 = vld [vmem:[%s13993_s3 + $0x1330] sm:$0xff]  ;;  %v2872_v41 = vmax.f32 %v2866_v33, 0.0  ;;  %v7023_v18 = vpack.c.bf16 %v5338_v21, %v5337_v26  ;;  %v12230_v32 = vld [vmem:[%s13993_s3 + $0x1260] sm:$0xff]  ;;  %v12235_v33 = vld [vmem:[%s13993_s3 + $0x1268] sm:$0xff]  ;;  %v3231_v30 = vmul.f32 %v14268_v2, %v11832_v44 }
 0x196   :  { %6988 = vmatprep.subr.bf16.mxu0 %v6987_v9  ;;  %v3217_v9 = vmul.f32 %v11471_v51, %v11780_v31  ;;  %v3248_v51 = vmul.f32 %v11439_v17, %v11898_v63  ;;  %v3308_v17 = vmax.f32 %v3302_v55, 0.0  ;;  %v7025_v13 = vpack.c.bf16 %v5356_v38, %v5355_v46  ;;  %v12263_v46 = vld [vmem:[%s13993_s3 + $0x1270] sm:$0xff]  ;;  %v12268_v38 = vld [vmem:[%s13993_s3 + $0x1278] sm:$0xff]  ;;  %v12292_v12 = vld [vmem:[%s13993_s3 + $0x1360] sm:$0xff] }
 0x197   :  { %7002 = vmatpush1.bf16.msra.mxu1 %v7001_v45  ;;  %v12194_v45 = vld [vmem:[%s13993_s3 + $0x1250] sm:$0xff]  ;;  %v3214_v55 = vadd.f32 %v3208_v8, %v3200_v39  ;;  %v12273_v39 = vld [vmem:[%s13993_s3 + $0x12c8] sm:$0xff]  ;;  %v12287_v53 = vld [vmem:[%s13993_s3 + $0x1358] sm:$0xff] }
 0x198   :  { %7003 = vmatprep.subr.bf16.mxu1 %v14123_v27  ;;  %v12278_v8 = vld [vmem:[%s13993_s3 + $0x12d0] sm:$0xff]  ;;  %v7010_v1 = vpack.c.bf16 %v12199_v58, %v12194_v45  ;;  %v12302_v2 = vld [vmem:[%s13993_s3 + $0x1288] sm:$0xff]  ;;  %v3254_v45 = vadd.f32 %v3248_v51, %v3240_v6  ;;  %v12320_v6 = vld [vmem:[%s13993_s3 + $0x12e0] sm:$0xff] }
 0x199   :  { %6990 = vmatpush3.bf16.msra.mxu0 %v6989_v49  ;;  %v5832_v10 = vpop.f32.mrb[6].mxu0  ;;  %v12240_v49 = vld [vmem:[%s13993_s3 + $0x12b8] sm:$0xff]  ;;  %v14269_v58 = vld [vmem:[#allocation9_spill] sm:$0xff] }
 0x19a   :  { %7022 = vmatprep.subr.bf16.mxu0 %v7021_v29  ;;  %v14267_v29 = vld [vmem:[#allocation27_spill] sm:$0xff]  ;;  %v5833_v21 = vpop.f32.mrb[7].mxu0  ;;  %v12342_v51 = vld [vmem:[%s13993_s3 + $0x12e8] sm:$0xff] }
 0x19b   :  { %7005 = vmatpush1.bf16.msra.mxu1 %v7004_v19  ;;  %v12255_v19 = vld [vmem:[%s13993_s3 + $0x1350] sm:$0xff]  ;;  %v3222_v26 = vmul.f32 %v14267_v29, %v11780_v31  ;;  %v3223_v29 = vadd.f32 %v3217_v9, %v3209_v36  ;;  %v5834_v16 = vadd.f32 %v5833_v21, %v5832_v10  ;;  %v12297_v36 = vld [vmem:[%s13993_s3 + $0x1280] sm:$0xff]  ;;  %v3262_v9 = vmul.f32 %v14269_v58, %v11960_v35 }
 0x19c   :  { %7006 = vmatprep.subr.bf16.mxu1 %v14123_v27  ;;  %3103 = vmatmul.mubr.f32.vlgmr.msra.gmra.mrb[18].mxu0 %v2872_v41  ;;  %v7027_v41 = vpack.c.bf16 %v12211_v4, %v12206_v40  ;;  %v7029_v10 = vpack.c.bf16 %v12225_v54, %v12216_v23  ;;  %v7013_v21 = vpack.c.bf16 %v12235_v33, %v12230_v32  ;;  %v12329_v40 = vld [vmem:[%s13993_s3 + $0x1368] sm:$0xff]  ;;  %v12334_v4 = vld [vmem:[%s13993_s3 + $0x1370] sm:$0xff]  ;;  %v12366_v33 = vld [vmem:[%s13993_s3 + $0x1418] sm:$0xff] }
 0x19d   :  { %7024 = vmatpush3.bf16.msra.mxu0 %v7023_v18  ;;  %3469 = vmatprep.mubr.f32.mxu0 %v3308_v17  ;;  %v12337_v23 = vadd.f32 %v5834_v16, %v12057_v37  ;;  %v12347_v18 = vld [vmem:[%s13990_s0 + $0xe8] sm:$0xff]  ;;  %v7031_v37 = vpack.c.bf16 %v12245_v5, %v12240_v49  ;;  %v7033_v16 = vpack.c.bf16 %v12255_v19, %v12250_v59  ;;  %v12361_v32 = vld [vmem:[%s13993_s3 + $0x12f0] sm:$0xff]  ;;  %v12371_v17 = vld [vmem:[%s13993_s3 + $0x1420] sm:$0xff] }
 0x19e   :  { %7026 = vmatprep.subr.bf16.mxu0 %v7025_v13  ;;  %14270 = vst [vmem:[#allocation27_spill] sm:$0xff] %v12347_v18  ;;  %v3236_v54 = vmul.f32 %v12347_v18, %v11832_v44  ;;  %v3237_v13 = vadd.f32 %v3231_v30, %v3223_v29  ;;  %v14271_v49 = vld [vmem:[#allocation8_spill] sm:$0xff]  ;;  %v7035_v19 = vpack.c.bf16 %v12278_v8, %v12273_v39  ;;  %v12392_v30 = vld [vmem:[%s13993_s3 + $0x1378] sm:$0xff]  ;;  %v12447_v8 = vstv %s12322_s20  ;;  %s12469_s20 = sld [smem:[#allocation2 + $0x406]] }
 0x19f   :  { %7008 = vmatpush1.bf16.msra.mxu1 %v7007_v47  ;;  %v3228_v47 = vadd.f32 %v3222_v26, %v3214_v55  ;;  %v3245_v5 = vmul.f32 %v14271_v49, %v11898_v63  ;;  %v12382_v55 = vld [vmem:[%s13993_s3 + $0x1398] sm:$0xff]  ;;  %v12387_v26 = vld [vmem:[%s13993_s3 + $0x13a0] sm:$0xff]  ;;  %v3268_v29 = vadd.f32 %v3262_v9, %v3254_v45  ;;  %v7037_v39 = vpack.c.bf16 %v12292_v12, %v12287_v53 }
 0x1a0   :  { %7009 = vmatprep.subr.bf16.mxu1 %v14123_v27  ;;  %v14272_v58 = vld [vmem:[#allocation24_spill] sm:$0xff]  ;;  %v12414_v9 = vld [vmem:[%s13993_s3 + $0x12f8] sm:$0xff] }
 0x1a1   :  { %v3276_v49 = vmul.f32 %v14272_v58, %v11999_v0  ;;  %7028 = vmatpush3.bf16.msra.mxu0 %v7027_v41  ;;  %v12409_v45 = vld [vmem:[%s13993_s3 + $0x1380] sm:$0xff]  ;;  %14273 = vst [vmem:[#allocation31_spill] sm:$0xff] %v12414_v9  ;;  %v3242_v41 = vadd.f32 %v3236_v54, %v3228_v47  ;;  %v14274_v58 = vld [vmem:[#allocation13_spill] sm:$0xff]  ;;  %v12450_v47 = vstv %s12324_s10  ;;  %v3622_v54 = vmul.f32 %v11848_v60, %v12447_v8 }
 0x1a2   :  { %v12419_v12 = vld [vmem:[%s13993_s3 + $0x1300] sm:$0xff]  ;;  %7030 = vmatprep.subr.bf16.mxu0 %v7029_v10  ;;  %v3250_v18 = vmul.f32 %v14274_v58, %v11898_v63  ;;  %v3251_v10 = vadd.f32 %v3245_v5, %v3237_v13  ;;  %v3290_v63 = vmul.f32 %v14276_v3, %v12033_v34  ;;  %v14278_v5 = vld [vmem:[#allocation19_spill] sm:$0xff]  ;;  %v12460_v3 = vld [vmem:[%s13993_s3 + $0x1430] sm:$0xff]  ;;  %v3630_v9 = vmul.f32 %v11863_v43, %v12450_v47 }
 0x1a3   :  { %7011 = vmatpush1.bf16.msra.mxu1 %v7010_v1  ;;  %v14275_v59 = vld [vmem:[#allocation20_spill] sm:$0xff]  ;;  %v3282_v58 = vadd.f32 %v3276_v49, %v3268_v29  ;;  %v14277_v1 = vld [vmem:[#allocation21_spill] sm:$0xff]  ;;  %v12493_v43 = vstv %s12396_s14  ;;  %s12521_s14 = sld [smem:[#allocation2 + $0x408]] }
 0x1a4   :  { %7012 = vmatprep.subr.bf16.mxu1 %v14123_v27  ;;  %v3259_v53 = vmul.f32 %v14275_v59, %v11960_v35  ;;  %v3273_v13 = vmul.f32 %v14277_v1, %v11999_v0  ;;  %v3183_v59 = vmul.f32 %v14278_v5, %v11618_v62  ;;  %v12455_v29 = vld [vmem:[%s13993_s3 + $0x1428] sm:$0xff]  ;;  %v3256_v49 = vadd.f32 %v3250_v18, %v3242_v41  ;;  %v14280_v1 = vld [vmem:[#allocation16_spill] sm:$0xff] }
 0x1a5   :  { %7032 = vmatpush3.bf16.msra.mxu0 %v7031_v37  ;;  %v14279_v37 = vld [vmem:[#allocation12_spill] sm:$0xff]  ;;  %v3264_v5 = vmul.f32 %v14280_v1, %v11960_v35  ;;  %v3296_v18 = vadd.f32 %v3290_v63, %v3282_v58  ;;  %v12481_v41 = vld [vmem:[%s13990_s0 + $0x8] sm:$0xff]  ;;  %v14283_v63 = vld [vmem:[#allocation11_spill] sm:$0xff]  ;;  %v3636_v58 = vadd.f32 %v3630_v9, %v3622_v54  ;;  %v3658_v1 = vmul.f32 %v11903_v24, %v12493_v43 }
 0x1a6   :  { %7034 = vmatprep.subr.bf16.mxu0 %v7033_v16  ;;  %v3191_v62 = vmul.f32 %v14279_v37, %v11621_v11  ;;  %v3265_v16 = vadd.f32 %v3259_v53, %v3251_v10  ;;  %14281 = vst [vmem:[#allocation9_spill] sm:$0xff] %v12481_v41  ;;  %v3619_v37 = vmul.f32 %v12481_v41, %v12447_v8  ;;  %v12488_v53 = vld [vmem:[%s13990_s0 + $0x38] sm:$0xff]  ;;  %v12519_v54 = vstv %s12425_s16 }
 0x1a7   :  { %7014 = vmatpush1.bf16.msra.mxu1 %v7013_v21  ;;  %v12467_v21 = vstv %s12351_s21  ;;  %14282 = vst [vmem:[#allocation8_spill] sm:$0xff] %v12488_v53  ;;  %v3627_v60 = vmul.f32 %v12488_v53, %v12450_v47  ;;  %v3205_v10 = vmul.f32 %v14283_v63, %v11700_v57  ;;  %v14284_v41 = vpack.c.bf16 %v12268_v38, %v12263_v46  ;;  %v12509_v53 = vld [vmem:[%s13993_s3 + $0x13a8] sm:$0xff]  ;;  %v5324_v63 = vld [vmem:[%s13993_s3 + $0x1290] sm:$0xf] }
 0x1a8   :  { %7015 = vmatprep.subr.bf16.mxu1 %v14123_v27  ;;  %v3644_v11 = vmul.f32 %v11870_v52, %v12467_v21  ;;  %v7057_v52 = vpack.c.bf16 %v12460_v3, %v12455_v29  ;;  %v3197_v57 = vadd.f32 %v3191_v62, %v3183_v59  ;;  %v3270_v9 = vadd.f32 %v3264_v5, %v3256_v49  ;;  %v5392_v29 = vld [vmem:[%s13993_s3 + $0x1450] sm:$0xff] }
 0x1a9   :  { %7036 = vmatpush3.bf16.msra.mxu0 %v7035_v19  ;;  %v12514_v19 = vld [vmem:[%s13993_s3 + $0x13b0] sm:$0xff]  ;;  %v3278_v24 = vmul.f32 %v11789_v20, %v11999_v0  ;;  %v3279_v46 = vadd.f32 %v3273_v13, %v3265_v16  ;;  %v3287_v38 = vmul.f32 %v11805_v28, %v12033_v34  ;;  %v3304_v59 = vadd.f32 %v12085_v42, %v3296_v18  ;;  %v12532_v20 = vld [vmem:[%s13990_s0 + $0x68] sm:$0xff] }
 0x1aa   :  { %7038 = vmatprep.subr.bf16.mxu0 %v7037_v39  ;;  %v3650_v39 = vadd.f32 %v3644_v11, %v3636_v58  ;;  %v3633_v62 = vadd.f32 %v3627_v60, %v3619_v37  ;;  %v3641_v49 = vmul.f32 %v12532_v20, %v12467_v21  ;;  %v12537_v5 = vstv %s12440_s13  ;;  %v5367_v13 = vld [vmem:[%s13993_s3 + $0x1388] sm:$0xff]  ;;  %v14289_v58 = vld [vmem:[#allocation23_spill] sm:$0xff] }
 0x1ab   :  { %7017 = vmatpush1.bf16.msra.mxu1 %v14284_v41  ;;  %v3672_v41 = vmul.f32 %v11940_v15, %v12519_v54  ;;  %v14285_v28 = vpack.c.bf16 %v12320_v6, %v12315_v50  ;;  %v7059_v15 = vpack.c.bf16 %v12514_v19, %v12509_v53  ;;  %v3219_v16 = vmul.f32 %v11775_v14, %v11780_v31  ;;  %v5368_v6 = vld [vmem:[%s13993_s3 + $0x1390] sm:$0xff]  ;;  %v12563_v14 = vld [vmem:[%s13993_s3 + $0x1308] sm:$0xff] }
 0x1ac   :  { %7018 = vmatprep.subr.bf16.mxu1 %v14123_v27  ;;  %v3664_v11 = vadd.f32 %v3658_v1, %v3650_v39  ;;  %v3686_v18 = vmul.f32 %v11965_v25, %v12537_v5  ;;  %v14286_v37 = vpack.c.bf16 %v12302_v2, %v12297_v36  ;;  %v14287_v50 = vpack.c.bf16 %v12334_v4, %v12329_v40  ;;  %v12568_v31 = vld [vmem:[%s13993_s3 + $0x1310] sm:$0xff]  ;;  %v12573_v2 = vld [vmem:[%s13990_s0 + $0x1a8] sm:$0xff] }
 0x1ad   :  { %7040 = vmatpush3.bf16.msra.mxu0 %v14285_v28  ;;  %v3211_v25 = vadd.f32 %v3205_v10, %v3197_v57  ;;  %v3284_v36 = vadd.f32 %v3278_v24, %v3270_v9  ;;  %v3292_v40 = vmul.f32 %v12573_v2, %v12033_v34  ;;  %v12578_v4 = vstv %s12469_s20  ;;  %v12590_v28 = vld [vmem:[%s13990_s0 + $0x98] sm:$0xff]  ;;  %s12597_s20 = sld [smem:[#allocation4 + $0x8]]  ;;  %v5403_v53 = vld [vmem:[%s13993_s3 + $0x14a8] sm:$0xff] }
 0x1ae   :  { %7042 = vmatprep.subr.bf16.mxu0 %v14287_v50  ;;  %v14288_v60 = vmov 0.0   ;;  %v2874_v1 = vmax.f32 %v14289_v58, 0.0  ;;  %v3293_v10 = vadd.f32 %v3287_v38, %v3279_v46  ;;  %v3678_v57 = vadd.f32 %v3672_v41, %v3664_v11  ;;  %v5375_v58 = vld [vmem:[%s13993_s3 + $0x13c8] sm:$0xff] }
 0x1af   :  { %7020 = vmatpush1.bf16.msra.mxu1 %v14286_v37  ;;  %v3700_v9 = vmul.f32 %v11992_v56, %v12578_v4  ;;  %v3310_v24 = vmax.f32 %v3304_v59, 0.0  ;;  %v3647_v39 = vadd.f32 %v3641_v49, %v3633_v62  ;;  %v3655_v37 = vmul.f32 %v12590_v28, %v12493_v43 }
 0x1b0   :  { %3148 = vmatprep.subr.mxu1 %v14288_v60  ;;  %v12595_v50 = vstv %s12495_s24  ;;  %v14290_v46 = vpack.c.bf16 %v12361_v32, %v12342_v51  ;;  %v7049_v56 = vpack.c.bf16 %v5368_v6, %v5367_v13  ;;  %v7051_v38 = vpack.c.bf16 %v12568_v31, %v12563_v14  ;;  %v5389_v51 = vld [vmem:[%s13993_s3 + $0x1438] sm:$0xff]  ;;  %v5390_v32 = vld [vmem:[%s13993_s3 + $0x1440] sm:$0xff]  ;;  %s12851_s24 = sld [smem:[#allocation2 + $0x481]] }
 0x1b1   :  { %v3692_v41 = vadd.f32 %v3686_v18, %v3678_v57  ;;  %v3714_v59 = vmul.f32 %v12014_v22, %v12595_v50  ;;  %v14291_v49 = vpack.c.bf16 %v12409_v45, %v12392_v30  ;;  %v3225_v13 = vadd.f32 %v3219_v16, %v3211_v25  ;;  %v14296_v57 = vld [vmem:[#allocation14_spill] sm:$0xff] }
 0x1b2   :  { %7044 = vmatpush3.bf16.msra.mxu0 %v14290_v46  ;;  %v1426_v62 = vpop.f32.mrb[8].mxu1  ;;  %v3233_v11 = vmul.f32 %v11827_v48, %v11832_v44  ;;  %v3298_v22 = vadd.f32 %v3292_v40, %v3284_v36  ;;  %v12619_v18 = vstv %s12521_s14  ;;  %v14292_v30 = vpack.c.bf16 %v12371_v17, %v12366_v33  ;;  %v5373_v48 = vld [vmem:[%s13993_s3 + $0x13b8] sm:$0xff]  ;;  %v5374_v44 = vld [vmem:[%s13993_s3 + $0x13c0] sm:$0xff] }
 0x1b3   :  { %5325 = vmatpush1.msk.msra.mxu1 %vm564_vm1, %v5324_v63  ;;  %7046 = vmatprep.subr.bf16.mxu0 %v14291_v49  ;;  %v1427_v6 = vadd.f32 %v1426_v62, %v12337_v23  ;;  %v1428_v45 = vpop.f32.mrb[9].mxu1  ;;  %v3706_v14 = vadd.f32 %v3700_v9, %v3692_v41  ;;  %v3728_v31 = vmul.f32 %v12042_v61, %v12619_v18  ;;  %v12640_v61 = vld [vmem:[%s13990_s0 + $0xc8] sm:$0xff]  ;;  %v5401_v40 = vld [vmem:[%s13993_s3 + $0x1498] sm:$0xff] }
 0x1b4   :  { %3173 = vmatmul.mubr.f32.vlgmr.msra.gmra.mrb[20].mxu1 %v2874_v1  ;;  %7054 = vmatprep.subr.bf16.mxu1 %v14292_v30  ;;  %v14293_v16 = vpack.c.bf16 %v12387_v26, %v12382_v55  ;;  %v3301_v23 = vadd.f32 %v12085_v42, %v3293_v10  ;;  %v3661_v33 = vadd.f32 %v3655_v37, %v3647_v39  ;;  %v14294_v26 = vld [vmem:[#allocation31_spill] sm:$0xff]  ;;  %v5376_v1 = vld [vmem:[%s13993_s3 + $0x13d0] sm:$0xff]  ;;  %v14299_v30 = vld [vmem:[#allocation17_spill] sm:$0xff] }
 0x1b5   :  { %3539 = vmatprep.mubr.f32.mxu1 %v3310_v24  ;;  %v3669_v17 = vmul.f32 %v12640_v61, %v12519_v54  ;;  %v12645_v55 = vadd.f32 %v1427_v6, %v11822_v7  ;;  %v14295_v25 = vpack.c.bf16 %v12419_v12, %v14294_v26  ;;  %v7061_v36 = vpack.c.bf16 %v5390_v32, %v5389_v51  ;;  %v5402_v7 = vld [vmem:[%s13993_s3 + $0x14a0] sm:$0xff]  ;;  %v5391_v12 = vld [vmem:[%s13993_s3 + $0x1448] sm:$0xff]  ;;  %v14297_v9 = vld [vmem:[#allocation15_spill] sm:$0xff] }
 0x1b6   :  { %7056 = vmatpush3.bf16.msra.mxu1 %v14293_v16  ;;  %v3720_v63 = vadd.f32 %v3714_v59, %v3706_v14  ;;  %v3306_v3 = vadd.f32 %v12085_v42, %v3298_v22  ;;  %v3239_v10 = vadd.f32 %v3233_v11, %v3225_v13  ;;  %v3247_v24 = vmul.f32 %v14297_v9, %v14296_v57  ;;  %v5404_v32 = vld [vmem:[%s13993_s3 + $0x14b0] sm:$0xff]  ;;  %v5394_v13 = vld [vmem:[%s13993_s3 + $0x1460] sm:$0xff]  ;;  %v12708_v14 = vld [vmem:[%s13990_s0 + $0x18] sm:$0xff] }
 0x1b7   :  { %7048 = vmatpush3.bf16.msra.mxu0 %v14295_v25  ;;  %7058 = vmatprep.subr.bf16.mxu1 %v7057_v52  ;;  %v7063_v52 = vpack.c.bf16 %v5374_v44, %v5373_v48  ;;  %v3307_v37 = vmax.f32 %v3301_v23, 0.0  ;;  %v3675_v46 = vadd.f32 %v3669_v17, %v3661_v33  ;;  %v12685_v59 = vstv %s12597_s20  ;;  %v12715_v16 = vld [vmem:[%s13990_s0 + $0x48] sm:$0xff]  ;;  %v5377_v25 = vld [vmem:[%s13993_s3 + $0x13d8] sm:$0xff] }
 0x1b8   :  { %7050 = vmatprep.subr.bf16.mxu0 %v7049_v56  ;;  %v3734_v39 = vadd.f32 %v3728_v31, %v3720_v63  ;;  %v12680_v56 = vld [vmem:[%s13990_s0 + $0xf8] sm:$0xff]  ;;  %v7086_v62 = vpack.c.bf16 %v5402_v7, %v5401_v40  ;;  %v7065_v49 = vpack.c.bf16 %v5392_v29, %v5391_v12  ;;  %v7067_v51 = vpack.c.bf16 %v5376_v1, %v5375_v58  ;;  %v12724_v23 = vld [vmem:[%s13990_s0 + $0x128] sm:$0xff]  ;;  %v5406_v63 = vld [vmem:[%s13993_s3 + $0x14c0] sm:$0xff] }
 0x1b9   :  { %v3683_v41 = vmul.f32 %v12680_v56, %v12537_v5  ;;  %v3312_v11 = vmax.f32 %v3306_v3, 0.0  ;;  %v3253_v6 = vadd.f32 %v3247_v24, %v3239_v10  ;;  %v3261_v45 = vmul.f32 %v14299_v30, %v11960_v35  ;;  %v5405_v40 = vld [vmem:[%s13993_s3 + $0x14b8] sm:$0xff]  ;;  %v5395_v7 = vld [vmem:[%s13993_s3 + $0x1468] sm:$0xff]  ;;  %v5396_v12 = vld [vmem:[%s13993_s3 + $0x1470] sm:$0xff] }
 0x1ba   :  { %7060 = vmatpush3.bf16.msra.mxu1 %v7059_v15  ;;  %v12691_v19 = vadd.f32 %v12685_v59, %v3734_v39  ;;  %v5867_v15 = vpop.f32.mrb[8].mxu0  ;;  %v3621_v31 = vmul.f32 %v12708_v14, %v12447_v8  ;;  %v3629_v48 = vmul.f32 %v12715_v16, %v12450_v47  ;;  %v3697_v33 = vmul.f32 %v12724_v23, %v12578_v4  ;;  %v14300_v3 = vld [vmem:[#allocation22_spill] sm:$0xff]  ;;  %v12753_v1 = vld [vmem:[%s13990_s0 + $0x78] sm:$0xff]  ;;  %v5379_v9 = vld [vmem:[%s13993_s3 + $0x13e8] sm:$0xff] }
 0x1bb   :  { %7052 = vmatpush3.bf16.msra.mxu0 %v7051_v38  ;;  %7062 = vmatprep.subr.bf16.mxu1 %v7061_v36  ;;  %v5393_v38 = vld [vmem:[%s13993_s3 + $0x1458] sm:$0xff]  ;;  %v5868_v22 = vpop.f32.mrb[9].mxu0  ;;  %v3689_v35 = vadd.f32 %v3683_v41, %v3675_v46  ;;  %v7089_v17 = vpack.c.bf16 %v5404_v32, %v5403_v53  ;;  %v5378_v36 = vld [vmem:[%s13993_s3 + $0x13e0] sm:$0xff]  ;;  %v3267_v29 = vadd.f32 %v3261_v45, %v3253_v6  ;;  %v5380_v24 = vld [vmem:[%s13993_s3 + $0x13f0] sm:$0xff] }
 0x1bc   :  { %14298 = vst [vmem:[#allocation24_spill] sm:$0xff] %v12691_v19  ;;  %7085 = vmatprep.subr.bf16.mxu0 %v14123_v27  ;;  %v12719_v44 = vadd.f32 %v5868_v22, %v5867_v15  ;;  %v7069_v26 = vpack.c.bf16 %v5394_v13, %v5393_v38  ;;  %v3635_v58 = vadd.f32 %v3629_v48, %v3621_v31  ;;  %v12766_v39 = vld [vmem:[%s13990_s0 + $0x158] sm:$0xff]  ;;  %v5398_v15 = vld [vmem:[%s13993_s3 + $0x1480] sm:$0xff]  ;;  %v14301_v6 = vld [vmem:[#allocation10_spill] sm:$0xff] }
 0x1bd   :  { %v3643_v10 = vmul.f32 %v12753_v1, %v12467_v21  ;;  %v7071_v57 = vpack.c.bf16 %v5378_v36, %v5377_v25  ;;  %v7092_v46 = vpack.c.bf16 %v5406_v63, %v5405_v40  ;;  %v7073_v41 = vpack.c.bf16 %v5396_v12, %v5395_v7  ;;  %v5397_v53 = vld [vmem:[%s13993_s3 + $0x1478] sm:$0xff]  ;;  %v12791_v32 = vld [vmem:[%s13993_s3 + $0x1400] sm:$0xff]  ;;  %v12813_v31 = vld [vmem:[%s13990_s0 + $0xa8] sm:$0xff] }
 0x1be   :  { %7064 = vmatpush3.bf16.msra.mxu1 %v7063_v52  ;;  %3470 = vmatmul.mubr.f32.vlgmr.msra.gmra.mrb[20].mxu0 %v3307_v37  ;;  %v3275_v52 = vmul.f32 %v14300_v3, %v11999_v0  ;;  %v3703_v0 = vadd.f32 %v3697_v33, %v3689_v35  ;;  %v3711_v37 = vmul.f32 %v12766_v39, %v12595_v50  ;;  %v12796_v38 = vld [vmem:[%s13993_s3 + $0x14d8] sm:$0xff]  ;;  %v12801_v13 = vld [vmem:[%s13993_s3 + $0x14e0] sm:$0xff]  ;;  %v12820_v33 = vld [vmem:[%s13993_s3 + $0x1490] sm:$0xff] }
 0x1bf   :  { %7087 = vmatpush1.bf16.msra.mxu0 %v7086_v62  ;;  %7066 = vmatprep.subr.bf16.mxu1 %v7065_v49  ;;  %v5407_v62 = vld [vmem:[%s13993_s3 + $0x14c8] sm:$0xff]  ;;  %v5408_v49 = vld [vmem:[%s13993_s3 + $0x14d0] sm:$0xff]  ;;  %v3289_v30 = vmul.f32 %v14301_v6, %v12033_v34  ;;  %v3649_v45 = vadd.f32 %v3643_v10, %v3635_v58  ;;  %14302 = vst [vmem:[#allocation13_spill] sm:$0xff] %v12813_v31  ;;  %v12861_v3 = vld [vmem:[%s13993_s3 + $0x15c0] sm:$0xff] }
 0x1c0   :  { %7088 = vmatprep.subr.bf16.mxu0 %v14123_v27  ;;  %5423 = vmatprep.mubr.msk.f32.mxu0 %vm560_vm0, %v3312_v11  ;;  %v12806_v11 = vld [vmem:[%s13993_s3 + $0x1488] sm:$0xff]  ;;  %v3281_v22 = vadd.f32 %v3275_v52, %v3267_v29  ;;  %v3657_v48 = vmul.f32 %v12813_v31, %v12493_v43  ;;  %v7075_v35 = vpack.c.bf16 %v5380_v24, %v5379_v9  ;;  %v12849_v12 = vld [vmem:[%s13993_s3 + $0x14f0] sm:$0xff]  ;;  %v12871_v58 = vld [vmem:[%s13993_s3 + $0x1540] sm:$0xff] }
 0x1c1   :  { %v12825_v34 = vld [vmem:[%s13993_s3 + $0x1408] sm:$0xff]  ;;  %v7095_v40 = vpack.c.bf16 %v5408_v49, %v5407_v62  ;;  %v7077_v63 = vpack.c.bf16 %v5398_v15, %v5397_v53  ;;  %v14304_v9 = vld [vmem:[#allocation28_spill] sm:$0xff]  ;;  %v12897_v53 = vld [vmem:[%s13990_s0 + $0xd8] sm:$0xff] }
 0x1c2   :  { %7068 = vmatpush3.bf16.msra.mxu1 %v7067_v51  ;;  %v12786_v51 = vld [vmem:[%s13993_s3 + $0x13f8] sm:$0xff]  ;;  %v12835_v25 = vld [vmem:[%s13990_s0 + $0x188] sm:$0xff]  ;;  %v3626_v24 = vmul.f32 %v14304_v9, %v12450_v47  ;;  %v12892_v62 = vld [vmem:[%s13993_s3 + $0x1500] sm:$0xff]  ;;  %v3663_v49 = vadd.f32 %v3657_v48, %v3649_v45  ;;  %14305 = vst [vmem:[#allocation20_spill] sm:$0xff] %v12897_v53  ;;  %v3671_v15 = vmul.f32 %v12897_v53, %v12519_v54  ;;  %v13027_v53 = vstv %s12901_s18 }
 0x1c3   :  { %7090 = vmatpush1.bf16.msra.mxu0 %v7089_v17  ;;  %7070 = vmatprep.subr.bf16.mxu1 %v7069_v26  ;;  %v12830_v17 = vld [vmem:[%s13993_s3 + $0x1410] sm:$0xff]  ;;  %v3717_v26 = vadd.f32 %v3711_v37, %v3703_v0  ;;  %v3725_v36 = vmul.f32 %v12835_v25, %v12619_v18  ;;  %v12844_v7 = vld [vmem:[%s13993_s3 + $0x14e8] sm:$0xff]  ;;  %v7079_v29 = vpack.c.bf16 %v12791_v32, %v12786_v51  ;;  %v12929_v45 = vld [vmem:[%s13993_s3 + $0x1558] sm:$0xff] }
 0x1c4   :  { %7091 = vmatprep.subr.bf16.mxu0 %v14123_v27  ;;  %v12866_v52 = vld [vmem:[%s13993_s3 + $0x15c8] sm:$0xff]  ;;  %v7098_v0 = vpack.c.bf16 %v12801_v13, %v12796_v38  ;;  %v3295_v37 = vadd.f32 %v3289_v30, %v3281_v22  ;;  %v7081_v51 = vpack.c.bf16 %v12820_v33, %v12806_v11  ;;  %v7083_v32 = vpack.c.bf16 %v12830_v17, %v12825_v34  ;;  %v12912_v13 = vld [vmem:[%s13993_s3 + $0x15d0] sm:$0xff]  ;;  %v12917_v22 = vld [vmem:[%s13993_s3 + $0x15d8] sm:$0xff] }
 0x1c5   :  { %v14303_v10 = vld [vmem:[#allocation25_spill] sm:$0xff]  ;;  %v3731_v6 = vadd.f32 %v3725_v36, %v3717_v26  ;;  %v7115_v11 = vpack.c.bf16 %v12866_v52, %v12861_v3  ;;  %v12924_v30 = vld [vmem:[%s13993_s3 + $0x1550] sm:$0xff]  ;;  %v12989_v52 = vstv %s12851_s24  ;;  %v12992_v26 = vstv %s12853_s27  ;;  %v7503_v19 = vld [vmem:[%s13990_s0 + $0x80] sm:$0xff] }
 0x1c6   :  { %7072 = vmatpush3.bf16.msra.mxu1 %v7071_v57  ;;  %v3618_v57 = vmul.f32 %v14303_v10, %v12447_v8  ;;  %v14306_v48 = vld [vmem:[#allocation29_spill] sm:$0xff]  ;;  %v14307_v33 = vld [vmem:[#allocation30_spill] sm:$0xff]  ;;  %v3303_v3 = vadd.f32 %v12085_v42, %v3295_v37  ;;  %v3677_v10 = vadd.f32 %v3671_v15, %v3663_v49  ;;  %v12974_v15 = vstv %s12839_s22  ;;  %s12994_s22 = sld [smem:[#allocation2 + $0x486]] }
 0x1c7   :  { %7093 = vmatpush1.bf16.msra.mxu0 %v7092_v46  ;;  %7074 = vmatprep.subr.bf16.mxu1 %v7073_v41  ;;  %v12882_v46 = vld [vmem:[%s13993_s3 + $0x1548] sm:$0xff]  ;;  %v12887_v41 = vld [vmem:[%s13993_s3 + $0x14f8] sm:$0xff]  ;;  %v3631_v34 = vmul.f32 %v14307_v33, %v12450_v47  ;;  %v12969_v37 = vld [vmem:[%s13990_s0 + $0x90] sm:$0xff] }
 0x1c8   :  { %7094 = vmatprep.subr.bf16.mxu0 %v14123_v27  ;;  %v3632_v36 = vadd.f32 %v3626_v24, %v3618_v57  ;;  %v12955_v9 = vld [vmem:[%s13990_s0 + $0x108] sm:$0xff]  ;;  %v12964_v24 = vadd.f32 %v12685_v59, %v3731_v6  ;;  %14310 = vst [vmem:[#allocation19_spill] sm:$0xff] %v12969_v37  ;;  %v3654_v49 = vmul.f32 %v12969_v37, %v12493_v43  ;;  %v12984_v6 = vld [vmem:[%s13993_s3 + $0x1510] sm:$0xff]  ;;  %v14311_v33 = vld [vmem:[#allocation32_spill] sm:$0xff]  ;;  %v3309_v37 = vmax.f32 %v3303_v3, 0.0 }
 0x1c9   :  { %14309 = vst [vmem:[#allocation21_spill] sm:$0xff] %v12955_v9  ;;  %v3685_v57 = vmul.f32 %v12955_v9, %v12537_v5  ;;  %v3645_v42 = vmul.f32 %v14311_v33, %v12467_v21  ;;  %v7502_v17 = vld [vmem:[%s13990_s0 + $0x50] sm:$0xff]  ;;  %v4081_v9 = vmul.f32 %v7503_v19, %v12992_v26  ;;  %v13036_v19 = vld [vmem:[%s13993_s3 + $0x1560] sm:$0xff]  ;;  %v13041_v3 = vld [vmem:[%s13993_s3 + $0x1568] sm:$0xff] }
 0x1ca   :  { %7076 = vmatpush3.bf16.msra.mxu1 %v7075_v35  ;;  %v3623_v35 = vmul.f32 %v14306_v48, %v12447_v8  ;;  %v4067_v38 = vmul.f32 %v7502_v17, %v12989_v52  ;;  %v14313_v17 = vpack.c.bf16 %v12849_v12, %v12844_v7 }
 0x1cb   :  { %7096 = vmatpush1.bf16.msra.mxu0 %v7095_v40  ;;  %7078 = vmatprep.subr.bf16.mxu1 %v7077_v63  ;;  %v12945_v40 = vld [vmem:[%s13990_s0 + $0x60] sm:$0xff] }
 0x1cc   :  { %7097 = vmatprep.subr.bf16.mxu0 %v14123_v27  ;;  %14308 = vst [vmem:[#allocation18_spill] sm:$0xff] %v12945_v40  ;;  %v3640_v63 = vmul.f32 %v12945_v40, %v12467_v21  ;;  %v3637_v48 = vadd.f32 %v3631_v34, %v3623_v35  ;;  %v7501_v34 = vld [vmem:[%s13990_s0 + $0x20] sm:$0xff] }
 0x1cd   :  { %v4059_v33 = vmul.f32 %v7501_v34, %v12974_v15 }
 0x1ce   :  { %7080 = vmatpush3.bf16.msra.mxu1 %v7079_v29  ;;  %v12979_v29 = vld [vmem:[%s13993_s3 + $0x1508] sm:$0xff]  ;;  %v3646_v35 = vadd.f32 %v3640_v63, %v3632_v36  ;;  %v3691_v36 = vadd.f32 %v3685_v57, %v3677_v10  ;;  %v13022_v63 = vld [vmem:[%s13990_s0 + $0x138] sm:$0xff]  ;;  %v3745_v10 = vmax.f32 %v12964_v24, 0.0  ;;  %v3651_v31 = vadd.f32 %v3645_v42, %v3637_v48 }
 0x1cf   :  { %7099 = vmatpush1.bf16.msra.mxu0 %v7098_v0  ;;  %7082 = vmatprep.subr.bf16.mxu1 %v7081_v51  ;;  %v13000_v0 = vld [vmem:[%s13993_s3 + $0x15e0] sm:$0xff]  ;;  %v13005_v51 = vld [vmem:[%s13993_s3 + $0x15e8] sm:$0xff]  ;;  %14312 = vst [vmem:[#allocation12_spill] sm:$0xff] %v13022_v63  ;;  %v3699_v34 = vmul.f32 %v13022_v63, %v12578_v4  ;;  %v4073_v57 = vadd.f32 %v4067_v38, %v4059_v33  ;;  %v13056_v24 = vld [vmem:[%s13990_s0 + $0xb8] sm:$0xff]  ;;  %v13061_v33 = vstv %s12935_s23 }
 0x1d0   :  { %7100 = vmatprep.subr.bf16.mxu0 %v14123_v27  ;;  %v7123_v40 = vpack.c.bf16 %v13005_v51, %v13000_v0  ;;  %v3659_v38 = vmul.f32 %v13056_v24, %v12493_v43  ;;  %v3660_v12 = vadd.f32 %v3654_v49, %v3646_v35  ;;  %v7508_v0 = vld [vmem:[%s13990_s0 + $0xe0] sm:$0xff]  ;;  %v13122_v49 = vstv %s12994_s22 }
 0x1d1   :  { %v4087_v48 = vadd.f32 %v4081_v9, %v4073_v57  ;;  %v4109_v51 = vmul.f32 %v7508_v0, %v13061_v33  ;;  %v3705_v35 = vadd.f32 %v3699_v34, %v3691_v36  ;;  %v13087_v57 = vstv %s12959_s29  ;;  %v13100_v36 = vld [vmem:[%s13993_s3 + $0x1520] sm:$0xff] }
 0x1d2   :  { %7084 = vmatpush3.bf16.msra.mxu1 %v7083_v32  ;;  %v7505_v32 = vld [vmem:[%s13990_s0 + $0xb0] sm:$0xff]  ;;  %v5902_v7 = vpop.f32.mrb[10].mxu1  ;;  %v14316_v0 = vpack.c.bf16 %v12882_v46, %v12871_v58  ;;  %v14317_v58 = vpack.c.bf16 %v12892_v62, %v12887_v41  ;;  %v14318_v46 = vpack.c.bf16 %v12917_v22, %v12912_v13  ;;  %v5457_v62 = vld [vmem:[%s13993_s3 + $0x15f8] sm:$0xff] }
 0x1d3   :  { %v4095_v63 = vmul.f32 %v7505_v32, %v13027_v53  ;;  %7102 = vmatpush1.bf16.msra.mxu0 %v14313_v17  ;;  %7116 = vmatprep.subr.bf16.mxu1 %v7115_v11  ;;  %v13069_v11 = vld [vmem:[%s13990_s0 + $0xc0] sm:$0xff]  ;;  %v5903_v17 = vpop.f32.mrb[11].mxu1  ;;  %v13082_v32 = vld [vmem:[%s13990_s0 + $0x168] sm:$0xff]  ;;  %v5456_v41 = vld [vmem:[%s13993_s3 + $0x15f0] sm:$0xff] }
 0x1d4   :  { %7103 = vmatprep.subr.bf16.mxu0 %v14123_v27  ;;  %14314 = vst [vmem:[#allocation16_spill] sm:$0xff] %v13069_v11  ;;  %v3668_v42 = vmul.f32 %v13069_v11, %v12519_v54  ;;  %14315 = vst [vmem:[#allocation11_spill] sm:$0xff] %v13082_v32  ;;  %v3713_v9 = vmul.f32 %v13082_v32, %v12595_v50  ;;  %v5904_v11 = vadd.f32 %v5903_v17, %v5902_v7  ;;  %v7510_v7 = vld [vmem:[%s13990_s0 + $0x110] sm:$0xff]  ;;  %v13143_v32 = vld [vmem:[%s13990_s0 + $0x198] sm:$0xff] }
 0x1d5   :  { %3540 = vmatmul.mubr.f32.vlgmr.msra.gmra.mrb[22].mxu1 %v3309_v37  ;;  %v13095_v37 = vld [vmem:[%s13993_s3 + $0x1518] sm:$0xff]  ;;  %v4101_v34 = vadd.f32 %v4095_v63, %v4087_v48  ;;  %v4123_v17 = vmul.f32 %v7510_v7, %v13087_v57  ;;  %14321 = vst [vmem:[#allocation31_spill] sm:$0xff] %v13143_v32 }
 0x1d6   :  { %7118 = vmatpush3.bf16.msra.mxu1 %v14316_v0  ;;  %3906 = vmatprep.mubr.f32.mxu1 %v3745_v10  ;;  %v13115_v0 = vld [vmem:[%s13990_s0 + $0xf0] sm:$0xff]  ;;  %v3665_v10 = vadd.f32 %v3659_v38, %v3651_v31  ;;  %v14320_v48 = vld [vmem:[#allocation27_spill] sm:$0xff]  ;;  %v13132_v13 = vadd.f32 %v5904_v11, %v12719_v44  ;;  %v3674_v22 = vadd.f32 %v3668_v42, %v3660_v12  ;;  %v7512_v38 = vld [vmem:[%s13990_s0 + $0x140] sm:$0xff]  ;;  %v13148_v12 = vstv %s13029_s19 }
 0x1d7   :  { %7105 = vmatpush1.bf16.msra.mxu0 %v14317_v58  ;;  %7120 = vmatprep.subr.bf16.mxu1 %v14318_v46  ;;  %14319 = vst [vmem:[#allocation23_spill] sm:$0xff] %v13115_v0  ;;  %v3682_v63 = vmul.f32 %v13115_v0, %v12537_v5  ;;  %v3673_v7 = vmul.f32 %v14320_v48, %v12519_v54  ;;  %v5440_v42 = vld [vmem:[%s13993_s3 + $0x1570] sm:$0xff] }
 0x1d8   :  { %7106 = vmatprep.subr.bf16.mxu0 %v14123_v27  ;;  %v4115_v31 = vadd.f32 %v4109_v51, %v4101_v34  ;;  %v4137_v58 = vmul.f32 %v7512_v38, %v13122_v49  ;;  %v7110_v46 = vpack.c.bf16 %v13100_v36, %v13095_v37  ;;  %v3719_v48 = vadd.f32 %v3713_v9, %v3705_v35  ;;  %v5441_v51 = vld [vmem:[%s13993_s3 + $0x1578] sm:$0xff]  ;;  %v13164_v35 = vld [vmem:[%s13990_s0 + $0x10] sm:$0xff] }
 0x1d9   :  { %v3727_v44 = vmul.f32 %v13143_v32, %v12619_v18  ;;  %v14322_v11 = vpack.c.bf16 %v12929_v45, %v12924_v30  ;;  %14323 = vst [vmem:[#allocation14_spill] sm:$0xff] %v13164_v35  ;;  %v3620_v9 = vmul.f32 %v13164_v35, %v12447_v8  ;;  %v13171_v30 = vld [vmem:[%s13990_s0 + $0x40] sm:$0xff]  ;;  %v7516_v36 = vld [vmem:[%s13990_s0 + $0x170] sm:$0xff]  ;;  %v14325_v38 = vpack.c.bf16 %v12984_v6, %v12979_v29 }
 0x1da   :  { %14324 = vst [vmem:[#allocation15_spill] sm:$0xff] %v13171_v30  ;;  %v3628_v45 = vmul.f32 %v13171_v30, %v12450_v47  ;;  %v4129_v37 = vadd.f32 %v4123_v17, %v4115_v31  ;;  %v4151_v34 = vmul.f32 %v7516_v36, %v13148_v12  ;;  %v7127_v8 = vpack.c.bf16 %v5457_v62, %v5456_v41  ;;  %v5420_v47 = vld [vmem:[%s13993_s3 + $0x1530] sm:$0xff]  ;;  %v13191_v31 = vld [vmem:[%s13990_s0 + $0x118] sm:$0xff]  ;;  %v13208_v41 = vld [vmem:[%s13990_s0 + $0x120] sm:$0xff] }
 0x1db   :  { %7122 = vmatpush3.bf16.msra.mxu1 %v14322_v11  ;;  %7108 = vmatpush1.bf16.msra.mxu0 %v14325_v38  ;;  %v5419_v11 = vld [vmem:[%s13993_s3 + $0x1528] sm:$0xff]  ;;  %v3679_v17 = vadd.f32 %v3673_v7, %v3665_v10  ;;  %14326 = vst [vmem:[#allocation17_spill] sm:$0xff] %v13191_v31  ;;  %v3687_v29 = vmul.f32 %v13191_v31, %v12537_v5  ;;  %v13196_v6 = vstv %s13063_s26  ;;  %14327 = vst [vmem:[#allocation22_spill] sm:$0xff] %v13208_v41  ;;  %v7519_v38 = vld [vmem:[%s13990_s0 + $0x1a0] sm:$0xff] }
 0x1dc   :  { %7124 = vmatprep.subr.bf16.mxu1 %v7123_v40  ;;  %7109 = vmatprep.subr.bf16.mxu0 %v14123_v27  ;;  %v5458_v40 = vld [vmem:[%s13993_s3 + $0x1600] sm:$0xff]  ;;  %v5459_v10 = vld [vmem:[%s13993_s3 + $0x1608] sm:$0xff]  ;;  %v3688_v7 = vadd.f32 %v3682_v63, %v3674_v22  ;;  %v3696_v62 = vmul.f32 %v13208_v41, %v12578_v4  ;;  %v4143_v36 = vadd.f32 %v4137_v58, %v4129_v37  ;;  %v13236_v0 = vld [vmem:[%s13990_s0 + $0x70] sm:$0xff] }
 0x1dd   :  { %v4165_v30 = vmul.f32 %v7519_v38, %v13196_v6  ;;  %v7129_v35 = vpack.c.bf16 %v5441_v51, %v5440_v42  ;;  %v13219_v63 = vld [vmem:[%s13993_s3 + $0x1580] sm:$0xff]  ;;  %v13224_v22 = vld [vmem:[%s13993_s3 + $0x1588] sm:$0xff]  ;;  %v3733_v32 = vadd.f32 %v3727_v44, %v3719_v48  ;;  %v14330_v42 = vpack.c.bf16 %v13041_v3, %v13036_v19  ;;  %14331 = vst [vmem:[#allocation10_spill] sm:$0xff] %v13236_v0  ;;  %v5461_v19 = vld [vmem:[%s13993_s3 + $0x1618] sm:$0xff] }
 0x1de   :  { %v14328_v58 = vld [vmem:[#allocation9_spill] sm:$0xff]  ;;  %v14329_v41 = vld [vmem:[#allocation8_spill] sm:$0xff]  ;;  %v7113_v51 = vpack.c.bf16 %v5420_v47, %v5419_v11  ;;  %v3634_v38 = vadd.f32 %v3628_v45, %v3620_v9  ;;  %v3642_v48 = vmul.f32 %v13236_v0, %v12467_v21  ;;  %v4157_v44 = vadd.f32 %v4151_v34, %v4143_v36  ;;  %v13265_v11 = vld [vmem:[%s13990_s0 + $0x150] sm:$0xff] }
 0x1df   :  { %v4056_v37 = vmul.f32 %v14328_v58, %v12974_v15  ;;  %v4064_v31 = vmul.f32 %v14329_v41, %v12989_v52  ;;  %7126 = vmatpush3.bf16.msra.mxu1 %v14330_v42  ;;  %7111 = vmatpush1.bf16.msra.mxu0 %v7110_v46  ;;  %v7131_v58 = vpack.c.bf16 %v5459_v10, %v5458_v40  ;;  %v5460_v41 = vld [vmem:[%s13993_s3 + $0x1610] sm:$0xff]  ;;  %v13249_v9 = vld [vmem:[%s13990_s0 + $0x148] sm:$0xff]  ;;  %v5482_v45 = vld [vmem:[%s13993_s3 + $0x16c0] sm:$0xff]  ;;  %v13283_v36 = vstv %s13150_s15 }
 0x1e0   :  { %7128 = vmatprep.subr.bf16.mxu1 %v7127_v8  ;;  %v3693_v3 = vadd.f32 %v3687_v29, %v3679_v17  ;;  %v3701_v21 = vmul.f32 %v13249_v9, %v12578_v4  ;;  %7112 = vmatprep.subr.bf16.mxu0 %v14123_v27  ;;  %v7133_v46 = vpack.c.bf16 %v13224_v22, %v13219_v63  ;;  %v5483_v34 = vld [vmem:[%s13993_s3 + $0x16c8] sm:$0xff]  ;;  %v13272_v29 = vld [vmem:[%s13993_s3 + $0x1590] sm:$0xff]  ;;  %v13277_v40 = vld [vmem:[%s13993_s3 + $0x1598] sm:$0xff] }
 0x1e1   :  { %v3702_v8 = vadd.f32 %v3696_v62, %v3688_v7  ;;  %v3710_v47 = vmul.f32 %v13265_v11, %v12595_v50  ;;  %v4171_v17 = vadd.f32 %v4165_v30, %v4157_v44  ;;  %v3741_v10 = vadd.f32 %v12685_v59, %v3733_v32  ;;  %v5466_v63 = vld [vmem:[%s13993_s3 + $0x1640] sm:$0xff]  ;;  %v5467_v22 = vld [vmem:[%s13993_s3 + $0x1648] sm:$0xff] }
 0x1e2   :  { %v4070_v7 = vadd.f32 %v4064_v31, %v4056_v37  ;;  %v4078_v62 = vmul.f32 %v12532_v20, %v12992_v26  ;;  %v7135_v30 = vpack.c.bf16 %v5461_v19, %v5460_v41  ;;  %v5462_v32 = vld [vmem:[%s13993_s3 + $0x1620] sm:$0xff]  ;;  %v3648_v31 = vadd.f32 %v3642_v48, %v3634_v38  ;;  %v5463_v44 = vld [vmem:[%s13993_s3 + $0x1628] sm:$0xff]  ;;  %v5484_v38 = vld [vmem:[%s13993_s3 + $0x16d0] sm:$0xff] }
 0x1e3   :  { %7130 = vmatpush3.bf16.msra.mxu1 %v7129_v35  ;;  %v13297_v20 = vld [vmem:[%s13990_s0 + $0xa0] sm:$0xff]  ;;  %v13302_v37 = vadd.f32 %v13283_v36, %v4171_v17  ;;  %7114 = vmatpush1.bf16.msra.mxu0 %v7113_v51  ;;  %v7147_v42 = vpack.c.bf16 %v5483_v34, %v5482_v45  ;;  %v5485_v48 = vld [vmem:[%s13993_s3 + $0x16d8] sm:$0xff]  ;;  %v3707_v41 = vadd.f32 %v3701_v21, %v3693_v3  ;;  %v14334_v19 = vld [vmem:[#allocation26_spill] sm:$0xff] }
 0x1e4   :  { %14332 = vst [vmem:[#allocation25_spill] sm:$0xff] %v13297_v20  ;;  %v3656_v35 = vmul.f32 %v13297_v20, %v12493_v43  ;;  %7132 = vmatprep.subr.bf16.mxu1 %v7131_v58  ;;  %v13316_v43 = vld [vmem:[%s13990_s0 + $0x178] sm:$0xff]  ;;  %3585 = vmatprep.subr.mxu0 %v14288_v60  ;;  %v3311_v45 = vmax.f32 %v14334_v19, 0.0  ;;  %v7137_v34 = vpack.c.bf16 %v13277_v40, %v13272_v29  ;;  %v13330_v21 = vld [vmem:[%s13990_s0 + $0x180] sm:$0xff]  ;;  %v5468_v20 = vld [vmem:[%s13993_s3 + $0x1650] sm:$0xff]  ;;  %v3747_v60 = vmax.f32 %v3741_v10, 0.0 }
 0x1e5   :  { %14333 = vst [vmem:[#allocation28_spill] sm:$0xff] %v13302_v37  ;;  %v3715_v51 = vmul.f32 %v13316_v43, %v12595_v50  ;;  %v5421_v58 = vld [vmem:[%s13993_s3 + $0x1538] sm:$0xf]  ;;  %v3716_v3 = vadd.f32 %v3710_v47, %v3702_v8  ;;  %14335 = vst [vmem:[#allocation29_spill] sm:$0xff] %v13330_v21  ;;  %v3724_v17 = vmul.f32 %v13330_v21, %v12619_v18  ;;  %v1863_v47 = vpop.f32.mrb[10].mxu0  ;;  %v13348_v21 = vld [vmem:[%s13990_s0 + $0xd0] sm:$0xff] }
 0x1e6   :  { %v7149_v37 = vpack.c.bf16 %v5467_v22, %v5466_v63  ;;  %v5469_v19 = vld [vmem:[%s13993_s3 + $0x1658] sm:$0xff]  ;;  %v4084_v29 = vadd.f32 %v4078_v62, %v4070_v7  ;;  %v4092_v8 = vmul.f32 %v12590_v28, %v13027_v53  ;;  %v7139_v40 = vpack.c.bf16 %v5463_v44, %v5462_v32  ;;  %v5446_v63 = vld [vmem:[%s13993_s3 + $0x15a0] sm:$0xff]  ;;  %v1865_v28 = vpop.f32.mrb[11].mxu0  ;;  %v5487_v32 = vld [vmem:[%s13993_s3 + $0x16e8] sm:$0xff] }
 0x1e7   :  { %7134 = vmatpush3.bf16.msra.mxu1 %v7133_v46  ;;  %v7151_v0 = vpack.c.bf16 %v5485_v48, %v5484_v38  ;;  %v3662_v22 = vadd.f32 %v3656_v35, %v3648_v31  ;;  %v3670_v10 = vmul.f32 %v13348_v21, %v12519_v54  ;;  %v1864_v7 = vadd.f32 %v1863_v47, %v13132_v13  ;;  %v5447_v46 = vld [vmem:[%s13993_s3 + $0x15a8] sm:$0xff]  ;;  %v5486_v62 = vld [vmem:[%s13993_s3 + $0x16e0] sm:$0xff]  ;;  %v5465_v35 = vld [vmem:[%s13993_s3 + $0x1638] sm:$0xff] }
 0x1e8   :  { %5422 = vmatpush1.msk.msra.mxu0 %vm564_vm1, %v5421_v58  ;;  %7136 = vmatprep.subr.bf16.mxu1 %v7135_v30  ;;  %v3721_v31 = vadd.f32 %v3715_v51, %v3707_v41  ;;  %v3729_v54 = vmul.f32 %v12573_v2, %v12619_v18  ;;  %v7153_v13 = vpack.c.bf16 %v5469_v19, %v5468_v20  ;;  %v5464_v30 = vld [vmem:[%s13993_s3 + $0x1630] sm:$0xff]  ;;  %v5470_v51 = vld [vmem:[%s13993_s3 + $0x1660] sm:$0xff] }
 0x1e9   :  { %3610 = vmatmul.mubr.f32.vlgmr.msra.gmra.mrb[22].mxu0 %v3311_v45  ;;  %7148 = vmatprep.subr.bf16.mxu0 %v7147_v42  ;;  %v3730_v44 = vadd.f32 %v3724_v17, %v3716_v3  ;;  %v13372_v38 = vadd.f32 %v1864_v7, %v12645_v55  ;;  %v4098_v48 = vadd.f32 %v4092_v8, %v4084_v29  ;;  %v5448_v41 = vld [vmem:[%s13993_s3 + $0x15b0] sm:$0xff]  ;;  %v13397_v45 = vld [vmem:[%s13990_s0 + $0x100] sm:$0xff]  ;;  %v5491_v7 = vld [vmem:[%s13993_s3 + $0x1708] sm:$0xff] }
 0x1ea   :  { %7150 = vmatpush3.bf16.msra.mxu0 %v7149_v37  ;;  %3976 = vmatprep.mubr.f32.mxu0 %v3747_v60  ;;  %v4106_v2 = vmul.f32 %v12640_v61, %v13061_v33  ;;  %v7141_v20 = vpack.c.bf16 %v5447_v46, %v5446_v63  ;;  %v7155_v42 = vpack.c.bf16 %v5487_v32, %v5486_v62  ;;  %v5471_v60 = vld [vmem:[%s13993_s3 + $0x1668] sm:$0xff]  ;;  %v5449_v61 = vld [vmem:[%s13993_s3 + $0x15b8] sm:$0xff]  ;;  %v5472_v63 = vld [vmem:[%s13993_s3 + $0x1670] sm:$0xff] }
 0x1eb   :  { %7138 = vmatpush3.bf16.msra.mxu1 %v7137_v34  ;;  %7152 = vmatprep.subr.bf16.mxu0 %v7151_v0  ;;  %v7143_v55 = vpack.c.bf16 %v5465_v35, %v5464_v30  ;;  %v5488_v0 = vld [vmem:[%s13993_s3 + $0x16f0] sm:$0xff]  ;;  %v5489_v37 = vld [vmem:[%s13993_s3 + $0x16f8] sm:$0xff]  ;;  %v3676_v58 = vadd.f32 %v3670_v10, %v3662_v22  ;;  %v3684_v34 = vmul.f32 %v13397_v45, %v12537_v5  ;;  %v5498_v22 = vld [vmem:[%s13993_s3 + $0x1740] sm:$0xff] }
 0x1ec   :  { %7140 = vmatprep.subr.bf16.mxu1 %v7139_v40  ;;  %v3735_v3 = vadd.f32 %v3729_v54, %v3721_v31  ;;  %v7157_v17 = vpack.c.bf16 %v5471_v60, %v5470_v51  ;;  %v3738_v19 = vadd.f32 %v12685_v59, %v3730_v44  ;;  %v4112_v29 = vadd.f32 %v4106_v2, %v4098_v48  ;;  %v5473_v5 = vld [vmem:[%s13993_s3 + $0x1678] sm:$0xff]  ;;  %v5490_v10 = vld [vmem:[%s13993_s3 + $0x1700] sm:$0xff]  ;;  %v13425_v46 = vld [vmem:[%s13990_s0 + $0x130] sm:$0xff] }
 0x1ed   :  { %v4120_v8 = vmul.f32 %v12680_v56, %v13087_v57  ;;  %v7145_v47 = vpack.c.bf16 %v5449_v61, %v5448_v41  ;;  %v7159_v40 = vpack.c.bf16 %v5489_v37, %v5488_v0  ;;  %v5499_v56 = vld [vmem:[%s13993_s3 + $0x1748] sm:$0xff]  ;;  %v3690_v28 = vadd.f32 %v3684_v34, %v3676_v58  ;;  %v5474_v48 = vld [vmem:[%s13993_s3 + $0x1680] sm:$0xff]  ;;  %v5500_v2 = vld [vmem:[%s13993_s3 + $0x1750] sm:$0xff] }
 0x1ee   :  { %7154 = vmatpush3.bf16.msra.mxu0 %v7153_v13  ;;  %v3698_v62 = vmul.f32 %v13425_v46, %v12578_v4  ;;  %v3743_v32 = vadd.f32 %v12685_v59, %v3735_v3  ;;  %v3744_v31 = vmax.f32 %v3738_v19, 0.0  ;;  %v7161_v54 = vpack.c.bf16 %v5473_v5, %v5472_v63  ;;  %v5475_v4 = vld [vmem:[%s13993_s3 + $0x1688] sm:$0xff]  ;;  %v13454_v51 = vld [vmem:[%s13990_s0 + $0x160] sm:$0xff]  ;;  %v13488_v5 = vld [vmem:[%s13990_s0 + $0x190] sm:$0xff] }
 0x1ef   :  { %7142 = vmatpush3.bf16.msra.mxu1 %v7141_v20  ;;  %7156 = vmatprep.subr.bf16.mxu0 %v7155_v42  ;;  %v4126_v13 = vadd.f32 %v4120_v8, %v4112_v29  ;;  %v4134_v30 = vmul.f32 %v12724_v23, %v13122_v49  ;;  %v7180_v35 = vpack.c.bf16 %v5499_v56, %v5498_v22  ;;  %v5501_v23 = vld [vmem:[%s13993_s3 + $0x1758] sm:$0xff]  ;;  %v5492_v20 = vld [vmem:[%s13993_s3 + $0x1710] sm:$0xff] }
 0x1f0   :  { %7144 = vmatprep.subr.bf16.mxu1 %v7143_v55  ;;  %v7163_v44 = vpack.c.bf16 %v5491_v7, %v5490_v10  ;;  %v5493_v42 = vld [vmem:[%s13993_s3 + $0x1718] sm:$0xff]  ;;  %v3704_v41 = vadd.f32 %v3698_v62, %v3690_v28  ;;  %v3712_v60 = vmul.f32 %v13454_v51, %v12595_v50  ;;  %v3749_v55 = vmax.f32 %v3743_v32, 0.0  ;;  %v5476_v29 = vld [vmem:[%s13993_s3 + $0x1690] sm:$0xff]  ;;  %v5478_v28 = vld [vmem:[%s13993_s3 + $0x16a0] sm:$0xff] }
 0x1f1   :  { %v4058_v0 = vmul.f32 %v12708_v14, %v12974_v15  ;;  %v4066_v37 = vmul.f32 %v12715_v16, %v12989_v52  ;;  %v7165_v58 = vpack.c.bf16 %v5475_v4, %v5474_v48  ;;  %v4140_v3 = vadd.f32 %v4134_v30, %v4126_v13  ;;  %v5477_v14 = vld [vmem:[%s13993_s3 + $0x1698] sm:$0xff]  ;;  %v5502_v16 = vld [vmem:[%s13993_s3 + $0x1760] sm:$0xff]  ;;  %v7532_v4 = vld [vmem:[%s13990_s0 + $0x30] sm:$0xff] }
 0x1f2   :  { %7158 = vmatpush3.bf16.msra.mxu0 %v7157_v17  ;;  %v5937_v61 = vpop.f32.mrb[12].mxu1  ;;  %v4148_v17 = vmul.f32 %v12766_v39, %v13148_v12  ;;  %v7183_v19 = vpack.c.bf16 %v5501_v23, %v5500_v2  ;;  %v7167_v50 = vpack.c.bf16 %v5493_v42, %v5492_v20  ;;  %v5503_v39 = vld [vmem:[%s13993_s3 + $0x1768] sm:$0xff]  ;;  %v3718_v63 = vadd.f32 %v3712_v60, %v3704_v41  ;;  %v5505_v13 = vld [vmem:[%s13993_s3 + $0x1778] sm:$0xff] }
 0x1f3   :  { %7146 = vmatpush3.bf16.msra.mxu1 %v7145_v47  ;;  %7160 = vmatprep.subr.bf16.mxu0 %v7159_v40  ;;  %v5938_v34 = vpop.f32.mrb[13].mxu1  ;;  %v5494_v47 = vld [vmem:[%s13993_s3 + $0x1720] sm:$0xff]  ;;  %v5495_v40 = vld [vmem:[%s13993_s3 + $0x1728] sm:$0xff]  ;;  %v3726_v22 = vmul.f32 %v13488_v5, %v12619_v18  ;;  %v4072_v56 = vadd.f32 %v4066_v37, %v4058_v0  ;;  %v4080_v10 = vmul.f32 %v12753_v1, %v12992_v26  ;;  %v5504_v1 = vld [vmem:[%s13993_s3 + $0x1770] sm:$0xff] }
 0x1f4   :  { %7179 = vmatprep.subr.bf16.mxu1 %v14123_v27  ;;  %v13473_v8 = vadd.f32 %v5938_v34, %v5937_v61  ;;  %v7169_v7 = vpack.c.bf16 %v5477_v14, %v5476_v29  ;;  %v4154_v62 = vadd.f32 %v4148_v17, %v4140_v3  ;;  %v4162_v32 = vmul.f32 %v12835_v25, %v13196_v6  ;;  %v5496_v25 = vld [vmem:[%s13993_s3 + $0x1730] sm:$0xff]  ;;  %v5497_v30 = vld [vmem:[%s13993_s3 + $0x1738] sm:$0xff]  ;;  %v14336_v20 = vld [vmem:[#allocation13_spill] sm:$0xff] }
 0x1f5   :  { %v7171_v18 = vpack.c.bf16 %v5495_v40, %v5494_v47  ;;  %v4063_v2 = vmul.f32 %v7532_v4, %v12989_v52  ;;  %v4086_v23 = vadd.f32 %v4080_v10, %v4072_v56  ;;  %v4094_v42 = vmul.f32 %v14336_v20, %v13027_v53  ;;  %v5481_v37 = vld [vmem:[%s13993_s3 + $0x16b8] sm:$0xff]  ;;  %v5507_v34 = vld [vmem:[%s13993_s3 + $0x1788] sm:$0xff]  ;;  %v14337_v47 = vld [vmem:[#allocation18_spill] sm:$0xff] }
 0x1f6   :  { %3907 = vmatmul.mubr.f32.vlgmr.msra.gmra.mrb[24].mxu1 %v3744_v31  ;;  %7162 = vmatpush3.bf16.msra.mxu0 %v7161_v54  ;;  %v7186_v31 = vpack.c.bf16 %v5503_v39, %v5502_v16  ;;  %v5479_v54 = vld [vmem:[%s13993_s3 + $0x16a8] sm:$0xff]  ;;  %v7189_v60 = vpack.c.bf16 %v5505_v13, %v5504_v1  ;;  %v4168_v61 = vadd.f32 %v4162_v32, %v4154_v62  ;;  %v5548_v16 = vld [vmem:[%s13993_s3 + $0x1870] sm:$0xff]  ;;  %v5509_v32 = vld [vmem:[%s13993_s3 + $0x1798] sm:$0xff] }
 0x1f7   :  { %7181 = vmatpush1.bf16.msra.mxu1 %v7180_v35  ;;  %7164 = vmatprep.subr.bf16.mxu0 %v7163_v44  ;;  %v3732_v35 = vadd.f32 %v3726_v22, %v3718_v63  ;;  %v7531_v44 = vld [vmem:[%s13990_s0] sm:$0xff]  ;;  %v7173_v41 = vpack.c.bf16 %v5479_v54, %v5478_v28  ;;  %v7175_v0 = vpack.c.bf16 %v5497_v30, %v5496_v25  ;;  %v7533_v3 = vld [vmem:[%s13990_s0 + $0x28] sm:$0xff]  ;;  %v5549_v30 = vld [vmem:[%s13993_s3 + $0x1878] sm:$0xff] }
 0x1f8   :  { %7182 = vmatprep.subr.bf16.mxu1 %v14123_v27  ;;  %5520 = vmatprep.mubr.msk.f32.mxu1 %vm560_vm0, %v3749_v55  ;;  %v4055_v48 = vmul.f32 %v7531_v44, %v12974_v15  ;;  %v5480_v55 = vld [vmem:[%s13993_s3 + $0x16b0] sm:$0xff]  ;;  %v4060_v17 = vmul.f32 %v7533_v3, %v12974_v15  ;;  %v5547_v14 = vld [vmem:[%s13993_s3 + $0x1868] sm:$0xff]  ;;  %v4077_v40 = vmul.f32 %v14337_v47, %v12992_v26  ;;  %v14338_v22 = vld [vmem:[#allocation20_spill] sm:$0xff] }
 0x1f9   :  { %v3740_v29 = vadd.f32 %v12685_v59, %v3732_v35  ;;  %v4100_v63 = vadd.f32 %v4094_v42, %v4086_v23  ;;  %v4108_v56 = vmul.f32 %v14338_v22, %v13061_v33  ;;  %v7177_v10 = vpack.c.bf16 %v5481_v37, %v5480_v55  ;;  %v5508_v59 = vld [vmem:[%s13993_s3 + $0x1790] sm:$0xff]  ;;  %v7535_v1 = vld [vmem:[%s13990_s0 + $0x88] sm:$0xff]  ;;  %v5550_v35 = vld [vmem:[%s13993_s3 + $0x1880] sm:$0xff] }
 0x1fa   :  { %7166 = vmatpush3.bf16.msra.mxu0 %v7165_v58  ;;  %v5506_v58 = vld [vmem:[%s13993_s3 + $0x1780] sm:$0xff]  ;;  %v4069_v39 = vadd.f32 %v4063_v2, %v4055_v48  ;;  %v4176_v28 = vadd.f32 %v13283_v36, %v4168_v61  ;;  %v7209_v62 = vpack.c.bf16 %v5548_v16, %v5547_v14  ;;  %v4082_v13 = vmul.f32 %v7535_v1, %v12992_v26  ;;  %v14339_v48 = vld [vmem:[#allocation19_spill] sm:$0xff]  ;;  %v14340_v23 = vld [vmem:[#allocation21_spill] sm:$0xff] }
 0x1fb   :  { %7184 = vmatpush1.bf16.msra.mxu1 %v7183_v19  ;;  %7168 = vmatprep.subr.bf16.mxu0 %v7167_v50  ;;  %v7534_v19 = vld [vmem:[%s13990_s0 + $0x58] sm:$0xff]  ;;  %v3746_v25 = vmax.f32 %v3740_v29, 0.0  ;;  %v4091_v4 = vmul.f32 %v14339_v48, %v13027_v53  ;;  %v4114_v2 = vadd.f32 %v4108_v56, %v4100_v63  ;;  %v4122_v20 = vmul.f32 %v14340_v23, %v13087_v57  ;;  %v14341_v16 = vld [vmem:[#allocation16_spill] sm:$0xff] }
 0x1fc   :  { %7185 = vmatprep.subr.bf16.mxu1 %v14123_v27  ;;  %v4068_v50 = vmul.f32 %v7534_v19, %v12989_v52  ;;  %v4083_v44 = vadd.f32 %v4077_v40, %v4069_v39  ;;  %v7195_v42 = vpack.c.bf16 %v5509_v32, %v5508_v59  ;;  %v4182_v55 = vmax.f32 %v4176_v28, 0.0  ;;  %v5533_v37 = vld [vmem:[%s13993_s3 + $0x17f8] sm:$0xff]  ;;  %v5551_v19 = vld [vmem:[%s13993_s3 + $0x1888] sm:$0xff]  ;;  %v5554_v1 = vld [vmem:[%s13993_s3 + $0x18a0] sm:$0xff] }
 0x1fd   :  { %v7213_v61 = vpack.c.bf16 %v5550_v35, %v5549_v30  ;;  %v4096_v3 = vmul.f32 %v13056_v24, %v13027_v53  ;;  %v4105_v39 = vmul.f32 %v14341_v16, %v13061_v33  ;;  %v4128_v47 = vadd.f32 %v4122_v20, %v4114_v2  ;;  %v14342_v24 = vld [vmem:[#allocation12_spill] sm:$0xff]  ;;  %v5513_v59 = vld [vmem:[%s13993_s3 + $0x17b8] sm:$0xff]  ;;  %v5535_v28 = vld [vmem:[%s13993_s3 + $0x1808] sm:$0xff] }
 0x1fe   :  { %7170 = vmatpush3.bf16.msra.mxu0 %v7169_v7  ;;  %v7192_v7 = vpack.c.bf16 %v5507_v34, %v5506_v58  ;;  %v4074_v54 = vadd.f32 %v4068_v50, %v4060_v17  ;;  %v5534_v58 = vld [vmem:[%s13993_s3 + $0x1800] sm:$0xff]  ;;  %v5552_v50 = vld [vmem:[%s13993_s3 + $0x1890] sm:$0xff]  ;;  %v4097_v14 = vadd.f32 %v4091_v4, %v4083_v44  ;;  %v4136_v40 = vmul.f32 %v14342_v24, %v13122_v49  ;;  %v14343_v30 = vld [vmem:[#allocation23_spill] sm:$0xff] }
 0x1ff   :  { %7187 = vmatpush1.bf16.msra.mxu1 %v7186_v31  ;;  %7172 = vmatprep.subr.bf16.mxu0 %v7171_v18  ;;  %v5531_v31 = vld [vmem:[%s13993_s3 + $0x17e8] sm:$0xff]  ;;  %v5532_v18 = vld [vmem:[%s13993_s3 + $0x17f0] sm:$0xff]  ;;  %v7215_v56 = vpack.c.bf16 %v5534_v58, %v5533_v37  ;;  %v4119_v35 = vmul.f32 %v14343_v30, %v13087_v57  ;;  %v14344_v48 = vld [vmem:[#allocation11_spill] sm:$0xff] }
 0x200   :  { %7188 = vmatprep.subr.bf16.mxu1 %v14123_v27  ;;  %v4088_v34 = vadd.f32 %v4082_v13, %v4074_v54  ;;  %v5553_v54 = vld [vmem:[%s13993_s3 + $0x1898] sm:$0xff]  ;;  %v4142_v44 = vadd.f32 %v4136_v40, %v4128_v47  ;;  %v4150_v4 = vmul.f32 %v14344_v48, %v13148_v12  ;;  %v5514_v20 = vld [vmem:[%s13993_s3 + $0x17c0] sm:$0xff]  ;;  %v5555_v37 = vld [vmem:[%s13993_s3 + $0x18a8] sm:$0xff] }
 0x201   :  { %v5556_v58 = vld [vmem:[%s13993_s3 + $0x18b0] sm:$0xff]  ;;  %v5517_v24 = vld [vmem:[%s13993_s3 + $0x17d8] sm:$0xff]  ;;  %v5539_v40 = vld [vmem:[%s13993_s3 + $0x1828] sm:$0xff] }
 0x202   :  { %7174 = vmatpush3.bf16.msra.mxu0 %v7173_v41  ;;  %v7211_v41 = vpack.c.bf16 %v5532_v18, %v5531_v31  ;;  %v4102_v32 = vadd.f32 %v4096_v3, %v4088_v34  ;;  %v7536_v31 = vld [vmem:[%s13990_s0 + $0xe8] sm:$0xff]  ;;  %v14346_v3 = vld [vmem:[#allocation22_spill] sm:$0xff]  ;;  %v7225_v47 = vpack.c.bf16 %v5556_v58, %v5555_v37  ;;  %v5541_v30 = vld [vmem:[%s13993_s3 + $0x1838] sm:$0xff] }
 0x203   :  { %7190 = vmatpush1.bf16.msra.mxu1 %v7189_v60  ;;  %7176 = vmatprep.subr.bf16.mxu0 %v7175_v0  ;;  %v5510_v60 = vld [vmem:[%s13993_s3 + $0x17a0] sm:$0xff]  ;;  %v5511_v0 = vld [vmem:[%s13993_s3 + $0x17a8] sm:$0xff]  ;;  %v4110_v18 = vmul.f32 %v7536_v31, %v13061_v33  ;;  %v5544_v37 = vld [vmem:[%s13993_s3 + $0x1850] sm:$0xff] }
 0x204   :  { %7191 = vmatprep.subr.bf16.mxu1 %v14123_v27  ;;  %v7198_v22 = vpack.c.bf16 %v5511_v0, %v5510_v60  ;;  %v5538_v60 = vld [vmem:[%s13993_s3 + $0x1820] sm:$0xff]  ;;  %v5581_v58 = vld [vmem:[%s13993_s3 + $0x1978] sm:$0xff] }
 0x205   :  { %v5972_v17 = vpop.f32.mrb[12].mxu0 }
 0x206   :  { %7178 = vmatpush3.bf16.msra.mxu0 %v7177_v10  ;;  %v5973_v29 = vpop.f32.mrb[13].mxu0  ;;  %v5512_v10 = vld [vmem:[%s13993_s3 + $0x17b0] sm:$0xff] }
 0x207   :  { %7193 = vmatpush1.bf16.msra.mxu1 %v7192_v7  ;;  %7210 = vmatprep.subr.bf16.mxu0 %v7209_v62  ;;  %v5974_v63 = vadd.f32 %v5973_v29, %v5972_v17  ;;  %v7217_v7 = vpack.c.bf16 %v5552_v50, %v5551_v19  ;;  %v5536_v62 = vld [vmem:[%s13993_s3 + $0x1810] sm:$0xff]  ;;  %v7201_v2 = vpack.c.bf16 %v5513_v59, %v5512_v10  ;;  %v14347_v50 = vld [vmem:[#allocation31_spill] sm:$0xff] }
 0x208   :  { %7194 = vmatprep.subr.bf16.mxu1 %v14123_v27  ;;  %v7219_v23 = vpack.c.bf16 %v5536_v62, %v5535_v28  ;;  %v4133_v17 = vmul.f32 %v14346_v3, %v13122_v49  ;;  %v4156_v19 = vadd.f32 %v4150_v4, %v4142_v44  ;;  %v4164_v29 = vmul.f32 %v14347_v50, %v13196_v6  ;;  %v5557_v10 = vld [vmem:[%s13993_s3 + $0x18b8] sm:$0xff]  ;;  %v14348_v59 = vld [vmem:[#allocation14_spill] sm:$0xff] }
 0x209   :  { %3977 = vmatmul.mubr.f32.vlgmr.msra.gmra.mrb[24].mxu0 %v3746_v25  ;;  %v13635_v13 = vadd.f32 %v5974_v63, %v13473_v8  ;;  %v4111_v25 = vadd.f32 %v4105_v39, %v4097_v14  ;;  %v5515_v8 = vld [vmem:[%s13993_s3 + $0x17c8] sm:$0xff]  ;;  %v5516_v39 = vld [vmem:[%s13993_s3 + $0x17d0] sm:$0xff]  ;;  %v4057_v28 = vmul.f32 %v14348_v59, %v12974_v15  ;;  %v14349_v62 = vld [vmem:[#allocation15_spill] sm:$0xff]  ;;  %v14352_v50 = vmov 0.0  }
 0x20a   :  { %7212 = vmatpush3.bf16.msra.mxu0 %v7211_v41  ;;  %4343 = vmatprep.mubr.f32.mxu0 %v4182_v55  ;;  %v5537_v41 = vld [vmem:[%s13993_s3 + $0x1818] sm:$0xff]  ;;  %v4116_v55 = vadd.f32 %v4110_v18, %v4102_v32  ;;  %v7204_v14 = vpack.c.bf16 %v5515_v8, %v5514_v20  ;;  %v5540_v63 = vld [vmem:[%s13993_s3 + $0x1830] sm:$0xff]  ;;  %v4065_v32 = vmul.f32 %v14349_v62, %v12989_v52  ;;  %v5542_v15 = vld [vmem:[%s13993_s3 + $0x1840] sm:$0xff] }
 0x20b   :  { %7196 = vmatpush1.bf16.msra.mxu1 %v7195_v42  ;;  %7214 = vmatprep.subr.bf16.mxu0 %v7213_v61  ;;  %v7221_v42 = vpack.c.bf16 %v5554_v1, %v5553_v54  ;;  %v14345_v61 = vld [vmem:[#allocation17_spill] sm:$0xff]  ;;  %v4125_v34 = vadd.f32 %v4119_v35, %v4111_v25  ;;  %v7223_v16 = vpack.c.bf16 %v5538_v60, %v5537_v41  ;;  %v5560_v44 = vld [vmem:[%s13993_s3 + $0x18d0] sm:$0xff]  ;;  %v5565_v62 = vld [vmem:[%s13993_s3 + $0x18f8] sm:$0xff] }
 0x20c   :  { %7197 = vmatprep.subr.bf16.mxu1 %v14123_v27  ;;  %v4124_v0 = vmul.f32 %v14345_v61, %v13087_v57  ;;  %v4170_v18 = vadd.f32 %v4164_v29, %v4156_v19  ;;  %v7207_v54 = vpack.c.bf16 %v5517_v24, %v5516_v39  ;;  %v7227_v1 = vpack.c.bf16 %v5540_v63, %v5539_v40  ;;  %v14350_v4 = vld [vmem:[#allocation10_spill] sm:$0xff]  ;;  %v5543_v61 = vld [vmem:[%s13993_s3 + $0x1848] sm:$0xff]  ;;  %v5518_v29 = vld [vmem:[%s13993_s3 + $0x17e0] sm:$0xf] }
 0x20d   :  { %v4139_v31 = vadd.f32 %v4133_v17, %v4125_v34  ;;  %v4152_v35 = vmul.f32 %v13316_v43, %v13148_v12  ;;  %v4071_v48 = vadd.f32 %v4065_v32, %v4057_v28  ;;  %v5580_v43 = vld [vmem:[%s13993_s3 + $0x1970] sm:$0xff]  ;;  %v7231_v60 = vpack.c.bf16 %v5542_v15, %v5541_v30  ;;  %v5582_v34 = vld [vmem:[%s13993_s3 + $0x1980] sm:$0xff]  ;;  %v7537_v17 = vld [vmem:[%s13990_s0 + $0x1a8] sm:$0xff] }
 0x20e   :  { %7216 = vmatpush3.bf16.msra.mxu0 %v7215_v56  ;;  %v4138_v56 = vmul.f32 %v13249_v9, %v13122_v49  ;;  %v4147_v9 = vmul.f32 %v13265_v11, %v13148_v12  ;;  %v5559_v11 = vld [vmem:[%s13993_s3 + $0x18c8] sm:$0xff]  ;;  %v4178_v41 = vadd.f32 %v13283_v36, %v4170_v18  ;;  %v4166_v19 = vmul.f32 %v7537_v17, %v13196_v6  ;;  %v5562_v24 = vld [vmem:[%s13993_s3 + $0x18e0] sm:$0xff] }
 0x20f   :  { %7199 = vmatpush1.bf16.msra.mxu1 %v7198_v22  ;;  %7218 = vmatprep.subr.bf16.mxu0 %v7217_v7  ;;  %v4130_v22 = vadd.f32 %v4124_v0, %v4116_v55  ;;  %v5558_v7 = vld [vmem:[%s13993_s3 + $0x18c0] sm:$0xff]  ;;  %v5564_v55 = vld [vmem:[%s13993_s3 + $0x18f0] sm:$0xff]  ;;  %v7233_v0 = vpack.c.bf16 %v5560_v44, %v5559_v11  ;;  %v14354_v63 = vld [vmem:[#allocation25_spill] sm:$0xff]  ;;  %v7235_v59 = vpack.c.bf16 %v5544_v37, %v5543_v61 }
 0x210   :  { %7200 = vmatprep.subr.bf16.mxu1 %v14123_v27  ;;  %v7229_v25 = vpack.c.bf16 %v5558_v7, %v5557_v10  ;;  %v4153_v20 = vadd.f32 %v4147_v9, %v4139_v31  ;;  %v4184_v7 = vmax.f32 %v4178_v41, 0.0  ;;  %v7245_v28 = vpack.c.bf16 %v5582_v34, %v5581_v58  ;;  %v5566_v32 = vld [vmem:[%s13993_s3 + $0x1900] sm:$0xff]  ;;  %v5545_v31 = vld [vmem:[%s13993_s3 + $0x1858] sm:$0xff]  ;;  %v5588_v58 = vld [vmem:[%s13993_s3 + $0x19b0] sm:$0xff] }
 0x211   :  { %v4144_v52 = vadd.f32 %v4138_v56, %v4130_v22  ;;  %v4093_v22 = vmul.f32 %v14354_v63, %v13027_v53  ;;  %v5546_v18 = vld [vmem:[%s13993_s3 + $0x1860] sm:$0xff]  ;;  %v7247_v11 = vpack.c.bf16 %v5566_v32, %v5565_v62  ;;  %v5569_v61 = vld [vmem:[%s13993_s3 + $0x1918] sm:$0xff] }
 0x212   :  { %7220 = vmatpush3.bf16.msra.mxu0 %v7219_v23  ;;  %v5579_v23 = vld [vmem:[%s13993_s3 + $0x1968] sm:$0xff]  ;;  %v5597_v37 = vld [vmem:[%s13993_s3 + $0x19f8] sm:$0xff]  ;;  %v5574_v32 = vld [vmem:[%s13993_s3 + $0x1940] sm:$0xff] }
 0x213   :  { %7202 = vmatpush1.bf16.msra.mxu1 %v7201_v2  ;;  %7222 = vmatprep.subr.bf16.mxu0 %v7221_v42  ;;  %v4079_v2 = vmul.f32 %v14350_v4, %v12992_v26  ;;  %v14351_v42 = vld [vmem:[#allocation29_spill] sm:$0xff]  ;;  %v4158_v3 = vadd.f32 %v4152_v35, %v4144_v52  ;;  %v7241_v39 = vpack.c.bf16 %v5580_v43, %v5579_v23  ;;  %v5585_v23 = vld [vmem:[%s13993_s3 + $0x1998] sm:$0xff]  ;;  %v5586_v43 = vld [vmem:[%s13993_s3 + $0x19a0] sm:$0xff] }
 0x214   :  { %7203 = vmatprep.subr.bf16.mxu1 %v14123_v27  ;;  %v4161_v8 = vmul.f32 %v14351_v42, %v13196_v6  ;;  %v5563_v26 = vld [vmem:[%s13993_s3 + $0x18e8] sm:$0xff]  ;;  %v4107_v35 = vmul.f32 %v13348_v21, %v13061_v33  ;;  %v7239_v4 = vpack.c.bf16 %v5546_v18, %v5545_v31  ;;  %v5568_v33 = vld [vmem:[%s13993_s3 + $0x1910] sm:$0xff]  ;;  %v5589_v63 = vld [vmem:[%s13993_s3 + $0x19b8] sm:$0xff]  ;;  %v4163_v18 = vmul.f32 %v13488_v5, %v13196_v6 }
 0x215   :  { %v4085_v40 = vadd.f32 %v4079_v2, %v4071_v48  ;;  %v7243_v56 = vpack.c.bf16 %v5564_v55, %v5563_v26  ;;  %v5595_v21 = vld [vmem:[%s13993_s3 + $0x19e8] sm:$0xff]  ;;  %v7253_v55 = vpack.c.bf16 %v5586_v43, %v5585_v23  ;;  %v5573_v62 = vld [vmem:[%s13993_s3 + $0x1938] sm:$0xff]  ;;  %v5604_v6 = vld [vmem:[%s13993_s3 + $0x1a30] sm:$0xff] }
 0x216   :  { %7224 = vmatpush3.bf16.msra.mxu0 %v7223_v16  ;;  %v4167_v10 = vadd.f32 %v4161_v8, %v4153_v20  ;;  %v4121_v8 = vmul.f32 %v13397_v45, %v13087_v57  ;;  %v5598_v57 = vld [vmem:[%s13993_s3 + $0x1a00] sm:$0xff]  ;;  %v5587_v45 = vld [vmem:[%s13993_s3 + $0x19a8] sm:$0xff]  ;;  %v5601_v31 = vld [vmem:[%s13993_s3 + $0x1a18] sm:$0xff] }
 0x217   :  { %7205 = vmatpush1.bf16.msra.mxu1 %v7204_v14  ;;  %7226 = vmatprep.subr.bf16.mxu0 %v7225_v47  ;;  %v14353_v14 = vld [vmem:[#allocation24_spill] sm:$0xff]  ;;  %v5561_v47 = vld [vmem:[%s13993_s3 + $0x18d8] sm:$0xff]  ;;  %v4099_v52 = vadd.f32 %v4093_v22, %v4085_v40  ;;  %v5572_v40 = vld [vmem:[%s13993_s3 + $0x1930] sm:$0xff] }
 0x218   :  { %7206 = vmatprep.subr.bf16.mxu1 %v14123_v27  ;;  %v3748_v16 = vmax.f32 %v14353_v14, 0.0  ;;  %v7237_v53 = vpack.c.bf16 %v5562_v24, %v5561_v47  ;;  %v4175_v44 = vadd.f32 %v13283_v36, %v4167_v10  ;;  %v7257_v47 = vpack.c.bf16 %v5588_v58, %v5587_v45  ;;  %v5571_v24 = vld [vmem:[%s13993_s3 + $0x1928] sm:$0xff]  ;;  %v5590_v22 = vld [vmem:[%s13993_s3 + $0x19c0] sm:$0xff]  ;;  %v5593_v5 = vld [vmem:[%s13993_s3 + $0x19d8] sm:$0xff] }
 0x219   :  { %v4113_v42 = vadd.f32 %v4107_v35, %v4099_v52  ;;  %v4149_v10 = vmul.f32 %v13454_v51, %v13148_v12  ;;  %v5602_v12 = vld [vmem:[%s13993_s3 + $0x1a20] sm:$0xff]  ;;  %v5591_v51 = vld [vmem:[%s13993_s3 + $0x19c8] sm:$0xff]  ;;  %v5612_v45 = vld [vmem:[%s13993_s3 + $0x1a70] sm:$0xff] }
 0x21a   :  { %7228 = vmatpush3.bf16.msra.mxu0 %v7227_v1  ;;  %v5584_v1 = vld [vmem:[%s13993_s3 + $0x1990] sm:$0xff]  ;;  %v5603_v52 = vld [vmem:[%s13993_s3 + $0x1a28] sm:$0xff]  ;;  %v5594_v35 = vld [vmem:[%s13993_s3 + $0x19e0] sm:$0xff] }
 0x21b   :  { %7208 = vmatpush1.bf16.msra.mxu1 %v7207_v54  ;;  %7230 = vmatprep.subr.bf16.mxu0 %v7229_v25  ;;  %v5583_v54 = vld [vmem:[%s13993_s3 + $0x1988] sm:$0xff]  ;;  %v4172_v25 = vadd.f32 %v4166_v19, %v4158_v3  ;;  %v4127_v17 = vadd.f32 %v4121_v8, %v4113_v42  ;;  %v4135_v19 = vmul.f32 %v13425_v46, %v13122_v49  ;;  %v5600_v46 = vld [vmem:[%s13993_s3 + $0x1a10] sm:$0xff] }
 0x21c   :  { %4022 = vmatprep.subr.mxu1 %v14352_v50  ;;  %v2300_v9 = vpop.f32.mrb[14].mxu1  ;;  %v7249_v2 = vpack.c.bf16 %v5584_v1, %v5583_v54  ;;  %v5599_v49 = vld [vmem:[%s13993_s3 + $0x1a08] sm:$0xff]  ;;  %v7263_v54 = vpack.c.bf16 %v5574_v32, %v5573_v62  ;;  %v7283_v1 = vpack.c.bf16 %v5602_v12, %v5601_v31  ;;  %v5608_v8 = vld [vmem:[%s13993_s3 + $0x1a50] sm:$0xff] }
 0x21d   :  { %v2301_v30 = vadd.f32 %v2300_v9, %v13635_v13  ;;  %v2302_v15 = vpop.f32.mrb[15].mxu1  ;;  %v5567_v13 = vld [vmem:[%s13993_s3 + $0x1908] sm:$0xff]  ;;  %v4180_v20 = vadd.f32 %v13283_v36, %v4172_v25  ;;  %v5592_v9 = vld [vmem:[%s13993_s3 + $0x19d0] sm:$0xff] }
 0x21e   :  { %7232 = vmatpush3.bf16.msra.mxu0 %v7231_v60  ;;  %v7251_v41 = vpack.c.bf16 %v5568_v33, %v5567_v13  ;;  %v4181_v60 = vmax.f32 %v4175_v44, 0.0  ;;  %v7265_v25 = vpack.c.bf16 %v5592_v9, %v5591_v51  ;;  %v5576_v15 = vld [vmem:[%s13993_s3 + $0x1950] sm:$0xff]  ;;  %v5577_v13 = vld [vmem:[%s13993_s3 + $0x1958] sm:$0xff]  ;;  %v5578_v33 = vld [vmem:[%s13993_s3 + $0x1960] sm:$0xff] }
 0x21f   :  { %5519 = vmatpush1.msk.msra.mxu1 %vm564_vm1, %v5518_v29  ;;  %7234 = vmatprep.subr.bf16.mxu0 %v7233_v0  ;;  %v13778_v48 = vadd.f32 %v2301_v30, %v13372_v38  ;;  %v5596_v38 = vld [vmem:[%s13993_s3 + $0x19f0] sm:$0xff]  ;;  %v5570_v0 = vld [vmem:[%s13993_s3 + $0x1920] sm:$0xff]  ;;  %v4186_v34 = vmax.f32 %v4180_v20, 0.0  ;;  %v5575_v30 = vld [vmem:[%s13993_s3 + $0x1948] sm:$0xff]  ;;  %v7271_v43 = vpack.c.bf16 %v5578_v33, %v5577_v13 }
 0x220   :  { %4047 = vmatmul.mubr.f32.vlgmr.msra.gmra.mrb[26].mxu1 %v3748_v16  ;;  %7242 = vmatprep.subr.bf16.mxu1 %v7241_v39  ;;  %v7274_v26 = vpack.c.bf16 %v5596_v38, %v5595_v21  ;;  %v7255_v14 = vpack.c.bf16 %v5570_v0, %v5569_v61  ;;  %v7277_v39 = vpack.c.bf16 %v5598_v57, %v5597_v37  ;;  %v5605_v21 = vld [vmem:[%s13993_s3 + $0x1a38] sm:$0xff]  ;;  %v5606_v38 = vld [vmem:[%s13993_s3 + $0x1a40] sm:$0xff]  ;;  %v5607_v42 = vld [vmem:[%s13993_s3 + $0x1a48] sm:$0xff] }
 0x221   :  { %7244 = vmatpush3.bf16.msra.mxu1 %v7243_v56  ;;  %4413 = vmatprep.mubr.f32.mxu1 %v4184_v7  ;;  %v4141_v56 = vadd.f32 %v4135_v19, %v4127_v17  ;;  %v7259_v7 = vpack.c.bf16 %v5572_v40, %v5571_v24  ;;  %v7267_v44 = vpack.c.bf16 %v5576_v15, %v5575_v30  ;;  %v5611_v57 = vld [vmem:[%s13993_s3 + $0x1a68] sm:$0xff]  ;;  %v5614_v17 = vld [vmem:[%s13993_s3 + $0x1a80] sm:$0xff] }
 0x222   :  { %7236 = vmatpush3.bf16.msra.mxu0 %v7235_v59  ;;  %7246 = vmatprep.subr.bf16.mxu1 %v7245_v28  ;;  %v7280_v59 = vpack.c.bf16 %v5600_v46, %v5599_v49  ;;  %v7261_v28 = vpack.c.bf16 %v5590_v22, %v5589_v63  ;;  %v7289_v20 = vpack.c.bf16 %v5606_v38, %v5605_v21  ;;  %v4499_v9 = vld [vmem:[%s13995_s5] sm:$0xff]  ;;  %v4504_v30 = vld [vmem:[%s13995_s5 + $0x28] sm:$0xff] }
 0x223   :  { %7238 = vmatprep.subr.bf16.mxu0 %v7237_v53  ;;  %v4155_v53 = vadd.f32 %v4149_v10, %v4141_v56 }
 0x225   :  { %7248 = vmatpush3.bf16.msra.mxu1 %v7247_v11  ;;  %v6007_v3 = vpop.f32.mrb[14].mxu0  ;;  %v4169_v11 = vadd.f32 %v4163_v18, %v4155_v53  ;;  %v4501_v18 = vld [vmem:[%s13995_s5 + $0x10] sm:$0xff] }
 0x226   :  { %7240 = vmatpush3.bf16.msra.mxu0 %v7239_v4  ;;  %7250 = vmatprep.subr.bf16.mxu1 %v7249_v2  ;;  %v6008_v29 = vpop.f32.mrb[15].mxu0  ;;  %v7286_v4 = vpack.c.bf16 %v5604_v6, %v5603_v52  ;;  %v7269_v2 = vpack.c.bf16 %v5594_v35, %v5593_v5 }
 0x227   :  { %7273 = vmatprep.subr.bf16.mxu0 %v14123_v27  ;;  %v13822_v16 = vadd.f32 %v6008_v29, %v6007_v3  ;;  %v4177_v23 = vadd.f32 %v13283_v36, %v4169_v11  ;;  %v5613_v3 = vld [vmem:[%s13993_s3 + $0x1a78] sm:$0xff]  ;;  %v5615_v29 = vld [vmem:[%s13993_s3 + $0x1a88] sm:$0xf]  ;;  %v4505_v11 = vld [vmem:[%s13995_s5 + $0x30] sm:$0x3] }
 0x228   :  { %v7301_v19 = vpack.c.bf16 %v5614_v17, %v5613_v3  ;;  %v5618_v3 = vld [vmem:[%s13994_s4] ss:$0 sm:$0xff] }
 0x229   :  { %7252 = vmatpush3.bf16.msra.mxu1 %v7251_v41  ;;  %4344 = vmatmul.mubr.f32.vlgmr.msra.gmra.mrb[26].mxu0 %v4181_v60  ;;  %v4183_v41 = vmax.f32 %v4177_v23, 0.0  ;;  %v7292_v60 = vpack.c.bf16 %v5608_v8, %v5607_v42 }
 0x22a   :  { %7275 = vmatpush1.bf16.msra.mxu0 %v7274_v26  ;;  %7254 = vmatprep.subr.bf16.mxu1 %v7253_v55  ;;  %v5609_v26 = vld [vmem:[%s13993_s3 + $0x1a58] sm:$0xff]  ;;  %v5610_v55 = vld [vmem:[%s13993_s3 + $0x1a60] sm:$0xff] }
 0x22b   :  { %7276 = vmatprep.subr.bf16.mxu0 %v14123_v27  ;;  %5617 = vmatprep.mubr.msk.f32.mxu0 %vm560_vm0, %v4186_v34  ;;  %v7295_v37 = vpack.c.bf16 %v5610_v55, %v5609_v26  ;;  %v7298_v34 = vpack.c.bf16 %v5612_v45, %v5611_v57 }
 0x22d   :  { %7256 = vmatpush3.bf16.msra.mxu1 %v7255_v14  ;;  %v14355_v14 = vld [vmem:[#allocation28_spill] sm:$0xff] }
 0x22e   :  { %7278 = vmatpush1.bf16.msra.mxu0 %v7277_v39  ;;  %7258 = vmatprep.subr.bf16.mxu1 %v7257_v47 }
 0x22f   :  { %7279 = vmatprep.subr.bf16.mxu0 %v14123_v27 }
 0x231   :  { %7260 = vmatpush3.bf16.msra.mxu1 %v7259_v7 }
 0x232   :  { %7281 = vmatpush1.bf16.msra.mxu0 %v7280_v59  ;;  %7262 = vmatprep.subr.bf16.mxu1 %v7261_v28 }
 0x233   :  { %7282 = vmatprep.subr.bf16.mxu0 %v14123_v27 }
 0x235   :  { %7264 = vmatpush3.bf16.msra.mxu1 %v7263_v54  ;;  %v4502_v54 = vld [vmem:[%s13995_s5 + $0x18] sm:$0xff] }
 0x236   :  { %7284 = vmatpush1.bf16.msra.mxu0 %v7283_v1  ;;  %7266 = vmatprep.subr.bf16.mxu1 %v7265_v25  ;;  %v7307_v1 = vpack.c.bf16 %v4502_v54, %v4501_v18  ;;  %v4503_v25 = vld [vmem:[%s13995_s5 + $0x20] sm:$0xff] }
 0x237   :  { %7285 = vmatprep.subr.bf16.mxu0 %v14123_v27  ;;  %v7310_v52 = vpack.c.bf16 %v4504_v30, %v4503_v25 }
 0x239   :  { %7268 = vmatpush3.bf16.msra.mxu1 %v7267_v44 }
 0x23a   :  { %7287 = vmatpush1.bf16.msra.mxu0 %v7286_v4  ;;  %7270 = vmatprep.subr.bf16.mxu1 %v7269_v2 }
 0x23b   :  { %7288 = vmatprep.subr.bf16.mxu0 %v14123_v27 }
 0x23c   :  { %v6042_v36 = vpop.f32.mrb[16].mxu1 }
 0x23d   :  { %7272 = vmatpush3.bf16.msra.mxu1 %v7271_v43  ;;  %v6043_v61 = vpop.f32.mrb[17].mxu1 }
 0x23e   :  { %7290 = vmatpush1.bf16.msra.mxu0 %v7289_v20  ;;  %7303 = vmatprep.subr.bf16.mxu1 %v14123_v27  ;;  %v6044_v0 = vadd.f32 %v6043_v61, %v6042_v36 }
 0x23f   :  { %7291 = vmatprep.subr.bf16.mxu0 %v14123_v27 }
 0x240   :  { %4414 = vmatmul.mubr.f32.vlgmr.msra.gmra.mrb[28].mxu1 %v4183_v41  ;;  %v2668_v58 = vadd.f32 %v6044_v0, %v13822_v16  ;;  %v4185_v16 = vmax.f32 %v14355_v14, 0.0 }
 0x241   :  { %6351 = vmatprep.mubr.msk.f32.mxu1 %vm7572_vm3, %v14352_v50 }
 0x242   :  { %7293 = vmatpush1.bf16.msra.mxu0 %v7292_v60 }
 0x243   :  { %7294 = vmatprep.subr.bf16.mxu0 %v14123_v27 }
 0x246   :  { %7296 = vmatpush1.bf16.msra.mxu0 %v7295_v37 }
 0x247   :  { %7297 = vmatprep.subr.bf16.mxu0 %v14123_v27 }
 0x24a   :  { %7299 = vmatpush1.bf16.msra.mxu0 %v7298_v34 }
 0x24b   :  { %7300 = vmatprep.subr.bf16.mxu0 %v14123_v27 }
 0x24e   :  { %7302 = vmatpush1.bf16.msra.mxu0 %v7301_v19  ;;  %v4592_v19 = vld [vmem:[%s13997_s7] sm:$0xff] }
 0x24f   :  { %4459 = vmatprep.subr.mxu0 %v14352_v50  ;;  %v2737_v39 = vpop.f32.mrb[16].mxu0 }
 0x250   :  { %v2738_v47 = vadd.f32 %v2737_v39, %v2668_v58  ;;  %v2739_v24 = vpop.f32.mrb[17].mxu0 }
 0x251   :  { %v5619_v24 = vld [vmem:[%s13996_s6] ss:$0 sm:$0xff] }
 0x252   :  { %5616 = vmatpush1.msk.msra.mxu0 %vm564_vm1, %v5615_v29  ;;  %v2741_v40 = vadd.f32 %v2738_v47, %v13778_v48  ;;  %v4500_v48 = vld [vmem:[%s13995_s5 + $0x8] sm:$0xff]  ;;  %v4594_v47 = vld [vmem:[%s13997_s7 + $0x10] sm:$0xf] }
 0x253   :  { %4484 = vmatmul.mubr.f32.vlgmr.msra.gmra.mrb[28].mxu0 %v4185_v16  ;;  %v7304_v53 = vpack.c.bf16 %v4500_v48, %v4499_v9  ;;  %v4593_v29 = vld [vmem:[%s13997_s7 + $0x8] sm:$0xff] }
 0x254   :  { %v7313_v16 = vpack.c.bf16 %v4593_v29, %v4592_v19 }
 0x255   :  { %7305 = vmatpush3.bf16.msra.mxu1 %v7304_v53 }
 0x256   :  { %7306 = vmatprep.subr.bf16.mxu1 %v14123_v27 }
 0x259   :  { %7308 = vmatpush3.bf16.msra.mxu1 %v7307_v1 }
 0x25a   :  { %7309 = vmatprep.subr.bf16.mxu1 %v14123_v27 }
 0x25d   :  { %v6077_v49 = vpop.f32.mrb[18].mxu1  ;;  %7311 = vmatpush3.bf16.msra.mxu1 %v7310_v52 }
 0x25e   :  { %v6078_v46 = vpop.f32.mrb[19].mxu1  ;;  %6349 = vmatprep.subr.mxu1 %v14352_v50 }
 0x25f   :  { %v6079_v63 = vadd.f32 %v6078_v46, %v6077_v49 }
 0x261   :  { %6350 = vmatpush3.msk.msra.mxu1 %vm4517_vm2, %v4505_v11 }
 0x262   :  { %7312 = vmatprep.subr.bf16.mxu1 %v14123_v27 }
 0x26f   :  { %v6112_v22 = vpop.f32.mrb[18].mxu0 }
 0x270   :  { %v6113_v56 = vpop.f32.mrb[19].mxu0 }
 0x271   :  { %v6114_v10 = vadd.f32 %v6113_v56, %v6112_v22 }
 0x273   :  { %v3105_v7 = vadd.f32 %v6114_v10, %v6079_v63 }
 0x287   :  { %v3174_v59 = vpop.f32.mrb[20].mxu1 }
 0x288   :  { %v3175_v28 = vadd.f32 %v3174_v59, %v3105_v7  ;;  %v3176_v62 = vpop.f32.mrb[21].mxu1 }
 0x28a   :  { %v3178_v32 = vadd.f32 %v3175_v28, %v2741_v40 }
 0x291   :  { %v6147_v31 = vpop.f32.mrb[20].mxu0 }
 0x292   :  { %v6148_v12 = vpop.f32.mrb[21].mxu0 }
 0x293   :  { %v6149_v51 = vadd.f32 %v6148_v12, %v6147_v31 }
 0x2a8   :  { %v6182_v15 = vpop.f32.mrb[22].mxu1 }
 0x2a9   :  { %v6183_v6 = vpop.f32.mrb[23].mxu1 }
 0x2aa   :  { %v6184_v5 = vadd.f32 %v6183_v6, %v6182_v15 }
 0x2ac   :  { %v3542_v35 = vadd.f32 %v6184_v5, %v6149_v51 }
 0x2bc   :  { %v3611_v44 = vpop.f32.mrb[22].mxu0 }
 0x2bd   :  { %v3612_v4 = vadd.f32 %v3611_v44, %v3542_v35  ;;  %v3613_v2 = vpop.f32.mrb[23].mxu0 }
 0x2bf   :  { %v3615_v13 = vadd.f32 %v3612_v4, %v3178_v32 }
 0x2c9   :  { %v6217_v33 = vpop.f32.mrb[24].mxu1 }
 0x2ca   :  { %v6218_v21 = vpop.f32.mrb[25].mxu1 }
 0x2cb   :  { %v6219_v38 = vadd.f32 %v6218_v21, %v6217_v33 }
 0x2dc   :  { %v6252_v23 = vpop.f32.mrb[24].mxu0 }
 0x2dd   :  { %v6253_v43 = vpop.f32.mrb[25].mxu0 }
 0x2de   :  { %v6254_v20 = vadd.f32 %v6253_v43, %v6252_v23 }
 0x2e0   :  { %v3979_v42 = vadd.f32 %v6254_v20, %v6219_v38 }
 0x2f3   :  { %v4048_v8 = vpop.f32.mrb[26].mxu1 }
 0x2f4   :  { %v4049_v41 = vadd.f32 %v4048_v8, %v3979_v42  ;;  %v4050_v60 = vpop.f32.mrb[27].mxu1 }
 0x2f6   :  { %v4052_v36 = vadd.f32 %v4049_v41, %v3615_v13 }
 0x2fc   :  { %v6287_v26 = vpop.f32.mrb[26].mxu0 }
 0x2fd   :  { %v6288_v55 = vpop.f32.mrb[27].mxu0 }
 0x2fe   :  { %v6289_v61 = vadd.f32 %v6288_v55, %v6287_v26 }
 0x313   :  { %v6322_v0 = vpop.f32.mrb[28].mxu1 }
 0x314   :  { %v6323_v27 = vpop.f32.mrb[29].mxu1 }
 0x315   :  { %v6324_v37 = vadd.f32 %v6323_v27, %v6322_v0 }
 0x317   :  { %v4416_v57 = vadd.f32 %v6324_v37, %v6289_v61 }
 0x326   :  { %v4485_v45 = vpop.f32.mrb[28].mxu0 }
 0x327   :  { %v4486_v58 = vadd.f32 %v4485_v45, %v4416_v57  ;;  %v4487_v34 = vpop.f32.mrb[29].mxu0 }
 0x329   :  { %v4489_v17 = vadd.f32 %v4486_v58, %v4052_v36 }
 0x32b   :  { %v4497_v14 = vadd.f32 %v5618_v3, %v4489_v17 }
 0x32d   :  { %v4498_v39 = vmax.f32 %v4497_v14, 0.0 }
 0x32f   :  { %6352 = vmatmul.mubr.msk.f32.vlgmr.msra.gmra.mrb[30].mxu1 %vm4513_vm4, %v4498_v39 }
 0x330   :  { %7314 = vmatpush3.bf16.msra.mxu1 %v7313_v16  ;;  %6360 = vmatprep.mubr.msk.f32.mxu1 %vm7572_vm3, %v14352_v50 }
 0x331   :  { %6358 = vmatprep.subr.mxu1 %v14352_v50  ;;  %v5622_v50 = vld [vmem:[%s13998_s8] ss:$0 sm:$0xff] }
 0x334   :  { %6359 = vmatpush3.msk.msra.mxu1 %vm564_vm1, %v4594_v47 }
 0x402   :  { %v4587_v40 = vpop.f32.mrb[30].mxu1 }
 0x403   :  { %v4588_v49 = vadd.f32 %v5619_v24, %v4587_v40  ;;  %v6353_v46 = vpop.f32.mrb[31].mxu1 }
 0x405   :  { %v4591_v63 = vmax.f32 %v4588_v49, 0.0 }
 0x407   :  { %6361 = vmatmul.mubr.msk.f32.vlgmr.msra.gmra.mrb[32].mxu1 %vm4602_vm5, %v4591_v63 }
 0x4da   :  { %v4675_v22 = vpop.f32.mrb[32].mxu1 }
 0x4db   :  { %v4676_v56 = vadd.f32 %v5622_v50, %v4675_v22  ;;  %v6362_v10 = vpop.f32.mrb[33].mxu1 }
 0x4dd   :  { %4680 = vst.msk [vmem:[%s13999_s9] sm:$0xff] %vm4679_vm6, %v4676_v56 }
 0x4de   :  { %4685 = vsyncpa [#allocation3], 1 }
 0x4df   :  { %4686 = vsyncpa [#allocation5], 1 }

</bundles_post_ra>
